<compile_context>
chip_gen: v5e
topology: v5e:2x2
jax: 0.10.0
libtpu: 0.0.40
codegen_flags: <defaults>
</compile_context>

<pallas_src>
import functools

import jax
import jax.numpy as jnp
from jax.experimental import pallas as pl
from jax.experimental.pallas import tpu as pltpu

_COMPUTE_DTYPE = jnp.bfloat16   # MXU operand dtype; accumulation stays f32.


def _fused_conv_block_kernel(x_ref, w1_ref, b1_ref, w2_ref, b2_ref, o_ref,
                             xpad_ref, *, bt, h, w, cin, cout, cout_pad):
    """One batch tile: conv3x3(pad=1)+ReLU -> conv3x3(pad=1)+ReLU, all on-chip.

    x_ref:    (bt, h, w, cin)          f32 NHWC input tile
    w1_ref:   (9, cin, cout)           bf16 per-tap conv1 weights (k = kh*3+kw)
    b1_ref:   (1, cout)                f32
    w2_ref:   (9, cout, cout_pad)      bf16 per-tap conv2 weights, N padded to 128-mult
    b2_ref:   (1, cout_pad)            f32
    o_ref:    (bt*h*w, cout_pad)       f32 lane-dense output tile
    xpad_ref: VMEM (bt, h+2, w+2, max(cin,cout)) bf16, reused for both stages
    """
    cdt = _COMPUTE_DTYPE
    cmax = max(cin, cout)
    m = bt * h * w

    # Zero only the 4 border strips; the interior is fully rewritten below.
    # Done every step (not program_id==0) because the grid axis is megacore
    # "parallel" and scratch is per-core.
    xpad_ref[:, 0:1, :, :] = jnp.zeros((bt, 1, w + 2, cmax), cdt)
    xpad_ref[:, h + 1:h + 2, :, :] = jnp.zeros((bt, 1, w + 2, cmax), cdt)
    xpad_ref[:, :, 0:1, :] = jnp.zeros((bt, h + 2, 1, cmax), cdt)
    xpad_ref[:, :, w + 1:w + 2, :] = jnp.zeros((bt, h + 2, 1, cmax), cdt)

    def conv3x3_relu(c_in, w_taps_ref, bias_ref, n_out):
        # 3x3 conv as 9 per-tap MXU matmuls (bf16 x bf16 -> f32) accumulated in
        # f32: no im2col col buffer and no lane-packing concatenate.
        acc = jnp.zeros((m, n_out), jnp.float32)
        idx = 0
        for kh in range(3):
            for kw in range(3):
                tap = xpad_ref[:, kh:kh + h, kw:kw + w, :c_in]  # (bt,h,w,c_in)
                lhs = tap.reshape(m, c_in)                      # merge leading dims
                acc = acc + jnp.dot(lhs, w_taps_ref[idx],
                                    preferred_element_type=jnp.float32)
                idx += 1
        return jnp.maximum(acc + bias_ref[...], 0.0)            # f32 epilogue

    # ---- conv1: pad input interior into VMEM scratch, 9 tap matmuls, ReLU ----
    xpad_ref[:, 1:h + 1, 1:w + 1, :cin] = x_ref[...].astype(cdt)
    h1 = conv3x3_relu(cin, w1_ref, b1_ref, cout)                # (m, cout) f32

    # ---- conv2: intermediate never leaves VMEM; re-pad interior with h1 ------
    xpad_ref[:, 1:h + 1, 1:w + 1, :cout] = h1.reshape(bt, h, w, cout).astype(cdt)
    y2 = conv3x3_relu(cout, w2_ref, b2_ref, cout_pad)           # (m, cout_pad) f32

    # Lane-dense (cout_pad is a multiple of 128) unmasked store.
    o_ref[...] = y2.astype(o_ref.dtype)


def _round_up(x, mult):
    return (x + mult - 1) // mult * mult


def _vmem_limit_bytes():
    """Generation-aware scoped-VMEM limit (<=48 MiB on v7x, 96 MiB on v5e/v6e)."""
    try:
        phys = int(pltpu.get_tpu_info().vmem_capacity_bytes)
    except Exception:
        phys = 64 * 1024 * 1024      # conservative: v7x per-TensorCore VMEM
    return int(min(phys * 3 // 4, 96 * 1024 * 1024))


def _pick_batch_tile(b, h, w, cin, cout, cout_pad, budget_bytes):
    """Largest batch tile that fits the VMEM budget, keeps M MXU-friendly, and
    preserves >= 2 parallel grid steps (v7x has 2 TensorCores per chip)."""
    cmax = max(cin, cout)
    per_img = ((h + 2) * (w + 2) * cmax * 2        # bf16 padded scratch
               + 2 * h * w * cin * 4               # double-buffered input block
               + 2 * h * w * cout_pad * 4          # double-buffered output block
               + h * w * (cout + cout_pad) * 4)    # live f32 accumulators
    bt = 1
    for cand in range(1, b + 1):
        if b % cand:
            continue
        if cand * per_img > budget_bytes:
            continue
        if cand * h * w > 4096:                    # M already fills the MXU
            continue
        if b >= 2 and b // cand < 2:               # keep >=2 parallel steps
            continue
        bt = cand
    return bt


def unet_conv_block_nhwc(x_nhwc, params):
    """Fused UNetConvBlock on NHWC activations (preferred, chainable layout)."""
    b, h, w, cin = x_nhwc.shape
    cout = params["w1"].shape[-1]
    cout_pad = _round_up(cout, 128)                # lane-dense output store
    cmax = max(cin, cout)

    # HWIO (3,3,C,Cout) -> per-tap (9, C, Cout) bf16 matmul operands.
    w1_taps = params["w1"].reshape(9, cin, cout).astype(_COMPUTE_DTYPE)
    w2_taps = params["w2"].reshape(9, cout, cout)
    if cout_pad != cout:
        w2_taps = jnp.pad(w2_taps, ((0, 0), (0, 0), (0, cout_pad - cout)))
    w2_taps = w2_taps.astype(_COMPUTE_DTYPE)
    b1 = params["b1"].astype(jnp.float32).reshape(1, cout)
    b2 = params["b2"].astype(jnp.float32)
    if cout_pad != cout:
        b2 = jnp.pad(b2, (0, cout_pad - cout))
    b2 = b2.reshape(1, cout_pad)

    vmem_limit = _vmem_limit_bytes()
    bt = _pick_batch_tile(b, h, w, cin, cout, cout_pad, vmem_limit // 4)
    m = bt * h * w

    kernel = functools.partial(_fused_conv_block_kernel,
                               bt=bt, h=h, w=w, cin=cin, cout=cout,
                               cout_pad=cout_pad)

    flops = 2 * b * h * w * 9 * (cin * cout + cout * cout_pad)
    bytes_accessed = (x_nhwc.size * x_nhwc.dtype.itemsize
                      + b * h * w * cout_pad * 4
                      + w1_taps.size * 2 + w2_taps.size * 2
                      + b1.size * 4 + b2.size * 4)
    cost = pl.CostEstimate(flops=int(flops), transcendentals=0,
                           bytes_accessed=int(bytes_accessed))

    out2d = pl.pallas_call(
        kernel,
        out_shape=jax.ShapeDtypeStruct((b * h * w, cout_pad), x_nhwc.dtype),
        grid_spec=pltpu.PrefetchScalarGridSpec(
            num_scalar_prefetch=0,
            grid=(b // bt,),
            in_specs=[
                pl.BlockSpec((bt, h, w, cin), lambda i: (i, 0, 0, 0)),
                pl.BlockSpec((9, cin, cout), lambda i: (0, 0, 0)),
                pl.BlockSpec((1, cout), lambda i: (0, 0)),
                pl.BlockSpec((9, cout, cout_pad), lambda i: (0, 0, 0)),
                pl.BlockSpec((1, cout_pad), lambda i: (0, 0)),
            ],
            out_specs=pl.BlockSpec((m, cout_pad), lambda i: (i, 0)),
            scratch_shapes=[
                pltpu.VMEM((bt, h + 2, w + 2, cmax), _COMPUTE_DTYPE),
            ],
        ),
        compiler_params=pltpu.CompilerParams(
            dimension_semantics=("parallel",),
            vmem_limit_bytes=vmem_limit,
        ),
        cost_estimate=cost,
    )(x_nhwc, w1_taps, b1, w2_taps, b2)

    out2d = out2d[:, :cout] if cout_pad != cout else out2d
    return out2d.reshape(b, h, w, cout)


@jax.jit
def unet_conv_block(x_nchw, params):
    """PyTorch-compatible NCHW interface. For chained blocks prefer the NHWC
    entry point above and transpose only at model entry/exit."""
    x_nhwc = jnp.transpose(x_nchw, (0, 2, 3, 1))
    y_nhwc = unet_conv_block_nhwc(x_nhwc, params)
    return jnp.transpose(y_nhwc, (0, 3, 1, 2))


def init_unet_conv_block_params(key, in_ch, out_ch):
    """Deterministic synthetic parameters matching nn.Conv2d shapes (stored HWIO)."""
    k1, k2, k3, k4 = jax.random.split(key, 4)
    w1_oihw = jax.random.normal(k1, (out_ch, in_ch, 3, 3), jnp.float32) * 0.1
    b1 = jax.random.normal(k2, (out_ch,), jnp.float32) * 0.1
    w2_oihw = jax.random.normal(k3, (out_ch, out_ch, 3, 3), jnp.float32) * 0.1
    b2 = jax.random.normal(k4, (out_ch,), jnp.float32) * 0.1
    w1_hwio = jnp.transpose(w1_oihw, (2, 3, 1, 0))   # (3,3,in,out)
    w2_hwio = jnp.transpose(w2_oihw, (2, 3, 1, 0))   # (3,3,out,out)
    return {"w1": w1_hwio, "b1": b1, "w2": w2_hwio, "b2": b2}


def _ref_unet_conv_block(x_nchw, params):
    """Pure-JAX reference (matches PyTorch Conv2d semantics, f32)."""
    w1_oihw = jnp.transpose(params["w1"], (3, 2, 0, 1))
    w2_oihw = jnp.transpose(params["w2"], (3, 2, 0, 1))

    def conv_relu(x, wgt, bias):
        y = jax.lax.conv_general_dilated(
            x, wgt, window_strides=(1, 1), padding=((1, 1), (1, 1)),
            dimension_numbers=("NCHW", "OIHW", "NCHW"),
            precision=jax.lax.Precision.HIGHEST)
        return jnp.maximum(y + bias[None, :, None, None], 0.0)

    return conv_relu(conv_relu(x_nchw, w1_oihw, params["b1"]),
                     w2_oihw, params["b2"])


if __name__ == "__main__":
    key = jax.random.PRNGKey(0)
    k_x, k_p = jax.random.split(key)

    B, in_ch, out_ch, H, W = 2, 4, 8, 16, 16
    x = jax.random.normal(k_x, (B, in_ch, H, W), jnp.float32)
    params = init_unet_conv_block_params(k_p, in_ch, out_ch)

    out = unet_conv_block(x, params)
    jax.block_until_ready(out)

    assert out.shape == (B, out_ch, H, W), out.shape
    assert out.dtype == jnp.float32
    # ReLU output must be non-negative.
    assert bool(jnp.all(out >= 0.0))

    # Numerical check vs. a pure-JAX reference (tolerance covers bf16 MXU
    # operands with f32 accumulation).
    ref = _ref_unet_conv_block(x, params)
    max_err = float(jnp.max(jnp.abs(out - ref)))
    assert max_err < 2e-2, max_err

    print("KERNEL_OK")
</pallas_src>

<mosaic_0001>
module attributes {stable_mosaic.version = 11 : i64} {
  func.func @_fused_conv_block_kernel(%arg0: i32, %arg1: memref<1x16x16x4xf32, #tpu.memory_space<vmem>>, %arg2: memref<9x4x8xbf16, #tpu.memory_space<vmem>>, %arg3: memref<1x8xf32, #tpu.memory_space<vmem>>, %arg4: memref<9x8x128xbf16, #tpu.memory_space<vmem>>, %arg5: memref<1x128xf32, #tpu.memory_space<vmem>>, %arg6: memref<256x128xf32, #tpu.memory_space<vmem>>, %arg7: memref<1x18x18x8xbf16, #tpu.memory_space<vmem>>) attributes {dimension_semantics = [#tpu.dimension_semantics<parallel>], iteration_bounds = array<i64: 2>, scalar_prefetch = 0 : i64, scratch_operands = 1 : i64, tpu.core_type = #tpu.core_type<tc>, window_params = [{transform_indices = @transform_0, window_bounds = array<i64: 1, 16, 16, 4>}, {pipeline_mode = #tpu.pipeline_mode<synchronous>, transform_indices = @transform_1, window_bounds = array<i64: 9, 4, 8>}, {pipeline_mode = #tpu.pipeline_mode<synchronous>, transform_indices = @transform_2, window_bounds = array<i64: 1, 8>}, {pipeline_mode = #tpu.pipeline_mode<synchronous>, transform_indices = @transform_3, window_bounds = array<i64: 9, 8, 128>}, {pipeline_mode = #tpu.pipeline_mode<synchronous>, transform_indices = @transform_4, window_bounds = array<i64: 1, 128>}, {transform_indices = @transform_5, window_bounds = array<i64: 256, 128>}]} {
    %cst = arith.constant 0.000000e+00 : bf16
    %0 = vector.broadcast %cst : bf16 to vector<1x1x18x8xbf16>
    %c0 = arith.constant 0 : index
    %c0_0 = arith.constant 0 : index
    %c0_1 = arith.constant 0 : index
    %c0_2 = arith.constant 0 : index
    %1 = vector.load %arg7[%c0, %c0_0, %c0_1, %c0_2] : memref<1x18x18x8xbf16, #tpu.memory_space<vmem>>, vector<1x1x18x8xbf16>
    tpu.vector_store %arg7[%c0, %c0_0, %c0_1, %c0_2], %0 {strides = array<i32>} : memref<1x18x18x8xbf16, #tpu.memory_space<vmem>>, vector<1x1x18x8xbf16>,
    %cst_3 = arith.constant 0.000000e+00 : bf16
    %2 = vector.broadcast %cst_3 : bf16 to vector<1x1x18x8xbf16>
    %c0_4 = arith.constant 0 : index
    %c17 = arith.constant 17 : index
    %c0_5 = arith.constant 0 : index
    %c0_6 = arith.constant 0 : index
    %3 = vector.load %arg7[%c0_4, %c17, %c0_5, %c0_6] : memref<1x18x18x8xbf16, #tpu.memory_space<vmem>>, vector<1x1x18x8xbf16>
    tpu.vector_store %arg7[%c0_4, %c17, %c0_5, %c0_6], %2 {strides = array<i32>} : memref<1x18x18x8xbf16, #tpu.memory_space<vmem>>, vector<1x1x18x8xbf16>,
    %cst_7 = arith.constant 0.000000e+00 : bf16
    %4 = vector.broadcast %cst_7 : bf16 to vector<1x18x1x8xbf16>
    %c0_8 = arith.constant 0 : index
    %c0_9 = arith.constant 0 : index
    %c0_10 = arith.constant 0 : index
    %c0_11 = arith.constant 0 : index
    %5 = vector.load %arg7[%c0_8, %c0_9, %c0_10, %c0_11] : memref<1x18x18x8xbf16, #tpu.memory_space<vmem>>, vector<1x18x1x8xbf16>
    tpu.vector_store %arg7[%c0_8, %c0_9, %c0_10, %c0_11], %4 {strides = array<i32>} : memref<1x18x18x8xbf16, #tpu.memory_space<vmem>>, vector<1x18x1x8xbf16>,
    %cst_12 = arith.constant 0.000000e+00 : bf16
    %6 = vector.broadcast %cst_12 : bf16 to vector<1x18x1x8xbf16>
    %c0_13 = arith.constant 0 : index
    %c0_14 = arith.constant 0 : index
    %c17_15 = arith.constant 17 : index
    %c0_16 = arith.constant 0 : index
    %7 = vector.load %arg7[%c0_13, %c0_14, %c17_15, %c0_16] : memref<1x18x18x8xbf16, #tpu.memory_space<vmem>>, vector<1x18x1x8xbf16>
    tpu.vector_store %arg7[%c0_13, %c0_14, %c17_15, %c0_16], %6 {strides = array<i32>} : memref<1x18x18x8xbf16, #tpu.memory_space<vmem>>, vector<1x18x1x8xbf16>,
    %c0_17 = arith.constant 0 : index
    %c0_18 = arith.constant 0 : index
    %c0_19 = arith.constant 0 : index
    %c0_20 = arith.constant 0 : index
    %8 = vector.load %arg1[%c0_17, %c0_18, %c0_19, %c0_20] : memref<1x16x16x4xf32, #tpu.memory_space<vmem>>, vector<1x16x16x4xf32>
    %9 = arith.truncf %8 : vector<1x16x16x4xf32> to vector<1x16x16x4xbf16>
    %c0_21 = arith.constant 0 : index
    %c1 = arith.constant 1 : index
    %c1_22 = arith.constant 1 : index
    %c0_23 = arith.constant 0 : index
    %10 = vector.load %arg7[%c0_21, %c1, %c1_22, %c0_23] : memref<1x18x18x8xbf16, #tpu.memory_space<vmem>>, vector<1x16x16x4xbf16>
    tpu.vector_store %arg7[%c0_21, %c1, %c1_22, %c0_23], %9 {strides = array<i32>} : memref<1x18x18x8xbf16, #tpu.memory_space<vmem>>, vector<1x16x16x4xbf16>,
    %cst_24 = arith.constant 0.000000e+00 : f32
    %11 = vector.broadcast %cst_24 : f32 to vector<256x8xf32>
    %c0_25 = arith.constant 0 : index
    %c0_26 = arith.constant 0 : index
    %c0_27 = arith.constant 0 : index
    %c0_28 = arith.constant 0 : index
    %12 = vector.load %arg7[%c0_25, %c0_26, %c0_27, %c0_28] : memref<1x18x18x8xbf16, #tpu.memory_space<vmem>>, vector<1x16x16x4xbf16>
    %13 = vector.shape_cast %12 : vector<1x16x16x4xbf16> to vector<256x4xbf16>
    %c0_29 = arith.constant 0 : index
    %c0_30 = arith.constant 0 : index
    %c0_31 = arith.constant 0 : index
    %14 = vector.load %arg2[%c0_29, %c0_30, %c0_31] : memref<9x4x8xbf16, #tpu.memory_space<vmem>>, vector<1x4x8xbf16>
    %15 = vector.shape_cast %14 : vector<1x4x8xbf16> to vector<4x8xbf16>
    %cst_32 = arith.constant dense<0.000000e+00> : vector<256x8xf32>
    %16 = tpu.matmul %13, %15, %cst_32 {dimension_numbers = #tpu.dot_dimension_numbers<[1], [0], [0], [1], [0, 0, 1, 1], [], []>} : vector<256x4xbf16>, vector<4x8xbf16>, vector<256x8xf32> -> vector<256x8xf32>
    %17 = arith.addf %11, %16 : vector<256x8xf32>
    %c0_33 = arith.constant 0 : index
    %c0_34 = arith.constant 0 : index
    %c1_35 = arith.constant 1 : index
    %c0_36 = arith.constant 0 : index
    %18 = vector.load %arg7[%c0_33, %c0_34, %c1_35, %c0_36] : memref<1x18x18x8xbf16, #tpu.memory_space<vmem>>, vector<1x16x16x4xbf16>
    %19 = vector.shape_cast %18 : vector<1x16x16x4xbf16> to vector<256x4xbf16>
    %c1_37 = arith.constant 1 : index
    %c0_38 = arith.constant 0 : index
    %c0_39 = arith.constant 0 : index
    %20 = vector.load %arg2[%c1_37, %c0_38, %c0_39] : memref<9x4x8xbf16, #tpu.memory_space<vmem>>, vector<1x4x8xbf16>
    %21 = vector.shape_cast %20 : vector<1x4x8xbf16> to vector<4x8xbf16>
    %cst_40 = arith.constant dense<0.000000e+00> : vector<256x8xf32>
    %22 = tpu.matmul %19, %21, %cst_40 {dimension_numbers = #tpu.dot_dimension_numbers<[1], [0], [0], [1], [0, 0, 1, 1], [], []>} : vector<256x4xbf16>, vector<4x8xbf16>, vector<256x8xf32> -> vector<256x8xf32>
    %23 = arith.addf %17, %22 : vector<256x8xf32>
    %c0_41 = arith.constant 0 : index
    %c0_42 = arith.constant 0 : index
    %c2 = arith.constant 2 : index
    %c0_43 = arith.constant 0 : index
    %24 = vector.load %arg7[%c0_41, %c0_42, %c2, %c0_43] : memref<1x18x18x8xbf16, #tpu.memory_space<vmem>>, vector<1x16x16x4xbf16>
    %25 = vector.shape_cast %24 : vector<1x16x16x4xbf16> to vector<256x4xbf16>
    %c2_44 = arith.constant 2 : index
    %c0_45 = arith.constant 0 : index
    %c0_46 = arith.constant 0 : index
    %26 = vector.load %arg2[%c2_44, %c0_45, %c0_46] : memref<9x4x8xbf16, #tpu.memory_space<vmem>>, vector<1x4x8xbf16>
    %27 = vector.shape_cast %26 : vector<1x4x8xbf16> to vector<4x8xbf16>
    %cst_47 = arith.constant dense<0.000000e+00> : vector<256x8xf32>
    %28 = tpu.matmul %25, %27, %cst_47 {dimension_numbers = #tpu.dot_dimension_numbers<[1], [0], [0], [1], [0, 0, 1, 1], [], []>} : vector<256x4xbf16>, vector<4x8xbf16>, vector<256x8xf32> -> vector<256x8xf32>
    %29 = arith.addf %23, %28 : vector<256x8xf32>
    %c0_48 = arith.constant 0 : index
    %c1_49 = arith.constant 1 : index
    %c0_50 = arith.constant 0 : index
    %c0_51 = arith.constant 0 : index
    %30 = vector.load %arg7[%c0_48, %c1_49, %c0_50, %c0_51] : memref<1x18x18x8xbf16, #tpu.memory_space<vmem>>, vector<1x16x16x4xbf16>
    %31 = vector.shape_cast %30 : vector<1x16x16x4xbf16> to vector<256x4xbf16>
    %c3 = arith.constant 3 : index
    %c0_52 = arith.constant 0 : index
    %c0_53 = arith.constant 0 : index
    %32 = vector.load %arg2[%c3, %c0_52, %c0_53] : memref<9x4x8xbf16, #tpu.memory_space<vmem>>, vector<1x4x8xbf16>
    %33 = vector.shape_cast %32 : vector<1x4x8xbf16> to vector<4x8xbf16>
    %cst_54 = arith.constant dense<0.000000e+00> : vector<256x8xf32>
    %34 = tpu.matmul %31, %33, %cst_54 {dimension_numbers = #tpu.dot_dimension_numbers<[1], [0], [0], [1], [0, 0, 1, 1], [], []>} : vector<256x4xbf16>, vector<4x8xbf16>, vector<256x8xf32> -> vector<256x8xf32>
    %35 = arith.addf %29, %34 : vector<256x8xf32>
    %c0_55 = arith.constant 0 : index
    %c1_56 = arith.constant 1 : index
    %c1_57 = arith.constant 1 : index
    %c0_58 = arith.constant 0 : index
    %36 = vector.load %arg7[%c0_55, %c1_56, %c1_57, %c0_58] : memref<1x18x18x8xbf16, #tpu.memory_space<vmem>>, vector<1x16x16x4xbf16>
    %37 = vector.shape_cast %36 : vector<1x16x16x4xbf16> to vector<256x4xbf16>
    %c4 = arith.constant 4 : index
    %c0_59 = arith.constant 0 : index
    %c0_60 = arith.constant 0 : index
    %38 = vector.load %arg2[%c4, %c0_59, %c0_60] : memref<9x4x8xbf16, #tpu.memory_space<vmem>>, vector<1x4x8xbf16>
    %39 = vector.shape_cast %38 : vector<1x4x8xbf16> to vector<4x8xbf16>
    %cst_61 = arith.constant dense<0.000000e+00> : vector<256x8xf32>
    %40 = tpu.matmul %37, %39, %cst_61 {dimension_numbers = #tpu.dot_dimension_numbers<[1], [0], [0], [1], [0, 0, 1, 1], [], []>} : vector<256x4xbf16>, vector<4x8xbf16>, vector<256x8xf32> -> vector<256x8xf32>
    %41 = arith.addf %35, %40 : vector<256x8xf32>
    %c0_62 = arith.constant 0 : index
    %c1_63 = arith.constant 1 : index
    %c2_64 = arith.constant 2 : index
    %c0_65 = arith.constant 0 : index
    %42 = vector.load %arg7[%c0_62, %c1_63, %c2_64, %c0_65] : memref<1x18x18x8xbf16, #tpu.memory_space<vmem>>, vector<1x16x16x4xbf16>
    %43 = vector.shape_cast %42 : vector<1x16x16x4xbf16> to vector<256x4xbf16>
    %c5 = arith.constant 5 : index
    %c0_66 = arith.constant 0 : index
    %c0_67 = arith.constant 0 : index
    %44 = vector.load %arg2[%c5, %c0_66, %c0_67] : memref<9x4x8xbf16, #tpu.memory_space<vmem>>, vector<1x4x8xbf16>
    %45 = vector.shape_cast %44 : vector<1x4x8xbf16> to vector<4x8xbf16>
    %cst_68 = arith.constant dense<0.000000e+00> : vector<256x8xf32>
    %46 = tpu.matmul %43, %45, %cst_68 {dimension_numbers = #tpu.dot_dimension_numbers<[1], [0], [0], [1], [0, 0, 1, 1], [], []>} : vector<256x4xbf16>, vector<4x8xbf16>, vector<256x8xf32> -> vector<256x8xf32>
    %47 = arith.addf %41, %46 : vector<256x8xf32>
    %c0_69 = arith.constant 0 : index
    %c2_70 = arith.constant 2 : index
    %c0_71 = arith.constant 0 : index
    %c0_72 = arith.constant 0 : index
    %48 = vector.load %arg7[%c0_69, %c2_70, %c0_71, %c0_72] : memref<1x18x18x8xbf16, #tpu.memory_space<vmem>>, vector<1x16x16x4xbf16>
    %49 = vector.shape_cast %48 : vector<1x16x16x4xbf16> to vector<256x4xbf16>
    %c6 = arith.constant 6 : index
    %c0_73 = arith.constant 0 : index
    %c0_74 = arith.constant 0 : index
    %50 = vector.load %arg2[%c6, %c0_73, %c0_74] : memref<9x4x8xbf16, #tpu.memory_space<vmem>>, vector<1x4x8xbf16>
    %51 = vector.shape_cast %50 : vector<1x4x8xbf16> to vector<4x8xbf16>
    %cst_75 = arith.constant dense<0.000000e+00> : vector<256x8xf32>
    %52 = tpu.matmul %49, %51, %cst_75 {dimension_numbers = #tpu.dot_dimension_numbers<[1], [0], [0], [1], [0, 0, 1, 1], [], []>} : vector<256x4xbf16>, vector<4x8xbf16>, vector<256x8xf32> -> vector<256x8xf32>
    %53 = arith.addf %47, %52 : vector<256x8xf32>
    %c0_76 = arith.constant 0 : index
    %c2_77 = arith.constant 2 : index
    %c1_78 = arith.constant 1 : index
    %c0_79 = arith.constant 0 : index
    %54 = vector.load %arg7[%c0_76, %c2_77, %c1_78, %c0_79] : memref<1x18x18x8xbf16, #tpu.memory_space<vmem>>, vector<1x16x16x4xbf16>
    %55 = vector.shape_cast %54 : vector<1x16x16x4xbf16> to vector<256x4xbf16>
    %c7 = arith.constant 7 : index
    %c0_80 = arith.constant 0 : index
    %c0_81 = arith.constant 0 : index
    %56 = vector.load %arg2[%c7, %c0_80, %c0_81] : memref<9x4x8xbf16, #tpu.memory_space<vmem>>, vector<1x4x8xbf16>
    %57 = vector.shape_cast %56 : vector<1x4x8xbf16> to vector<4x8xbf16>
    %cst_82 = arith.constant dense<0.000000e+00> : vector<256x8xf32>
    %58 = tpu.matmul %55, %57, %cst_82 {dimension_numbers = #tpu.dot_dimension_numbers<[1], [0], [0], [1], [0, 0, 1, 1], [], []>} : vector<256x4xbf16>, vector<4x8xbf16>, vector<256x8xf32> -> vector<256x8xf32>
    %59 = arith.addf %53, %58 : vector<256x8xf32>
    %c0_83 = arith.constant 0 : index
    %c2_84 = arith.constant 2 : index
    %c2_85 = arith.constant 2 : index
    %c0_86 = arith.constant 0 : index
    %60 = vector.load %arg7[%c0_83, %c2_84, %c2_85, %c0_86] : memref<1x18x18x8xbf16, #tpu.memory_space<vmem>>, vector<1x16x16x4xbf16>
    %61 = vector.shape_cast %60 : vector<1x16x16x4xbf16> to vector<256x4xbf16>
    %c8 = arith.constant 8 : index
    %c0_87 = arith.constant 0 : index
    %c0_88 = arith.constant 0 : index
    %62 = vector.load %arg2[%c8, %c0_87, %c0_88] : memref<9x4x8xbf16, #tpu.memory_space<vmem>>, vector<1x4x8xbf16>
    %63 = vector.shape_cast %62 : vector<1x4x8xbf16> to vector<4x8xbf16>
    %cst_89 = arith.constant dense<0.000000e+00> : vector<256x8xf32>
    %64 = tpu.matmul %61, %63, %cst_89 {dimension_numbers = #tpu.dot_dimension_numbers<[1], [0], [0], [1], [0, 0, 1, 1], [], []>} : vector<256x4xbf16>, vector<4x8xbf16>, vector<256x8xf32> -> vector<256x8xf32>
    %65 = arith.addf %59, %64 : vector<256x8xf32>
    %c0_90 = arith.constant 0 : index
    %c0_91 = arith.constant 0 : index
    %66 = vector.load %arg3[%c0_90, %c0_91] : memref<1x8xf32, #tpu.memory_space<vmem>>, vector<1x8xf32>
    %67 = vector.broadcast %66 : vector<1x8xf32> to vector<256x8xf32>
    %68 = arith.addf %65, %67 : vector<256x8xf32>
    %cst_92 = arith.constant 0.000000e+00 : f32
    %69 = vector.broadcast %cst_92 : f32 to vector<256x8xf32>
    %70 = arith.maximumf %68, %69 : vector<256x8xf32>
    %71 = vector.shape_cast %70 : vector<256x8xf32> to vector<1x16x16x8xf32>
    %72 = arith.truncf %71 : vector<1x16x16x8xf32> to vector<1x16x16x8xbf16>
    %c0_93 = arith.constant 0 : index
    %c1_94 = arith.constant 1 : index
    %c1_95 = arith.constant 1 : index
    %c0_96 = arith.constant 0 : index
    %73 = vector.load %arg7[%c0_93, %c1_94, %c1_95, %c0_96] : memref<1x18x18x8xbf16, #tpu.memory_space<vmem>>, vector<1x16x16x8xbf16>
    tpu.vector_store %arg7[%c0_93, %c1_94, %c1_95, %c0_96], %72 {strides = array<i32>} : memref<1x18x18x8xbf16, #tpu.memory_space<vmem>>, vector<1x16x16x8xbf16>,
    %cst_97 = arith.constant 0.000000e+00 : f32
    %74 = vector.broadcast %cst_97 : f32 to vector<256x128xf32>
    %c0_98 = arith.constant 0 : index
    %c0_99 = arith.constant 0 : index
    %c0_100 = arith.constant 0 : index
    %c0_101 = arith.constant 0 : index
    %75 = vector.load %arg7[%c0_98, %c0_99, %c0_100, %c0_101] : memref<1x18x18x8xbf16, #tpu.memory_space<vmem>>, vector<1x16x16x8xbf16>
    %76 = vector.shape_cast %75 : vector<1x16x16x8xbf16> to vector<256x8xbf16>
    %c0_102 = arith.constant 0 : index
    %c0_103 = arith.constant 0 : index
    %c0_104 = arith.constant 0 : index
    %77 = vector.load %arg4[%c0_102, %c0_103, %c0_104] : memref<9x8x128xbf16, #tpu.memory_space<vmem>>, vector<1x8x128xbf16>
    %78 = vector.shape_cast %77 : vector<1x8x128xbf16> to vector<8x128xbf16>
    %cst_105 = arith.constant dense<0.000000e+00> : vector<256x128xf32>
    %79 = tpu.matmul %76, %78, %cst_105 {dimension_numbers = #tpu.dot_dimension_numbers<[1], [0], [0], [1], [0, 0, 1, 1], [], []>} : vector<256x8xbf16>, vector<8x128xbf16>, vector<256x128xf32> -> vector<256x128xf32>
    %80 = arith.addf %74, %79 : vector<256x128xf32>
    %c0_106 = arith.constant 0 : index
    %c0_107 = arith.constant 0 : index
    %c1_108 = arith.constant 1 : index
    %c0_109 = arith.constant 0 : index
    %81 = vector.load %arg7[%c0_106, %c0_107, %c1_108, %c0_109] : memref<1x18x18x8xbf16, #tpu.memory_space<vmem>>, vector<1x16x16x8xbf16>
    %82 = vector.shape_cast %81 : vector<1x16x16x8xbf16> to vector<256x8xbf16>
    %c1_110 = arith.constant 1 : index
    %c0_111 = arith.constant 0 : index
    %c0_112 = arith.constant 0 : index
    %83 = vector.load %arg4[%c1_110, %c0_111, %c0_112] : memref<9x8x128xbf16, #tpu.memory_space<vmem>>, vector<1x8x128xbf16>
    %84 = vector.shape_cast %83 : vector<1x8x128xbf16> to vector<8x128xbf16>
    %cst_113 = arith.constant dense<0.000000e+00> : vector<256x128xf32>
    %85 = tpu.matmul %82, %84, %cst_113 {dimension_numbers = #tpu.dot_dimension_numbers<[1], [0], [0], [1], [0, 0, 1, 1], [], []>} : vector<256x8xbf16>, vector<8x128xbf16>, vector<256x128xf32> -> vector<256x128xf32>
    %86 = arith.addf %80, %85 : vector<256x128xf32>
    %c0_114 = arith.constant 0 : index
    %c0_115 = arith.constant 0 : index
    %c2_116 = arith.constant 2 : index
    %c0_117 = arith.constant 0 : index
    %87 = vector.load %arg7[%c0_114, %c0_115, %c2_116, %c0_117] : memref<1x18x18x8xbf16, #tpu.memory_space<vmem>>, vector<1x16x16x8xbf16>
    %88 = vector.shape_cast %87 : vector<1x16x16x8xbf16> to vector<256x8xbf16>
    %c2_118 = arith.constant 2 : index
    %c0_119 = arith.constant 0 : index
    %c0_120 = arith.constant 0 : index
    %89 = vector.load %arg4[%c2_118, %c0_119, %c0_120] : memref<9x8x128xbf16, #tpu.memory_space<vmem>>, vector<1x8x128xbf16>
    %90 = vector.shape_cast %89 : vector<1x8x128xbf16> to vector<8x128xbf16>
    %cst_121 = arith.constant dense<0.000000e+00> : vector<256x128xf32>
    %91 = tpu.matmul %88, %90, %cst_121 {dimension_numbers = #tpu.dot_dimension_numbers<[1], [0], [0], [1], [0, 0, 1, 1], [], []>} : vector<256x8xbf16>, vector<8x128xbf16>, vector<256x128xf32> -> vector<256x128xf32>
    %92 = arith.addf %86, %91 : vector<256x128xf32>
    %c0_122 = arith.constant 0 : index
    %c1_123 = arith.constant 1 : index
    %c0_124 = arith.constant 0 : index
    %c0_125 = arith.constant 0 : index
    %93 = vector.load %arg7[%c0_122, %c1_123, %c0_124, %c0_125] : memref<1x18x18x8xbf16, #tpu.memory_space<vmem>>, vector<1x16x16x8xbf16>
    %94 = vector.shape_cast %93 : vector<1x16x16x8xbf16> to vector<256x8xbf16>
    %c3_126 = arith.constant 3 : index
    %c0_127 = arith.constant 0 : index
    %c0_128 = arith.constant 0 : index
    %95 = vector.load %arg4[%c3_126, %c0_127, %c0_128] : memref<9x8x128xbf16, #tpu.memory_space<vmem>>, vector<1x8x128xbf16>
    %96 = vector.shape_cast %95 : vector<1x8x128xbf16> to vector<8x128xbf16>
    %cst_129 = arith.constant dense<0.000000e+00> : vector<256x128xf32>
    %97 = tpu.matmul %94, %96, %cst_129 {dimension_numbers = #tpu.dot_dimension_numbers<[1], [0], [0], [1], [0, 0, 1, 1], [], []>} : vector<256x8xbf16>, vector<8x128xbf16>, vector<256x128xf32> -> vector<256x128xf32>
    %98 = arith.addf %92, %97 : vector<256x128xf32>
    %c0_130 = arith.constant 0 : index
    %c1_131 = arith.constant 1 : index
    %c1_132 = arith.constant 1 : index
    %c0_133 = arith.constant 0 : index
    %99 = vector.load %arg7[%c0_130, %c1_131, %c1_132, %c0_133] : memref<1x18x18x8xbf16, #tpu.memory_space<vmem>>, vector<1x16x16x8xbf16>
    %100 = vector.shape_cast %99 : vector<1x16x16x8xbf16> to vector<256x8xbf16>
    %c4_134 = arith.constant 4 : index
    %c0_135 = arith.constant 0 : index
    %c0_136 = arith.constant 0 : index
    %101 = vector.load %arg4[%c4_134, %c0_135, %c0_136] : memref<9x8x128xbf16, #tpu.memory_space<vmem>>, vector<1x8x128xbf16>
    %102 = vector.shape_cast %101 : vector<1x8x128xbf16> to vector<8x128xbf16>
    %cst_137 = arith.constant dense<0.000000e+00> : vector<256x128xf32>
    %103 = tpu.matmul %100, %102, %cst_137 {dimension_numbers = #tpu.dot_dimension_numbers<[1], [0], [0], [1], [0, 0, 1, 1], [], []>} : vector<256x8xbf16>, vector<8x128xbf16>, vector<256x128xf32> -> vector<256x128xf32>
    %104 = arith.addf %98, %103 : vector<256x128xf32>
    %c0_138 = arith.constant 0 : index
    %c1_139 = arith.constant 1 : index
    %c2_140 = arith.constant 2 : index
    %c0_141 = arith.constant 0 : index
    %105 = vector.load %arg7[%c0_138, %c1_139, %c2_140, %c0_141] : memref<1x18x18x8xbf16, #tpu.memory_space<vmem>>, vector<1x16x16x8xbf16>
    %106 = vector.shape_cast %105 : vector<1x16x16x8xbf16> to vector<256x8xbf16>
    %c5_142 = arith.constant 5 : index
    %c0_143 = arith.constant 0 : index
    %c0_144 = arith.constant 0 : index
    %107 = vector.load %arg4[%c5_142, %c0_143, %c0_144] : memref<9x8x128xbf16, #tpu.memory_space<vmem>>, vector<1x8x128xbf16>
    %108 = vector.shape_cast %107 : vector<1x8x128xbf16> to vector<8x128xbf16>
    %cst_145 = arith.constant dense<0.000000e+00> : vector<256x128xf32>
    %109 = tpu.matmul %106, %108, %cst_145 {dimension_numbers = #tpu.dot_dimension_numbers<[1], [0], [0], [1], [0, 0, 1, 1], [], []>} : vector<256x8xbf16>, vector<8x128xbf16>, vector<256x128xf32> -> vector<256x128xf32>
    %110 = arith.addf %104, %109 : vector<256x128xf32>
    %c0_146 = arith.constant 0 : index
    %c2_147 = arith.constant 2 : index
    %c0_148 = arith.constant 0 : index
    %c0_149 = arith.constant 0 : index
    %111 = vector.load %arg7[%c0_146, %c2_147, %c0_148, %c0_149] : memref<1x18x18x8xbf16, #tpu.memory_space<vmem>>, vector<1x16x16x8xbf16>
    %112 = vector.shape_cast %111 : vector<1x16x16x8xbf16> to vector<256x8xbf16>
    %c6_150 = arith.constant 6 : index
    %c0_151 = arith.constant 0 : index
    %c0_152 = arith.constant 0 : index
    %113 = vector.load %arg4[%c6_150, %c0_151, %c0_152] : memref<9x8x128xbf16, #tpu.memory_space<vmem>>, vector<1x8x128xbf16>
    %114 = vector.shape_cast %113 : vector<1x8x128xbf16> to vector<8x128xbf16>
    %cst_153 = arith.constant dense<0.000000e+00> : vector<256x128xf32>
    %115 = tpu.matmul %112, %114, %cst_153 {dimension_numbers = #tpu.dot_dimension_numbers<[1], [0], [0], [1], [0, 0, 1, 1], [], []>} : vector<256x8xbf16>, vector<8x128xbf16>, vector<256x128xf32> -> vector<256x128xf32>
    %116 = arith.addf %110, %115 : vector<256x128xf32>
    %c0_154 = arith.constant 0 : index
    %c2_155 = arith.constant 2 : index
    %c1_156 = arith.constant 1 : index
    %c0_157 = arith.constant 0 : index
    %117 = vector.load %arg7[%c0_154, %c2_155, %c1_156, %c0_157] : memref<1x18x18x8xbf16, #tpu.memory_space<vmem>>, vector<1x16x16x8xbf16>
    %118 = vector.shape_cast %117 : vector<1x16x16x8xbf16> to vector<256x8xbf16>
    %c7_158 = arith.constant 7 : index
    %c0_159 = arith.constant 0 : index
    %c0_160 = arith.constant 0 : index
    %119 = vector.load %arg4[%c7_158, %c0_159, %c0_160] : memref<9x8x128xbf16, #tpu.memory_space<vmem>>, vector<1x8x128xbf16>
    %120 = vector.shape_cast %119 : vector<1x8x128xbf16> to vector<8x128xbf16>
    %cst_161 = arith.constant dense<0.000000e+00> : vector<256x128xf32>
    %121 = tpu.matmul %118, %120, %cst_161 {dimension_numbers = #tpu.dot_dimension_numbers<[1], [0], [0], [1], [0, 0, 1, 1], [], []>} : vector<256x8xbf16>, vector<8x128xbf16>, vector<256x128xf32> -> vector<256x128xf32>
    %122 = arith.addf %116, %121 : vector<256x128xf32>
    %c0_162 = arith.constant 0 : index
    %c2_163 = arith.constant 2 : index
    %c2_164 = arith.constant 2 : index
    %c0_165 = arith.constant 0 : index
    %123 = vector.load %arg7[%c0_162, %c2_163, %c2_164, %c0_165] : memref<1x18x18x8xbf16, #tpu.memory_space<vmem>>, vector<1x16x16x8xbf16>
    %124 = vector.shape_cast %123 : vector<1x16x16x8xbf16> to vector<256x8xbf16>
    %c8_166 = arith.constant 8 : index
    %c0_167 = arith.constant 0 : index
    %c0_168 = arith.constant 0 : index
    %125 = vector.load %arg4[%c8_166, %c0_167, %c0_168] : memref<9x8x128xbf16, #tpu.memory_space<vmem>>, vector<1x8x128xbf16>
    %126 = vector.shape_cast %125 : vector<1x8x128xbf16> to vector<8x128xbf16>
    %cst_169 = arith.constant dense<0.000000e+00> : vector<256x128xf32>
    %127 = tpu.matmul %124, %126, %cst_169 {dimension_numbers = #tpu.dot_dimension_numbers<[1], [0], [0], [1], [0, 0, 1, 1], [], []>} : vector<256x8xbf16>, vector<8x128xbf16>, vector<256x128xf32> -> vector<256x128xf32>
    %128 = arith.addf %122, %127 : vector<256x128xf32>
    %c0_170 = arith.constant 0 : index
    %c0_171 = arith.constant 0 : index
    %129 = vector.load %arg5[%c0_170, %c0_171] : memref<1x128xf32, #tpu.memory_space<vmem>>, vector<1x128xf32>
    %130 = vector.broadcast %129 : vector<1x128xf32> to vector<256x128xf32>
    %131 = arith.addf %128, %130 : vector<256x128xf32>
    %cst_172 = arith.constant 0.000000e+00 : f32
    %132 = vector.broadcast %cst_172 : f32 to vector<256x128xf32>
    %133 = arith.maximumf %131, %132 : vector<256x128xf32>
    %c0_173 = arith.constant 0 : index
    %c0_174 = arith.constant 0 : index
    %134 = vector.load %arg6[%c0_173, %c0_174] : memref<256x128xf32, #tpu.memory_space<vmem>>, vector<256x128xf32>
    tpu.vector_store %arg6[%c0_173, %c0_174], %133 {strides = array<i32>} : memref<256x128xf32, #tpu.memory_space<vmem>>, vector<256x128xf32>,
    return
  }
  func.func @transform_0(%arg0: i32) -> (i32, i32, i32, i32) {
    %c0_i32 = arith.constant 0 : i32
    %c0_i32_0 = arith.constant 0 : i32
    %c0_i32_1 = arith.constant 0 : i32
    %c0_i32_2 = arith.constant 0 : i32
    return %arg0, %c0_i32, %c0_i32_0, %c0_i32_1 : i32, i32, i32, i32
  }
  func.func @transform_1(%arg0: i32) -> (i32, i32, i32) {
    %c0_i32 = arith.constant 0 : i32
    %c0_i32_0 = arith.constant 0 : i32
    %c0_i32_1 = arith.constant 0 : i32
    %c0_i32_2 = arith.constant 0 : i32
    return %c0_i32, %c0_i32_0, %c0_i32_1 : i32, i32, i32
  }
  func.func @transform_2(%arg0: i32) -> (i32, i32) {
    %c0_i32 = arith.constant 0 : i32
    %c0_i32_0 = arith.constant 0 : i32
    %c0_i32_1 = arith.constant 0 : i32
    return %c0_i32, %c0_i32_0 : i32, i32
  }
  func.func @transform_3(%arg0: i32) -> (i32, i32, i32) {
    %c0_i32 = arith.constant 0 : i32
    %c0_i32_0 = arith.constant 0 : i32
    %c0_i32_1 = arith.constant 0 : i32
    %c0_i32_2 = arith.constant 0 : i32
    return %c0_i32, %c0_i32_0, %c0_i32_1 : i32, i32, i32
  }
  func.func @transform_4(%arg0: i32) -> (i32, i32) {
    %c0_i32 = arith.constant 0 : i32
    %c0_i32_0 = arith.constant 0 : i32
    %c0_i32_1 = arith.constant 0 : i32
    return %c0_i32, %c0_i32_0 : i32, i32
  }
  func.func @transform_5(%arg0: i32) -> (i32, i32) {
    %c0_i32 = arith.constant 0 : i32
    %c0_i32_0 = arith.constant 0 : i32
    return %arg0, %c0_i32 : i32, i32
  }
}

</mosaic_0001>

<bundles_post_ra>
// kernel: unet_conv_block.1
= control target key start
LH: loop header
LB: loop body
LE: loop exit
PB: predicated region body
PF: predicated region fallthrough
CT: control target
= control target key end

     0   :  { %s10332_s18 = smov 0   ;;  %s14384_s0 = inlined_call_operand.vmem [shape: f32[2,16,16,4], index: 0, kind: input, shape index: {}]   ;;  %s14385_s1 = inlined_call_operand.vmem [shape: bf16[9,4,8], index: 1, kind: input, shape index: {}]   ;;  %s14386_s2 = inlined_call_operand.vmem [shape: f32[1,8], index: 2, kind: input, shape index: {}]   ;;  %s14387_s3 = inlined_call_operand.vmem [shape: bf16[9,8,128], index: 3, kind: input, shape index: {}]   ;;  %s14388_s4 = inlined_call_operand.vmem [shape: f32[1,128], index: 4, kind: input, shape index: {}]   ;;  %s14389_s5 = inlined_call_operand.vmem [shape: f32[512,128], index: 5, kind: output, shape index: {}]  }
   0x1 LB: > { %s10338_s19 = sadd.s32 4294967295, %s10299_s18   ;;  %p9359_p0 = scmp.ge.s32.totalorder %s10299_s18, 1  ;;  %s10299_s18 = sphi %s10332_s18, %s15_s18  }
   0x2   : > { %p187_p1 = scmp.lt.s32.totalorder %s10299_s18, 3 }
   0x4   : > { %p188_p2 = pnand %p9359_p0, %p187_p1 }
   0x6   : > { %191 = sbr.rel (%p188_p2) target bundleno = 1506 (0x5e2), region = 40 }
   0xb   : > { %v885_v0 = vld [vmem:[%s14385_s1] sm:$0x3]  ;;  %vm1388_vm0 = vcmask 1041408   ;;  %p215_p3 = scmp.lt.s32.totalorder %s10338_s19, 1  ;;  %vm230_vm1 = vcmask 57344   ;;  %vm227_vm5 = vcmask 60416  }
   0xc   : > { %v1610_v1 = vsel %vm1388_vm0, %v885_v0, 0  ;;  %vm237_vm2 = vsmask.f32 256  ;;  %v263_v2 = vld [vmem:[#allocation2 + $0x60] sm:$0x1]  ;;  %vm736_vm7 = vcmask 27648  }
   0xd   : > { %10248 = vmatpush.bf16.msra.mxu3 %v1610_v1  ;;  %s216_s22 = scalar_select %p215_p3, %s10338_s19, 1  ;;  %vm10350_vm3 = vmand %vm230_vm1, %vm237_vm2  ;;  %vm293_vm4 = vsmask.f32 7938  ;;  %1619 = vmatpush.bf16.msra.mxu1 %v1610_v1  ;;  %v9364_v6 = vld [vmem:[%s14385_s1 + $0x2] sm:$0x3]  ;;  %v10301_v8 = vmov 0  }
   0xe   : > { %v264_v4 = vsel %vm10350_vm3, 0, %v263_v2  ;;  %vm10358_vm6 = vmand %vm230_vm1, %vm293_vm4  ;;  %v1390_v7 = vsel %vm1388_vm0, %v9364_v6, 0  ;;  %vm413_vm8 = vsmask.f32 4368  ;;  %228 = vst.msk [vmem:[#allocation2] sm:$0xf] %vm227_vm5, %v10301_v8 }
   0xf   : > { %s10150_s25 = sshll.u32 %s216_s22, 8  ;;  %265 = vst [vmem:[#allocation2 + $0x60] sm:$0x1] %v264_v4  ;;  %1399 = vmatpush.bf16.msra.mxu0 %v1390_v7  ;;  %10247 = vmatpush.bf16.msra.mxu2 %v1390_v7  ;;  %v319_v9 = vld [vmem:[#allocation2 + $0x68] sm:$0x1]  ;;  %vm743_vm9 = vcmask 24576   ;;  %vm10396_vm10 = vmor %vm237_vm2, %vm413_vm8 }
  0x10   : > { %s10369_s28 = scalar_lea.vmem %s14384_s0, %s10150_s25  ;;  %229 = vst.msk [vmem:[#allocation2 + $0x4] sm:$0xf] %vm227_vm5, %v10301_v8  ;;  %v320_v12 = vsel %vm10358_vm6, 0, %v319_v9  ;;  %v9477_v15 = vld [vmem:[%s14385_s1 + $0x4] sm:$0x3]  ;;  %vm10402_vm11 = vmand %vm736_vm7, %vm293_vm4  ;;  %vm1339_vm12 = vcmask 31744  }
  0x11   : > { %v363_v10 = vld [vmem:[%s10369_s28 + $0x70] sm:$0xff]  ;;  %v364_v11 = vld [vmem:[%s10369_s28 + $0x78] sm:$0xff]  ;;  %231 = vst.msk [vmem:[#allocation2 + $0x8] sm:$0x1] %vm230_vm1, %v10301_v8  ;;  %v9494_v16 = vld [vmem:[%s14385_s1 + $0x6] sm:$0x3] }
  0x12   : > { %v395_v13 = vpack.c.bf16 %v363_v10, %v363_v10  ;;  %v396_v14 = vpack.c.bf16 %v364_v11, %v364_v11  ;;  %233 = vst.msk [vmem:[#allocation2 + $0xcc] sm:$0xf] %vm227_vm5, %v10301_v8  ;;  %v1963_v17 = vsel %vm1388_vm0, %v9477_v15, 0  ;;  %v2249_v18 = vsel %vm1388_vm0, %v9494_v16, 0  ;;  %v266_v19 = vld [vmem:[#allocation2 + $0x6c] sm:$0x1]  ;;  %vm10421_vm15 = vmand %vm743_vm9, %vm237_vm2 }
  0x13   : > { %234 = vst.msk [vmem:[#allocation2 + $0xd0] sm:$0xf] %vm227_vm5, %v10301_v8  ;;  %1972 = vmatpush.bf16.msrb.mxu2 %v1963_v17  ;;  %2258 = vmatpush.bf16.msrb.mxu3 %v2249_v18  ;;  %v267_v24 = vsel %vm10350_vm3, 0, %v266_v19  ;;  %v365_v25 = vld [vmem:[%s10369_s28 + $0x80] sm:$0xff]  ;;  %v366_v26 = vld [vmem:[%s10369_s28 + $0x88] sm:$0xff]  ;;  %v367_v63 = vld [vmem:[%s10369_s28 + $0x90] sm:$0xff] }
  0x14   : > { %v535_v20 = vshrl.u32 %v395_v13, 16  ;;  %v538_v21 = vshll.u32 %v395_v13, 16  ;;  %v543_v22 = vshrl.u32 %v396_v14, 16  ;;  %v546_v23 = vshll.u32 %v396_v14, 16  ;;  %235 = vst.msk [vmem:[#allocation2 + $0xd4] sm:$0x1] %vm230_vm1, %v10301_v8 }
  0x15   : > { %v349_v27 = vld [vmem:[%s10369_s28] sm:$0xff]  ;;  %321 = vst [vmem:[#allocation2 + $0x68] sm:$0x1] %v320_v12  ;;  %v397_v32 = vpack.c.bf16 %v365_v25, %v365_v25  ;;  %v398_v35 = vpack.c.bf16 %v366_v26, %v366_v26  ;;  %v242_v36 = vld [vmem:[#allocation2 + $0xc] sm:$0x1]  ;;  %v368_v15 = vld [vmem:[%s10369_s28 + $0x98] sm:$0xff]  ;;  %v10446_v16 = vpack.c.bf16 %v367_v63, %v367_v63 }
  0x16   : > { %v537_v29 = vrot.slane %v535_v20, 7  ;;  %v545_v30 = vrot.slane %v543_v22, 7  ;;  %v790_v31 = vld [vmem:[#allocation2 + $0x60] sm:$0xf]  ;;  %268 = vst [vmem:[#allocation2 + $0x6c] sm:$0x1] %v267_v24  ;;  %v10406_v37 = vpack.c.bf16 %v349_v27, %v349_v27 }
  0x17   : > { %v239_v34 = vld [vmem:[#allocation2] sm:$0x1]  ;;  %v854_v42 = vld [vmem:[#allocation2 + $0x4] sm:$0xf]  ;;  %v298_v43 = vld [vmem:[#allocation2 + $0x14] sm:$0x1] }
  0x18   : > { %v540_v38 = vor.u32 %v538_v21, %v537_v29  ;;  %v541_v39 = vrot.slane %v537_v29, 4  ;;  %v548_v40 = vor.u32 %v546_v23, %v545_v30  ;;  %v550_v41 = vrot.slane %v545_v30, 4  ;;  %v295_v45 = vld [vmem:[#allocation2 + $0x8] sm:$0x1]  ;;  %v322_v14 = vld [vmem:[#allocation2 + $0x74] sm:$0x1] }
  0x19   : > { %v240_v44 = vsel %vm10350_vm3, 0, %v239_v34  ;;  %v915_v46 = vshll.u32 %v854_v42, 16  ;;  %v919_v47 = vshrl.u32 %v854_v42, 16  ;;  %v552_v48 = vshrl.u32 %v397_v32, 16  ;;  %v350_v53 = vld [vmem:[%s10369_s28 + $0x8] sm:$0xff]  ;;  %s9362_s21 = sshll.u32 %s10338_s19, 5 }
  0x1a   : > { %v549_v49 = vsel %vm10396_vm10, %v541_v39, %v548_v40  ;;  %v791_v50 = vsel %vm10402_vm11, %v540_v38, %v790_v31  ;;  %241 = vst [vmem:[#allocation2] sm:$0x1] %v240_v44  ;;  %v296_v51 = vsel %vm10358_vm6, 0, %v295_v45  ;;  %v555_v52 = vshll.u32 %v397_v32, 16  ;;  %p221_p4 = scmp.lt.s32.totalorder %s9362_s21, 63 }
  0x1b   : > { %792 = vst [vmem:[#allocation2 + $0x60] sm:$0xf] %v791_v50  ;;  %vm902_vm13 = vsmask.f32 3328  ;;  %vm903_vm14 = vsmask.f32 7440  ;;  %v10430_v62 = vpack.c.bf16 %v350_v53, %v350_v53  ;;  %v10456_v29 = vpack.c.bf16 %v368_v15, %v368_v15 }
  0x1c   : > { %v10417_v54 = vrot.slane %v915_v46, 5  ;;  %v921_v55 = vrot.slane %v919_v47, 4  ;;  %v554_v57 = vrot.slane %v552_v48, 7  ;;  %v560_v58 = vshrl.u32 %v398_v35, 16  ;;  %793 = vst.msk [vmem:[#allocation2 + $0x64] sm:$0xf] %vm736_vm7, %v549_v49  ;;  %vm10463_vm1 = vmor %vm902_vm13, %vm903_vm14 }
  0x1d   : > { %v563_v59 = vshll.u32 %v398_v35, 16  ;;  %v243_v60 = vsel %vm10350_vm3, 0, %v242_v36  ;;  %v299_v61 = vsel %vm10358_vm6, 0, %v298_v43  ;;  %297 = vst [vmem:[#allocation2 + $0x8] sm:$0x1] %v296_v51  ;;  %v416_v9 = vshrl.u32 %v10406_v37, 16 }
  0x1e   : > { %v922_v0 = vor.u32 %v921_v55, %v10417_v54  ;;  %v794_v1 = vld [vmem:[#allocation2 + $0x68] sm:$0x1]  ;;  %v557_v2 = vor.u32 %v555_v52, %v554_v57  ;;  %v558_v4 = vrot.slane %v554_v57, 4  ;;  %v10434_v6 = vrot.slane %v560_v58, 7  ;;  %v797_v8 = vld [vmem:[#allocation2 + $0x6c] sm:$0xf] }
  0x1f   : > { %v795_v7 = vsel %vm10421_vm15, %v550_v41, %v794_v1  ;;  %244 = vst [vmem:[#allocation2 + $0xc] sm:$0x1] %v243_v60  ;;  %v419_v10 = vshll.u32 %v10406_v37, 16  ;;  %v418_v18 = vrot.slane %v416_v9, 7  ;;  %v424_v19 = vshrl.u32 %v10430_v62, 16  ;;  %s14651_s21 = smov (!%p221_p4, %s9362_s21), 63 }
  0x20   : > { %v10440_v11 = vrot.slane %v922_v0, 4  ;;  %796 = vst [vmem:[#allocation2 + $0x68] sm:$0x1] %v795_v7  ;;  %v565_v12 = vor.u32 %v563_v59, %v10434_v6  ;;  %v798_v13 = vsel %vm10402_vm11, %v557_v2, %v797_v8  ;;  %v567_v17 = vrot.slane %v10434_v6, 4  ;;  %v9575_v59 = vld [vmem:[%s14385_s1 + $0x8] sm:$0x3] }
  0x21   : > { %799 = vst [vmem:[#allocation2 + $0x6c] sm:$0xf] %v798_v13  ;;  %v427_v20 = vshll.u32 %v10430_v62, 16  ;;  %v853_v21 = vld [vmem:[#allocation2] sm:$0xf]  ;;  %v323_v24 = vsel %vm10358_vm6, 0, %v322_v14  ;;  %v421_v35 = vor.u32 %v419_v10, %v418_v18 }
  0x22   : > { %v10151_v22 = vld [vmem:[#allocation2] sm:$0xff]  ;;  %v566_v23 = vsel %vm10396_vm10, %v558_v4, %v565_v12  ;;  %300 = vst [vmem:[#allocation2 + $0x14] sm:$0x1] %v299_v61  ;;  %v906_v25 = vshrl.u32 %v853_v21, 16  ;;  %v909_v26 = vshll.u32 %v853_v21, 16  ;;  %v569_v36 = vshrl.u32 %v10446_v16, 16 }
  0x23   : > { %v869_v27 = vld [vmem:[#allocation2 + $0x60] sm:$0xf]  ;;  %800 = vst.msk [vmem:[#allocation2 + $0x70] sm:$0xf] %vm736_vm7, %v566_v23  ;;  %v870_v31 = vld [vmem:[#allocation2 + $0x64] sm:$0xf]  ;;  %9445 = vmatmul.msk.bf16.vlgmr.msra.gmra.mxu1 %vm1339_vm12, %v10151_v22 }
  0x24   : > { %v10159_v30 = vld [vmem:[#allocation2 + $0x60] sm:$0xff]  ;;  %v1098_v32 = vshrl.u32 %v869_v27, 16  ;;  %v1101_v34 = vshll.u32 %v869_v27, 16  ;;  %v886_v37 = vld [vmem:[#allocation2 + $0x8] sm:$0x1]  ;;  %v908_v38 = vrot.slane %v906_v25, 4 }
  0x25   : > { %v911_v39 = vrot.slane %v909_v26, 5  ;;  %v1107_v40 = vshll.u32 %v870_v31, 16  ;;  %v1111_v41 = vshrl.u32 %v870_v31, 16  ;;  %9453 = vmatmul.msk.bf16.vlgmr.msra.gmra.mxu3 %vm1339_vm12, %v10159_v30  ;;  %v925_v42 = vshll.u32 %v886_v37, 16  ;;  %324 = vst [vmem:[#allocation2 + $0x74] sm:$0x1] %v323_v24 }
  0x26   : > { %v1100_v43 = vrot.slane %v1098_v32, 4  ;;  %v1103_v44 = vrot.slane %v1101_v34, 5  ;;  %v422_v45 = vrot.slane %v418_v18, 4  ;;  %v738_v46 = vld [vmem:[#allocation2 + $0xc] sm:$0xf]  ;;  %v426_v52 = vrot.slane %v424_v19, 7 }
  0x27   : > { %v912_v48 = vor.u32 %v911_v39, %v908_v38  ;;  %v894_v49 = vld [vmem:[#allocation2 + $0x68] sm:$0x1]  ;;  %v1109_v50 = vrot.slane %v1107_v40, 5  ;;  %v1113_v51 = vrot.slane %v1111_v41, 4  ;;  %v927_v53 = vrot.slane %v925_v42, 5  ;;  %v351_v30 = vld [vmem:[%s10369_s28 + $0x10] sm:$0xff] }
  0x28   : > { %v1104_v55 = vor.u32 %v1103_v44, %v1100_v43  ;;  %v1117_v57 = vshll.u32 %v894_v49, 16  ;;  %v739_v58 = vsel %vm10402_vm11, %v421_v35, %v738_v46  ;;  %v429_v62 = vor.u32 %v427_v20, %v426_v52  ;;  %v871_v8 = vld [vmem:[#allocation2 + $0x6c] sm:$0xf]  ;;  %v269_v20 = vld [vmem:[#allocation2 + $0x78] sm:$0x1]  ;;  %s9363_s24 = sshll.u32 %s14651_s21, 3 }
  0x29   : > { %v913_v60 = vrot.slane %v912_v48, 4  ;;  %v1114_v61 = vor.u32 %v1113_v51, %v1109_v50  ;;  %v431_v63 = vrot.slane %v426_v52, 4  ;;  %740 = vst [vmem:[#allocation2 + $0xc] sm:$0xf] %v739_v58  ;;  %v745_v0 = vld [vmem:[#allocation2 + $0x14] sm:$0x1]  ;;  %v928_v1 = vsel %vm10463_vm1, %v10440_v11, %v927_v53  ;;  %s14259_s26 = scalar_lea.vmem %s14389_s5, %s9363_s24 }
  0x2a   : > { %v1105_v2 = vrot.slane %v1104_v55, 4  ;;  %v1119_v4 = vrot.slane %v1117_v57, 5  ;;  %v2903_v7 = vsel %vm1388_vm0, %v9575_v59, 0  ;;  %v1292_v10 = vunpack.c.l.b16 %v928_v1  ;;  %v872_v14 = vld [vmem:[#allocation2 + $0x70] sm:$0xf] }
  0x2b   : > { %v918_v9 = vsel %vm10463_vm1, %v913_v60, %v10417_v54  ;;  %v1115_v12 = vrot.slane %v1114_v61, 4  ;;  %v430_v13 = vsel %vm10396_vm10, %v422_v45, %v429_v62  ;;  %2912 = vmatpush.bf16.msrb.mxu0 %v2903_v7  ;;  %v746_v18 = vsel %vm10421_vm15, %v431_v63, %v745_v0  ;;  %v10160_v43 = vld [vmem:[#allocation2 + $0x6c] sm:$0xff]  ;;  %v245_v51 = vld [vmem:[#allocation2 + $0x18] sm:$0x1] }
  0x2c   : > { %v1291_v15 = vunpack.c.l.b16 %v918_v9  ;;  %v1110_v11 = vsel %vm10463_vm1, %v1105_v2, %v1109_v50  ;;  %742 = vst.msk [vmem:[#allocation2 + $0x10] sm:$0xf] %vm736_vm7, %v430_v13  ;;  %v1122_v19 = vshrl.u32 %v871_v8, 16  ;;  %v1125_v22 = vshll.u32 %v871_v8, 16  ;;  %v801_v31 = vld [vmem:[#allocation2 + $0x74] sm:$0x1] }
  0x2d   : > { %v1120_v54 = vsel %vm10463_vm1, %v1115_v12, %v1119_v4  ;;  %v1307_v21 = vunpack.c.l.b16 %v1110_v11  ;;  %747 = vst [vmem:[#allocation2 + $0x14] sm:$0x1] %v746_v18  ;;  %v1131_v23 = vshll.u32 %v872_v14, 16  ;;  %v1135_v27 = vshrl.u32 %v872_v14, 16  ;;  %v352_v4 = vld [vmem:[%s10369_s28 + $0x18] sm:$0xff] }
  0x2e   : > { %v1323_v24 = vpack.c.b16 %v1292_v10, %v1291_v15  ;;  %v1308_v25 = vunpack.c.l.b16 %v1120_v54  ;;  %v1124_v26 = vrot.slane %v1122_v19, 4  ;;  %v1127_v32 = vrot.slane %v1125_v22, 5  ;;  %v325_v12 = vld [vmem:[#allocation2 + $0x80] sm:$0x1]  ;;  %v272_v13 = vld [vmem:[#allocation2 + $0x84] sm:$0x1] }
  0x2f   : > { %v1133_v34 = vrot.slane %v1131_v23, 5  ;;  %v270_v35 = vsel %vm10350_vm3, 0, %v269_v20  ;;  %v571_v37 = vrot.slane %v569_v36, 7  ;;  %v802_v40 = vsel %vm10421_vm15, %v567_v17, %v801_v31  ;;  %v301_v17 = vld [vmem:[#allocation2 + $0x20] sm:$0x1]  ;;  %v370_v31 = vld [vmem:[%s10369_s28 + $0xa8] sm:$0xff] }
  0x30   : > { %9365 = vmatmul.msk.bf16.vlgmr.msra.gmra.mxu0 %vm1339_vm12, %v1323_v24  ;;  %v1331_v38 = vpack.c.b16 %v1308_v25, %v1307_v21  ;;  %v855_v39 = vld [vmem:[#allocation2 + $0xc] sm:$0xf]  ;;  %v1137_v41 = vrot.slane %v1135_v27, 4  ;;  %271 = vst [vmem:[#allocation2 + $0x78] sm:$0x1] %v270_v35  ;;  %v572_v42 = vshll.u32 %v10446_v16, 16  ;;  %v1128_v46 = vor.u32 %v1127_v32, %v1124_v26 }
  0x31   : > { %v930_v44 = vshrl.u32 %v855_v39, 16  ;;  %v933_v45 = vshll.u32 %v855_v39, 16  ;;  %803 = vst [vmem:[#allocation2 + $0x74] sm:$0x1] %v802_v40  ;;  %v575_v48 = vrot.slane %v571_v37, 4  ;;  %v577_v50 = vshrl.u32 %v10456_v29, 16 }
  0x32   : > { %9373 = vmatmul.msk.bf16.vlgmr.msra.gmra.mxu2 %vm1339_vm12, %v1331_v38  ;;  %v1138_v36 = vor.u32 %v1137_v41, %v1133_v34  ;;  %v574_v49 = vor.u32 %v572_v42, %v571_v37  ;;  %v580_v6 = vshll.u32 %v10456_v29, 16  ;;  %v1129_v55 = vrot.slane %v1128_v46, 4  ;;  %v369_v24 = vld [vmem:[%s10369_s28 + $0xa0] sm:$0xff] }
  0x33   : > { %v856_v52 = vld [vmem:[#allocation2 + $0x10] sm:$0xf]  ;;  %v932_v53 = vrot.slane %v930_v44, 4  ;;  %v935_v16 = vrot.slane %v933_v45, 5  ;;  %v383_v58 = vpack.c.bf16 %v351_v30, %v351_v30  ;;  %v10500_v63 = vrot.slane %v577_v50, 7 }
  0x34   : > { %v10152_v57 = vld [vmem:[#allocation2 + $0xc] sm:$0xff]  ;;  %v887_v59 = vld [vmem:[#allocation2 + $0x14] sm:$0x1]  ;;  %v939_v60 = vshll.u32 %v856_v52, 16  ;;  %v943_v61 = vshrl.u32 %v856_v52, 16  ;;  %v1139_v62 = vrot.slane %v1138_v36, 4  ;;  %v1134_v29 = vsel %vm10463_vm1, %v1129_v55, %v1133_v34 }
  0x35   : > { %v936_v0 = vor.u32 %v935_v16, %v932_v53  ;;  %v949_v1 = vshll.u32 %v887_v59, 16  ;;  %9446 = vmatmul.msk.bf16.gmra.mxu1 %vm1339_vm12, %v10152_v57  ;;  %v246_v2 = vsel %vm10350_vm3, 0, %v245_v51  ;;  %9454 = vmatmul.msk.bf16.gmra.mxu3 %vm1339_vm12, %v10160_v43  ;;  %v10509_v9 = vunpack.c.l.b16 %v1134_v29  ;;  %v353_v53 = vld [vmem:[%s10369_s28 + $0x20] sm:$0xff]  ;;  %v354_v16 = vld [vmem:[%s10369_s28 + $0x28] sm:$0xff] }
  0x36   : > { %v941_v7 = vrot.slane %v939_v60, 5  ;;  %v945_v8 = vrot.slane %v943_v61, 4  ;;  %v582_v10 = vor.u32 %v580_v6, %v10500_v63  ;;  %247 = vst [vmem:[#allocation2 + $0x18] sm:$0x1] %v246_v2  ;;  %v584_v11 = vrot.slane %v10500_v63, 4 }
  0x37   : > { %v937_v14 = vrot.slane %v936_v0, 4  ;;  %v951_v15 = vrot.slane %v949_v1, 5  ;;  %v804_v18 = vld [vmem:[#allocation2 + $0x78] sm:$0xf]  ;;  %v302_v19 = vsel %vm10358_vm6, 0, %v301_v17  ;;  %v384_v23 = vpack.c.bf16 %v352_v4, %v352_v4 }
  0x38   : > { %v946_v20 = vor.u32 %v945_v8, %v941_v7  ;;  %v895_v54 = vld [vmem:[#allocation2 + $0x74] sm:$0x1]  ;;  %v583_v21 = vsel %vm10396_vm10, %v575_v48, %v582_v10  ;;  %v805_v22 = vsel %vm10402_vm11, %v574_v49, %v804_v18  ;;  %303 = vst [vmem:[#allocation2 + $0x20] sm:$0x1] %v302_v19  ;;  %v433_v27 = vshrl.u32 %v383_v58, 16 }
  0x39   : > { %v942_v25 = vsel %vm10463_vm1, %v937_v14, %v941_v7  ;;  %v1141_v26 = vshll.u32 %v895_v54, 16  ;;  %806 = vst [vmem:[#allocation2 + $0x78] sm:$0xf] %v805_v22  ;;  %v436_v30 = vshll.u32 %v383_v58, 16  ;;  %v441_v35 = vshrl.u32 %v384_v23, 16 }
  0x3a   : > { %v947_v32 = vrot.slane %v946_v20, 4  ;;  %v1293_v34 = vunpack.c.l.b16 %v942_v25  ;;  %807 = vst.msk [vmem:[#allocation2 + $0x7c] sm:$0xf] %vm736_vm7, %v583_v21  ;;  %v444_v37 = vshll.u32 %v384_v23, 16  ;;  %v435_v39 = vrot.slane %v433_v27, 7 }
  0x3b   : > { %v1143_v38 = vrot.slane %v1141_v26, 5  ;;  %v326_v40 = vsel %vm10358_vm6, 0, %v325_v12  ;;  %v273_v41 = vsel %vm10350_vm3, 0, %v272_v13  ;;  %v443_v43 = vrot.slane %v441_v35, 7  ;;  %v248_v2 = vld [vmem:[#allocation2 + $0x24] sm:$0x1] }
  0x3c   : > { %v952_v42 = vsel %vm10463_vm1, %v947_v32, %v951_v15  ;;  %327 = vst [vmem:[#allocation2 + $0x80] sm:$0x1] %v326_v40  ;;  %v401_v44 = vpack.c.bf16 %v369_v24, %v369_v24  ;;  %v402_v45 = vpack.c.bf16 %v370_v31, %v370_v31  ;;  %v438_v36 = vor.u32 %v436_v30, %v435_v39  ;;  %v304_v8 = vld [vmem:[#allocation2 + $0x2c] sm:$0x1]  ;;  %v371_v30 = vld [vmem:[%s10369_s28 + $0xb0] sm:$0xff] }
  0x3d   : > { %v1294_v46 = vunpack.c.l.b16 %v952_v42  ;;  %v1144_v48 = vsel %vm10463_vm1, %v1139_v62, %v1143_v38  ;;  %v439_v49 = vrot.slane %v435_v39, 4  ;;  %v748_v50 = vld [vmem:[#allocation2 + $0x18] sm:$0xf]  ;;  %274 = vst [vmem:[#allocation2 + $0x84] sm:$0x1] %v273_v41  ;;  %v446_v51 = vor.u32 %v444_v37, %v443_v43  ;;  %v355_v40 = vld [vmem:[%s10369_s28 + $0x30] sm:$0xff] }
  0x3e   : > { %v1310_v6 = vunpack.c.l.b16 %v1144_v48  ;;  %v448_v17 = vrot.slane %v443_v43, 4  ;;  %v586_v52 = vshrl.u32 %v401_v44, 16  ;;  %v749_v57 = vsel %vm10402_vm11, %v438_v36, %v748_v50  ;;  %v372_v39 = vld [vmem:[%s10369_s28 + $0xb8] sm:$0xff] }
  0x3f   : > { %v1324_v55 = vpack.c.b16 %v1294_v46, %v1293_v34  ;;  %v752_v58 = vld [vmem:[#allocation2 + $0x20] sm:$0x1]  ;;  %v589_v59 = vshll.u32 %v401_v44, 16  ;;  %v594_v60 = vshrl.u32 %v402_v45, 16  ;;  %v447_v62 = vsel %vm10396_vm10, %v439_v49, %v446_v51  ;;  %750 = vst [vmem:[#allocation2 + $0x18] sm:$0xf] %v749_v57 }
  0x40   : > { %v1332_v61 = vpack.c.b16 %v1310_v6, %v10509_v9  ;;  %v753_v0 = vsel %vm10421_vm15, %v448_v17, %v752_v58  ;;  %v873_v1 = vld [vmem:[#allocation2 + $0x78] sm:$0xf]  ;;  %v588_v29 = vrot.slane %v586_v52, 7  ;;  %751 = vst.msk [vmem:[#allocation2 + $0x1c] sm:$0xf] %vm736_vm7, %v447_v62  ;;  %v10543_v10 = vpack.c.bf16 %v353_v53, %v353_v53 }
  0x41   : > { %9366 = vmatmul.msk.bf16.gmra.mxu0 %vm1339_vm12, %v1324_v55  ;;  %v874_v4 = vld [vmem:[#allocation2 + $0x7c] sm:$0xf]  ;;  %v1146_v7 = vshrl.u32 %v873_v1, 16  ;;  %v10545_v9 = vpack.c.bf16 %v354_v16, %v354_v16  ;;  %754 = vst [vmem:[#allocation2 + $0x20] sm:$0x1] %v753_v0  ;;  %v1149_v13 = vshll.u32 %v873_v1, 16  ;;  %v10573_v55 = vpack.c.bf16 %v372_v39, %v372_v39 }
  0x42   : > { %9374 = vmatmul.msk.bf16.gmra.mxu2 %vm1339_vm12, %v1332_v61  ;;  %v10161_v12 = vld [vmem:[#allocation2 + $0x78] sm:$0xff]  ;;  %v1155_v14 = vshll.u32 %v874_v4, 16  ;;  %v1159_v15 = vshrl.u32 %v874_v4, 16  ;;  %v591_v18 = vor.u32 %v589_v59, %v588_v29  ;;  %v592_v54 = vrot.slane %v588_v29, 4  ;;  %v328_v6 = vld [vmem:[#allocation2 + $0x8c] sm:$0x1] }
  0x43   : > { %v808_v19 = vld [vmem:[#allocation2 + $0x80] sm:$0x1]  ;;  %v1148_v20 = vrot.slane %v1146_v7, 4  ;;  %v10548_v21 = vrot.slane %v594_v60, 7  ;;  %v597_v22 = vshll.u32 %v402_v45, 16  ;;  %v1151_v24 = vrot.slane %v1149_v13, 5 }
  0x44   : > { %v809_v23 = vsel %vm10421_vm15, %v584_v11, %v808_v19  ;;  %v1157_v25 = vrot.slane %v1155_v14, 5  ;;  %v1161_v26 = vrot.slane %v1159_v15, 4  ;;  %v811_v27 = vld [vmem:[#allocation2 + $0x84] sm:$0xf]  ;;  %v249_v63 = vsel %vm10350_vm3, 0, %v248_v2  ;;  %v356_v60 = vld [vmem:[%s10369_s28 + $0x38] sm:$0xff] }
  0x45   : > { %810 = vst [vmem:[#allocation2 + $0x80] sm:$0x1] %v809_v23  ;;  %v599_v31 = vor.u32 %v597_v22, %v10548_v21  ;;  %v601_v32 = vrot.slane %v10548_v21, 4  ;;  %v812_v34 = vsel %vm10402_vm11, %v591_v18, %v811_v27  ;;  %9455 = vmatmul.msk.bf16.gmra.mxu3 %vm1339_vm12, %v10161_v12  ;;  %v1152_v11 = vor.u32 %v1151_v24, %v1148_v20  ;;  %v275_v2 = vld [vmem:[#allocation2 + $0x90] sm:$0x1] }
  0x46   : > { %v1162_v35 = vor.u32 %v1161_v26, %v1157_v25  ;;  %813 = vst [vmem:[#allocation2 + $0x84] sm:$0xf] %v812_v34  ;;  %v305_v37 = vsel %vm10358_vm6, 0, %v304_v8  ;;  %v450_v38 = vshrl.u32 %v10543_v10, 16  ;;  %v857_v41 = vld [vmem:[#allocation2 + $0x18] sm:$0xf]  ;;  %v10571_v45 = vpack.c.bf16 %v371_v30, %v371_v30 }
  0x47   : > { %v600_v42 = vsel %vm10396_vm10, %v592_v54, %v599_v31  ;;  %250 = vst [vmem:[#allocation2 + $0x24] sm:$0x1] %v249_v63  ;;  %v453_v43 = vshll.u32 %v10543_v10, 16  ;;  %v458_v44 = vshrl.u32 %v10545_v9, 16  ;;  %v858_v46 = vld [vmem:[#allocation2 + $0x1c] sm:$0xf]  ;;  %v10577_v61 = vpack.c.bf16 %v355_v40, %v355_v40 }
  0x48   : > { %v954_v48 = vshrl.u32 %v857_v41, 16  ;;  %v957_v36 = vshll.u32 %v857_v41, 16  ;;  %v1153_v49 = vrot.slane %v1152_v11, 4  ;;  %v1163_v50 = vrot.slane %v1162_v35, 4  ;;  %v888_v51 = vld [vmem:[#allocation2 + $0x20] sm:$0x1] }
  0x49   : > { %v963_v17 = vshll.u32 %v858_v46, 16  ;;  %v967_v52 = vshrl.u32 %v858_v46, 16  ;;  %v10153_v53 = vld [vmem:[#allocation2 + $0x18] sm:$0xff]  ;;  %v452_v16 = vrot.slane %v450_v38, 7  ;;  %v973_v59 = vshll.u32 %v888_v51, 16 }
  0x4a   : > { %v956_v57 = vrot.slane %v954_v48, 4  ;;  %v959_v58 = vrot.slane %v957_v36, 5  ;;  %814 = vst.msk [vmem:[#allocation2 + $0x88] sm:$0xf] %vm736_vm7, %v600_v42  ;;  %v1158_v1 = vsel %vm10463_vm1, %v1153_v49, %v1157_v25  ;;  %9447 = vmatmul.msk.bf16.gmra.mxu1 %vm1339_vm12, %v10153_v53  ;;  %v460_v12 = vrot.slane %v458_v44, 7 }
  0x4b   : > { %v965_v62 = vrot.slane %v963_v17, 5  ;;  %v969_v0 = vrot.slane %v967_v52, 4  ;;  %306 = vst [vmem:[#allocation2 + $0x2c] sm:$0x1] %v305_v37  ;;  %v455_v29 = vor.u32 %v453_v43, %v452_v16  ;;  %v975_v7 = vrot.slane %v973_v59, 5 }
  0x4c   : > { %v960_v4 = vor.u32 %v959_v58, %v956_v57  ;;  %v896_v8 = vld [vmem:[#allocation2 + $0x80] sm:$0x1]  ;;  %v456_v10 = vrot.slane %v452_v16, 4  ;;  %v461_v15 = vshll.u32 %v10545_v9, 16  ;;  %v329_v18 = vsel %vm10358_vm6, 0, %v328_v6 }
  0x4d   : > { %v970_v13 = vor.u32 %v969_v0, %v965_v62  ;;  %v1165_v14 = vshll.u32 %v896_v8, 16  ;;  %v875_v19 = vld [vmem:[#allocation2 + $0x84] sm:$0xf]  ;;  %v1311_v54 = vunpack.c.l.b16 %v1158_v1  ;;  %v465_v22 = vrot.slane %v460_v12, 4  ;;  %330 = vst [vmem:[#allocation2 + $0x8c] sm:$0x1] %v329_v18 }
  0x4e   : > { %v961_v20 = vrot.slane %v960_v4, 4  ;;  %v755_v23 = vld [vmem:[#allocation2 + $0x24] sm:$0xf]  ;;  %v10585_v24 = vpack.c.bf16 %v356_v60, %v356_v60  ;;  %v463_v27 = vor.u32 %v461_v15, %v460_v12  ;;  %v1170_v31 = vshrl.u32 %v875_v19, 16  ;;  %v251_v6 = vld [vmem:[#allocation2 + $0x30] sm:$0x1] }
  0x4f   : > { %v971_v25 = vrot.slane %v970_v13, 4  ;;  %v1167_v26 = vrot.slane %v1165_v14, 5  ;;  %v756_v30 = vsel %vm10402_vm11, %v455_v29, %v755_v23  ;;  %v1173_v34 = vshll.u32 %v875_v19, 16  ;;  %v373_v16 = vld [vmem:[%s10369_s28 + $0xc0] sm:$0xff] }
  0x50   : > { %v966_v9 = vsel %vm10463_vm1, %v961_v20, %v965_v62  ;;  %757 = vst [vmem:[#allocation2 + $0x24] sm:$0xf] %v756_v30  ;;  %v276_v63 = vsel %vm10350_vm3, 0, %v275_v2  ;;  %v464_v38 = vsel %vm10396_vm10, %v456_v10, %v463_v27  ;;  %v1172_v43 = vrot.slane %v1170_v31, 4  ;;  %v307_v2 = vld [vmem:[#allocation2 + $0x38] sm:$0x1] }
  0x51   : > { %v976_v11 = vsel %vm10463_vm1, %v971_v25, %v975_v7  ;;  %v1295_v35 = vunpack.c.l.b16 %v966_v9  ;;  %v1168_v37 = vsel %vm10463_vm1, %v1163_v50, %v1167_v26  ;;  %v876_v39 = vld [vmem:[#allocation2 + $0x88] sm:$0xf]  ;;  %277 = vst [vmem:[#allocation2 + $0x90] sm:$0x1] %v276_v63  ;;  %v1175_v44 = vrot.slane %v1173_v34, 5 }
  0x52   : > { %v1296_v40 = vunpack.c.l.b16 %v976_v11  ;;  %v1312_v41 = vunpack.c.l.b16 %v1168_v37  ;;  %758 = vst.msk [vmem:[#allocation2 + $0x28] sm:$0xf] %vm736_vm7, %v464_v38  ;;  %v759_v42 = vld [vmem:[#allocation2 + $0x2c] sm:$0x1]  ;;  %v10162_v46 = vld [vmem:[#allocation2 + $0x84] sm:$0xff]  ;;  %v1179_v36 = vshll.u32 %v876_v39, 16 }
  0x53   : > { %v760_v48 = vsel %vm10421_vm15, %v465_v22, %v759_v42  ;;  %v1183_v49 = vshrl.u32 %v876_v39, 16  ;;  %v603_v50 = vshrl.u32 %v10571_v45, 16  ;;  %v1176_v52 = vor.u32 %v1175_v44, %v1172_v43  ;;  %v331_v11 = vld [vmem:[#allocation2 + $0x98] sm:$0x1]  ;;  %v374_v37 = vld [vmem:[%s10369_s28 + $0xc8] sm:$0xff] }
  0x54   : > { %v1325_v51 = vpack.c.b16 %v1296_v40, %v1295_v35  ;;  %v1333_v17 = vpack.c.b16 %v1312_v41, %v1311_v54  ;;  %761 = vst [vmem:[#allocation2 + $0x2c] sm:$0x1] %v760_v48  ;;  %v606_v53 = vshll.u32 %v10571_v45, 16  ;;  %v815_v57 = vld [vmem:[#allocation2 + $0x8c] sm:$0x1]  ;;  %v1181_v58 = vrot.slane %v1179_v36, 5 }
  0x55   : > { %v1185_v59 = vrot.slane %v1183_v49, 4  ;;  %v605_v60 = vrot.slane %v603_v50, 7  ;;  %v611_v62 = vshrl.u32 %v10573_v55, 16  ;;  %v816_v0 = vsel %vm10421_vm15, %v601_v32, %v815_v57  ;;  %9456 = vmatmul.msk.bf16.gmra.mxu3 %vm1339_vm12, %v10162_v46  ;;  %v278_v35 = vld [vmem:[#allocation2 + $0x9c] sm:$0x1] }
  0x56   : > { %9367 = vmatmul.msk.bf16.gmra.mxu0 %vm1339_vm12, %v1325_v51  ;;  %9375 = vmatmul.msk.bf16.gmra.mxu2 %vm1339_vm12, %v1333_v17  ;;  %v1177_v1 = vrot.slane %v1176_v52, 4  ;;  %v614_v29 = vshll.u32 %v10573_v55, 16  ;;  %v252_v45 = vsel %vm10350_vm3, 0, %v251_v6  ;;  %817 = vst [vmem:[#allocation2 + $0x8c] sm:$0x1] %v816_v0  ;;  %v10620_v55 = vpack.c.bf16 %v373_v16, %v373_v16 }
  0x57   : > { %v859_v4 = vld [vmem:[#allocation2 + $0x24] sm:$0xf]  ;;  %v1186_v7 = vor.u32 %v1185_v59, %v1181_v58  ;;  %v608_v8 = vor.u32 %v606_v53, %v605_v60  ;;  %v609_v10 = vrot.slane %v605_v60, 4  ;;  %v10616_v12 = vrot.slane %v611_v62, 7  ;;  %253 = vst [vmem:[#allocation2 + $0x30] sm:$0x1] %v252_v45 }
  0x58   : > { %v978_v21 = vshrl.u32 %v859_v4, 16  ;;  %v981_v13 = vshll.u32 %v859_v4, 16  ;;  %v1182_v32 = vsel %vm10463_vm1, %v1177_v1, %v1181_v58  ;;  %v818_v14 = vld [vmem:[#allocation2 + $0x90] sm:$0xf]  ;;  %v308_v34 = vsel %vm10358_vm6, 0, %v307_v2  ;;  %v357_v1 = vld [vmem:[%s10369_s28 + $0x40] sm:$0xff] }
  0x59   : > { %v860_v15 = vld [vmem:[#allocation2 + $0x28] sm:$0xf]  ;;  %v1187_v18 = vrot.slane %v1186_v7, 4  ;;  %v10622_v19 = vunpack.c.l.b16 %v1182_v32  ;;  %v616_v54 = vor.u32 %v614_v29, %v10616_v12  ;;  %v618_v22 = vrot.slane %v10616_v12, 4  ;;  %309 = vst [vmem:[#allocation2 + $0x38] sm:$0x1] %v308_v34 }
  0x5a   : > { %v10154_v20 = vld [vmem:[#allocation2 + $0x24] sm:$0xff]  ;;  %v980_v23 = vrot.slane %v978_v21, 4  ;;  %v983_v25 = vrot.slane %v981_v13, 5  ;;  %v987_v26 = vshll.u32 %v860_v15, 16  ;;  %v991_v27 = vshrl.u32 %v860_v15, 16 }
  0x5b   : > { %v889_v30 = vld [vmem:[#allocation2 + $0x2c] sm:$0x1]  ;;  %9448 = vmatmul.msk.bf16.gmra.mxu1 %vm1339_vm12, %v10154_v20  ;;  %v617_v9 = vsel %vm10396_vm10, %v609_v10, %v616_v54  ;;  %v819_v31 = vsel %vm10402_vm11, %v608_v8, %v818_v14  ;;  %v467_v63 = vshrl.u32 %v10577_v61, 16  ;;  %v470_v43 = vshll.u32 %v10577_v61, 16  ;;  %v254_v32 = vld [vmem:[#allocation2 + $0x3c] sm:$0x1] }
  0x5c   : > { %v984_v38 = vor.u32 %v983_v25, %v980_v23  ;;  %v989_v39 = vrot.slane %v987_v26, 5  ;;  %v993_v40 = vrot.slane %v991_v27, 4  ;;  %v997_v41 = vshll.u32 %v889_v30, 16  ;;  %820 = vst [vmem:[#allocation2 + $0x90] sm:$0xf] %v819_v31 }
  0x5d   : > { %821 = vst.msk [vmem:[#allocation2 + $0x94] sm:$0xf] %vm736_vm7, %v617_v9  ;;  %v469_v42 = vrot.slane %v467_v63, 7  ;;  %v475_v44 = vshrl.u32 %v10585_v24, 16  ;;  %v478_v46 = vshll.u32 %v10585_v24, 16  ;;  %v10639_v6 = vpack.c.bf16 %v374_v37, %v374_v37 }
  0x5e   : > { %v985_v48 = vrot.slane %v984_v38, 4  ;;  %v994_v36 = vor.u32 %v993_v40, %v989_v39  ;;  %v999_v49 = vrot.slane %v997_v41, 5  ;;  %v897_v50 = vld [vmem:[#allocation2 + $0x8c] sm:$0x1]  ;;  %v762_v16 = vld [vmem:[#allocation2 + $0x30] sm:$0xf] }
  0x5f   : > { %v1189_v51 = vshll.u32 %v897_v50, 16  ;;  %v472_v17 = vor.u32 %v470_v43, %v469_v42  ;;  %v473_v52 = vrot.slane %v469_v42, 4  ;;  %v477_v53 = vrot.slane %v475_v44, 7  ;;  %v310_v63 = vld [vmem:[#allocation2 + $0x44] sm:$0x1]  ;;  %v375_v50 = vld [vmem:[%s10369_s28 + $0xd0] sm:$0xff] }
  0x60   : > { %v990_v61 = vsel %vm10463_vm1, %v985_v48, %v989_v39  ;;  %v995_v57 = vrot.slane %v994_v36, 4  ;;  %v332_v24 = vsel %vm10358_vm6, 0, %v331_v11  ;;  %v279_v58 = vsel %vm10350_vm3, 0, %v278_v35  ;;  %v766_v25 = vld [vmem:[#allocation2 + $0x38] sm:$0x1]  ;;  %v358_v11 = vld [vmem:[%s10369_s28 + $0x48] sm:$0xff] }
  0x61   : > { %v1297_v59 = vunpack.c.l.b16 %v990_v61  ;;  %v1191_v60 = vrot.slane %v1189_v51, 5  ;;  %v480_v62 = vor.u32 %v478_v46, %v477_v53  ;;  %v482_v0 = vrot.slane %v477_v53, 4  ;;  %333 = vst [vmem:[#allocation2 + $0x98] sm:$0x1] %v332_v24  ;;  %v334_v24 = vld [vmem:[#allocation2 + $0xa4] sm:$0x1] }
  0x62   : > { %v1000_v29 = vsel %vm10463_vm1, %v995_v57, %v999_v49  ;;  %v763_v45 = vsel %vm10402_vm11, %v472_v17, %v762_v16  ;;  %280 = vst [vmem:[#allocation2 + $0x9c] sm:$0x1] %v279_v58  ;;  %v620_v2 = vshrl.u32 %v10620_v55, 16  ;;  %v623_v4 = vshll.u32 %v10620_v55, 16 }
  0x63   : > { %v1298_v7 = vunpack.c.l.b16 %v1000_v29  ;;  %v1192_v8 = vsel %vm10463_vm1, %v1187_v18, %v1191_v60  ;;  %v481_v10 = vsel %vm10396_vm10, %v473_v52, %v480_v62  ;;  %764 = vst [vmem:[#allocation2 + $0x30] sm:$0xf] %v763_v45  ;;  %v877_v21 = vld [vmem:[#allocation2 + $0x90] sm:$0xf]  ;;  %v628_v13 = vshrl.u32 %v10639_v6, 16 }
  0x64   : > { %v1314_v14 = vunpack.c.l.b16 %v1192_v8  ;;  %v10163_v15 = vld [vmem:[#allocation2 + $0x90] sm:$0xff]  ;;  %765 = vst.msk [vmem:[#allocation2 + $0x34] sm:$0xf] %vm736_vm7, %v481_v10  ;;  %v1194_v54 = vshrl.u32 %v877_v21, 16  ;;  %v10660_v55 = vpack.c.bf16 %v357_v1, %v357_v1  ;;  %v1197_v18 = vshll.u32 %v877_v21, 16 }
  0x65   : > { %v878_v20 = vld [vmem:[#allocation2 + $0x94] sm:$0xf]  ;;  %v1326_v23 = vpack.c.b16 %v1298_v7, %v1297_v59  ;;  %v767_v9 = vsel %vm10421_vm15, %v482_v0, %v766_v25  ;;  %v622_v34 = vrot.slane %v620_v2, 7  ;;  %9457 = vmatmul.msk.bf16.gmra.mxu3 %vm1339_vm12, %v10163_v15  ;;  %v10668_v39 = vrot.slane %v628_v13, 7 }
  0x66   : > { %v1203_v26 = vshll.u32 %v878_v20, 16  ;;  %v1207_v27 = vshrl.u32 %v878_v20, 16  ;;  %v1334_v30 = vpack.c.b16 %v1314_v14, %v10622_v19  ;;  %v1196_v31 = vrot.slane %v1194_v54, 4  ;;  %768 = vst [vmem:[#allocation2 + $0x38] sm:$0x1] %v767_v9 }
  0x67   : > { %9368 = vmatmul.msk.bf16.gmra.mxu0 %vm1339_vm12, %v1326_v23  ;;  %v1199_v35 = vrot.slane %v1197_v18, 5  ;;  %v625_v40 = vor.u32 %v623_v4, %v622_v34  ;;  %v626_v41 = vrot.slane %v622_v34, 4  ;;  %v631_v42 = vshll.u32 %v10639_v6, 16  ;;  %v281_v20 = vld [vmem:[#allocation2 + $0xa8] sm:$0x1] }
  0x68   : > { %v1205_v37 = vrot.slane %v1203_v26, 5  ;;  %v1209_v38 = vrot.slane %v1207_v27, 4  ;;  %9376 = vmatmul.msk.bf16.gmra.mxu2 %vm1339_vm12, %v1334_v30  ;;  %v822_v19 = vld [vmem:[#allocation2 + $0x98] sm:$0x1]  ;;  %v255_v43 = vsel %vm10350_vm3, 0, %v254_v32  ;;  %v10678_v49 = vpack.c.bf16 %v358_v11, %v358_v11 }
  0x69   : > { %v823_v44 = vsel %vm10421_vm15, %v618_v22, %v822_v19  ;;  %v1200_v46 = vor.u32 %v1199_v35, %v1196_v31  ;;  %v825_v36 = vld [vmem:[#allocation2 + $0x9c] sm:$0xf]  ;;  %256 = vst [vmem:[#allocation2 + $0x3c] sm:$0x1] %v255_v43  ;;  %v633_v17 = vor.u32 %v631_v42, %v10668_v39  ;;  %v635_v6 = vrot.slane %v10668_v39, 4 }
  0x6a   : > { %v1210_v48 = vor.u32 %v1209_v38, %v1205_v37  ;;  %v861_v51 = vld [vmem:[#allocation2 + $0x30] sm:$0xf]  ;;  %824 = vst [vmem:[#allocation2 + $0x98] sm:$0x1] %v823_v44  ;;  %v826_v52 = vsel %vm10402_vm11, %v625_v40, %v825_v36  ;;  %v484_v12 = vshrl.u32 %v10660_v55, 16  ;;  %v311_v57 = vsel %vm10358_vm6, 0, %v310_v63 }
  0x6b   : > { %v862_v53 = vld [vmem:[#allocation2 + $0x34] sm:$0xf]  ;;  %v1002_v22 = vshrl.u32 %v861_v51, 16  ;;  %v1005_v16 = vshll.u32 %v861_v51, 16  ;;  %v1201_v61 = vrot.slane %v1200_v46, 4  ;;  %v634_v62 = vsel %vm10396_vm10, %v626_v41, %v633_v17  ;;  %v376_v26 = vld [vmem:[%s10369_s28 + $0xd8] sm:$0xff] }
  0x6c   : > { %v1011_v58 = vshll.u32 %v862_v53, 16  ;;  %v1015_v59 = vshrl.u32 %v862_v53, 16  ;;  %v10155_v60 = vld [vmem:[#allocation2 + $0x30] sm:$0xff]  ;;  %827 = vst [vmem:[#allocation2 + $0x9c] sm:$0xf] %v826_v52  ;;  %v486_v0 = vrot.slane %v484_v12, 7  ;;  %v10695_v21 = vpack.c.bf16 %v375_v50, %v375_v50 }
  0x6d   : > { %v1004_v1 = vrot.slane %v1002_v22, 4  ;;  %v1007_v29 = vrot.slane %v1005_v16, 5  ;;  %v1211_v45 = vrot.slane %v1210_v48, 4  ;;  %828 = vst.msk [vmem:[#allocation2 + $0xa0] sm:$0xf] %vm736_vm7, %v634_v62  ;;  %v487_v2 = vshll.u32 %v10660_v55, 16  ;;  %9449 = vmatmul.msk.bf16.gmra.mxu1 %vm1339_vm12, %v10155_v60 }
  0x6e   : > { %v890_v4 = vld [vmem:[#allocation2 + $0x38] sm:$0x1]  ;;  %v1013_v7 = vrot.slane %v1011_v58, 5  ;;  %v1017_v8 = vrot.slane %v1015_v59, 4  ;;  %v1206_v10 = vsel %vm10463_vm1, %v1201_v61, %v1205_v37  ;;  %312 = vst [vmem:[#allocation2 + $0x44] sm:$0x1] %v311_v57  ;;  %v10708_v40 = vpack.c.bf16 %v376_v26, %v376_v26 }
  0x6f   : > { %v1008_v13 = vor.u32 %v1007_v29, %v1004_v1  ;;  %v1021_v32 = vshll.u32 %v890_v4, 16  ;;  %v489_v14 = vor.u32 %v487_v2, %v486_v0  ;;  %v490_v15 = vrot.slane %v486_v0, 4  ;;  %v359_v53 = vld [vmem:[%s10369_s28 + $0x50] sm:$0xff]  ;;  %v257_v29 = vld [vmem:[#allocation2 + $0x48] sm:$0x1] }
  0x70   : > { %v1018_v54 = vor.u32 %v1017_v8, %v1013_v7  ;;  %v492_v55 = vshrl.u32 %v10678_v49, 16  ;;  %v495_v23 = vshll.u32 %v10678_v49, 16  ;;  %v769_v25 = vld [vmem:[#allocation2 + $0x3c] sm:$0xf]  ;;  %v335_v18 = vsel %vm10358_vm6, 0, %v334_v24 }
  0x71   : > { %v1009_v27 = vrot.slane %v1008_v13, 4  ;;  %v1023_v30 = vrot.slane %v1021_v32, 5  ;;  %v898_v9 = vld [vmem:[#allocation2 + $0x98] sm:$0x1]  ;;  %v1315_v31 = vunpack.c.l.b16 %v1206_v10  ;;  %v770_v34 = vsel %vm10402_vm11, %v489_v14, %v769_v25  ;;  %336 = vst [vmem:[#allocation2 + $0xa4] sm:$0x1] %v335_v18 }
  0x72   : > { %v1019_v63 = vrot.slane %v1018_v54, 4  ;;  %v1213_v11 = vshll.u32 %v898_v9, 16  ;;  %v494_v35 = vrot.slane %v492_v55, 7  ;;  %771 = vst [vmem:[#allocation2 + $0x3c] sm:$0xf] %v770_v34  ;;  %v282_v37 = vsel %vm10350_vm3, 0, %v281_v20 }
  0x73   : > { %v1014_v38 = vsel %vm10463_vm1, %v1009_v27, %v1013_v7  ;;  %v879_v19 = vld [vmem:[#allocation2 + $0x9c] sm:$0xf]  ;;  %283 = vst [vmem:[#allocation2 + $0xa8] sm:$0x1] %v282_v37  ;;  %v637_v41 = vshrl.u32 %v10695_v21, 16  ;;  %v640_v42 = vshll.u32 %v10695_v21, 16 }
  0x74   : > { %v1024_v43 = vsel %vm10463_vm1, %v1019_v63, %v1023_v30  ;;  %v1299_v44 = vunpack.c.l.b16 %v1014_v38  ;;  %v1215_v46 = vrot.slane %v1213_v11, 5  ;;  %v10164_v48 = vld [vmem:[#allocation2 + $0x9c] sm:$0xff]  ;;  %v497_v36 = vor.u32 %v495_v23, %v494_v35  ;;  %v313_v21 = vld [vmem:[#allocation2 + $0x50] sm:$0x1]  ;;  %v378_v11 = vld [vmem:[%s10369_s28 + $0xe8] sm:$0xff] }
  0x75   : > { %v880_v49 = vld [vmem:[#allocation2 + $0xa0] sm:$0xf]  ;;  %v1300_v50 = vunpack.c.l.b16 %v1024_v43  ;;  %v499_v51 = vrot.slane %v494_v35, 4  ;;  %v773_v17 = vld [vmem:[#allocation2 + $0x44] sm:$0x1]  ;;  %v1218_v52 = vshrl.u32 %v879_v19, 16  ;;  %9458 = vmatmul.msk.bf16.gmra.mxu3 %vm1339_vm12, %v10164_v48 }
  0x76   : > { %v1221_v12 = vshll.u32 %v879_v19, 16  ;;  %v1216_v22 = vsel %vm10463_vm1, %v1211_v45, %v1215_v46  ;;  %v498_v16 = vsel %vm10396_vm10, %v490_v15, %v497_v36  ;;  %v1227_v61 = vshll.u32 %v880_v49, 16  ;;  %v360_v27 = vld [vmem:[%s10369_s28 + $0x58] sm:$0xff]  ;;  %v377_v30 = vld [vmem:[%s10369_s28 + $0xe0] sm:$0xff] }
  0x77   : > { %v1231_v57 = vshrl.u32 %v880_v49, 16  ;;  %v1327_v24 = vpack.c.b16 %v1300_v50, %v1299_v44  ;;  %v1316_v58 = vunpack.c.l.b16 %v1216_v22  ;;  %772 = vst.msk [vmem:[#allocation2 + $0x40] sm:$0xf] %vm736_vm7, %v498_v16  ;;  %v774_v59 = vsel %vm10421_vm15, %v499_v51, %v773_v17  ;;  %v337_v51 = vld [vmem:[#allocation2 + $0xb0] sm:$0x1] }
  0x78   : > { %v1220_v60 = vrot.slane %v1218_v52, 4  ;;  %775 = vst [vmem:[#allocation2 + $0x44] sm:$0x1] %v774_v59  ;;  %v829_v62 = vld [vmem:[#allocation2 + $0xa4] sm:$0x1]  ;;  %v1223_v0 = vrot.slane %v1221_v12, 5  ;;  %v10725_v45 = vpack.c.bf16 %v359_v53, %v359_v53  ;;  %v392_v44 = vpack.c.bf16 %v360_v27, %v360_v27 }
  0x79   : > { %v10723_v1 = vrot.slane %v1227_v61, 5  ;;  %9369 = vmatmul.msk.bf16.gmra.mxu0 %vm1339_vm12, %v1327_v24  ;;  %v1335_v2 = vpack.c.b16 %v1316_v58, %v1315_v31  ;;  %v863_v4 = vld [vmem:[#allocation2 + $0x3c] sm:$0xf]  ;;  %v830_v7 = vsel %vm10421_vm15, %v635_v6, %v829_v62  ;;  %v1233_v8 = vrot.slane %v1231_v57, 4  ;;  %v284_v58 = vld [vmem:[#allocation2 + $0xb4] sm:$0x1] }
  0x7a   : > { %v639_v10 = vrot.slane %v637_v41, 7  ;;  %v1026_v13 = vshrl.u32 %v863_v4, 16  ;;  %v1029_v32 = vshll.u32 %v863_v4, 16  ;;  %831 = vst [vmem:[#allocation2 + $0xa4] sm:$0x1] %v830_v7  ;;  %v1224_v14 = vor.u32 %v1223_v0, %v1220_v60 }
  0x7b   : > { %v645_v15 = vshrl.u32 %v10708_v40, 16  ;;  %9377 = vmatmul.msk.bf16.gmra.mxu2 %vm1339_vm12, %v1335_v2  ;;  %v1234_v20 = vor.u32 %v1233_v8, %v10723_v1  ;;  %v648_v6 = vshll.u32 %v10708_v40, 16  ;;  %v832_v55 = vld [vmem:[#allocation2 + $0xa8] sm:$0xf]  ;;  %v258_v34 = vsel %vm10350_vm3, 0, %v257_v29 }
  0x7c   : > { %v642_v39 = vor.u32 %v640_v42, %v639_v10  ;;  %v643_v54 = vrot.slane %v639_v10, 4  ;;  %v1028_v23 = vrot.slane %v1026_v13, 4  ;;  %v1031_v25 = vrot.slane %v1029_v32, 5  ;;  %259 = vst [vmem:[#allocation2 + $0x48] sm:$0x1] %v258_v34 }
  0x7d   : > { %v1225_v18 = vrot.slane %v1224_v14, 4  ;;  %v10736_v26 = vrot.slane %v645_v15, 7  ;;  %v1235_v9 = vrot.slane %v1234_v20, 4  ;;  %v314_v63 = vsel %vm10358_vm6, 0, %v313_v21 }
  0x7e   : > { %v833_v31 = vsel %vm10402_vm11, %v642_v39, %v832_v55  ;;  %v864_v35 = vld [vmem:[#allocation2 + $0x40] sm:$0xf]  ;;  %v1032_v37 = vor.u32 %v1031_v25, %v1028_v23  ;;  %v10749_v46 = vpack.c.bf16 %v377_v30, %v377_v30  ;;  %315 = vst [vmem:[#allocation2 + $0x50] sm:$0x1] %v314_v63  ;;  %v501_v50 = vshrl.u32 %v10725_v45, 16 }
  0x7f   : > { %v10156_v38 = vld [vmem:[#allocation2 + $0x3c] sm:$0xff]  ;;  %v650_v19 = vor.u32 %v648_v6, %v10736_v26  ;;  %v652_v40 = vrot.slane %v10736_v26, 4  ;;  %834 = vst [vmem:[#allocation2 + $0xa8] sm:$0xf] %v833_v31  ;;  %v891_v41 = vld [vmem:[#allocation2 + $0x44] sm:$0x1]  ;;  %v1230_v53 = vsel %vm10463_vm1, %v1225_v18, %v10723_v1  ;;  %v10759_v22 = vpack.c.bf16 %v378_v11, %v378_v11 }
  0x80   : > { %v1035_v42 = vshll.u32 %v864_v35, 16  ;;  %v1039_v43 = vshrl.u32 %v864_v35, 16  ;;  %v1033_v48 = vrot.slane %v1032_v37, 4  ;;  %v1045_v36 = vshll.u32 %v891_v41, 16  ;;  %9450 = vmatmul.msk.bf16.gmra.mxu1 %vm1339_vm12, %v10156_v38  ;;  %v260_v25 = vld [vmem:[#allocation2 + $0x54] sm:$0x1] }
  0x81   : > { %v651_v49 = vsel %vm10396_vm10, %v643_v54, %v650_v19  ;;  %v899_v12 = vld [vmem:[#allocation2 + $0xa4] sm:$0x1]  ;;  %v503_v57 = vrot.slane %v501_v50, 7  ;;  %v504_v24 = vshll.u32 %v10725_v45, 16  ;;  %v509_v62 = vshrl.u32 %v392_v44, 16 }
  0x82   : > { %v1037_v17 = vrot.slane %v1035_v42, 5  ;;  %v1041_v52 = vrot.slane %v1039_v43, 4  ;;  %835 = vst.msk [vmem:[#allocation2 + $0xac] sm:$0xf] %vm736_vm7, %v651_v49  ;;  %v1047_v16 = vrot.slane %v1045_v36, 5  ;;  %v1237_v61 = vshll.u32 %v899_v12, 16 }
  0x83   : > { %v512_v0 = vshll.u32 %v392_v44, 16  ;;  %v1317_v2 = vunpack.c.l.b16 %v1230_v53  ;;  %v506_v4 = vor.u32 %v504_v24, %v503_v57  ;;  %v507_v1 = vrot.slane %v503_v57, 4  ;;  %v776_v14 = vld [vmem:[#allocation2 + $0x48] sm:$0xf]  ;;  %v316_v38 = vld [vmem:[#allocation2 + $0x5c] sm:$0x1] }
  0x84   : > { %v1038_v59 = vsel %vm10463_vm1, %v1033_v48, %v1037_v17  ;;  %v1042_v60 = vor.u32 %v1041_v52, %v1037_v17  ;;  %v1239_v29 = vrot.slane %v1237_v61, 5  ;;  %v511_v8 = vrot.slane %v509_v62, 7  ;;  %v361_v19 = vld [vmem:[%s10369_s28 + $0x60] sm:$0xff]  ;;  %v362_v48 = vld [vmem:[%s10369_s28 + $0x68] sm:$0xff] }
  0x85   : > { %v338_v10 = vsel %vm10358_vm6, 0, %v337_v51  ;;  %v285_v45 = vsel %vm10350_vm3, 0, %v284_v58  ;;  %v1301_v13 = vunpack.c.l.b16 %v1038_v59  ;;  %v780_v23 = vld [vmem:[#allocation2 + $0x50] sm:$0x1]  ;;  %v777_v30 = vsel %vm10402_vm11, %v506_v4, %v776_v14 }
  0x86   : > { %v1043_v7 = vrot.slane %v1042_v60, 4  ;;  %v881_v21 = vld [vmem:[#allocation2 + $0xa8] sm:$0xf]  ;;  %v1240_v32 = vsel %vm10463_vm1, %v1235_v9, %v1239_v29  ;;  %339 = vst [vmem:[#allocation2 + $0xb0] sm:$0x1] %v338_v10  ;;  %v514_v6 = vor.u32 %v512_v0, %v511_v8  ;;  %v516_v55 = vrot.slane %v511_v8, 4 }
  0x87   : > { %v1242_v15 = vshrl.u32 %v881_v21, 16  ;;  %v1245_v20 = vshll.u32 %v881_v21, 16  ;;  %v1318_v54 = vunpack.c.l.b16 %v1240_v32  ;;  %286 = vst [vmem:[#allocation2 + $0xb4] sm:$0x1] %v285_v45  ;;  %v654_v44 = vshrl.u32 %v10749_v46, 16 }
  0x88   : > { %v1048_v39 = vsel %vm10463_vm1, %v1043_v7, %v1047_v16  ;;  %v515_v11 = vsel %vm10396_vm10, %v507_v1, %v514_v6  ;;  %778 = vst [vmem:[#allocation2 + $0x48] sm:$0xf] %v777_v30  ;;  %v781_v35 = vsel %vm10421_vm15, %v516_v55, %v780_v23  ;;  %v657_v36 = vshll.u32 %v10749_v46, 16  ;;  %v340_v45 = vld [vmem:[#allocation2 + $0xbc] sm:$0x1] }
  0x89   : > { %v1302_v18 = vunpack.c.l.b16 %v1048_v39  ;;  %v10165_v27 = vld [vmem:[#allocation2 + $0xa8] sm:$0xff]  ;;  %v1244_v31 = vrot.slane %v1242_v15, 4  ;;  %v1247_v34 = vrot.slane %v1245_v20, 5  ;;  %v1336_v63 = vpack.c.b16 %v1318_v54, %v1317_v2  ;;  %779 = vst.msk [vmem:[#allocation2 + $0x4c] sm:$0xf] %vm736_vm7, %v515_v11 }
  0x8a   : > { %v882_v9 = vld [vmem:[#allocation2 + $0xac] sm:$0xf]  ;;  %9459 = vmatmul.msk.bf16.gmra.mxu3 %vm1339_vm12, %v10165_v27  ;;  %782 = vst [vmem:[#allocation2 + $0x50] sm:$0x1] %v781_v35  ;;  %v662_v49 = vshrl.u32 %v10759_v22, 16  ;;  %v665_v50 = vshll.u32 %v10759_v22, 16  ;;  %v393_v12 = vpack.c.bf16 %v361_v19, %v361_v19  ;;  %v394_v61 = vpack.c.bf16 %v362_v48, %v362_v48 }
  0x8b   : > { %v1251_v37 = vshll.u32 %v882_v9, 16  ;;  %v1328_v41 = vpack.c.b16 %v1302_v18, %v1301_v13  ;;  %v1248_v42 = vor.u32 %v1247_v34, %v1244_v31  ;;  %v1255_v43 = vshrl.u32 %v882_v9, 16  ;;  %9378 = vmatmul.msk.bf16.gmra.mxu2 %vm1339_vm12, %v1336_v63 }
  0x8c   : > { %v656_v17 = vrot.slane %v654_v44, 7  ;;  %v261_v52 = vsel %vm10350_vm3, 0, %v260_v25  ;;  %v10792_v16 = vrot.slane %v662_v49, 7  ;;  %v317_v46 = vsel %vm10358_vm6, 0, %v316_v38 }
  0x8d   : > { %9370 = vmatmul.msk.bf16.gmra.mxu0 %vm1339_vm12, %v1328_v41  ;;  %v10788_v51 = vrot.slane %v1251_v37, 5  ;;  %v836_v53 = vld [vmem:[#allocation2 + $0xb0] sm:$0x1]  ;;  %262 = vst [vmem:[#allocation2 + $0x54] sm:$0x1] %v261_v52  ;;  %v10800_v57 = vrot.slane %v1248_v42, 4 }
  0x8e   : > { %v837_v22 = vsel %vm10421_vm15, %v652_v40, %v836_v53  ;;  %v1257_v24 = vrot.slane %v1255_v43, 4  ;;  %v659_v58 = vor.u32 %v657_v36, %v656_v17  ;;  %v839_v59 = vld [vmem:[#allocation2 + $0xb4] sm:$0xf]  ;;  %318 = vst [vmem:[#allocation2 + $0x5c] sm:$0x1] %v317_v46  ;;  %v660_v60 = vrot.slane %v656_v17, 4 }
  0x8f   : > { %838 = vst [vmem:[#allocation2 + $0xb0] sm:$0x1] %v837_v22  ;;  %v667_v62 = vor.u32 %v665_v50, %v10792_v16  ;;  %v865_v0 = vld [vmem:[#allocation2 + $0x48] sm:$0xf]  ;;  %v669_v29 = vrot.slane %v10792_v16, 4  ;;  %v518_v26 = vshrl.u32 %v393_v12, 16  ;;  %v1254_v15 = vsel %vm10463_vm1, %v10800_v57, %v10788_v51 }
  0x90   : > { %v840_v2 = vsel %vm10402_vm11, %v659_v58, %v839_v59  ;;  %v521_v4 = vshll.u32 %v393_v12, 16  ;;  %v10806_v1 = vld [vmem:[#allocation2 + $0x4c] sm:$0xf]  ;;  %v1050_v40 = vshrl.u32 %v865_v0, 16  ;;  %v1053_v7 = vshll.u32 %v865_v0, 16 }
  0x91   : > { %v10157_v8 = vld [vmem:[#allocation2 + $0x48] sm:$0xff]  ;;  %v668_v10 = vsel %vm10396_vm10, %v660_v60, %v667_v62  ;;  %v526_v21 = vshrl.u32 %v394_v61, 16  ;;  %v10810_v13 = vld [vmem:[#allocation2 + $0x50] sm:$0x1]  ;;  %v1059_v32 = vshll.u32 %v10806_v1, 16  ;;  %v1063_v14 = vshrl.u32 %v10806_v1, 16 }
  0x92   : > { %v1258_v20 = vor.u32 %v1257_v24, %v10788_v51  ;;  %841 = vst [vmem:[#allocation2 + $0xb4] sm:$0xf] %v840_v2  ;;  %v1052_v39 = vrot.slane %v1050_v40, 4  ;;  %v1055_v54 = vrot.slane %v1053_v7, 5  ;;  %v1069_v6 = vshll.u32 %v10810_v13, 16  ;;  %9451 = vmatmul.msk.bf16.gmra.mxu1 %vm1339_vm12, %v10157_v8 }
  0x93   : > { %842 = vst.msk [vmem:[#allocation2 + $0xb8] sm:$0xf] %vm736_vm7, %v668_v10  ;;  %v520_v55 = vrot.slane %v518_v26, 7  ;;  %v1061_v23 = vrot.slane %v1059_v32, 5  ;;  %v1065_v25 = vrot.slane %v1063_v14, 4  ;;  %v528_v18 = vrot.slane %v526_v21, 7 }
  0x94   : > { %v529_v27 = vshll.u32 %v394_v61, 16  ;;  %v783_v30 = vld [vmem:[#allocation2 + $0x54] sm:$0xf]  ;;  %v1056_v9 = vor.u32 %v1055_v54, %v1052_v39  ;;  %v1071_v31 = vrot.slane %v1069_v6, 5  ;;  %v341_v41 = vsel %vm10358_vm6, 0, %v340_v45 }
  0x95   : > { %v523_v34 = vor.u32 %v521_v4, %v520_v55  ;;  %v524_v63 = vrot.slane %v520_v55, 4  ;;  %v787_v11 = vld [vmem:[#allocation2 + $0x5c] sm:$0x1]  ;;  %v1066_v35 = vor.u32 %v1065_v25, %v1061_v23  ;;  %v533_v19 = vrot.slane %v528_v18, 4  ;;  %v2372_v42 = vld [vmem:[#allocation2 + $0xc] sm:$0xf] }
  0x96   : > { %v900_v37 = vld [vmem:[#allocation2 + $0xb0] sm:$0x1]  ;;  %v531_v38 = vor.u32 %v529_v27, %v528_v18  ;;  %v1057_v43 = vrot.slane %v1056_v9, 4  ;;  %v1259_v44 = vrot.slane %v1258_v20, 4  ;;  %342 = vst [vmem:[#allocation2 + $0xbc] sm:$0x1] %v341_v41  ;;  %v1319_v57 = vunpack.c.l.b16 %v1254_v15 }
  0x97   : > { %v1261_v48 = vshll.u32 %v900_v37, 16  ;;  %v784_v36 = vsel %vm10402_vm11, %v523_v34, %v783_v30  ;;  %v1067_v49 = vrot.slane %v1066_v35, 4  ;;  %v788_v51 = vsel %vm10421_vm15, %v533_v19, %v787_v11  ;;  %v10838_v32 = vld [vmem:[#allocation2 + $0x10] sm:$0xf] }
  0x98   : > { %v532_v50 = vsel %vm10396_vm10, %v524_v63, %v531_v38  ;;  %785 = vst [vmem:[#allocation2 + $0x54] sm:$0xf] %v784_v36  ;;  %v2421_v17 = vshrl.u32 %v2372_v42, 16  ;;  %v1062_v52 = vsel %vm10463_vm1, %v1057_v43, %v1061_v23  ;;  %v2424_v46 = vshll.u32 %v2372_v42, 16 }
  0x99   : > { %v1263_v12 = vrot.slane %v1261_v48, 5  ;;  %786 = vst.msk [vmem:[#allocation2 + $0x58] sm:$0xf] %vm736_vm7, %v532_v50  ;;  %v883_v53 = vld [vmem:[#allocation2 + $0xb4] sm:$0xf]  ;;  %v1072_v61 = vsel %vm10463_vm1, %v1067_v49, %v1071_v31  ;;  %v1303_v22 = vunpack.c.l.b16 %v1062_v52  ;;  %v2430_v9 = vshll.u32 %v10838_v32, 16 }
  0x9a   : > { %v10166_v24 = vld [vmem:[#allocation2 + $0xb4] sm:$0xff]  ;;  %789 = vst [vmem:[#allocation2 + $0x5c] sm:$0x1] %v788_v51  ;;  %v1266_v59 = vshrl.u32 %v883_v53, 16  ;;  %v1304_v60 = vunpack.c.l.b16 %v1072_v61  ;;  %v1269_v0 = vshll.u32 %v883_v53, 16  ;;  %v2423_v14 = vrot.slane %v2421_v17, 4 }
  0x9b   : > { %v884_v58 = vld [vmem:[#allocation2 + $0xb8] sm:$0xf]  ;;  %v1264_v62 = vsel %vm10463_vm1, %v1259_v44, %v1263_v12  ;;  %9460 = vmatmul.msk.bf16.gmra.mxu3 %vm1339_vm12, %v10166_v24  ;;  %v2426_v6 = vrot.slane %v2424_v46, 5  ;;  %v2434_v11 = vshrl.u32 %v10838_v32, 16  ;;  %v9625_v44 = vld [vmem:[%s14385_s1 + $0xc] sm:$0x3] }
  0x9c   : > { %v1275_v2 = vshll.u32 %v884_v58, 16  ;;  %v1320_v26 = vunpack.c.l.b16 %v1264_v62  ;;  %v1268_v4 = vrot.slane %v1266_v59, 4  ;;  %v1279_v40 = vshrl.u32 %v884_v58, 16  ;;  %v9706_v48 = vld [vmem:[%s14385_s1 + $0xe] sm:$0x3] }
  0x9d   : > { %v1329_v7 = vpack.c.b16 %v1304_v60, %v1303_v22  ;;  %v1271_v8 = vrot.slane %v1269_v0, 5  ;;  %v843_v21 = vld [vmem:[#allocation2 + $0xbc] sm:$0x1]  ;;  %v10862_v49 = vrot.slane %v2430_v9, 5  ;;  %v2436_v50 = vrot.slane %v2434_v11, 4 }
  0x9e   : > { %v1337_v10 = vpack.c.b16 %v1320_v26, %v1319_v57  ;;  %v1277_v45 = vrot.slane %v1275_v2, 5  ;;  %v844_v20 = vsel %vm10421_vm15, %v669_v29, %v843_v21  ;;  %v1281_v54 = vrot.slane %v1279_v40, 4  ;;  %v10866_v53 = vld [vmem:[#allocation2 + $0x14] sm:$0x1]  ;;  %v10167_v57 = vld [vmem:[#allocation2 + $0xc] sm:$0xff] }
  0x9f   : > { %9371 = vmatmul.msk.bf16.gmra.mxu0 %vm1339_vm12, %v1329_v7  ;;  %v867_v15 = vld [vmem:[#allocation2 + $0x54] sm:$0xf]  ;;  %v1272_v39 = vor.u32 %v1271_v8, %v1268_v4  ;;  %845 = vst [vmem:[#allocation2 + $0xbc] sm:$0x1] %v844_v20  ;;  %v2427_v46 = vor.u32 %v2426_v6, %v2423_v14  ;;  %v3588_v24 = vsel %vm1388_vm0, %v9625_v44, 0  ;;  %v4242_v58 = vsel %vm1388_vm0, %v9706_v48, 0 }
  0xa0   : > { %9379 = vmatmul.msk.bf16.gmra.mxu2 %vm1339_vm12, %v1337_v10  ;;  %v10846_v55 = vld [vmem:[#allocation2 + $0x58] sm:$0xf]  ;;  %v1074_v23 = vshrl.u32 %v867_v15, 16  ;;  %v1077_v25 = vshll.u32 %v867_v15, 16  ;;  %v1621_v29 = vpop.f32.mrf.mxu1  ;;  %v1282_v19 = vor.u32 %v1281_v54, %v1277_v45  ;;  %v9608_v59 = vld [vmem:[%s14385_s1 + $0xa] sm:$0x3]  ;;  %4251 = vmatpush.bf16.msra.mxu3 %v4242_v58  ;;  %v2437_v4 = vor.u32 %v2436_v50, %v10862_v49 }
  0xa1   : > { %v10848_v18 = vld [vmem:[#allocation2 + $0x5c] sm:$0x1]  ;;  %v1083_v27 = vshll.u32 %v10846_v55, 16  ;;  %v1087_v30 = vshrl.u32 %v10846_v55, 16  ;;  %v10158_v16 = vld [vmem:[#allocation2 + $0x54] sm:$0xff]  ;;  %v1273_v38 = vrot.slane %v1272_v39, 4  ;;  %3597 = vmatpush.bf16.msra.mxu2 %v3588_v24 }
  0xa2   : > { %v1076_v31 = vrot.slane %v1074_v23, 4  ;;  %v1079_v34 = vrot.slane %v1077_v25, 5  ;;  %v1093_v63 = vshll.u32 %v10848_v18, 16  ;;  %9452 = vmatmul.msk.bf16.gmra.mxu1 %vm1339_vm12, %v10158_v16  ;;  %v1283_v12 = vrot.slane %v1282_v19, 4  ;;  %v10260_v39 = vld [vmem:[#allocation2 + $0x4] sm:$0xf] }
  0xa3   : > { %v1085_v35 = vrot.slane %v1083_v27, 5  ;;  %v1089_v37 = vrot.slane %v1087_v30, 4  ;;  %v1278_v52 = vsel %vm10463_vm1, %v1273_v38, %v1277_v45  ;;  %v2440_v40 = vshll.u32 %v10866_v53, 16  ;;  %v3026_v6 = vld [vmem:[#allocation2 + $0xc] sm:$0xe] }
  0xa4   : > { %v1080_v41 = vor.u32 %v1079_v34, %v1076_v31  ;;  %v1095_v43 = vrot.slane %v1093_v63, 5  ;;  %v1321_v8 = vunpack.c.l.b16 %v1278_v52  ;;  %v3301_v10 = vsel %vm1388_vm0, %v9608_v59, 0  ;;  %v1701_v30 = vld [vmem:[#allocation2] sm:$0xe]  ;;  %v2375_v9 = vld [vmem:[#allocation2 + $0x18] sm:$0xf] }
  0xa5   : > { %v1090_v42 = vor.u32 %v1089_v37, %v1085_v35  ;;  %v2428_v14 = vrot.slane %v2427_v46, 4  ;;  %3310 = vmatpush.bf16.msrb.mxu1 %v3301_v10  ;;  %v1754_v54 = vrot.slane %v10260_v39, 5  ;;  %v2438_v23 = vrot.slane %v2437_v4, 4  ;;  %v9739_v31 = vld [vmem:[%s14385_s1 + $0x10] sm:$0x3] }
  0xa6   : > { %v1081_v36 = vrot.slane %v1080_v41, 4  ;;  %v901_v17 = vld [vmem:[#allocation2 + $0xbc] sm:$0x1]  ;;  %v2442_v25 = vrot.slane %v2440_v40, 5  ;;  %vm1749_vm2 = vcmask 1042432   ;;  %vm1750_vm8 = vcmask 1046532  }
  0xa7   : > { %v1091_v51 = vrot.slane %v1090_v42, 4  ;;  %v1285_v22 = vshll.u32 %v901_v17, 16  ;;  %v10261_v34 = vld [vmem:[#allocation2 + $0x8] sm:$0x1]  ;;  %v2433_v11 = vsel %vm10463_vm1, %v2428_v14, %v10862_v49  ;;  %v9592_v37 = vrot.slane %v3026_v6, 9  ;;  %vm10906_vm9 = vmor %vm1749_vm2, %vm1750_vm8 }
  0xa8   : > { %v1086_v61 = vsel %vm10463_vm1, %v1081_v36, %v1085_v35  ;;  %v1661_v0 = vpop.f32.mrf.mxu3  ;;  %v10879_v7 = vpop.f32.mrf.mxu1  ;;  %v1757_v63 = vrot.slane %v10261_v34, 5  ;;  %v10894_v35 = vld [vmem:[#allocation2 + $0x1c] sm:$0xf]  ;;  %v9461_v19 = vrot.slane %v1701_v30, 9  ;;  %v1756_v41 = vrot.slane %v1754_v54, 4 }
  0xa9   : > { %v1096_v60 = vsel %vm10463_vm1, %v1091_v51, %v1095_v43  ;;  %v1305_v62 = vunpack.c.l.b16 %v1086_v61  ;;  %v1287_v26 = vrot.slane %v1285_v22, 5  ;;  %v3092_v42 = vrot.slane %v10838_v32, 5 }
  0xaa   : > { %v1306_v2 = vunpack.c.l.b16 %v1096_v60  ;;  %v3095_v43 = vrot.slane %v10866_v53, 5  ;;  %v2443_v44 = vsel %vm10463_vm1, %v2438_v23, %v2442_v25  ;;  %v2445_v36 = vshrl.u32 %v2375_v9, 16 }
  0xab   : > { %v1288_v45 = vsel %vm10463_vm1, %v1283_v12, %v1287_v26  ;;  %9559 = vmatmul.msk.bf16.vlgmr.msrb.gmra.mxu3 %vm1339_vm12, %v10167_v57  ;;  %v2448_v49 = vshll.u32 %v2375_v9, 16  ;;  %v2454_v50 = vshll.u32 %v10894_v35, 16  ;;  %v2458_v51 = vshrl.u32 %v10894_v35, 16  ;;  %v2377_v26 = vld [vmem:[#allocation2 + $0x20] sm:$0x1] }
  0xac   : > { %v1330_v21 = vpack.c.b16 %v1306_v2, %v1305_v62  ;;  %v1322_v15 = vunpack.c.l.b16 %v1288_v45  ;;  %v3093_v32 = vsel %vm10906_vm9, %v9592_v37, %v3092_v42  ;;  %v3094_v17 = vrot.slane %v3092_v42, 4 }
  0xad   : > { %v1401_v20 = vpop.f32.mrf.mxu0  ;;  %v2806_v52 = vunpack.c.l.b16 %v2433_v11  ;;  %v3204_v12 = vunpack.c.l.b16 %v3093_v32  ;;  %v2807_v46 = vunpack.c.l.b16 %v2443_v44  ;;  %v1755_v22 = vsel %vm10906_vm9, %v9461_v19, %v1754_v54  ;;  %v2378_v19 = vld [vmem:[#allocation2 + $0x24] sm:$0xf] }
  0xae   : > { %v10885_v27 = vadd.f32 %v1621_v29, %v1401_v20  ;;  %v1338_v16 = vpack.c.b16 %v1322_v15, %v1321_v8  ;;  %v4640_v29 = vsel %vm1388_vm0, %v9739_v31, 0  ;;  %v1758_v57 = vsel %vm10906_vm9, %v1756_v41, %v1757_v63  ;;  %v10168_v8 = vld [vmem:[#allocation2 + $0x18] sm:$0xff]  ;;  %v1702_v31 = vld [vmem:[#allocation2 + $0xc] sm:$0xe] }
  0xaf   : > { %9372 = vmatmul.msk.bf16.gmra.mxu0 %vm1339_vm12, %v1330_v21  ;;  %v3096_v58 = vsel %vm10906_vm9, %v3094_v17, %v3095_v43  ;;  %v2447_v60 = vrot.slane %v2445_v36, 4  ;;  %v2450_v62 = vrot.slane %v2448_v49, 5  ;;  %v2456_v4 = vrot.slane %v2454_v50, 5  ;;  %v3027_v15 = vld [vmem:[#allocation2 + $0x18] sm:$0xe] }
  0xb0   : > { %9380 = vmatmul.msk.bf16.gmra.mxu2 %vm1339_vm12, %v1338_v16  ;;  %v10898_v38 = vpop.f32.mrf.mxu3  ;;  %4649 = vmatpush.bf16.msra.mxu0 %v4640_v29  ;;  %v3205_v2 = vunpack.c.l.b16 %v3096_v58  ;;  %v2460_v40 = vrot.slane %v2458_v51, 4  ;;  %v1866_v21 = vunpack.c.l.b16 %v1755_v22  ;;  %v1867_v45 = vunpack.c.l.b16 %v1758_v57  ;;  %v10262_v29 = vld [vmem:[#allocation2 + $0x10] sm:$0xf]  ;;  %v2379_v36 = vld [vmem:[#allocation2 + $0x28] sm:$0xf] }
  0xb1   : > { %14405 = vst [vmem:[#allocation3_spill] sm:$0xff] %v10898_v38  ;;  %v3099_v20 = vrot.slane %v10894_v35, 5  ;;  %v2838_v39 = vpack.c.b16 %v2807_v46, %v2806_v52  ;;  %v2451_v54 = vor.u32 %v2450_v62, %v2447_v60  ;;  %v2464_v6 = vshll.u32 %v2377_v26, 16  ;;  %v10263_v51 = vld [vmem:[#allocation2 + $0x14] sm:$0x1] }
  0xb2   : > { %v1626_v53 = vpop.f32.mrf.mxu1  ;;  %v3236_v10 = vpack.c.b16 %v3205_v2, %v3204_v12  ;;  %v9593_v23 = vrot.slane %v3027_v15, 9  ;;  %v3102_v30 = vrot.slane %v2377_v26, 5  ;;  %v1898_v16 = vpack.c.b16 %v1867_v45, %v1866_v21  ;;  %v2380_v45 = vld [vmem:[#allocation2 + $0x2c] sm:$0x1] }
  0xb3   : > { %v3101_v25 = vrot.slane %v3099_v20, 4  ;;  %v2452_v63 = vrot.slane %v2451_v54, 4  ;;  %v2466_v11 = vrot.slane %v2464_v6, 5  ;;  %v1761_v35 = vrot.slane %v10262_v29, 5 }
  0xb4   : > { %9609 = vmatmul.msk.bf16.vlgmr.msrb.gmra.mxu1 %vm1339_vm12, %v3236_v10  ;;  %v3100_v43 = vsel %vm10906_vm9, %v9593_v23, %v3099_v20  ;;  %v9462_v50 = vrot.slane %v1702_v31, 9  ;;  %v1764_v32 = vrot.slane %v10263_v51, 5  ;;  %v2469_v17 = vshrl.u32 %v2378_v19, 16  ;;  %v3028_v31 = vld [vmem:[#allocation2 + $0x24] sm:$0xe] }
  0xb5   : > { %v10914_v61 = vpop.f32.mrf.mxu0  ;;  %v1441_v24 = vpop.f32.mrf.mxu2  ;;  %v3103_v44 = vsel %vm10906_vm9, %v3101_v25, %v3102_v30  ;;  %v2472_v52 = vshll.u32 %v2378_v19, 16  ;;  %v2457_v12 = vsel %vm10463_vm1, %v2452_v63, %v2456_v4  ;;  %v3206_v46 = vunpack.c.l.b16 %v3100_v43  ;;  %v1703_v43 = vld [vmem:[#allocation2 + $0x18] sm:$0xe] }
  0xb6   : > { %v10922_v59 = vadd.f32 %v1661_v0, %v1441_v24  ;;  %v2461_v0 = vor.u32 %v2460_v40, %v2456_v4  ;;  %v3207_v22 = vunpack.c.l.b16 %v3103_v44  ;;  %v2478_v24 = vshll.u32 %v2379_v36, 16  ;;  %v10264_v44 = vld [vmem:[#allocation2 + $0x1c] sm:$0xf] }
  0xb7   : > { %v2482_v58 = vshrl.u32 %v2379_v36, 16  ;;  %v2808_v60 = vunpack.c.l.b16 %v2457_v12  ;;  %v1762_v62 = vsel %vm10906_vm9, %v9462_v50, %v1761_v35  ;;  %v2471_v26 = vrot.slane %v2469_v17, 4 }
  0xb8   : > { %v1666_v14 = vpop.f32.mrf.mxu3  ;;  %v2462_v41 = vrot.slane %v2461_v0, 4  ;;  %v2474_v40 = vrot.slane %v2472_v52, 5  ;;  %v3237_v21 = vpack.c.b16 %v3207_v22, %v3206_v46  ;;  %v2480_v15 = vrot.slane %v2478_v24, 5  ;;  %v2382_v24 = vld [vmem:[#allocation2 + $0x34] sm:$0xf] }
  0xb9   : > { %v2484_v20 = vrot.slane %v2482_v58, 4  ;;  %v3106_v6 = vrot.slane %v2379_v36, 5  ;;  %v1868_v23 = vunpack.c.l.b16 %v1762_v62  ;;  %v2488_v63 = vshll.u32 %v2380_v45, 16 }
  0xba   : > { %v10929_v37 = vpop.f32.mrf.mxu1  ;;  %v2467_v57 = vsel %vm10463_vm1, %v2462_v41, %v2466_v11  ;;  %v9594_v11 = vrot.slane %v3028_v31, 9  ;;  %v1768_v36 = vrot.slane %v10264_v44, 5  ;;  %v3029_v44 = vld [vmem:[#allocation2 + $0x30] sm:$0xe]  ;;  %vm5828_vm0 = vcmask 1043456  }
  0xbb   : > { %9560 = vmatmul.msk.bf16.gmra.mxu3 %vm1339_vm12, %v10168_v8  ;;  %v2809_v8 = vunpack.c.l.b16 %v2467_v57  ;;  %v3108_v29 = vrot.slane %v3106_v6, 4  ;;  %v2490_v51 = vrot.slane %v2488_v63, 5  ;;  %v9463_v57 = vrot.slane %v1703_v43, 9  ;;  %v10170_v63 = vld [vmem:[#allocation2 + $0x30] sm:$0xff]  ;;  %v2383_v43 = vld [vmem:[#allocation2 + $0x38] sm:$0x1] }
  0xbc   : > { %v3107_v17 = vsel %vm10906_vm9, %v9594_v11, %v3106_v6  ;;  %v1770_v58 = vrot.slane %v1768_v36, 4 }
  0xbd   : > { %v10927_v9 = vpop.f32.mrf.mxu2 }
  0xbe   : > { %v1406_v34 = vpop.f32.mrf.mxu0 }
  0xbf   : > { %9576 = vmatmul.msk.bf16.vlgmr.msrb.gmra.mxu0 %vm1339_vm12, %v2838_v39  ;;  %v10932_v42 = vadd.f32 %v1626_v53, %v1406_v34  ;;  %v1763_v53 = vrot.slane %v1761_v35, 4  ;;  %v10169_v39 = vld [vmem:[#allocation2 + $0x24] sm:$0xff]  ;;  %v2839_v34 = vpack.c.b16 %v2809_v8, %v2808_v60  ;;  %v3109_v35 = vrot.slane %v2380_v45, 5  ;;  %v10265_v60 = vld [vmem:[#allocation2 + $0x20] sm:$0x1] }
  0xc0   : > { %9478 = vmatmul.msk.bf16.vlgmr.msrb.gmra.mxu2 %vm1339_vm12, %v1898_v16  ;;  %v10939_v49 = vpop.f32.mrf.mxu3  ;;  %v2475_v16 = vor.u32 %v2474_v40, %v2471_v26  ;;  %v1771_v62 = vrot.slane %v10265_v60, 5 }
  0xc1   : > { %14408 = vst [vmem:[#allocation4_spill] sm:$0xff] %v10939_v49  ;;  %v1765_v10 = vsel %vm10906_vm9, %v1763_v53, %v1764_v32  ;;  %v3110_v52 = vsel %vm10906_vm9, %v3108_v29, %v3109_v35  ;;  %v2381_v53 = vld [vmem:[#allocation2 + $0x30] sm:$0xf]  ;;  %v3113_v35 = vrot.slane %v2382_v24, 5 }
  0xc2   : > { %v1869_v25 = vunpack.c.l.b16 %v1765_v10  ;;  %v2476_v41 = vrot.slane %v2475_v16, 4  ;;  %v3209_v26 = vunpack.c.l.b16 %v3110_v52  ;;  %v2493_v10 = vshrl.u32 %v2381_v53, 16 }
  0xc4   : > { %9610 = vmatmul.msk.bf16.gmra.mxu1 %vm1339_vm12, %v3237_v21  ;;  %v1899_v19 = vpack.c.b16 %v1869_v25, %v1868_v23  ;;  %v2481_v46 = vsel %vm10463_vm1, %v2476_v41, %v2480_v15  ;;  %v2496_v21 = vshll.u32 %v2381_v53, 16  ;;  %v1769_v23 = vsel %vm10906_vm9, %v9463_v57, %v1768_v36 }
  0xc5   : > { %v1446_v2 = vpop.f32.mrf.mxu2  ;;  %v2810_v6 = vunpack.c.l.b16 %v2481_v46  ;;  %v1772_v25 = vsel %vm10906_vm9, %v1770_v58, %v1771_v62  ;;  %v2495_v31 = vrot.slane %v2493_v10, 4  ;;  %v9595_v53 = vrot.slane %v3029_v44, 9  ;;  %v10266_v62 = vld [vmem:[#allocation2 + $0x28] sm:$0xf] }
  0xc6   : > { %v10949_v4 = vadd.f32 %v1666_v14, %v1446_v2  ;;  %v10951_v0 = vpop.f32.mrf.mxu0  ;;  %v2485_v14 = vor.u32 %v2484_v20, %v2480_v15  ;;  %v3208_v2 = vunpack.c.l.b16 %v3107_v17  ;;  %v2502_v20 = vshll.u32 %v2382_v24, 16 }
  0xc7   : > { %v1631_v54 = vpop.f32.mrf.mxu1  ;;  %v3115_v46 = vrot.slane %v3113_v35, 4  ;;  %v3116_v57 = vrot.slane %v2383_v43, 5  ;;  %v2512_v58 = vshll.u32 %v2383_v43, 16 }
  0xc8   : > { %14409 = vst [vmem:[#allocation5_spill] sm:$0xff] %v10949_v4  ;;  %v1671_v30 = vpop.f32.mrf.mxu3  ;;  %v2486_v50 = vrot.slane %v2485_v14, 4  ;;  %v3238_v16 = vpack.c.b16 %v3209_v26, %v3208_v2  ;;  %v2504_v14 = vrot.slane %v2502_v20, 5  ;;  %v1775_v2 = vrot.slane %v10266_v62, 5  ;;  %v1704_v26 = vld [vmem:[#allocation2 + $0x24] sm:$0xe] }
  0xc9   : > { %v2384_v20 = vld [vmem:[#allocation2 + $0x3c] sm:$0xf] }
  0xca   : > { %v2491_v8 = vsel %vm10463_vm1, %v2486_v50, %v2490_v51  ;;  %v2520_v44 = vshll.u32 %v2384_v20, 16 }
  0xcb   : > { %9561 = vmatmul.msk.bf16.gmra.mxu3 %vm1339_vm12, %v10169_v39  ;;  %v2506_v39 = vshrl.u32 %v2382_v24, 16  ;;  %v2811_v15 = vunpack.c.l.b16 %v2491_v8  ;;  %v3117_v8 = vsel %vm10906_vm9, %v3115_v46, %v3116_v57 }
  0xcc   : > { %v2522_v62 = vrot.slane %v2520_v44, 5  ;;  %v10268_v44 = vld [vmem:[#allocation2 + $0x34] sm:$0xf] }
  0xcd   : > { %v10956_v32 = vpop.f32.mrf.mxu2  ;;  %v2508_v11 = vrot.slane %v2506_v39, 4  ;;  %v2840_v50 = vpack.c.b16 %v2811_v15, %v2810_v6  ;;  %v9464_v6 = vrot.slane %v1704_v26, 9  ;;  %v1777_v15 = vrot.slane %v1775_v2, 4 }
  0xce   : > { %14410 = vst [vmem:[#allocation6_spill] sm:$0xff] %v10956_v32 }
  0xcf   : > { %9577 = vmatmul.msk.bf16.gmra.mxu0 %vm1339_vm12, %v2839_v34  ;;  %v10962_v12 = vpop.f32.mrf.mxu1  ;;  %v2498_v34 = vrot.slane %v2496_v21, 5  ;;  %v2509_v24 = vor.u32 %v2508_v11, %v2504_v14  ;;  %v2514_v21 = vrot.slane %v2512_v58, 5 }
  0xd0   : > { %9479 = vmatmul.msk.bf16.gmra.mxu2 %vm1339_vm12, %v1899_v19  ;;  %v1673_v22 = vpop.f32.mrf.mxu3  ;;  %v1871_v19 = vunpack.c.l.b16 %v1772_v25  ;;  %v2385_v25 = vld [vmem:[#allocation2 + $0x40] sm:$0xf] }
  0xd1   : > { %v2499_v52 = vor.u32 %v2498_v34, %v2495_v31  ;;  %v2510_v10 = vrot.slane %v2509_v24, 4  ;;  %v10267_v34 = vld [vmem:[#allocation2 + $0x2c] sm:$0x1] }
  0xd3   : > { %v1411_v40 = vpop.f32.mrf.mxu0  ;;  %v2515_v43 = vsel %vm10463_vm1, %v2510_v10, %v2514_v21  ;;  %v2386_v21 = vld [vmem:[#allocation2 + $0x44] sm:$0x1] }
  0xd4   : > { %v10969_v45 = vadd.f32 %v1631_v54, %v1411_v40  ;;  %v1870_v54 = vunpack.c.l.b16 %v1769_v23  ;;  %9611 = vmatmul.msk.bf16.gmra.mxu1 %vm1339_vm12, %v3238_v16  ;;  %v3114_v40 = vsel %vm10906_vm9, %v9595_v53, %v3113_v35  ;;  %v3211_v35 = vunpack.c.l.b16 %v3117_v8 }
  0xd5   : > { %v3210_v11 = vunpack.c.l.b16 %v3114_v40  ;;  %v2813_v58 = vunpack.c.l.b16 %v2515_v43  ;;  %v3120_v40 = vrot.slane %v2385_v25, 5  ;;  %v1705_v43 = vld [vmem:[#allocation2 + $0x30] sm:$0xe] }
  0xd6   : > { %v1900_v60 = vpack.c.b16 %v1871_v19, %v1870_v54  ;;  %v2517_v19 = vshrl.u32 %v2384_v20, 16 }
  0xd7   : > { %v3239_v57 = vpack.c.b16 %v3211_v35, %v3210_v11 }
  0xd8   : > { %v1636_v29 = vpop.f32.mrf.mxu1  ;;  %v10977_v36 = vpop.f32.mrf.mxu3 }
  0xd9   : > { %v1451_v41 = vpop.f32.mrf.mxu2 }
  0xda   : > { %v10975_v51 = vadd.f32 %v1671_v30, %v1451_v41  ;;  %v2500_v30 = vrot.slane %v2499_v52, 4  ;;  %v2530_v52 = vshrl.u32 %v2385_v25, 16 }
  0xdb   : > { %v10980_v17 = vpop.f32.mrf.mxu0  ;;  %9562 = vmatmul.msk.bf16.gmra.mxu3 %vm1339_vm12, %v10170_v63  ;;  %v1778_v63 = vrot.slane %v10267_v34, 5  ;;  %v3122_v34 = vrot.slane %v3120_v40, 4 }
  0xdc   : > { %14411 = vst [vmem:[#allocation7_spill] sm:$0xff] %v10975_v51  ;;  %v2505_v54 = vsel %vm10463_vm1, %v2500_v30, %v2504_v14  ;;  %v2519_v14 = vrot.slane %v2517_v19, 4  ;;  %v2532_v30 = vrot.slane %v2530_v52, 4  ;;  %v2536_v19 = vshll.u32 %v2386_v21, 16  ;;  %v2387_v52 = vld [vmem:[#allocation2 + $0x48] sm:$0xf] }
  0xdd   : > { %v1779_v46 = vsel %vm10906_vm9, %v1777_v15, %v1778_v63  ;;  %v2812_v24 = vunpack.c.l.b16 %v2505_v54  ;;  %v3123_v63 = vrot.slane %v2386_v21, 5 }
  0xde   : > { %v1873_v10 = vunpack.c.l.b16 %v1779_v46 }
  0xdf   : > { %9578 = vmatmul.msk.bf16.gmra.mxu0 %vm1339_vm12, %v2840_v50  ;;  %v2526_v50 = vshll.u32 %v2385_v25, 16  ;;  %v2523_v25 = vor.u32 %v2522_v62, %v2519_v14  ;;  %v9465_v14 = vrot.slane %v1705_v43, 9  ;;  %v10269_v62 = vld [vmem:[#allocation2 + $0x38] sm:$0x1] }
  0xe0   : > { %9480 = vmatmul.msk.bf16.gmra.mxu2 %vm1339_vm12, %v1900_v60  ;;  %v10989_v23 = vpop.f32.mrf.mxu1  ;;  %v10993_v31 = vpop.f32.mrf.mxu3  ;;  %v10171_v60 = vld [vmem:[#allocation2 + $0x3c] sm:$0xff] }
  0xe1   : > { %v1453_v39 = vpop.f32.mrf.mxu2  ;;  %v2528_v26 = vrot.slane %v2526_v50, 5  ;;  %v1782_v50 = vrot.slane %v10268_v44, 5 }
  0xe2   : > { %v10991_v16 = vadd.f32 %v1673_v22, %v1453_v39  ;;  %v1776_v22 = vsel %vm10906_vm9, %v9464_v6, %v1775_v2  ;;  %v2841_v2 = vpack.c.b16 %v2813_v58, %v2812_v24  ;;  %v2538_v58 = vrot.slane %v2536_v19, 5 }
  0xe3   : > { %v1872_v8 = vunpack.c.l.b16 %v1776_v22  ;;  %v2533_v54 = vor.u32 %v2532_v30, %v2528_v26  ;;  %v11015_v22 = vld [vmem:[#allocation2 + $0x4c] sm:$0xf]  ;;  %v1785_v30 = vrot.slane %v10269_v62, 5  ;;  %v1783_v19 = vsel %vm10906_vm9, %v9465_v14, %v1782_v50 }
  0xe4   : > { %14412 = vst [vmem:[#allocation8_spill] sm:$0xff] %v10991_v16  ;;  %v1416_v41 = vpop.f32.mrf.mxu0  ;;  %9612 = vmatmul.msk.bf16.gmra.mxu1 %vm1339_vm12, %v3239_v57  ;;  %v2524_v57 = vrot.slane %v2523_v25, 4 }
  0xe5   : > { %v10999_v53 = vadd.f32 %v1636_v29, %v1416_v41  ;;  %v3030_v29 = vld [vmem:[#allocation2 + $0x3c] sm:$0xe]  ;;  %v1901_v41 = vpack.c.b16 %v1873_v10, %v1872_v8  ;;  %v2534_v24 = vrot.slane %v2533_v54, 4  ;;  %v2541_v8 = vshrl.u32 %v2387_v52, 16 }
  0xe6   : > { %v9596_v15 = vrot.slane %v3030_v29, 9  ;;  %v2544_v10 = vshll.u32 %v2387_v52, 16  ;;  %v2550_v29 = vshll.u32 %v11015_v22, 16 }
  0xe7   : > { %v2539_v25 = vsel %vm10463_vm1, %v2534_v24, %v2538_v58  ;;  %v2543_v43 = vrot.slane %v2541_v8, 4  ;;  %v2389_v24 = vld [vmem:[#allocation2 + $0x50] sm:$0x1]  ;;  %v10172_v58 = vld [vmem:[#allocation2 + $0x48] sm:$0xff] }
  0xe8   : > { %v11005_v20 = vpop.f32.mrf.mxu3  ;;  %v3121_v46 = vsel %vm10906_vm9, %v9596_v15, %v3120_v40  ;;  %v2554_v40 = vshrl.u32 %v11015_v22, 16  ;;  %v2546_v52 = vrot.slane %v2544_v10, 5  ;;  %v2560_v8 = vshll.u32 %v2389_v24, 16 }
  0xea   : > { %v1641_v6 = vpop.f32.mrf.mxu1 }
  0xeb   : > { %v1456_v39 = vpop.f32.mrf.mxu2  ;;  %9563 = vmatmul.msk.bf16.gmra.mxu3 %vm1339_vm12, %v10171_v60  ;;  %v1784_v60 = vrot.slane %v1782_v50, 4  ;;  %v3031_v50 = vld [vmem:[#allocation2 + $0x48] sm:$0xe] }
  0xec   : > { %v11008_v11 = vpop.f32.mrf.mxu0  ;;  %v11011_v35 = vadd.f32 %v10977_v36, %v1456_v39  ;;  %v3124_v36 = vsel %vm10906_vm9, %v3122_v34, %v3123_v63  ;;  %v2529_v63 = vsel %vm10463_vm1, %v2524_v57, %v2528_v26  ;;  %v2815_v26 = vunpack.c.l.b16 %v2539_v25 }
  0xed   : > { %v3213_v39 = vunpack.c.l.b16 %v3124_v36  ;;  %v2556_v36 = vrot.slane %v2554_v40, 4 }
  0xee   : > { %14413 = vst [vmem:[#allocation9_spill] sm:$0xff] %v11011_v35  ;;  %v2814_v35 = vunpack.c.l.b16 %v2529_v63  ;;  %v2390_v63 = vld [vmem:[#allocation2 + $0x54] sm:$0xf] }
  0xef   : > { %9579 = vmatmul.msk.bf16.gmra.mxu0 %vm1339_vm12, %v2841_v2  ;;  %v3212_v2 = vunpack.c.l.b16 %v3121_v46  ;;  %v2552_v46 = vrot.slane %v2550_v29, 5  ;;  %v9597_v29 = vrot.slane %v3031_v50, 9 }
  0xf0   : > { %9481 = vmatmul.msk.bf16.gmra.mxu2 %vm1339_vm12, %v1901_v41  ;;  %v11022_v21 = vpop.f32.mrf.mxu3  ;;  %v1786_v41 = vsel %vm10906_vm9, %v1784_v60, %v1785_v30  ;;  %v2547_v60 = vor.u32 %v2546_v52, %v2543_v43  ;;  %v2842_v10 = vpack.c.b16 %v2815_v26, %v2814_v35  ;;  %v2562_v43 = vrot.slane %v2560_v8, 5  ;;  %v1706_v52 = vld [vmem:[#allocation2 + $0x3c] sm:$0xe] }
  0xf1   : > { %v3240_v62 = vpack.c.b16 %v3213_v39, %v3212_v2  ;;  %v2557_v30 = vor.u32 %v2556_v36, %v2552_v46  ;;  %v3130_v2 = vrot.slane %v2389_v24, 5  ;;  %v10270_v36 = vld [vmem:[#allocation2 + $0x40] sm:$0xf]  ;;  %v2565_v24 = vshrl.u32 %v2390_v63, 16 }
  0xf2   : > { %v1643_v34 = vpop.f32.mrf.mxu1  ;;  %v1789_v16 = vrot.slane %v10270_v36, 5  ;;  %v2392_v36 = vld [vmem:[#allocation2 + $0x5c] sm:$0x1] }
  0xf3   : > { %v1458_v15 = vpop.f32.mrf.mxu2 }
  0xf4   : > { %v11031_v54 = vadd.f32 %v10993_v31, %v1458_v15  ;;  %v3127_v31 = vrot.slane %v11015_v22, 5  ;;  %v1874_v15 = vunpack.c.l.b16 %v1783_v19  ;;  %9613 = vmatmul.msk.bf16.gmra.mxu1 %vm1339_vm12, %v3240_v62  ;;  %v11044_v22 = vld [vmem:[#allocation2 + $0x58] sm:$0xf] }
  0xf5   : > { %v2578_v50 = vshrl.u32 %v11044_v22, 16 }
  0xf6   : > { %14414 = vst [vmem:[#allocation10_spill] sm:$0xff] %v11031_v54  ;;  %v1421_v44 = vpop.f32.mrf.mxu0  ;;  %v1875_v54 = vunpack.c.l.b16 %v1786_v41  ;;  %v3129_v40 = vrot.slane %v3127_v31, 4  ;;  %v2548_v41 = vrot.slane %v2547_v60, 4  ;;  %v9466_v60 = vrot.slane %v1706_v52, 9 }
  0xf7   : > { %v11037_v57 = vadd.f32 %v1641_v6, %v1421_v44  ;;  %v2558_v44 = vrot.slane %v2557_v30, 4  ;;  %v1791_v30 = vrot.slane %v1789_v16, 4 }
  0xf8   : > { %v11040_v14 = vpop.f32.mrf.mxu3  ;;  %v1902_v6 = vpack.c.b16 %v1875_v54, %v1874_v15  ;;  %v3128_v54 = vsel %vm10906_vm9, %v9597_v29, %v3127_v31  ;;  %v3131_v26 = vsel %vm10906_vm9, %v3129_v40, %v3130_v2  ;;  %v2574_v15 = vshll.u32 %v11044_v22, 16 }
  0xf9   : > { %v2553_v31 = vsel %vm10463_vm1, %v2548_v41, %v2552_v46  ;;  %v2563_v29 = vsel %vm10463_vm1, %v2558_v44, %v2562_v43  ;;  %v2567_v2 = vrot.slane %v2565_v24, 4  ;;  %v1790_v52 = vsel %vm10906_vm9, %v9466_v60, %v1789_v16  ;;  %v10173_v43 = vld [vmem:[#allocation2 + $0x54] sm:$0xff] }
  0xfa   : > { %v2817_v46 = vunpack.c.l.b16 %v2563_v29  ;;  %v1876_v51 = vunpack.c.l.b16 %v1790_v52  ;;  %v3032_v16 = vld [vmem:[#allocation2 + $0x54] sm:$0xe] }
  0xfb   : > { %9564 = vmatmul.msk.bf16.gmra.mxu3 %vm1339_vm12, %v10172_v58  ;;  %v2568_v58 = vshll.u32 %v2390_v63, 16 }
  0xfd   : > { %v1646_v39 = vpop.f32.mrf.mxu1  ;;  %v2570_v63 = vrot.slane %v2568_v58, 5 }
  0xfe   : > { %v1423_v25 = vpop.f32.mrf.mxu0  ;;  %v1461_v19 = vpop.f32.mrf.mxu2 }
  0xff   : > { %9580 = vmatmul.msk.bf16.gmra.mxu0 %vm1339_vm12, %v2842_v10  ;;  %v11048_v35 = vadd.f32 %v11005_v20, %v1461_v19  ;;  %v11050_v62 = vadd.f32 %v1643_v34, %v1423_v25  ;;  %v10271_v20 = vld [vmem:[#allocation2 + $0x44] sm:$0x1]  ;;  %v3214_v34 = vunpack.c.l.b16 %v3128_v54  ;;  %v3215_v10 = vunpack.c.l.b16 %v3131_v26 }
 0x100   : > { %9482 = vmatmul.msk.bf16.gmra.mxu2 %vm1339_vm12, %v1902_v6  ;;  %v1792_v8 = vrot.slane %v10271_v20, 5  ;;  %v11063_v40 = vpop.f32.mrf.mxu3  ;;  %v2576_v25 = vrot.slane %v2574_v15, 5  ;;  %v2580_v19 = vrot.slane %v2578_v50, 4  ;;  %v2816_v20 = vunpack.c.l.b16 %v2553_v31 }
 0x101   : > { %14415 = vst [vmem:[#allocation11_spill] sm:$0xff] %v11048_v35  ;;  %v3241_v26 = vpack.c.b16 %v3215_v10, %v3214_v34  ;;  %v2571_v24 = vor.u32 %v2570_v63, %v2567_v2  ;;  %v2584_v15 = vshll.u32 %v2392_v36, 16  ;;  %v3134_v50 = vrot.slane %v11044_v22, 5 }
 0x102   : > { %v1793_v54 = vsel %vm10906_vm9, %v1791_v30, %v1792_v8  ;;  %v2581_v58 = vor.u32 %v2580_v19, %v2576_v25  ;;  %v2843_v30 = vpack.c.b16 %v2817_v46, %v2816_v20  ;;  %v9598_v8 = vrot.slane %v3032_v16, 9  ;;  %v1707_v19 = vld [vmem:[#allocation2 + $0x48] sm:$0xe] }
 0x103   : > { %v1877_v49 = vunpack.c.l.b16 %v1793_v54  ;;  %v3136_v34 = vrot.slane %v3134_v50, 4  ;;  %v2572_v10 = vrot.slane %v2571_v24, 4  ;;  %v2586_v29 = vrot.slane %v2584_v15, 5 }
 0x104   : > { %9614 = vmatmul.msk.bf16.gmra.mxu1 %vm1339_vm12, %v3241_v26  ;;  %v2582_v31 = vrot.slane %v2581_v58, 4  ;;  %v1796_v2 = vrot.slane %v10806_v1, 5 }
 0x105   : > { %v1648_v44 = vpop.f32.mrf.mxu1  ;;  %v1903_v22 = vpack.c.b16 %v1877_v49, %v1876_v51  ;;  %v2577_v1 = vsel %vm10463_vm1, %v2572_v10, %v2576_v25  ;;  %v9467_v51 = vrot.slane %v1707_v19, 9 }
 0x106   : > { %v1463_v6 = vpop.f32.mrf.mxu2  ;;  %v2587_v49 = vsel %vm10463_vm1, %v2582_v31, %v2586_v29  ;;  %v1798_v26 = vrot.slane %v1796_v2, 4  ;;  %v2818_v25 = vunpack.c.l.b16 %v2577_v1 }
 0x107   : > { %v11070_v41 = vadd.f32 %v11022_v21, %v1463_v6  ;;  %v3137_v21 = vrot.slane %v2392_v36, 5  ;;  %v3135_v36 = vsel %vm10906_vm9, %v9598_v8, %v3134_v50  ;;  %v2819_v8 = vunpack.c.l.b16 %v2587_v49 }
 0x108   : > { %v3216_v16 = vunpack.c.l.b16 %v3135_v36  ;;  %v2395_v36 = vld [vmem:[#allocation2 + $0x68] sm:$0x1] }
 0x109   : > { %14416 = vst [vmem:[#allocation12_spill] sm:$0xff] %v11070_v41  ;;  %v3138_v54 = vsel %vm10906_vm9, %v3136_v34, %v3137_v21  ;;  %v1797_v21 = vsel %vm10906_vm9, %v9467_v51, %v1796_v2  ;;  %v2844_v2 = vpack.c.b16 %v2819_v8, %v2818_v25 }
 0x10a   : > { %v1426_v35 = vpop.f32.mrf.mxu0  ;;  %v1878_v1 = vunpack.c.l.b16 %v1797_v21  ;;  %v1803_v21 = vrot.slane %v10846_v55, 5 }
 0x10b   : > { %v11073_v60 = vadd.f32 %v1646_v39, %v1426_v35  ;;  %9565 = vmatmul.msk.bf16.gmra.mxu3 %vm1339_vm12, %v10173_v43  ;;  %v2393_v39 = vld [vmem:[#allocation2 + $0x60] sm:$0xf]  ;;  %v2394_v35 = vld [vmem:[#allocation2 + $0x64] sm:$0xf] }
 0x10c   : > { %v2589_v43 = vshrl.u32 %v2393_v39, 16  ;;  %v2592_v24 = vshll.u32 %v2393_v39, 16  ;;  %v2598_v58 = vshll.u32 %v2394_v35, 16  ;;  %v2602_v50 = vshrl.u32 %v2394_v35, 16  ;;  %v10174_v39 = vld [vmem:[#allocation2 + $0x60] sm:$0xff] }
 0x10d   : > { %v11078_v63 = vpop.f32.mrf.mxu3 }
 0x10e   : > { %v1466_v6 = vpop.f32.mrf.mxu2  ;;  %v2591_v10 = vrot.slane %v2589_v43, 4  ;;  %v2594_v31 = vrot.slane %v2592_v24, 5  ;;  %v2604_v19 = vrot.slane %v2602_v50, 4  ;;  %v2608_v24 = vshll.u32 %v2395_v36, 16 }
 0x10f   : > { %9581 = vmatmul.msk.bf16.gmra.mxu0 %vm1339_vm12, %v2843_v30  ;;  %v11082_v52 = vadd.f32 %v11040_v14, %v1466_v6  ;;  %v1651_v46 = vpop.f32.mrf.mxu1  ;;  %v1799_v14 = vrot.slane %v10810_v13, 5  ;;  %v3217_v30 = vunpack.c.l.b16 %v3138_v54  ;;  %v3141_v54 = vrot.slane %v2394_v35, 5 }
 0x110   : > { %9483 = vmatmul.msk.bf16.gmra.mxu2 %vm1339_vm12, %v1903_v22  ;;  %v2600_v22 = vrot.slane %v2598_v58, 5  ;;  %v3144_v58 = vrot.slane %v2395_v36, 5  ;;  %v1806_v36 = vrot.slane %v10848_v18, 5 }
 0x111   : > { %14417 = vst [vmem:[#allocation13_spill] sm:$0xff] %v11082_v52  ;;  %v1800_v13 = vsel %vm10906_vm9, %v1798_v26, %v1799_v14  ;;  %v3033_v52 = vld [vmem:[#allocation2 + $0x60] sm:$0xe]  ;;  %v3143_v14 = vrot.slane %v3141_v54, 4 }
 0x112   : > { %v1428_v20 = vpop.f32.mrf.mxu0  ;;  %v1879_v49 = vunpack.c.l.b16 %v1800_v13  ;;  %v2605_v51 = vor.u32 %v2604_v19, %v2600_v22  ;;  %v9599_v26 = vrot.slane %v3033_v52, 9 }
 0x113   : > { %v11094_v15 = vadd.f32 %v1648_v44, %v1428_v20  ;;  %v3242_v44 = vpack.c.b16 %v3217_v30, %v3216_v16  ;;  %v2595_v20 = vor.u32 %v2594_v31, %v2591_v10  ;;  %v1708_v30 = vld [vmem:[#allocation2 + $0x54] sm:$0xe]  ;;  %v2396_v10 = vld [vmem:[#allocation2 + $0x6c] sm:$0xf]  ;;  %v2610_v31 = vrot.slane %v2608_v24, 5 }
 0x114   : > { %v1904_v16 = vpack.c.b16 %v1879_v49, %v1878_v1  ;;  %v2606_v8 = vrot.slane %v2605_v51, 4  ;;  %v3142_v52 = vsel %vm10906_vm9, %v9599_v26, %v3141_v54  ;;  %v9468_v55 = vrot.slane %v1708_v30, 9 }
 0x115   : > { %v11096_v34 = vpop.f32.mrf.mxu3  ;;  %9615 = vmatmul.msk.bf16.gmra.mxu1 %vm1339_vm12, %v3242_v44  ;;  %v2596_v35 = vrot.slane %v2595_v20, 4  ;;  %v2613_v19 = vshrl.u32 %v2396_v10, 16  ;;  %v2616_v44 = vshll.u32 %v2396_v10, 16  ;;  %v3218_v1 = vunpack.c.l.b16 %v3142_v52 }
 0x116   : > { %v1468_v29 = vpop.f32.mrf.mxu2  ;;  %v2611_v54 = vsel %vm10463_vm1, %v2606_v8, %v2610_v31  ;;  %v1804_v18 = vsel %vm10906_vm9, %v9468_v55, %v1803_v21  ;;  %v2398_v31 = vld [vmem:[#allocation2 + $0x74] sm:$0x1] }
 0x117   : > { %v11103_v6 = vadd.f32 %v11063_v40, %v1468_v29  ;;  %v1653_v43 = vpop.f32.mrf.mxu1  ;;  %v3145_v29 = vsel %vm10906_vm9, %v3143_v14, %v3144_v58  ;;  %v2601_v13 = vsel %vm10463_vm1, %v2596_v35, %v2600_v22  ;;  %v2821_v35 = vunpack.c.l.b16 %v2611_v54 }
 0x118   : > { %v3219_v49 = vunpack.c.l.b16 %v3145_v29  ;;  %v2820_v22 = vunpack.c.l.b16 %v2601_v13  ;;  %v10175_v29 = vld [vmem:[#allocation2 + $0x6c] sm:$0xff]  ;;  %v2632_v54 = vshll.u32 %v2398_v31, 16 }
 0x119   : > { %14418 = vst [vmem:[#allocation14_spill] sm:$0xff] %v11103_v6 }
 0x11a   : > { %v3243_v10 = vpack.c.b16 %v3219_v49, %v3218_v1 }
 0x11b   : > { %9566 = vmatmul.msk.bf16.gmra.mxu3 %vm1339_vm12, %v10174_v39  ;;  %v1805_v39 = vrot.slane %v1803_v21, 4 }
 0x11c   : > { %v1431_v50 = vpop.f32.mrf.mxu0 }
 0x11d   : > { %v11107_v40 = vadd.f32 %v1651_v46, %v1431_v50  ;;  %v2397_v46 = vld [vmem:[#allocation2 + $0x70] sm:$0xf]  ;;  %v2615_v50 = vrot.slane %v2613_v19, 4  ;;  %v1807_v30 = vsel %vm10906_vm9, %v1805_v39, %v1806_v36  ;;  %v3034_v19 = vld [vmem:[#allocation2 + $0x6c] sm:$0xe]  ;;  %v3151_v36 = vrot.slane %v2398_v31, 5 }
 0x11e   : > { %v11111_v25 = vpop.f32.mrf.mxu3  ;;  %v2626_v51 = vshrl.u32 %v2397_v46, 16  ;;  %v1881_v13 = vunpack.c.l.b16 %v1807_v30  ;;  %v2634_v31 = vrot.slane %v2632_v54, 5 }
 0x11f   : > { %9582 = vmatmul.msk.bf16.gmra.mxu0 %vm1339_vm12, %v2844_v2  ;;  %v2622_v2 = vshll.u32 %v2397_v46, 16  ;;  %v1656_v58 = vpop.f32.mrf.mxu1 }
 0x120   : > { %9484 = vmatmul.msk.bf16.gmra.mxu2 %vm1339_vm12, %v1904_v16  ;;  %v2618_v16 = vrot.slane %v2616_v44, 5  ;;  %v2845_v44 = vpack.c.b16 %v2821_v35, %v2820_v22  ;;  %v10272_v22 = vld [vmem:[#allocation2 + $0x64] sm:$0xf]  ;;  %v2399_v35 = vld [vmem:[#allocation2 + $0x78] sm:$0xf] }
 0x121   : > { %v2624_v52 = vrot.slane %v2622_v2, 5 }
 0x123   : > { %v1471_v20 = vpop.f32.mrf.mxu2 }
 0x124   : > { %v1433_v24 = vpop.f32.mrf.mxu0  ;;  %v11124_v26 = vadd.f32 %v11078_v63, %v1471_v20  ;;  %v2628_v63 = vrot.slane %v2626_v51, 4  ;;  %v1880_v20 = vunpack.c.l.b16 %v1804_v18 }
 0x125   : > { %v11126_v14 = vadd.f32 %v1653_v43, %v1433_v24  ;;  %v3148_v43 = vrot.slane %v2397_v46, 5  ;;  %v2619_v24 = vor.u32 %v2618_v16, %v2615_v50  ;;  %9616 = vmatmul.msk.bf16.gmra.mxu1 %vm1339_vm12, %v3243_v10  ;;  %v1709_v50 = vld [vmem:[#allocation2 + $0x60] sm:$0xe]  ;;  %v1810_v16 = vrot.slane %v10272_v22, 5 }
 0x126   : > { %14419 = vst [vmem:[#allocation15_spill] sm:$0xff] %v11124_v26  ;;  %v11132_v8 = vpop.f32.mrf.mxu3  ;;  %v2629_v55 = vor.u32 %v2628_v63, %v2624_v52  ;;  %v9600_v26 = vrot.slane %v3034_v19, 9  ;;  %v1905_v2 = vpack.c.b16 %v1881_v13, %v1880_v20  ;;  %v2400_v63 = vld [vmem:[#allocation2 + $0x7c] sm:$0xf]  ;;  %v9469_v20 = vrot.slane %v1709_v50, 9 }
 0x127   : > { %v3150_v39 = vrot.slane %v3148_v43, 4  ;;  %v2620_v51 = vrot.slane %v2619_v24, 4  ;;  %v1658_v18 = vpop.f32.mrf.mxu1  ;;  %v2637_v13 = vshrl.u32 %v2399_v35, 16  ;;  %v2640_v24 = vshll.u32 %v2399_v35, 16 }
 0x128   : > { %v2630_v10 = vrot.slane %v2629_v55, 4  ;;  %v1812_v19 = vrot.slane %v1810_v16, 4 }
 0x129   : > { %v2642_v50 = vrot.slane %v2640_v24, 5 }
 0x12b   : > { %v1473_v21 = vpop.f32.mrf.mxu2  ;;  %9567 = vmatmul.msk.bf16.gmra.mxu3 %vm1339_vm12, %v10175_v29  ;;  %v2625_v29 = vsel %vm10463_vm1, %v2620_v51, %v2624_v52  ;;  %v2639_v51 = vrot.slane %v2637_v13, 4 }
 0x12c   : > { %v1436_v1 = vpop.f32.mrf.mxu0  ;;  %v11136_v49 = vadd.f32 %v11096_v34, %v1473_v21  ;;  %v3149_v34 = vsel %vm10906_vm9, %v9600_v26, %v3148_v43  ;;  %v2635_v26 = vsel %vm10463_vm1, %v2630_v10, %v2634_v31  ;;  %v2646_v43 = vshll.u32 %v2400_v63, 16 }
 0x12d   : > { %v11139_v46 = vadd.f32 %v1656_v58, %v1436_v1  ;;  %v3152_v58 = vsel %vm10906_vm9, %v3150_v39, %v3151_v36  ;;  %v3220_v55 = vunpack.c.l.b16 %v3149_v34  ;;  %v2650_v1 = vshrl.u32 %v2400_v63, 16 }
 0x12e   : > { %14420 = vst [vmem:[#allocation16_spill] sm:$0xff] %v11136_v49  ;;  %v11142_v30 = vpop.f32.mrf.mxu3  ;;  %v3221_v54 = vunpack.c.l.b16 %v3152_v58  ;;  %v2822_v22 = vunpack.c.l.b16 %v2625_v29  ;;  %v2823_v35 = vunpack.c.l.b16 %v2635_v26  ;;  %v1811_v34 = vsel %vm10906_vm9, %v9469_v20, %v1810_v16  ;;  %v2401_v29 = vld [vmem:[#allocation2 + $0x80] sm:$0x1]  ;;  %v3035_v26 = vld [vmem:[#allocation2 + $0x78] sm:$0xe] }
 0x12f   : > { %9583 = vmatmul.msk.bf16.gmra.mxu0 %vm1339_vm12, %v2845_v44  ;;  %v10273_v44 = vld [vmem:[#allocation2 + $0x68] sm:$0x1]  ;;  %v2648_v49 = vrot.slane %v2646_v43, 5  ;;  %v2643_v24 = vor.u32 %v2642_v50, %v2639_v51  ;;  %v2656_v6 = vshll.u32 %v2401_v29, 16  ;;  %v9601_v20 = vrot.slane %v3035_v26, 9 }
 0x130   : > { %9485 = vmatmul.msk.bf16.gmra.mxu2 %vm1339_vm12, %v1905_v2  ;;  %v1813_v21 = vrot.slane %v10273_v44, 5  ;;  %v3244_v10 = vpack.c.b16 %v3221_v54, %v3220_v55  ;;  %v11171_v51 = vld [vmem:[#allocation2 + $0x88] sm:$0xf]  ;;  %v10274_v50 = vld [vmem:[#allocation2 + $0x70] sm:$0xf] }
 0x131   : > { %v11164_v44 = vpop.f32.mrf.mxu1  ;;  %v2674_v26 = vshrl.u32 %v11171_v51, 16 }
 0x132   : > { %v1814_v58 = vsel %vm10906_vm9, %v1812_v19, %v1813_v21  ;;  %v3158_v21 = vrot.slane %v2401_v29, 5  ;;  %v2658_v29 = vrot.slane %v2656_v6, 5 }
 0x133   : > { %v1476_v36 = vpop.f32.mrf.mxu2  ;;  %v1883_v13 = vunpack.c.l.b16 %v1814_v58  ;;  %v2676_v4 = vrot.slane %v2674_v26, 4 }
 0x134   : > { %v1438_v39 = vpop.f32.mrf.mxu0  ;;  %v11154_v2 = vadd.f32 %v11111_v25, %v1476_v36  ;;  %v2652_v25 = vrot.slane %v2650_v1, 4  ;;  %v10176_v36 = vld [vmem:[#allocation2 + $0x78] sm:$0xff]  ;;  %v2644_v1 = vrot.slane %v2643_v24, 4  ;;  %v2670_v24 = vshll.u32 %v11171_v51, 16 }
 0x135   : > { %v11156_v52 = vadd.f32 %v1658_v18, %v1438_v39  ;;  %v3155_v18 = vrot.slane %v2400_v63, 5  ;;  %v1882_v39 = vunpack.c.l.b16 %v1811_v34  ;;  %9617 = vmatmul.msk.bf16.gmra.mxu1 %vm1339_vm12, %v3244_v10  ;;  %v2402_v34 = vld [vmem:[#allocation2 + $0x84] sm:$0xf] }
 0x136   : > { %14421 = vst [vmem:[#allocation17_spill] sm:$0xff] %v11154_v2  ;;  %v11162_v31 = vpop.f32.mrf.mxu3  ;;  %v2846_v2 = vpack.c.b16 %v2823_v35, %v2822_v22  ;;  %v2653_v16 = vor.u32 %v2652_v25, %v2648_v49  ;;  %v1710_v22 = vld [vmem:[#allocation2 + $0x6c] sm:$0xe]  ;;  %v1817_v35 = vrot.slane %v10274_v50, 5  ;;  %v11189_v32 = vrot.slane %v2670_v24, 5 }
 0x137   : > { %v3157_v19 = vrot.slane %v3155_v18, 4  ;;  %v1906_v63 = vpack.c.b16 %v1883_v13, %v1882_v39  ;;  %v2661_v39 = vshrl.u32 %v2402_v34, 16  ;;  %v2664_v13 = vshll.u32 %v2402_v34, 16 }
 0x138   : > { %v2654_v10 = vrot.slane %v2653_v16, 4  ;;  %v9470_v6 = vrot.slane %v1710_v22, 9  ;;  %v1819_v16 = vrot.slane %v1817_v35, 4  ;;  %v2677_v26 = vor.u32 %v2676_v4, %v11189_v32 }
 0x139   : > { %v11176_v25 = vpop.f32.mrf.mxu1  ;;  %v2663_v34 = vrot.slane %v2661_v39, 4  ;;  %v2666_v41 = vrot.slane %v2664_v13, 5  ;;  %v10177_v13 = vld [vmem:[#allocation2 + $0x84] sm:$0xff] }
 0x13a   : > { %v1818_v22 = vsel %vm10906_vm9, %v9470_v6, %v1817_v35 }
 0x13b   : > { %v1478_v54 = vpop.f32.mrf.mxu2  ;;  %9568 = vmatmul.msk.bf16.gmra.mxu3 %vm1339_vm12, %v10176_v36  ;;  %v3159_v36 = vsel %vm10906_vm9, %v3157_v19, %v3158_v21  ;;  %v2667_v24 = vor.u32 %v2666_v41, %v2663_v34 }
 0x13c   : > { %v2914_v55 = vpop.f32.mrf.mxu0  ;;  %v11169_v43 = vadd.f32 %v11132_v8, %v1478_v54  ;;  %v3156_v8 = vsel %vm10906_vm9, %v9601_v20, %v3155_v18  ;;  %v10275_v54 = vld [vmem:[#allocation2 + $0x74] sm:$0x1]  ;;  %v3223_v18 = vunpack.c.l.b16 %v3159_v36  ;;  %v2659_v20 = vsel %vm10463_vm1, %v2654_v10, %v2658_v29 }
 0x13d   : > { %v1820_v50 = vrot.slane %v10275_v54, 5  ;;  %v3162_v54 = vrot.slane %v11171_v51, 5 }
 0x13e   : > { %14422 = vst [vmem:[#allocation18_spill] sm:$0xff] %v11169_v43  ;;  %v11174_v58 = vpop.f32.mrf.mxu3  ;;  %v3222_v43 = vunpack.c.l.b16 %v3156_v8 }
 0x13f   : > { %9584 = vmatmul.msk.bf16.gmra.mxu0 %vm1339_vm12, %v2846_v2  ;;  %v2649_v2 = vsel %vm10463_vm1, %v2644_v1, %v2648_v49  ;;  %v2404_v49 = vld [vmem:[#allocation2 + $0x8c] sm:$0x1]  ;;  %v2825_v1 = vunpack.c.l.b16 %v2659_v20  ;;  %v1821_v8 = vsel %vm10906_vm9, %v1819_v16, %v1820_v50  ;;  %v1624_v50 = vadd.f32 %v10879_v7, %v10914_v61  ;;  %v1711_v61 = vld [vmem:[#allocation2 + $0x78] sm:$0xe] }
 0x140   : > { %9486 = vmatmul.msk.bf16.gmra.mxu2 %vm1339_vm12, %v1906_v63  ;;  %v2824_v38 = vunpack.c.l.b16 %v2649_v2  ;;  %v3245_v36 = vpack.c.b16 %v3223_v18, %v3222_v43  ;;  %v2680_v35 = vshll.u32 %v2404_v49, 16  ;;  %v1884_v43 = vunpack.c.l.b16 %v1818_v22 }
 0x141   : > { %v11199_v39 = vpop.f32.mrf.mxu1  ;;  %v1885_v16 = vunpack.c.l.b16 %v1821_v8  ;;  %v3164_v20 = vrot.slane %v3162_v54, 4  ;;  %v2678_v22 = vrot.slane %v2677_v26, 4 }
 0x142   : > { %v2847_v18 = vpack.c.b16 %v2825_v1, %v2824_v38  ;;  %v2682_v8 = vrot.slane %v2680_v35, 5  ;;  %v2405_v38 = vld [vmem:[#allocation2 + $0x90] sm:$0xf] }
 0x143   : > { %v1974_v21 = vpop.f32.mrf.mxu2 }
 0x144   : > { %v2916_v19 = vpop.f32.mrf.mxu0  ;;  %v2054_v63 = vadd.f32 %v1974_v21, %v10885_v27  ;;  %v9756_v27 = vld [vmem:[%s14387_s3 + $0x4] sm:$0xf]  ;;  %v3165_v21 = vrot.slane %v2404_v49, 5  ;;  %v2683_v35 = vsel %vm10463_vm1, %v2678_v22, %v2682_v8 }
 0x145   : > { %v5830_v2 = vsel %vm5828_vm0, %v9756_v27, 0  ;;  %9618 = vmatmul.msk.bf16.gmra.mxu1 %vm1339_vm12, %v3245_v36  ;;  %v10276_v27 = vld [vmem:[#allocation2 + $0x7c] sm:$0xf]  ;;  %v11220_v36 = vld [vmem:[#allocation2 + $0x94] sm:$0xf] }
 0x146   : > { %v2340_v10 = vadd.f32 %v11142_v30, %v2054_v63  ;;  %v11197_v29 = vpop.f32.mrf.mxu3  ;;  %5839 = vmatpush.bf16.msra.mxu1 %v5830_v2  ;;  %v3036_v30 = vld [vmem:[#allocation2 + $0x84] sm:$0xe]  ;;  %v2668_v63 = vrot.slane %v2667_v24, 4  ;;  %v1824_v7 = vrot.slane %v10276_v27, 5  ;;  %v3166_v24 = vsel %vm10906_vm9, %v3164_v20, %v3165_v21 }
 0x147   : > { %v9602_v4 = vrot.slane %v3036_v30, 9  ;;  %v2688_v2 = vshll.u32 %v2405_v38, 16  ;;  %v10277_v30 = vld [vmem:[#allocation2 + $0x80] sm:$0x1]  ;;  %v3225_v20 = vunpack.c.l.b16 %v3166_v24 }
 0x148   : > { %v2994_v6 = vadd.f32 %v2914_v55, %v2340_v10  ;;  %v1907_v10 = vpack.c.b16 %v1885_v16, %v1884_v43  ;;  %v2673_v26 = vsel %vm10463_vm1, %v2668_v63, %v11189_v32  ;;  %v9471_v43 = vrot.slane %v1711_v61, 9 }
 0x149   : > { %v11218_v49 = vpop.f32.mrf.mxu1  ;;  %v1826_v16 = vrot.slane %v1824_v7, 4  ;;  %v2690_v22 = vrot.slane %v2688_v2, 5  ;;  %v10178_v2 = vld [vmem:[#allocation2 + $0x90] sm:$0xff] }
 0x14a   : > { %v11211_v41 = vadd.f32 %v11164_v44, %v2994_v6 }
 0x14b   : > { %v1976_v55 = vpop.f32.mrf.mxu2  ;;  %9569 = vmatmul.msk.bf16.gmra.mxu3 %vm1339_vm12, %v10177_v13  ;;  %v3163_v13 = vsel %vm10906_vm9, %v9602_v4, %v3162_v54  ;;  %v2694_v54 = vshll.u32 %v11220_v36, 16 }
 0x14c   : > { %v2919_v34 = vpop.f32.mrf.mxu0  ;;  %v2055_v51 = vadd.f32 %v1976_v55, %v1624_v50  ;;  %v1827_v50 = vrot.slane %v10277_v30, 5  ;;  %v3224_v4 = vunpack.c.l.b16 %v3163_v13 }
 0x14e   : > { %v2341_v44 = vadd.f32 %v11162_v31, %v2055_v51  ;;  %v11216_v1 = vpop.f32.mrf.mxu3  ;;  %v2685_v31 = vshrl.u32 %v2405_v38, 16  ;;  %v2827_v51 = vunpack.c.l.b16 %v2683_v35  ;;  %v1828_v27 = vsel %vm10906_vm9, %v1826_v16, %v1827_v50 }
 0x14f   : > { %9585 = vmatmul.msk.bf16.gmra.mxu0 %vm1339_vm12, %v2847_v18  ;;  %v2698_v18 = vshrl.u32 %v11220_v36, 16  ;;  %v2696_v38 = vrot.slane %v2694_v54, 5  ;;  %v1629_v16 = vadd.f32 %v10929_v37, %v10951_v0 }
 0x150   : > { %9487 = vmatmul.msk.bf16.gmra.mxu2 %vm1339_vm12, %v1907_v10  ;;  %v2995_v6 = vadd.f32 %v2916_v19, %v2341_v44  ;;  %v2687_v63 = vrot.slane %v2685_v31, 4  ;;  %v2826_v19 = vunpack.c.l.b16 %v2673_v26  ;;  %v1825_v10 = vsel %vm10906_vm9, %v9471_v43, %v1824_v7  ;;  %v2407_v31 = vld [vmem:[#allocation2 + $0x98] sm:$0x1]  ;;  %v3037_v43 = vld [vmem:[#allocation2 + $0x90] sm:$0xe] }
 0x151   : > { %v2700_v61 = vrot.slane %v2698_v18, 4  ;;  %v3246_v44 = vpack.c.b16 %v3225_v20, %v3224_v4  ;;  %v11245_v24 = vpop.f32.mrf.mxu1  ;;  %v3169_v26 = vrot.slane %v11220_v36, 5  ;;  %v1887_v7 = vunpack.c.l.b16 %v1828_v27  ;;  %v2408_v18 = vld [vmem:[#allocation2 + $0x9c] sm:$0xf] }
 0x152   : > { %v11235_v32 = vadd.f32 %v11176_v25, %v2995_v6  ;;  %v1886_v6 = vunpack.c.l.b16 %v1825_v10  ;;  %v2848_v30 = vpack.c.b16 %v2827_v51, %v2826_v19  ;;  %v2704_v54 = vshll.u32 %v2407_v31, 16  ;;  %v1712_v19 = vld [vmem:[#allocation2 + $0x84] sm:$0xe]  ;;  %v11255_v10 = vld [vmem:[#allocation2 + $0xa0] sm:$0xf] }
 0x153   : > { %v1979_v55 = vpop.f32.mrf.mxu2  ;;  %v2701_v50 = vor.u32 %v2700_v61, %v2696_v38  ;;  %v9603_v4 = vrot.slane %v3037_v43, 9  ;;  %v3171_v20 = vrot.slane %v3169_v26, 4  ;;  %v2709_v27 = vshrl.u32 %v2408_v18, 16 }
 0x154   : > { %v2921_v21 = vpop.f32.mrf.mxu0  ;;  %v2056_v8 = vadd.f32 %v1979_v55, %v10932_v42  ;;  %v2691_v42 = vor.u32 %v2690_v22, %v2687_v63  ;;  %v3172_v55 = vrot.slane %v2407_v31, 5  ;;  %v10278_v22 = vld [vmem:[#allocation2 + $0x88] sm:$0xf]  ;;  %v1908_v0 = vpack.c.b16 %v1887_v7, %v1886_v6 }
 0x155   : > { %9619 = vmatmul.msk.bf16.gmra.mxu1 %vm1339_vm12, %v3246_v44  ;;  %v2702_v51 = vrot.slane %v2701_v50, 4  ;;  %v9472_v6 = vrot.slane %v1712_v19, 9  ;;  %v2722_v50 = vshrl.u32 %v11255_v10, 16 }
 0x156   : > { %v2342_v25 = vadd.f32 %v11174_v58, %v2056_v8  ;;  %v11243_v13 = vpop.f32.mrf.mxu3  ;;  %v2692_v63 = vrot.slane %v2691_v42, 4  ;;  %v1831_v8 = vrot.slane %v10278_v22, 5  ;;  %v3173_v42 = vsel %vm10906_vm9, %v3171_v20, %v3172_v55 }
 0x158   : > { %v2996_v35 = vadd.f32 %v2919_v34, %v2342_v25  ;;  %v2706_v25 = vrot.slane %v2704_v54, 5  ;;  %v1833_v7 = vrot.slane %v1831_v8, 4  ;;  %v2711_v54 = vrot.slane %v2709_v27, 4  ;;  %v2410_v27 = vld [vmem:[#allocation2 + $0xa4] sm:$0x1] }
 0x159   : > { %v11261_v31 = vpop.f32.mrf.mxu1  ;;  %v1832_v22 = vsel %vm10906_vm9, %v9472_v6, %v1831_v8  ;;  %v3176_v8 = vrot.slane %v11255_v10, 5 }
 0x15a   : > { %v11252_v58 = vadd.f32 %v11199_v39, %v2996_v35  ;;  %v2712_v39 = vshll.u32 %v2408_v18, 16  ;;  %v2697_v35 = vsel %vm10463_vm1, %v2692_v63, %v2696_v38  ;;  %v2707_v38 = vsel %vm10463_vm1, %v2702_v51, %v2706_v25 }
 0x15b   : > { %v1981_v34 = vpop.f32.mrf.mxu2  ;;  %9570 = vmatmul.msk.bf16.gmra.mxu3 %vm1339_vm12, %v10178_v2  ;;  %v3170_v2 = vsel %vm10906_vm9, %v9603_v4, %v3169_v26  ;;  %v3227_v4 = vunpack.c.l.b16 %v3173_v42  ;;  %v2829_v19 = vunpack.c.l.b16 %v2707_v38  ;;  %v10179_v42 = vld [vmem:[#allocation2 + $0x9c] sm:$0xff]  ;;  %v3179_v38 = vrot.slane %v2410_v27, 5 }
 0x15c   : > { %v2924_v36 = vpop.f32.mrf.mxu0  ;;  %v2057_v37 = vadd.f32 %v1981_v34, %v1629_v16  ;;  %v2714_v18 = vrot.slane %v2712_v39, 5  ;;  %v3226_v26 = vunpack.c.l.b16 %v3170_v2 }
 0x15e   : > { %v2343_v61 = vadd.f32 %v11197_v29, %v2057_v37  ;;  %v11259_v44 = vpop.f32.mrf.mxu3  ;;  %v10279_v29 = vld [vmem:[#allocation2 + $0x8c] sm:$0x1]  ;;  %v2715_v39 = vor.u32 %v2714_v18, %v2711_v54  ;;  %v10280_v54 = vld [vmem:[#allocation2 + $0x94] sm:$0xf] }
 0x15f   : > { %9586 = vmatmul.msk.bf16.gmra.mxu0 %vm1339_vm12, %v2848_v30  ;;  %v1834_v16 = vrot.slane %v10279_v29, 5  ;;  %v2718_v30 = vshll.u32 %v11255_v10, 16  ;;  %v2728_v29 = vshll.u32 %v2410_v27, 16  ;;  %v1838_v18 = vrot.slane %v10280_v54, 5  ;;  %v1713_v10 = vld [vmem:[#allocation2 + $0x90] sm:$0xe] }
 0x160   : > { %9488 = vmatmul.msk.bf16.gmra.mxu2 %vm1339_vm12, %v1908_v0  ;;  %v2997_v43 = vadd.f32 %v2921_v21, %v2343_v61  ;;  %v2828_v21 = vunpack.c.l.b16 %v2697_v35  ;;  %v2724_v0 = vrot.slane %v2722_v50, 4  ;;  %v3247_v61 = vpack.c.b16 %v3227_v4, %v3226_v26 }
 0x161   : > { %v11282_v37 = vrot.slane %v2718_v30, 5  ;;  %v11289_v2 = vpop.f32.mrf.mxu1  ;;  %v2411_v30 = vld [vmem:[#allocation2 + $0xa8] sm:$0xf]  ;;  %v3178_v4 = vrot.slane %v3176_v8, 4  ;;  %v1840_v27 = vrot.slane %v1838_v18, 4 }
 0x162   : > { %v11273_v20 = vadd.f32 %v11218_v49, %v2997_v43  ;;  %v1835_v49 = vsel %vm10906_vm9, %v1833_v7, %v1834_v16  ;;  %v3038_v7 = vld [vmem:[#allocation2 + $0x9c] sm:$0xe]  ;;  %v1634_v16 = vadd.f32 %v10962_v12, %v10980_v17  ;;  %v2849_v50 = vpack.c.b16 %v2829_v19, %v2828_v21 }
 0x163   : > { %v1984_v34 = vpop.f32.mrf.mxu2  ;;  %v1889_v6 = vunpack.c.l.b16 %v1835_v49  ;;  %v2725_v43 = vor.u32 %v2724_v0, %v11282_v37  ;;  %v2733_v12 = vshrl.u32 %v2411_v30, 16  ;;  %v2736_v17 = vshll.u32 %v2411_v30, 16 }
 0x164   : > { %v11277_v55 = vpop.f32.mrf.mxu0  ;;  %v2058_v63 = vadd.f32 %v1984_v34, %v10969_v45  ;;  %v1888_v45 = vunpack.c.l.b16 %v1832_v22  ;;  %v11302_v22 = vld [vmem:[#allocation2 + $0xac] sm:$0xf]  ;;  %v2730_v49 = vrot.slane %v2728_v29, 5 }
 0x165   : > { %9620 = vmatmul.msk.bf16.gmra.mxu1 %vm1339_vm12, %v3247_v61  ;;  %v2726_v19 = vrot.slane %v2725_v43, 4  ;;  %v10281_v61 = vld [vmem:[#allocation2 + $0x98] sm:$0x1]  ;;  %v287_v43 = vld [vmem:[#allocation2 + $0xc0] sm:$0x1]  ;;  %v2735_v29 = vrot.slane %v2733_v12, 4 }
 0x166   : > { %v2344_v51 = vadd.f32 %v11216_v1, %v2058_v63  ;;  %v11287_v25 = vpop.f32.mrf.mxu3  ;;  %v2716_v1 = vrot.slane %v2715_v39, 4  ;;  %v1909_v0 = vpack.c.b16 %v1889_v6, %v1888_v45  ;;  %v9473_v39 = vrot.slane %v1713_v10, 9 }
 0x167   : > { %v2742_v45 = vshll.u32 %v11302_v22, 16 }
 0x168   : > { %v2998_v35 = vadd.f32 %v2924_v36, %v2344_v51  ;;  %v9604_v36 = vrot.slane %v3038_v7, 9  ;;  %v1841_v51 = vrot.slane %v10281_v61, 5  ;;  %v2738_v7 = vrot.slane %v2736_v17, 5  ;;  %v11338_v61 = vld [vmem:[#allocation2 + $0xb0] sm:$0x1] }
 0x169   : > { %v11311_v30 = vpop.f32.mrf.mxu1 }
 0x16a   : > { %v11297_v26 = vadd.f32 %v11245_v24, %v2998_v35  ;;  %v2721_v24 = vsel %vm10463_vm1, %v2716_v1, %v11282_v37  ;;  %v3177_v6 = vsel %vm10906_vm9, %v9604_v36, %v3176_v8  ;;  %v3180_v37 = vsel %vm10906_vm9, %v3178_v4, %v3179_v38  ;;  %v380_v1 = vld [vmem:[%s10369_s28 + $0xf8] sm:$0xff] }
 0x16b   : > { %v1986_v63 = vpop.f32.mrf.mxu2  ;;  %9571 = vmatmul.msk.bf16.gmra.mxu3 %vm1339_vm12, %v10179_v42  ;;  %v2731_v8 = vsel %vm10463_vm1, %v2726_v19, %v2730_v49  ;;  %v11327_v36 = vunpack.c.l.b16 %v2721_v24  ;;  %v1839_v4 = vsel %vm10906_vm9, %v9473_v39, %v1838_v18  ;;  %v3228_v38 = vunpack.c.l.b16 %v3177_v6 }
 0x16c   : > { %v11299_v34 = vpop.f32.mrf.mxu0  ;;  %v2059_v21 = vadd.f32 %v1986_v63, %v1634_v16  ;;  %v2746_v16 = vshrl.u32 %v11302_v22, 16  ;;  %v3229_v63 = vunpack.c.l.b16 %v3180_v37  ;;  %v1842_v17 = vsel %vm10906_vm9, %v1840_v27, %v1841_v51 }
 0x16d   : > { %v2831_v49 = vunpack.c.l.b16 %v2731_v8  ;;  %v2739_v24 = vor.u32 %v2738_v7, %v2735_v29 }
 0x16e   : > { %v2345_v42 = vadd.f32 %v11243_v13, %v2059_v21  ;;  %v11309_v35 = vpop.f32.mrf.mxu3  ;;  %v288_v13 = vsel %vm10350_vm3, 0, %v287_v43  ;;  %v412_v21 = vpack.c.bf16 %v380_v1, %v380_v1  ;;  %v2748_v18 = vrot.slane %v2746_v16, 4 }
 0x16f   : > { %9587 = vmatmul.msk.bf16.gmra.mxu0 %vm1339_vm12, %v2849_v50  ;;  %v379_v50 = vld [vmem:[%s10369_s28 + $0xf0] sm:$0xff]  ;;  %289 = vst [vmem:[#allocation2 + $0xc0] sm:$0x1] %v288_v13  ;;  %v1890_v43 = vunpack.c.l.b16 %v1839_v4  ;;  %v1891_v13 = vunpack.c.l.b16 %v1842_v17  ;;  %v3248_v27 = vpack.c.b16 %v3229_v63, %v3228_v38  ;;  %v11351_v16 = vrot.slane %v2739_v24, 4  ;;  %v3039_v17 = vld [vmem:[#allocation2 + $0xa8] sm:$0xe] }
 0x170   : > { %9489 = vmatmul.msk.bf16.gmra.mxu2 %vm1339_vm12, %v1909_v0  ;;  %v2999_v54 = vadd.f32 %v11277_v55, %v2345_v42  ;;  %v411_v10 = vpack.c.bf16 %v379_v50, %v379_v50  ;;  %v11340_v42 = vrot.slane %v2742_v45, 5  ;;  %v679_v37 = vshrl.u32 %v412_v21, 16  ;;  %v343_v50 = vld [vmem:[#allocation2 + $0xc8] sm:$0x1] }
 0x171   : > { %v682_v51 = vshll.u32 %v412_v21, 16  ;;  %v11346_v8 = vpop.f32.mrf.mxu1  ;;  %v2752_v45 = vshll.u32 %v11338_v61, 16  ;;  %v3183_v4 = vrot.slane %v11302_v22, 5  ;;  %v1639_v24 = vadd.f32 %v10989_v23, %v11008_v11  ;;  %v2414_v22 = vld [vmem:[#allocation2 + $0xb4] sm:$0xf] }
 0x172   : > { %v11332_v12 = vadd.f32 %v11261_v31, %v2999_v54  ;;  %v671_v55 = vshrl.u32 %v411_v10, 16  ;;  %v674_v31 = vshll.u32 %v411_v10, 16  ;;  %v11349_v7 = vrot.slane %v679_v37, 7 }
 0x173   : > { %v1989_v19 = vpop.f32.mrf.mxu2  ;;  %v2749_v10 = vor.u32 %v2748_v18, %v11340_v42  ;;  %v2850_v18 = vpack.c.b16 %v2831_v49, %v11327_v36  ;;  %v3185_v33 = vrot.slane %v3183_v4, 4  ;;  %v2754_v11 = vrot.slane %v2752_v45, 5  ;;  %v10282_v36 = vld [vmem:[#allocation2 + $0xa0] sm:$0xf] }
 0x174   : > { %v11336_v0 = vpop.f32.mrf.mxu0  ;;  %v2060_v39 = vadd.f32 %v1989_v19, %v10999_v53  ;;  %v673_v6 = vrot.slane %v671_v55, 7  ;;  %v10180_v53 = vld [vmem:[#allocation2 + $0xa8] sm:$0xff]  ;;  %v684_v21 = vor.u32 %v682_v51, %v11349_v7  ;;  %v344_v19 = vsel %vm10358_vm6, 0, %v343_v50 }
 0x175   : > { %9621 = vmatmul.msk.bf16.gmra.mxu1 %vm1339_vm12, %v3248_v27  ;;  %345 = vst [vmem:[#allocation2 + $0xc8] sm:$0x1] %v344_v19  ;;  %v2750_v23 = vrot.slane %v2749_v10, 4  ;;  %v1845_v49 = vrot.slane %v10282_v36, 5 }
 0x176   : > { %v2346_v1 = vadd.f32 %v11259_v44, %v2060_v39  ;;  %v11344_v54 = vpop.f32.mrf.mxu3  ;;  %v676_v29 = vor.u32 %v674_v31, %v673_v6  ;;  %v677_v38 = vrot.slane %v673_v6, 4  ;;  %v846_v63 = vld [vmem:[#allocation2 + $0xc0] sm:$0xf]  ;;  %v11365_v39 = vld [vmem:[#allocation2 + $0xb8] sm:$0xf]  ;;  %v9605_v6 = vrot.slane %v3039_v17, 9 }
 0x177   : > { %v3186_v31 = vrot.slane %v11338_v61, 5  ;;  %v2766_v61 = vshll.u32 %v11365_v39, 16  ;;  %v2745_v17 = vsel %vm10463_vm1, %v11351_v16, %v11340_v42  ;;  %v2416_v16 = vld [vmem:[#allocation2 + $0xbc] sm:$0x1] }
 0x178   : > { %v3000_v44 = vadd.f32 %v11299_v34, %v2346_v1  ;;  %v847_v55 = vsel %vm10402_vm11, %v676_v29, %v846_v63  ;;  %v685_v27 = vsel %vm10396_vm10, %v677_v38, %v684_v21  ;;  %v1910_v1 = vpack.c.b16 %v1891_v13, %v1890_v43  ;;  %vm11927_vm11 = vmand %vm227_vm5, %vm293_vm4 }
 0x179   : > { %848 = vst [vmem:[#allocation2 + $0xc0] sm:$0xf] %v847_v55  ;;  %v2757_v29 = vshrl.u32 %v2414_v22, 16  ;;  %v2760_v63 = vshll.u32 %v2414_v22, 16  ;;  %v11381_v10 = vpop.f32.mrf.mxu1  ;;  %v3184_v43 = vsel %vm10906_vm9, %v9605_v6, %v3183_v4  ;;  %v3187_v13 = vsel %vm10906_vm9, %v3185_v33, %v3186_v31  ;;  %v10283_v4 = vld [vmem:[#allocation2 + $0xa4] sm:$0x1] }
 0x17a   : > { %v11368_v34 = vadd.f32 %v11289_v2, %v3000_v44  ;;  %v1714_v2 = vld [vmem:[#allocation2 + $0x9c] sm:$0xe]  ;;  %849 = vst.msk [vmem:[#allocation2 + $0xc4] sm:$0xf] %vm736_vm7, %v685_v27  ;;  %v2770_v44 = vshrl.u32 %v11365_v39, 16  ;;  %v686_v38 = vrot.slane %v11349_v7, 4  ;;  %v3230_v33 = vunpack.c.l.b16 %v3184_v43 }
 0x17b   : > { %v1991_v51 = vpop.f32.mrf.mxu2  ;;  %9572 = vmatmul.msk.bf16.gmra.mxu3 %vm1339_vm12, %v10180_v53  ;;  %v9474_v21 = vrot.slane %v1714_v2, 9  ;;  %v1847_v55 = vrot.slane %v1845_v49, 4  ;;  %v2762_v22 = vrot.slane %v2760_v63, 5  ;;  %v11396_v6 = vrot.slane %v2766_v61, 5  ;;  %v10181_v43 = vld [vmem:[#allocation2 + $0xb4] sm:$0xff] }
 0x17c   : > { %v2934_v37 = vpop.f32.mrf.mxu0  ;;  %v2061_v50 = vadd.f32 %v1991_v51, %v1639_v24  ;;  %v1848_v24 = vrot.slane %v10283_v4, 5  ;;  %v2772_v7 = vrot.slane %v2770_v44, 4  ;;  %v3231_v31 = vunpack.c.l.b16 %v3187_v13  ;;  %v850_v51 = vld [vmem:[#allocation2 + $0xc8] sm:$0x1]  ;;  %v10284_v4 = vld [vmem:[#allocation2 + $0xac] sm:$0xf] }
 0x17d   : > { %v2776_v63 = vshll.u32 %v2416_v16, 16  ;;  %vm5779_vm7 = vcmask 64512  }
 0x17e   : > { %v2347_v45 = vadd.f32 %v11287_v25, %v2061_v50  ;;  %v11379_v53 = vpop.f32.mrf.mxu3  ;;  %v2755_v25 = vsel %vm10463_vm1, %v2750_v23, %v2754_v11  ;;  %v851_v23 = vsel %vm10421_vm15, %v686_v38, %v850_v51  ;;  %v1849_v2 = vsel %vm10906_vm9, %v1847_v55, %v1848_v24 }
 0x17f   : > { %9588 = vmatmul.msk.bf16.gmra.mxu0 %vm1339_vm12, %v2850_v18  ;;  %v2759_v18 = vrot.slane %v2757_v29, 4  ;;  %852 = vst [vmem:[#allocation2 + $0xc8] sm:$0x1] %v851_v23  ;;  %v2833_v50 = vunpack.c.l.b16 %v2755_v25  ;;  %v3249_v61 = vpack.c.b16 %v3231_v31, %v3230_v33  ;;  %v3040_v25 = vld [vmem:[#allocation2 + $0xb4] sm:$0xe]  ;;  %v1852_v24 = vrot.slane %v10284_v4, 5 }
 0x180   : > { %9490 = vmatmul.msk.bf16.gmra.mxu2 %vm1339_vm12, %v1910_v1  ;;  %v3001_v19 = vadd.f32 %v11336_v0, %v2347_v45  ;;  %v2832_v0 = vunpack.c.l.b16 %v2745_v17  ;;  %v1846_v1 = vsel %vm10906_vm9, %v9474_v21, %v1845_v49  ;;  %v1893_v17 = vunpack.c.l.b16 %v1849_v2  ;;  %v3711_v23 = vld [vmem:[#allocation2 + $0x18] sm:$0xf] }
 0x181   : > { %v2763_v29 = vor.u32 %v2762_v22, %v2759_v18  ;;  %v11412_v45 = vpop.f32.mrf.mxu1  ;;  %v1892_v49 = vunpack.c.l.b16 %v1846_v1  ;;  %v1715_v18 = vld [vmem:[#allocation2 + $0xa8] sm:$0xe]  ;;  %v9606_v22 = vrot.slane %v3040_v25, 9  ;;  %v3193_v33 = vrot.slane %v2416_v16, 5  ;;  %v11428_v16 = vld [vmem:[#allocation2 + $0xc4] sm:$0xf] }
 0x182   : > { %v11399_v42 = vadd.f32 %v11311_v30, %v3001_v19  ;;  %v2773_v30 = vor.u32 %v2772_v7, %v11396_v6  ;;  %v2851_v38 = vpack.c.b16 %v2833_v50, %v2832_v0  ;;  %v2778_v19 = vrot.slane %v2776_v63, 5  ;;  %v2417_v50 = vld [vmem:[#allocation2 + $0xc0] sm:$0xf]  ;;  %v10285_v63 = vld [vmem:[#allocation2 + $0xb0] sm:$0x1] }
 0x183   : > { %v1994_v36 = vpop.f32.mrf.mxu2  ;;  %v2764_v21 = vrot.slane %v2763_v29, 4  ;;  %v1911_v51 = vpack.c.b16 %v1893_v17, %v1892_v49  ;;  %v1854_v2 = vrot.slane %v1852_v24, 4  ;;  %v2784_v49 = vshll.u32 %v2417_v50, 16 }
 0x184   : > { %v2936_v11 = vpop.f32.mrf.mxu0  ;;  %v2062_v27 = vadd.f32 %v1994_v36, %v11037_v57  ;;  %v3190_v57 = vrot.slane %v11365_v39, 5  ;;  %v2774_v55 = vrot.slane %v2773_v30, 4  ;;  %v11421_v36 = vld [vmem:[#allocation2 + $0x1c] sm:$0xf]  ;;  %v2790_v17 = vshll.u32 %v11428_v16, 16 }
 0x185   : > { %9622 = vmatmul.msk.bf16.gmra.mxu1 %vm1339_vm12, %v3249_v61  ;;  %v2769_v0 = vsel %vm10463_vm1, %v2764_v21, %v11396_v6  ;;  %v1855_v61 = vrot.slane %v10285_v63, 5  ;;  %v2794_v25 = vshrl.u32 %v11428_v16, 16 }
 0x186   : > { %v2348_v56 = vadd.f32 %v11309_v35, %v2062_v27  ;;  %v11410_v44 = vpop.f32.mrf.mxu3  ;;  %v3192_v7 = vrot.slane %v3190_v57, 4  ;;  %v9475_v27 = vrot.slane %v1715_v18, 9  ;;  %v3191_v30 = vsel %vm10906_vm9, %v9606_v22, %v3190_v57 }
 0x187   : > { %v3232_v57 = vunpack.c.l.b16 %v3191_v30  ;;  %v2796_v30 = vrot.slane %v2794_v25, 4  ;;  %v3197_v25 = vrot.slane %v11428_v16, 5 }
 0x188   : > { %v3002_v13 = vadd.f32 %v2934_v37, %v2348_v56  ;;  %v3194_v6 = vsel %vm10906_vm9, %v3192_v7, %v3193_v33  ;;  %v3760_v56 = vshrl.u32 %v3711_v23, 16 }
 0x189   : > { %v11434_v29 = vpop.f32.mrf.mxu1  ;;  %v3233_v21 = vunpack.c.l.b16 %v3194_v6 }
 0x18a   : > { %v11417_v35 = vadd.f32 %v11346_v8, %v3002_v13  ;;  %v2779_v8 = vsel %vm10463_vm1, %v2774_v55, %v2778_v19  ;;  %14423 = vst [vmem:[#allocation19_spill] sm:$0xff] %v11434_v29  ;;  %v3769_v13 = vshll.u32 %v11421_v36, 16  ;;  %v3773_v55 = vshrl.u32 %v11421_v36, 16  ;;  %v11475_v29 = vld [vmem:[#allocation2 + $0x28] sm:$0xf] }
 0x18b   : > { %v1996_v37 = vpop.f32.mrf.mxu2  ;;  %9573 = vmatmul.msk.bf16.gmra.mxu3 %vm1339_vm12, %v10181_v43  ;;  %v3763_v43 = vshll.u32 %v3711_v23, 16  ;;  %v2834_v19 = vunpack.c.l.b16 %v2769_v0  ;;  %v2835_v4 = vunpack.c.l.b16 %v2779_v8  ;;  %v3762_v7 = vrot.slane %v3760_v56, 4 }
 0x18c   : > { %v2939_v39 = vpop.f32.mrf.mxu0  ;;  %v2063_v31 = vadd.f32 %v1996_v37, %v11050_v62  ;;  %v11449_v37 = vrot.slane %v3769_v13, 5  ;;  %v1856_v23 = vsel %vm10906_vm9, %v1854_v2, %v1855_v61  ;;  %v2786_v0 = vrot.slane %v2784_v49, 5  ;;  %v10182_v13 = vld [vmem:[#allocation2 + $0xc0] sm:$0xff] }
 0x18d   : > { %v3765_v33 = vrot.slane %v3763_v43, 5  ;;  %v11458_v8 = vrot.slane %v2790_v17, 5  ;;  %v3250_v6 = vpack.c.b16 %v3233_v21, %v3232_v57  ;;  %v1895_v49 = vunpack.c.l.b16 %v1856_v23  ;;  %v3041_v17 = vld [vmem:[#allocation2 + $0xc0] sm:$0xe] }
 0x18e   : > { %v2349_v1 = vadd.f32 %v11344_v54, %v2063_v31  ;;  %v11432_v62 = vpop.f32.mrf.mxu3  ;;  %v2852_v57 = vpack.c.b16 %v2835_v4, %v2834_v19 }
 0x18f   : > { %9589 = vmatmul.msk.bf16.gmra.mxu0 %vm1339_vm12, %v2851_v38  ;;  %v2781_v38 = vshrl.u32 %v2417_v50, 16 }
 0x190   : > { %9491 = vmatmul.msk.bf16.gmra.mxu2 %vm1339_vm12, %v1911_v51  ;;  %v11442_v54 = vadd.f32 %v2936_v11, %v2349_v1  ;;  %v3775_v11 = vrot.slane %v3773_v55, 4  ;;  %v1853_v51 = vsel %vm10906_vm9, %v9475_v27, %v1852_v24  ;;  %v11456_v1 = vld [vmem:[#allocation2 + $0x20] sm:$0x1]  ;;  %v3766_v24 = vor.u32 %v3765_v33, %v3762_v7  ;;  %v1716_v7 = vld [vmem:[#allocation2 + $0xb4] sm:$0xe] }
 0x191   : > { %v2783_v50 = vrot.slane %v2781_v38, 4  ;;  %v3779_v2 = vshll.u32 %v11456_v1, 16  ;;  %v1894_v38 = vunpack.c.l.b16 %v1853_v51  ;;  %v10286_v33 = vld [vmem:[#allocation2 + $0xb8] sm:$0xf] }
 0x192   : > { %v11463_v43 = vpop.f32.mrf.mxu1  ;;  %v3776_v27 = vor.u32 %v3775_v11, %v11449_v37  ;;  %v1859_v11 = vrot.slane %v10286_v33, 5  ;;  %v3767_v16 = vrot.slane %v3766_v24, 4 }
 0x193   : > { %v1999_v22 = vpop.f32.mrf.mxu2  ;;  %v2787_v21 = vor.u32 %v2786_v0, %v2783_v50  ;;  %v3781_v4 = vrot.slane %v3779_v2, 5  ;;  %v3199_v50 = vrot.slane %v3197_v25, 4  ;;  %v10287_v2 = vld [vmem:[#allocation2 + $0xbc] sm:$0x1] }
 0x194   : > { %v11447_v18 = vpop.f32.mrf.mxu0  ;;  %v2064_v31 = vadd.f32 %v1999_v22, %v11073_v60  ;;  %v2419_v60 = vld [vmem:[#allocation2 + $0xc8] sm:$0x1]  ;;  %v3777_v19 = vrot.slane %v3776_v27, 4 }
 0x195   : > { %v2800_v55 = vshll.u32 %v2419_v60, 16  ;;  %9623 = vmatmul.msk.bf16.gmra.mxu1 %vm1339_vm12, %v3250_v6  ;;  %v3714_v6 = vld [vmem:[#allocation2 + $0x24] sm:$0xf] }
 0x196   : > { %v2350_v63 = vadd.f32 %v11379_v53, %v2064_v31  ;;  %v11461_v56 = vpop.f32.mrf.mxu3  ;;  %v2797_v53 = vor.u32 %v2796_v30, %v11458_v8  ;;  %v9607_v31 = vrot.slane %v3041_v17, 9  ;;  %v1912_v30 = vpack.c.b16 %v1895_v49, %v1894_v38 }
 0x197   : > { %v1862_v38 = vrot.slane %v10287_v2, 5  ;;  %v3772_v49 = vsel %vm10463_vm1, %v3767_v16, %v11449_v37 }
 0x198   : > { %v3004_v61 = vadd.f32 %v2939_v39, %v2350_v63  ;;  %v3200_v39 = vrot.slane %v2419_v60, 5  ;;  %v2788_v63 = vrot.slane %v2787_v21, 4 }
 0x19a   : > { %v11471_v22 = vadd.f32 %v11412_v45, %v3004_v61  ;;  %v2798_v45 = vrot.slane %v2797_v53, 4  ;;  %v2802_v61 = vrot.slane %v2800_v55, 5  ;;  %v11481_v24 = vpop.f32.mrf.mxu1  ;;  %v3201_v27 = vsel %vm10906_vm9, %v3199_v50, %v3200_v39 }
 0x19b   : > { %v2001_v23 = vpop.f32.mrf.mxu2  ;;  %9574 = vmatmul.msk.bf16.gmra.mxu3 %vm1339_vm12, %v10182_v13  ;;  %v1861_v13 = vrot.slane %v1859_v11, 4  ;;  %v3787_v53 = vshll.u32 %v3714_v6, 16  ;;  %v3797_v55 = vshrl.u32 %v11475_v29, 16  ;;  %v3235_v33 = vunpack.c.l.b16 %v3201_v27 }
 0x19c   : > { %14424 = vst [vmem:[#allocation20_spill] sm:$0xff] %v11471_v22  ;;  %v2944_v51 = vpop.f32.mrf.mxu0  ;;  %v2065_v0 = vadd.f32 %v2001_v23, %v11094_v15  ;;  %v9476_v22 = vrot.slane %v1716_v7, 9  ;;  %v3198_v15 = vsel %vm10906_vm9, %v9607_v31, %v3197_v25  ;;  %v3793_v25 = vshll.u32 %v11475_v29, 16 }
 0x19d   : > { %v3234_v7 = vunpack.c.l.b16 %v3198_v15  ;;  %v2793_v37 = vsel %vm10463_vm1, %v2788_v63, %v11458_v8  ;;  %v2803_v31 = vsel %vm10463_vm1, %v2798_v45, %v2802_v61  ;;  %v1863_v16 = vsel %vm10906_vm9, %v1861_v13, %v1862_v38  ;;  %v11508_v63 = vld [vmem:[#allocation2 + $0x2c] sm:$0x1] }
 0x19e   : > { %v2351_v60 = vadd.f32 %v11410_v44, %v2065_v0  ;;  %v11479_v17 = vpop.f32.mrf.mxu3  ;;  %v3782_v44 = vsel %vm10463_vm1, %v3777_v19, %v3781_v4  ;;  %v1860_v39 = vsel %vm10906_vm9, %v9476_v22, %v1859_v11  ;;  %v4145_v19 = vunpack.c.l.b16 %v3772_v49 }
 0x19f   : > { %9590 = vmatmul.msk.bf16.gmra.mxu0 %vm1339_vm12, %v2852_v57  ;;  %v3784_v57 = vshrl.u32 %v3714_v6, 16  ;;  %v4146_v4 = vunpack.c.l.b16 %v3782_v44  ;;  %v3795_v6 = vrot.slane %v3793_v25, 5  ;;  %v3251_v8 = vpack.c.b16 %v3235_v33, %v3234_v7  ;;  %v4365_v25 = vld [vmem:[#allocation2 + $0x18] sm:$0xe] }
 0x1a0   : > { %9492 = vmatmul.msk.bf16.gmra.mxu2 %vm1339_vm12, %v1912_v30  ;;  %v11494_v21 = vadd.f32 %v11447_v18, %v2351_v60  ;;  %v3789_v30 = vrot.slane %v3787_v53, 5  ;;  %v3799_v60 = vrot.slane %v3797_v55, 4  ;;  %v2836_v61 = vunpack.c.l.b16 %v2793_v37  ;;  %v3717_v55 = vld [vmem:[#allocation2 + $0x30] sm:$0xf] }
 0x1a1   : > { %v3786_v50 = vrot.slane %v3784_v57, 4  ;;  %v2837_v22 = vunpack.c.l.b16 %v2803_v31  ;;  %v1896_v27 = vunpack.c.l.b16 %v1860_v39  ;;  %v1897_v13 = vunpack.c.l.b16 %v1863_v16 }
 0x1a2   : > { %v3347_v15 = vpop.f32.mrf.mxu1  ;;  %v4177_v2 = vpack.c.b16 %v4146_v4, %v4145_v19  ;;  %v3800_v44 = vor.u32 %v3799_v60, %v3795_v6  ;;  %v4431_v57 = vrot.slane %v11421_v36, 5  ;;  %v9723_v16 = vrot.slane %v4365_v25, 9 }
 0x1a3   : > { %v2004_v18 = vpop.f32.mrf.mxu2  ;;  %v3790_v49 = vor.u32 %v3789_v30, %v3786_v50  ;;  %v1913_v37 = vpack.c.b16 %v1897_v13, %v1896_v27  ;;  %v3808_v4 = vshrl.u32 %v3717_v55, 16  ;;  %v3811_v60 = vshll.u32 %v3717_v55, 16 }
 0x1a4   : > { %v2946_v23 = vpop.f32.mrf.mxu0  ;;  %v2066_v0 = vadd.f32 %v2004_v18, %v11107_v40  ;;  %v3803_v40 = vshll.u32 %v11508_v63, 16  ;;  %v3801_v18 = vrot.slane %v3800_v44, 4  ;;  %v4433_v19 = vrot.slane %v4431_v57, 4 }
 0x1a5   : > { %9624 = vmatmul.msk.bf16.gmra.mxu1 %vm1339_vm12, %v3251_v8  ;;  %v3791_v39 = vrot.slane %v3790_v49, 4  ;;  %v3810_v27 = vrot.slane %v3808_v4, 4  ;;  %v3813_v13 = vrot.slane %v3811_v60, 5 }
 0x1a6   : > { %v2352_v45 = vadd.f32 %v11432_v62, %v2066_v0  ;;  %v11511_v11 = vpop.f32.mrf.mxu3  ;;  %v2853_v62 = vpack.c.b16 %v2837_v22, %v2836_v61  ;;  %v3805_v36 = vrot.slane %v3803_v40, 5 }
 0x1a8   : > { %v3006_v38 = vadd.f32 %v2944_v51, %v2352_v45  ;;  %v11520_v51 = vld [vmem:[#allocation2 + $0x34] sm:$0xf]  ;;  %v3806_v61 = vsel %vm10463_vm1, %v3801_v18, %v3805_v36 }
 0x1a9   : > { %v3817_v8 = vshll.u32 %v11520_v51, 16  ;;  %v4148_v40 = vunpack.c.l.b16 %v3806_v61  ;;  %v10183_v61 = vld [vmem:[#allocation2 + $0x18] sm:$0xff] }
 0x1aa   : > { %v11517_v53 = vadd.f32 %v11463_v43, %v3006_v38  ;;  %v4434_v43 = vrot.slane %v11456_v1, 5  ;;  %v11528_v30 = vpop.f32.mrf.mxu1  ;;  %v3796_v1 = vsel %vm10463_vm1, %v3791_v39, %v3795_v6 }
 0x1ab   : > { %v2006_v33 = vpop.f32.mrf.mxu2  ;;  %9707 = vmatmul.msk.bf16.vlgmr.msra.gmra.mxu3 %vm1339_vm12, %v4177_v2  ;;  %v3819_v2 = vrot.slane %v3817_v8, 5 }
 0x1ac   : > { %v2949_v7 = vpop.f32.mrf.mxu0  ;;  %v2067_v31 = vadd.f32 %v2006_v33, %v11126_v14  ;;  %v3821_v14 = vshrl.u32 %v11520_v51, 16  ;;  %v4435_v22 = vsel %vm10906_vm9, %v4433_v19, %v4434_v43  ;;  %v4438_v43 = vrot.slane %v11475_v29, 5 }
 0x1ad   : > { %v4544_v55 = vunpack.c.l.b16 %v4435_v22  ;;  %v11555_v22 = vld [vmem:[#allocation2 + $0x40] sm:$0xf] }
 0x1ae   : > { %v2353_v50 = vadd.f32 %v11461_v56, %v2067_v31  ;;  %v11526_v0 = vpop.f32.mrf.mxu3  ;;  %v4432_v56 = vsel %vm10906_vm9, %v9723_v16, %v4431_v57  ;;  %v3823_v38 = vrot.slane %v3821_v14, 4  ;;  %v3814_v31 = vor.u32 %v3813_v13, %v3810_v27 }
 0x1af   : > { %9591 = vmatmul.msk.bf16.gmra.mxu0 %vm1339_vm12, %v2853_v62  ;;  %v11543_v62 = vld [vmem:[#allocation2 + $0x38] sm:$0x1]  ;;  %v4543_v25 = vunpack.c.l.b16 %v4432_v56  ;;  %v3720_v56 = vld [vmem:[#allocation2 + $0x3c] sm:$0xf]  ;;  %v4440_v27 = vrot.slane %v4438_v43, 4  ;;  %v4441_v13 = vrot.slane %v11508_v63, 5 }
 0x1b0   : > { %9493 = vmatmul.msk.bf16.gmra.mxu2 %vm1339_vm12, %v1913_v37  ;;  %v11533_v45 = vadd.f32 %v2946_v23, %v2353_v50  ;;  %v4147_v23 = vunpack.c.l.b16 %v3796_v1  ;;  %v3824_v39 = vor.u32 %v3823_v38, %v3819_v2  ;;  %v3827_v18 = vshll.u32 %v11543_v62, 16  ;;  %v4366_v50 = vld [vmem:[#allocation2 + $0x24] sm:$0xe] }
 0x1b1   : > { %v4575_v19 = vpack.c.b16 %v4544_v55, %v4543_v25  ;;  %v3845_v25 = vshrl.u32 %v11555_v22, 16  ;;  %v4442_v55 = vsel %vm10906_vm9, %v4440_v27, %v4441_v13 }
 0x1b2   : > { %v3352_v37 = vpop.f32.mrf.mxu1  ;;  %v4178_v36 = vpack.c.b16 %v4148_v40, %v4147_v23  ;;  %v3825_v60 = vrot.slane %v3824_v39, 4  ;;  %v3829_v8 = vrot.slane %v3827_v18, 5  ;;  %v3832_v23 = vshrl.u32 %v3720_v56, 16 }
 0x1b3   : > { %v2009_v44 = vpop.f32.mrf.mxu2  ;;  %v3835_v40 = vshll.u32 %v3720_v56, 16 }
 0x1b4   : > { %v2951_v49 = vpop.f32.mrf.mxu0  ;;  %v2068_v6 = vadd.f32 %v2009_v44, %v11139_v46  ;;  %v3815_v46 = vrot.slane %v3814_v31, 4  ;;  %v3834_v18 = vrot.slane %v3832_v23, 4 }
 0x1b6   : > { %v2354_v33 = vadd.f32 %v11479_v17, %v2068_v6  ;;  %v11547_v57 = vpop.f32.mrf.mxu3  ;;  %v3820_v44 = vsel %vm10463_vm1, %v3815_v46, %v3819_v2  ;;  %v3841_v6 = vshll.u32 %v11555_v22, 16  ;;  %v11578_v46 = vld [vmem:[#allocation2 + $0x44] sm:$0x1] }
 0x1b7   : > { %v4149_v2 = vunpack.c.l.b16 %v3820_v44 }
 0x1b8   : > { %v3008_v16 = vadd.f32 %v2949_v7, %v2354_v33  ;;  %v9724_v7 = vrot.slane %v4366_v50, 9 }
 0x1ba   : > { %v11551_v4 = vadd.f32 %v3347_v15, %v3008_v16  ;;  %v11562_v38 = vpop.f32.mrf.mxu1  ;;  %v4439_v63 = vsel %vm10906_vm9, %v9724_v7, %v4438_v43  ;;  %v3843_v16 = vrot.slane %v3841_v6, 5  ;;  %v3851_v7 = vshll.u32 %v11578_v46, 16 }
 0x1bb   : > { %v2011_v17 = vpop.f32.mrf.mxu2  ;;  %9708 = vmatmul.msk.bf16.gmra.mxu3 %vm1339_vm12, %v4178_v36  ;;  %14425 = vst [vmem:[#allocation21_spill] sm:$0xff] %v11562_v38  ;;  %v3837_v36 = vrot.slane %v3835_v40, 5  ;;  %v4367_v40 = vld [vmem:[#allocation2 + $0x30] sm:$0xe] }
 0x1bc   : > { %v2954_v14 = vpop.f32.mrf.mxu0  ;;  %v2069_v1 = vadd.f32 %v2011_v17, %v11156_v52  ;;  %v3830_v52 = vsel %vm10463_vm1, %v3825_v60, %v3829_v8  ;;  %v4545_v60 = vunpack.c.l.b16 %v4439_v63  ;;  %v4546_v8 = vunpack.c.l.b16 %v4442_v55 }
 0x1bd   : > { %v4150_v33 = vunpack.c.l.b16 %v3830_v52  ;;  %v4445_v52 = vrot.slane %v11520_v51, 5  ;;  %v3853_v63 = vrot.slane %v3851_v7, 5  ;;  %v9725_v51 = vrot.slane %v4367_v40, 9 }
 0x1be   : > { %v2355_v29 = vadd.f32 %v11511_v11, %v2069_v1  ;;  %v11559_v15 = vpop.f32.mrf.mxu3 }
 0x1bf   : > { %9740 = vmatmul.msk.bf16.vlgmr.msra.gmra.mxu0 %vm1339_vm12, %v4575_v19  ;;  %v3847_v19 = vrot.slane %v3845_v25, 4  ;;  %v4179_v1 = vpack.c.b16 %v4150_v33, %v4149_v2  ;;  %v10184_v2 = vld [vmem:[#allocation2 + $0x24] sm:$0xff] }
 0x1c0   : > { %9690 = vmatmul.msk.bf16.vlgmr.msra.gmra.mxu2 %vm1339_vm12, %v10183_v61  ;;  %v11571_v11 = vadd.f32 %v2951_v49, %v2355_v29  ;;  %v3838_v61 = vor.u32 %v3837_v36, %v3834_v18  ;;  %v14426_v29 = vld [vmem:[#allocation3_spill] sm:$0xff]  ;;  %v3723_v33 = vld [vmem:[#allocation2 + $0x48] sm:$0xf]  ;;  %v4448_v36 = vrot.slane %v11543_v62, 5 }
 0x1c1   : > { %v3848_v56 = vor.u32 %v3847_v19, %v3843_v16  ;;  %v1664_v13 = vadd.f32 %v14426_v29, %v10927_v9 }
 0x1c2   : > { %v3357_v17 = vpop.f32.mrf.mxu1  ;;  %v3839_v6 = vrot.slane %v3838_v61, 4  ;;  %v4446_v61 = vsel %vm10906_vm9, %v9725_v51, %v4445_v52 }
 0x1c3   : > { %v2014_v39 = vpop.f32.mrf.mxu2  ;;  %v3849_v25 = vrot.slane %v3848_v56, 4 }
 0x1c4   : > { %v2956_v31 = vpop.f32.mrf.mxu0  ;;  %v2070_v50 = vadd.f32 %v2014_v39, %v10922_v59  ;;  %v4576_v59 = vpack.c.b16 %v4546_v8, %v4545_v60  ;;  %v4447_v39 = vrot.slane %v4445_v52, 4  ;;  %v3844_v19 = vsel %vm10463_vm1, %v3839_v6, %v3843_v16  ;;  %v11613_v6 = vld [vmem:[#allocation2 + $0x50] sm:$0x1] }
 0x1c5   : > { %v4151_v7 = vunpack.c.l.b16 %v3844_v19  ;;  %v4452_v19 = vrot.slane %v11555_v22, 5 }
 0x1c6   : > { %v2356_v49 = vadd.f32 %v11526_v0, %v2070_v50  ;;  %v11581_v43 = vpop.f32.mrf.mxu3  ;;  %v3854_v50 = vsel %vm10463_vm1, %v3849_v25, %v3853_v63  ;;  %v4449_v16 = vsel %vm10906_vm9, %v4447_v39, %v4448_v36  ;;  %v4547_v63 = vunpack.c.l.b16 %v4446_v61  ;;  %v3726_v61 = vld [vmem:[#allocation2 + $0x54] sm:$0xf] }
 0x1c7   : > { %v3875_v36 = vshll.u32 %v11613_v6, 16 }
 0x1c8   : > { %v3010_v27 = vadd.f32 %v2954_v14, %v2356_v49  ;;  %v11590_v14 = vld [vmem:[#allocation2 + $0x4c] sm:$0xf]  ;;  %v3856_v49 = vshrl.u32 %v3723_v33, 16 }
 0x1c9   : > { %v3865_v8 = vshll.u32 %v11590_v14, 16 }
 0x1ca   : > { %v11586_v44 = vadd.f32 %v3352_v37, %v3010_v27  ;;  %v11596_v18 = vpop.f32.mrf.mxu1  ;;  %v4152_v27 = vunpack.c.l.b16 %v3854_v50  ;;  %v3858_v29 = vrot.slane %v3856_v49, 4  ;;  %v14429_v50 = vld [vmem:[#allocation6_spill] sm:$0xff]  ;;  %v14430_v49 = vld [vmem:[#allocation4_spill] sm:$0xff] }
 0x1cb   : > { %v2016_v23 = vpop.f32.mrf.mxu2  ;;  %9709 = vmatmul.msk.bf16.gmra.mxu3 %vm1339_vm12, %v4179_v1  ;;  %14427 = vst [vmem:[#allocation3_spill] sm:$0xff] %v11596_v18  ;;  %v3869_v1 = vshrl.u32 %v11590_v14, 16  ;;  %v11659_v18 = vld [vmem:[#allocation2 + $0x64] sm:$0xf] }
 0x1cc   : > { %v2959_v0 = vpop.f32.mrf.mxu0  ;;  %v2071_v55 = vadd.f32 %v2016_v23, %v1664_v13  ;;  %v14428_v13 = vld [vmem:[#allocation5_spill] sm:$0xff]  ;;  %v3867_v23 = vrot.slane %v3865_v8, 5 }
 0x1cd   : > { %v3871_v40 = vrot.slane %v3869_v1, 4 }
 0x1ce   : > { %v2357_v9 = vadd.f32 %v11547_v57, %v2071_v55  ;;  %v11594_v37 = vpop.f32.mrf.mxu3  ;;  %v3859_v57 = vshll.u32 %v3723_v33, 16  ;;  %v4548_v55 = vunpack.c.l.b16 %v4449_v16  ;;  %v4180_v33 = vpack.c.b16 %v4152_v27, %v4151_v7  ;;  %v11625_v7 = vld [vmem:[#allocation2 + $0x58] sm:$0xf]  ;;  %v10185_v27 = vld [vmem:[#allocation2 + $0x30] sm:$0xff] }
 0x1cf   : > { %9741 = vmatmul.msk.bf16.gmra.mxu0 %vm1339_vm12, %v4576_v59  ;;  %v3872_v39 = vor.u32 %v3871_v40, %v3867_v23  ;;  %v4455_v40 = vrot.slane %v11578_v46, 5 }
 0x1d0   : > { %9691 = vmatmul.msk.bf16.gmra.mxu2 %vm1339_vm12, %v10184_v2  ;;  %v11604_v60 = vadd.f32 %v2956_v31, %v2357_v9  ;;  %v3861_v31 = vrot.slane %v3859_v57, 5  ;;  %v1669_v57 = vadd.f32 %v14430_v49, %v14429_v50  ;;  %v4577_v1 = vpack.c.b16 %v4548_v55, %v4547_v63 }
 0x1d2   : > { %v3362_v2 = vpop.f32.mrf.mxu1  ;;  %v3862_v51 = vor.u32 %v3861_v31, %v3858_v29  ;;  %v4454_v31 = vrot.slane %v4452_v19, 4 }
 0x1d3   : > { %v2019_v56 = vpop.f32.mrf.mxu2 }
 0x1d4   : > { %v2961_v62 = vpop.f32.mrf.mxu0  ;;  %v2072_v59 = vadd.f32 %v2019_v56, %v14428_v13  ;;  %v3863_v29 = vrot.slane %v3862_v51, 4  ;;  %v3873_v13 = vrot.slane %v3872_v39, 4  ;;  %v3893_v51 = vshrl.u32 %v11625_v7, 16 }
 0x1d5   : > { %v4456_v50 = vsel %vm10906_vm9, %v4454_v31, %v4455_v40 }
 0x1d6   : > { %v2358_v25 = vadd.f32 %v11559_v15, %v2072_v59  ;;  %v11616_v52 = vpop.f32.mrf.mxu3  ;;  %v4368_v15 = vld [vmem:[#allocation2 + $0x3c] sm:$0xe]  ;;  %v3877_v59 = vrot.slane %v3875_v36, 5  ;;  %v3868_v46 = vsel %vm10463_vm1, %v3863_v29, %v3867_v23 }
 0x1d7   : > { %v9726_v22 = vrot.slane %v4368_v15, 9  ;;  %v3895_v15 = vrot.slane %v3893_v51, 4  ;;  %v14434_v23 = vld [vmem:[#allocation7_spill] sm:$0xff] }
 0x1d8   : > { %v3012_v9 = vadd.f32 %v2959_v0, %v2358_v25  ;;  %v3878_v36 = vsel %vm10463_vm1, %v3873_v13, %v3877_v59  ;;  %v4550_v13 = vunpack.c.l.b16 %v4456_v50 }
 0x1da   : > { %v11622_v8 = vadd.f32 %v3357_v17, %v3012_v9  ;;  %v3880_v17 = vshrl.u32 %v3726_v61, 16  ;;  %v11632_v55 = vpop.f32.mrf.mxu1  ;;  %v3889_v9 = vshll.u32 %v11625_v7, 16 }
 0x1db   : > { %v2021_v16 = vpop.f32.mrf.mxu2  ;;  %9710 = vmatmul.msk.bf16.gmra.mxu3 %vm1339_vm12, %v4180_v33  ;;  %14432 = vst [vmem:[#allocation6_spill] sm:$0xff] %v11632_v55  ;;  %v3883_v33 = vshll.u32 %v3726_v61, 16  ;;  %v4369_v55 = vld [vmem:[#allocation2 + $0x48] sm:$0xe] }
 0x1dc   : > { %14431 = vst [vmem:[#allocation5_spill] sm:$0xff] %v11622_v8  ;;  %v2964_v56 = vpop.f32.mrf.mxu0  ;;  %v2073_v0 = vadd.f32 %v2021_v16, %v1669_v57  ;;  %v3882_v49 = vrot.slane %v3880_v17, 4 }
 0x1dd   : > { %v3885_v57 = vrot.slane %v3883_v33, 5 }
 0x1de   : > { %v2359_v25 = vadd.f32 %v11581_v43, %v2073_v0  ;;  %v11630_v63 = vpop.f32.mrf.mxu3  ;;  %v4453_v43 = vsel %vm10906_vm9, %v9726_v22, %v4452_v19  ;;  %v4154_v0 = vunpack.c.l.b16 %v3878_v36 }
 0x1df   : > { %9742 = vmatmul.msk.bf16.gmra.mxu0 %vm1339_vm12, %v4577_v1  ;;  %v3891_v1 = vrot.slane %v3889_v9, 5  ;;  %v3886_v31 = vor.u32 %v3885_v57, %v3882_v49  ;;  %v10186_v57 = vld [vmem:[#allocation2 + $0x3c] sm:$0xff] }
 0x1e0   : > { %9692 = vmatmul.msk.bf16.gmra.mxu2 %vm1339_vm12, %v10185_v27  ;;  %v11637_v39 = vadd.f32 %v2961_v62, %v2359_v25  ;;  %v4153_v62 = vunpack.c.l.b16 %v3868_v46  ;;  %v11647_v27 = vld [vmem:[#allocation2 + $0x5c] sm:$0x1]  ;;  %v4549_v25 = vunpack.c.l.b16 %v4453_v43  ;;  %v4459_v46 = vrot.slane %v11590_v14, 5 }
 0x1e1   : > { %v3896_v40 = vor.u32 %v3895_v15, %v3891_v1  ;;  %v3899_v17 = vshll.u32 %v11647_v27, 16  ;;  %v3729_v15 = vld [vmem:[#allocation2 + $0x60] sm:$0xf] }
 0x1e2   : > { %14433 = vst [vmem:[#allocation4_spill] sm:$0xff] %v11637_v39  ;;  %v3367_v22 = vpop.f32.mrf.mxu1  ;;  %v4181_v33 = vpack.c.b16 %v4154_v0, %v4153_v62  ;;  %v4578_v51 = vpack.c.b16 %v4550_v13, %v4549_v25  ;;  %v4461_v62 = vrot.slane %v4459_v46, 4  ;;  %v4462_v0 = vrot.slane %v11613_v6, 5 }
 0x1e3   : > { %v2024_v16 = vpop.f32.mrf.mxu2  ;;  %v3897_v43 = vrot.slane %v3896_v40, 4  ;;  %v3901_v50 = vrot.slane %v3899_v17, 5  ;;  %v3913_v40 = vshll.u32 %v11659_v18, 16 }
 0x1e4   : > { %v2966_v61 = vpop.f32.mrf.mxu0  ;;  %v2074_v29 = vadd.f32 %v2024_v16, %v14434_v23  ;;  %v3887_v16 = vrot.slane %v3886_v31, 4  ;;  %v3907_v31 = vshll.u32 %v3729_v15, 16 }
 0x1e5   : > { %v3902_v13 = vsel %vm10463_vm1, %v3897_v43, %v3901_v50 }
 0x1e6   : > { %v2360_v59 = vadd.f32 %v11594_v37, %v2074_v29  ;;  %v11651_v19 = vpop.f32.mrf.mxu3  ;;  %v14436_v29 = vld [vmem:[#allocation8_spill] sm:$0xff]  ;;  %v3892_v25 = vsel %vm10463_vm1, %v3887_v16, %v3891_v1  ;;  %v4463_v1 = vsel %vm10906_vm9, %v4461_v62, %v4462_v0  ;;  %v3909_v50 = vrot.slane %v3907_v31, 5 }
 0x1e8   : > { %v3014_v9 = vadd.f32 %v2964_v56, %v2360_v59  ;;  %v9727_v56 = vrot.slane %v4369_v55, 9  ;;  %v3904_v59 = vshrl.u32 %v3729_v15, 16  ;;  %v3917_v55 = vshrl.u32 %v11659_v18, 16 }
 0x1ea   : > { %v11655_v36 = vadd.f32 %v3362_v2, %v3014_v9  ;;  %v4460_v6 = vsel %vm10906_vm9, %v9727_v56, %v4459_v46  ;;  %v4156_v9 = vunpack.c.l.b16 %v3902_v13  ;;  %v3906_v43 = vrot.slane %v3904_v59, 4 }
 0x1eb   : > { %v2026_v37 = vpop.f32.mrf.mxu2  ;;  %9711 = vmatmul.msk.bf16.gmra.mxu3 %vm1339_vm12, %v4181_v33  ;;  %v4155_v33 = vunpack.c.l.b16 %v3892_v25 }
 0x1ec   : > { %14435 = vst [vmem:[#allocation7_spill] sm:$0xff] %v11655_v36  ;;  %v2969_v23 = vpop.f32.mrf.mxu0  ;;  %v2075_v49 = vadd.f32 %v2026_v37, %v14436_v29  ;;  %v3915_v37 = vrot.slane %v3913_v40, 5  ;;  %v3919_v29 = vrot.slane %v3917_v55, 4  ;;  %v3910_v62 = vor.u32 %v3909_v50, %v3906_v43  ;;  %v10187_v43 = vld [vmem:[#allocation2 + $0x48] sm:$0xff] }
 0x1ed   : > { %v4182_v56 = vpack.c.b16 %v4156_v9, %v4155_v33  ;;  %v4466_v55 = vrot.slane %v11625_v7, 5  ;;  %v14441_v33 = vld [vmem:[#allocation10_spill] sm:$0xff]  ;;  %v3732_v50 = vld [vmem:[#allocation2 + $0x6c] sm:$0xf] }
 0x1ee   : > { %v2361_v14 = vadd.f32 %v11616_v52, %v2075_v49  ;;  %v11663_v2 = vpop.f32.mrf.mxu3  ;;  %v11675_v52 = vpop.f32.mrf.mxu1  ;;  %v14439_v49 = vld [vmem:[#allocation9_spill] sm:$0xff]  ;;  %v3920_v0 = vor.u32 %v3919_v29, %v3915_v37  ;;  %v11693_v29 = vld [vmem:[#allocation2 + $0x70] sm:$0xf] }
 0x1ef   : > { %9743 = vmatmul.msk.bf16.gmra.mxu0 %vm1339_vm12, %v4578_v51  ;;  %14438 = vst [vmem:[#allocation22_spill] sm:$0xff] %v11675_v52  ;;  %v4552_v52 = vunpack.c.l.b16 %v4463_v1 }
 0x1f0   : > { %9693 = vmatmul.msk.bf16.gmra.mxu2 %vm1339_vm12, %v10186_v57  ;;  %v11673_v17 = vadd.f32 %v2966_v61, %v2361_v14  ;;  %v11682_v61 = vld [vmem:[#allocation2 + $0x68] sm:$0x1]  ;;  %v4551_v14 = vunpack.c.l.b16 %v4460_v6  ;;  %v3911_v6 = vrot.slane %v3910_v62, 4  ;;  %v3921_v1 = vrot.slane %v3920_v0, 4 }
 0x1f1   : > { %v3923_v25 = vshll.u32 %v11682_v61, 16  ;;  %v3928_v62 = vshrl.u32 %v3732_v50, 16 }
 0x1f2   : > { %14437 = vst [vmem:[#allocation8_spill] sm:$0xff] %v11673_v17  ;;  %v4579_v31 = vpack.c.b16 %v4552_v52, %v4551_v14  ;;  %v4468_v52 = vrot.slane %v4466_v55, 4  ;;  %v3916_v14 = vsel %vm10463_vm1, %v3911_v6, %v3915_v37 }
 0x1f3   : > { %v2029_v16 = vpop.f32.mrf.mxu2 }
 0x1f4   : > { %v2971_v51 = vpop.f32.mrf.mxu0  ;;  %v2076_v57 = vadd.f32 %v2029_v16, %v14439_v49 }
 0x1f6   : > { %v2362_v15 = vadd.f32 %v11630_v63, %v2076_v57  ;;  %v11685_v46 = vpop.f32.mrf.mxu3  ;;  %v3372_v40 = vpop.f32.mrf.mxu1  ;;  %v4370_v63 = vld [vmem:[#allocation2 + $0x54] sm:$0xe]  ;;  %v3925_v57 = vrot.slane %v3923_v25, 5  ;;  %v3931_v25 = vshll.u32 %v3732_v50, 16 }
 0x1f7   : > { %v9728_v7 = vrot.slane %v4370_v63, 9  ;;  %v4157_v63 = vunpack.c.l.b16 %v3916_v14 }
 0x1f8   : > { %v3016_v13 = vadd.f32 %v2969_v23, %v2362_v15  ;;  %v4469_v15 = vrot.slane %v11647_v27, 5 }
 0x1fa   : > { %v11688_v59 = vadd.f32 %v3367_v22, %v3016_v13  ;;  %v3941_v13 = vshrl.u32 %v11693_v29, 16  ;;  %v4470_v37 = vsel %vm10906_vm9, %v4468_v52, %v4469_v15 }
 0x1fb   : > { %v2031_v49 = vpop.f32.mrf.mxu2  ;;  %9712 = vmatmul.msk.bf16.gmra.mxu3 %vm1339_vm12, %v4182_v56  ;;  %v3926_v56 = vsel %vm10463_vm1, %v3921_v1, %v3925_v57  ;;  %v3930_v1 = vrot.slane %v3928_v62, 4  ;;  %v14443_v57 = vld [vmem:[#allocation11_spill] sm:$0xff]  ;;  %v4473_v62 = vrot.slane %v11659_v18, 5  ;;  %v4476_v18 = vrot.slane %v11682_v61, 5 }
 0x1fc   : > { %14440 = vst [vmem:[#allocation9_spill] sm:$0xff] %v11688_v59  ;;  %v2974_v16 = vpop.f32.mrf.mxu0  ;;  %v2077_v9 = vadd.f32 %v2031_v49, %v14441_v33  ;;  %v4158_v6 = vunpack.c.l.b16 %v3926_v56  ;;  %v3943_v50 = vrot.slane %v3941_v13, 4  ;;  %v3735_v13 = vld [vmem:[#allocation2 + $0x78] sm:$0xf] }
 0x1fe   : > { %v2363_v22 = vadd.f32 %v11651_v19, %v2077_v9  ;;  %v11697_v23 = vpop.f32.mrf.mxu3  ;;  %v3937_v19 = vshll.u32 %v11693_v29, 16  ;;  %v3933_v9 = vrot.slane %v3931_v25, 5  ;;  %v4183_v17 = vpack.c.b16 %v4158_v6, %v4157_v63 }
 0x1ff   : > { %9744 = vmatmul.msk.bf16.gmra.mxu0 %vm1339_vm12, %v4579_v31  ;;  %v4467_v31 = vsel %vm10906_vm9, %v9728_v7, %v4466_v55  ;;  %v4554_v7 = vunpack.c.l.b16 %v4470_v37 }
 0x200   : > { %9694 = vmatmul.msk.bf16.gmra.mxu2 %vm1339_vm12, %v10187_v43  ;;  %v11705_v0 = vadd.f32 %v2971_v51, %v2363_v22  ;;  %v11714_v51 = vpop.f32.mrf.mxu1  ;;  %v3939_v43 = vrot.slane %v3937_v19, 5  ;;  %v11716_v22 = vld [vmem:[#allocation2 + $0x74] sm:$0x1]  ;;  %v4553_v55 = vunpack.c.l.b16 %v4467_v31  ;;  %v3934_v15 = vor.u32 %v3933_v9, %v3930_v1  ;;  %v4371_v19 = vld [vmem:[#allocation2 + $0x60] sm:$0xe] }
 0x201   : > { %14444 = vst [vmem:[#allocation11_spill] sm:$0xff] %v11714_v51  ;;  %v3947_v56 = vshll.u32 %v11716_v22, 16  ;;  %v14446_v31 = vld [vmem:[#allocation12_spill] sm:$0xff]  ;;  %v9729_v1 = vrot.slane %v4371_v19, 9 }
 0x202   : > { %14442 = vst [vmem:[#allocation10_spill] sm:$0xff] %v11705_v0  ;;  %v3944_v14 = vor.u32 %v3943_v50, %v3939_v43  ;;  %v4580_v25 = vpack.c.b16 %v4554_v7, %v4553_v55  ;;  %v3955_v55 = vshll.u32 %v3735_v13, 16 }
 0x203   : > { %v2034_v49 = vpop.f32.mrf.mxu2  ;;  %v3949_v6 = vrot.slane %v3947_v56, 5 }
 0x204   : > { %v2976_v27 = vpop.f32.mrf.mxu0  ;;  %v2078_v33 = vadd.f32 %v2034_v49, %v14443_v57  ;;  %v3945_v63 = vrot.slane %v3944_v14, 4 }
 0x206   : > { %v2364_v0 = vadd.f32 %v11663_v2, %v2078_v33  ;;  %v11719_v59 = vpop.f32.mrf.mxu3  ;;  %v11726_v2 = vld [vmem:[#allocation2 + $0x7c] sm:$0xf]  ;;  %v4475_v33 = vrot.slane %v4473_v62, 4 }
 0x207   : > { %v3961_v7 = vshll.u32 %v11726_v2, 16 }
 0x208   : > { %v3018_v52 = vadd.f32 %v2974_v16, %v2364_v0  ;;  %v10188_v16 = vld [vmem:[#allocation2 + $0x54] sm:$0xff]  ;;  %v3935_v0 = vrot.slane %v3934_v15, 4  ;;  %v3950_v15 = vsel %vm10463_vm1, %v3945_v63, %v3949_v6  ;;  %v4477_v14 = vsel %vm10906_vm9, %v4475_v33, %v4476_v18 }
 0x209   : > { %v3963_v19 = vrot.slane %v3961_v7, 5  ;;  %v4556_v63 = vunpack.c.l.b16 %v4477_v14 }
 0x20a   : > { %v11723_v49 = vadd.f32 %v3372_v40, %v3018_v52  ;;  %v3952_v40 = vshrl.u32 %v3735_v13, 16  ;;  %v3940_v61 = vsel %vm10463_vm1, %v3935_v0, %v3939_v43  ;;  %v14448_v43 = vld [vmem:[#allocation13_spill] sm:$0xff] }
 0x20b   : > { %v2036_v51 = vpop.f32.mrf.mxu2  ;;  %9713 = vmatmul.msk.bf16.gmra.mxu3 %vm1339_vm12, %v4183_v17  ;;  %v3377_v17 = vpop.f32.mrf.mxu1 }
 0x20c   : > { %14445 = vst [vmem:[#allocation23_spill] sm:$0xff] %v11723_v49  ;;  %v2979_v57 = vpop.f32.mrf.mxu0  ;;  %v2079_v37 = vadd.f32 %v2036_v51, %v14446_v31  ;;  %v3965_v51 = vshrl.u32 %v11726_v2, 16  ;;  %v3954_v56 = vrot.slane %v3952_v40, 4 }
 0x20e   : > { %v2365_v9 = vadd.f32 %v11685_v46, %v2079_v37  ;;  %v11732_v50 = vpop.f32.mrf.mxu3  ;;  %v4474_v46 = vsel %vm10906_vm9, %v9729_v1, %v4473_v62  ;;  %v3967_v13 = vrot.slane %v3965_v51, 4 }
 0x20f   : > { %9745 = vmatmul.msk.bf16.gmra.mxu0 %vm1339_vm12, %v4580_v25  ;;  %v3957_v25 = vrot.slane %v3955_v55, 5 }
 0x210   : > { %9695 = vmatmul.msk.bf16.gmra.mxu2 %vm1339_vm12, %v10188_v16  ;;  %v11737_v52 = vadd.f32 %v2976_v27, %v2365_v9  ;;  %v4159_v27 = vunpack.c.l.b16 %v3940_v61  ;;  %v4160_v16 = vunpack.c.l.b16 %v3950_v15  ;;  %v11747_v9 = vld [vmem:[#allocation2 + $0x80] sm:$0x1]  ;;  %v3968_v33 = vor.u32 %v3967_v13, %v3963_v19 }
 0x211   : > { %v3958_v1 = vor.u32 %v3957_v25, %v3954_v56  ;;  %v3971_v18 = vshll.u32 %v11747_v9, 16  ;;  %v4480_v61 = vrot.slane %v11693_v29, 5  ;;  %v14451_v56 = vld [vmem:[#allocation14_spill] sm:$0xff]  ;;  %v10189_v13 = vld [vmem:[#allocation2 + $0x60] sm:$0xff] }
 0x212   : > { %14447 = vst [vmem:[#allocation12_spill] sm:$0xff] %v11737_v52  ;;  %v4555_v52 = vunpack.c.l.b16 %v4474_v46  ;;  %v4184_v40 = vpack.c.b16 %v4160_v16, %v4159_v27  ;;  %v3969_v14 = vrot.slane %v3968_v33, 4  ;;  %v3738_v27 = vld [vmem:[#allocation2 + $0x84] sm:$0xf] }
 0x213   : > { %v2039_v37 = vpop.f32.mrf.mxu2  ;;  %v11754_v7 = vpop.f32.mrf.mxu1  ;;  %v3959_v46 = vrot.slane %v3958_v1, 4  ;;  %v3976_v33 = vshrl.u32 %v3738_v27, 16 }
 0x214   : > { %v2981_v31 = vpop.f32.mrf.mxu0  ;;  %v2080_v0 = vadd.f32 %v2039_v37, %v14448_v43  ;;  %14449 = vst [vmem:[#allocation13_spill] sm:$0xff] %v11754_v7  ;;  %v4581_v51 = vpack.c.b16 %v4556_v63, %v4555_v52  ;;  %v4372_v37 = vld [vmem:[#allocation2 + $0x6c] sm:$0xe]  ;;  %v3973_v43 = vrot.slane %v3971_v18, 5  ;;  %v4482_v52 = vrot.slane %v4480_v61, 4  ;;  %v14453_v7 = vld [vmem:[#allocation15_spill] sm:$0xff] }
 0x215   : > { %v9730_v16 = vrot.slane %v4372_v37, 9  ;;  %v4483_v63 = vrot.slane %v11716_v22, 5  ;;  %v3979_v18 = vshll.u32 %v3738_v27, 16 }
 0x216   : > { %v2366_v6 = vadd.f32 %v11697_v23, %v2080_v0  ;;  %v11751_v62 = vpop.f32.mrf.mxu3  ;;  %v3974_v1 = vsel %vm10463_vm1, %v3969_v14, %v3973_v43 }
 0x217   : > { %v4481_v22 = vsel %vm10906_vm9, %v9730_v16, %v4480_v61 }
 0x218   : > { %v3020_v55 = vadd.f32 %v2979_v57, %v2366_v6  ;;  %v11761_v57 = vld [vmem:[#allocation2 + $0x88] sm:$0xf]  ;;  %v3964_v6 = vsel %vm10463_vm1, %v3959_v46, %v3963_v19  ;;  %v4484_v19 = vsel %vm10906_vm9, %v4482_v52, %v4483_v63  ;;  %v4162_v46 = vunpack.c.l.b16 %v3974_v1 }
 0x219   : > { %v4161_v37 = vunpack.c.l.b16 %v3964_v6 }
 0x21a   : > { %v11757_v15 = vadd.f32 %v3377_v17, %v3020_v55  ;;  %v3989_v55 = vshrl.u32 %v11761_v57, 16 }
 0x21b   : > { %v2041_v0 = vpop.f32.mrf.mxu2  ;;  %9714 = vmatmul.msk.bf16.gmra.mxu3 %vm1339_vm12, %v4184_v40  ;;  %v3985_v40 = vshll.u32 %v11761_v57, 16  ;;  %v4185_v16 = vpack.c.b16 %v4162_v46, %v4161_v37  ;;  %v14455_v37 = vld [vmem:[#allocation16_spill] sm:$0xff] }
 0x21c   : > { %14450 = vst [vmem:[#allocation24_spill] sm:$0xff] %v11757_v15  ;;  %v2984_v23 = vpop.f32.mrf.mxu0  ;;  %v2081_v25 = vadd.f32 %v2041_v0, %v14451_v56  ;;  %v3978_v0 = vrot.slane %v3976_v33, 4  ;;  %v3981_v56 = vrot.slane %v3979_v18, 5  ;;  %v3991_v27 = vrot.slane %v3989_v55, 4 }
 0x21d   : > { %v4487_v33 = vrot.slane %v11726_v2, 5 }
 0x21e   : > { %v2367_v29 = vadd.f32 %v11719_v59, %v2081_v25  ;;  %v11765_v17 = vpop.f32.mrf.mxu3  ;;  %v3382_v59 = vpop.f32.mrf.mxu1  ;;  %v3987_v25 = vrot.slane %v3985_v40, 5  ;;  %v3982_v52 = vor.u32 %v3981_v56, %v3978_v0  ;;  %v10190_v0 = vld [vmem:[#allocation2 + $0x6c] sm:$0xff]  ;;  %v11793_v56 = vld [vmem:[#allocation2 + $0x94] sm:$0xf] }
 0x21f   : > { %9746 = vmatmul.msk.bf16.gmra.mxu0 %vm1339_vm12, %v4581_v51 }
 0x220   : > { %9696 = vmatmul.msk.bf16.gmra.mxu2 %vm1339_vm12, %v10189_v13  ;;  %v11775_v51 = vadd.f32 %v2981_v31, %v2367_v29  ;;  %v11782_v13 = vld [vmem:[#allocation2 + $0x8c] sm:$0x1]  ;;  %v4557_v29 = vunpack.c.l.b16 %v4481_v22  ;;  %v3992_v63 = vor.u32 %v3991_v27, %v3987_v25 }
 0x221   : > { %v3995_v6 = vshll.u32 %v11782_v13, 16 }
 0x222   : > { %14452 = vst [vmem:[#allocation14_spill] sm:$0xff] %v11775_v51  ;;  %v4558_v51 = vunpack.c.l.b16 %v4484_v19  ;;  %v3741_v19 = vld [vmem:[#allocation2 + $0x90] sm:$0xf] }
 0x223   : > { %v2044_v43 = vpop.f32.mrf.mxu2  ;;  %v3997_v22 = vrot.slane %v3995_v6, 5  ;;  %v4009_v6 = vshll.u32 %v11793_v56, 16 }
 0x224   : > { %v2986_v14 = vpop.f32.mrf.mxu0  ;;  %v2082_v15 = vadd.f32 %v2044_v43, %v14453_v7  ;;  %v4582_v40 = vpack.c.b16 %v4558_v51, %v4557_v29  ;;  %v4373_v7 = vld [vmem:[#allocation2 + $0x78] sm:$0xe]  ;;  %v4490_v51 = vrot.slane %v11747_v9, 5  ;;  %v4000_v29 = vshrl.u32 %v3741_v19, 16 }
 0x225   : > { %v9731_v2 = vrot.slane %v4373_v7, 9 }
 0x226   : > { %v2368_v31 = vadd.f32 %v11732_v50, %v2082_v15  ;;  %v11785_v61 = vpop.f32.mrf.mxu3  ;;  %v3983_v50 = vrot.slane %v3982_v52, 4  ;;  %v3993_v15 = vrot.slane %v3992_v63, 4 }
 0x228   : > { %v3022_v1 = vadd.f32 %v2984_v23, %v2368_v31  ;;  %v11795_v23 = vpop.f32.mrf.mxu1  ;;  %v3988_v52 = vsel %vm10463_vm1, %v3983_v50, %v3987_v25  ;;  %v3998_v63 = vsel %vm10463_vm1, %v3993_v15, %v3997_v22  ;;  %v4002_v25 = vrot.slane %v4000_v29, 4  ;;  %v5297_v15 = vld [vmem:[#allocation2 + $0x4] sm:$0xf] }
 0x229   : > { %14456 = vst [vmem:[#allocation16_spill] sm:$0xff] %v11795_v23  ;;  %v4163_v7 = vunpack.c.l.b16 %v3988_v52  ;;  %v5359_v52 = vshrl.u32 %v5297_v15, 16 }
 0x22a   : > { %v11789_v18 = vadd.f32 %v3382_v59, %v3022_v1  ;;  %v4489_v59 = vrot.slane %v4487_v33, 4  ;;  %v4013_v1 = vshrl.u32 %v11793_v56, 16 }
 0x22b   : > { %v2046_v43 = vpop.f32.mrf.mxu2  ;;  %9715 = vmatmul.msk.bf16.gmra.mxu3 %vm1339_vm12, %v4185_v16  ;;  %v4003_v16 = vshll.u32 %v3741_v19, 16  ;;  %v5296_v19 = vld [vmem:[#allocation2] sm:$0xf] }
 0x22c   : > { %14454 = vst [vmem:[#allocation15_spill] sm:$0xff] %v11789_v18  ;;  %v2989_v55 = vpop.f32.mrf.mxu0  ;;  %v2083_v46 = vadd.f32 %v2046_v43, %v14455_v37  ;;  %v4164_v43 = vunpack.c.l.b16 %v3998_v63  ;;  %v4015_v23 = vrot.slane %v4013_v1, 4  ;;  %v11818_v18 = vld [vmem:[#allocation2 + $0x98] sm:$0x1] }
 0x22d   : > { %v4005_v50 = vrot.slane %v4003_v16, 5 }
 0x22e   : > { %v2369_v27 = vadd.f32 %v11751_v62, %v2083_v46  ;;  %v11800_v31 = vpop.f32.mrf.mxu3  ;;  %v4488_v62 = vsel %vm10906_vm9, %v9731_v2, %v4487_v33  ;;  %v11815_v46 = vrot.slane %v4009_v6, 5  ;;  %v5355_v33 = vshll.u32 %v5297_v15, 16  ;;  %v5329_v6 = vld [vmem:[#allocation2 + $0x8] sm:$0x1] }
 0x22f   : > { %9747 = vmatmul.msk.bf16.gmra.mxu0 %vm1339_vm12, %v4582_v40  ;;  %v4491_v40 = vsel %vm10906_vm9, %v4489_v59, %v4490_v51  ;;  %v4559_v2 = vunpack.c.l.b16 %v4488_v62  ;;  %v4006_v49 = vor.u32 %v4005_v50, %v4002_v25  ;;  %v4186_v39 = vpack.c.b16 %v4164_v43, %v4163_v7 }
 0x230   : > { %9697 = vmatmul.msk.bf16.gmra.mxu2 %vm1339_vm12, %v10190_v0  ;;  %v11809_v9 = vadd.f32 %v2986_v14, %v2369_v27  ;;  %v5346_v0 = vshrl.u32 %v5296_v19, 16  ;;  %v5349_v14 = vshll.u32 %v5296_v19, 16  ;;  %v14458_v27 = vld [vmem:[#allocation17_spill] sm:$0xff]  ;;  %v4560_v16 = vunpack.c.l.b16 %v4491_v40  ;;  %v3387_v1 = vpop.f32.mrf.mxu1  ;;  %v4374_v40 = vld [vmem:[#allocation2 + $0x84] sm:$0xe] }
 0x231   : > { %v5357_v36 = vrot.slane %v5355_v33, 5  ;;  %v4016_v19 = vor.u32 %v4015_v23, %v11815_v46  ;;  %v5361_v62 = vrot.slane %v5359_v52, 4  ;;  %v4494_v15 = vrot.slane %v11761_v57, 5  ;;  %v10191_v52 = vld [vmem:[#allocation2 + $0x78] sm:$0xff] }
 0x232   : > { %14457 = vst [vmem:[#allocation25_spill] sm:$0xff] %v11809_v9  ;;  %v5348_v59 = vrot.slane %v5346_v0, 4  ;;  %v5351_v51 = vrot.slane %v5349_v14, 5  ;;  %v5365_v0 = vshll.u32 %v5329_v6, 16  ;;  %v4007_v25 = vrot.slane %v4006_v49, 4 }
 0x233   : > { %v2049_v37 = vpop.f32.mrf.mxu2  ;;  %v5362_v50 = vor.u32 %v5361_v62, %v5357_v36  ;;  %v4017_v23 = vrot.slane %v4016_v19, 4  ;;  %v4497_v49 = vrot.slane %v11782_v13, 5  ;;  %v11833_v6 = vld [vmem:[#allocation2 + $0xa0] sm:$0xf] }
 0x234   : > { %v2991_v22 = vpop.f32.mrf.mxu0  ;;  %v2084_v9 = vadd.f32 %v2049_v37, %v14458_v27  ;;  %v4019_v37 = vshll.u32 %v11818_v18, 16  ;;  %v5352_v27 = vor.u32 %v5351_v51, %v5348_v59  ;;  %v5367_v43 = vrot.slane %v5365_v0, 5  ;;  %v3744_v59 = vld [vmem:[#allocation2 + $0x9c] sm:$0xf]  ;;  %v14459_v51 = vld [vmem:[#allocation18_spill] sm:$0xff] }
 0x235   : > { %v4024_v19 = vshrl.u32 %v3744_v59, 16  ;;  %v4037_v0 = vshrl.u32 %v11833_v6, 16 }
 0x236   : > { %v2370_v29 = vadd.f32 %v11765_v17, %v2084_v9  ;;  %v11821_v63 = vpop.f32.mrf.mxu3  ;;  %v5353_v14 = vrot.slane %v5352_v27, 4  ;;  %v4583_v9 = vpack.c.b16 %v4560_v16, %v4559_v2  ;;  %v4021_v7 = vrot.slane %v4019_v37, 5 }
 0x237   : > { %v4496_v2 = vrot.slane %v4494_v15, 4  ;;  %v4012_v37 = vsel %vm10463_vm1, %v4007_v25, %v11815_v46 }
 0x238   : > { %v3024_v8 = vadd.f32 %v2989_v55, %v2370_v29  ;;  %v5358_v55 = vsel %vm10463_vm1, %v5353_v14, %v5357_v36  ;;  %v9732_v29 = vrot.slane %v4374_v40, 9  ;;  %v4022_v13 = vsel %vm10463_vm1, %v4017_v23, %v4021_v7 }
 0x239   : > { %v5731_v16 = vunpack.c.l.b16 %v5358_v55  ;;  %v4498_v46 = vsel %vm10906_vm9, %v4496_v2, %v4497_v49  ;;  %v4026_v40 = vrot.slane %v4024_v19, 4  ;;  %v4165_v7 = vunpack.c.l.b16 %v4012_v37  ;;  %v4375_v55 = vld [vmem:[#allocation2 + $0x90] sm:$0xe]  ;;  %v11868_v2 = vld [vmem:[%s14386_s2] ss:$0 sm:$0xff] }
 0x23a   : > { %v11826_v17 = vadd.f32 %v3387_v1, %v3024_v8  ;;  %v5363_v8 = vrot.slane %v5362_v50, 4 }
 0x23b   : > { %v2051_v38 = vpop.f32.mrf.mxu2  ;;  %9716 = vmatmul.msk.bf16.gmra.mxu3 %vm1339_vm12, %v4186_v39 }
 0x23c   : > { %v4651_v33 = vpop.f32.mrf.mxu0  ;;  %v2085_v57 = vadd.f32 %v2051_v38, %v14459_v51  ;;  %v5368_v36 = vsel %vm10463_vm1, %v5363_v8, %v5367_v43  ;;  %v4027_v38 = vshll.u32 %v3744_v59, 16  ;;  %v11859_v59 = vld [vmem:[#allocation2 + $0xa4] sm:$0x1]  ;;  %v4501_v8 = vrot.slane %v11793_v56, 5  ;;  %v9869_v56 = vld [vmem:[%s14387_s3 + $0x8] sm:$0xf] }
 0x23d   : > { %v5732_v27 = vunpack.c.l.b16 %v5368_v36  ;;  %v5328_v36 = vld [vmem:[%s14387_s3] sm:$0xf]  ;;  %v6400_v37 = vsel %vm5828_vm0, %v9869_v56, 0 }
 0x23e   : > { %v2371_v39 = vadd.f32 %v11785_v61, %v2085_v57  ;;  %v11837_v1 = vpop.f32.mrf.mxu3  ;;  %v4033_v61 = vshll.u32 %v11833_v6, 16  ;;  %v4029_v25 = vrot.slane %v4027_v38, 5  ;;  %v6050_v38 = vsel %vm5828_vm0, %v5328_v36, 0  ;;  %6409 = vmatpush.bf16.msrb.mxu3 %v6400_v37 }
 0x23f   : > { %9748 = vmatmul.msk.bf16.gmra.mxu0 %vm1339_vm12, %v4583_v9  ;;  %v5763_v14 = vpack.c.b16 %v5732_v27, %v5731_v16  ;;  %v4495_v9 = vsel %vm10906_vm9, %v9732_v29, %v4494_v15  ;;  %v4039_v15 = vrot.slane %v4037_v0, 4  ;;  %v9733_v16 = vrot.slane %v4375_v55, 9  ;;  %6059 = vmatpush.bf16.msrb.mxu2 %v6050_v38  ;;  %v11903_v38 = vld [vmem:[#allocation2 + $0xb0] sm:$0x1] }
 0x240   : > { %9698 = vmatmul.msk.bf16.gmra.mxu2 %vm1339_vm12, %v10191_v52  ;;  %v11847_v62 = vadd.f32 %v2991_v22, %v2371_v39  ;;  %v4166_v22 = vunpack.c.l.b16 %v4022_v13  ;;  %v11861_v51 = vrot.slane %v4033_v61, 5  ;;  %v4561_v57 = vunpack.c.l.b16 %v4495_v9 }
 0x241   : > { %9757 = vmatmul.msk.bf16.vlgmr.msra.gmra.mxu1 %vm5779_vm7, %v5763_v14  ;;  %v4562_v52 = vunpack.c.l.b16 %v4498_v46  ;;  %v4503_v61 = vrot.slane %v4501_v8, 4  ;;  %v11885_v14 = vsel %vm10906_vm9, %v9733_v16, %v4501_v8  ;;  %v4504_v9 = vrot.slane %v11818_v18, 5 }
 0x242   : > { %v4187_v39 = vpack.c.b16 %v4166_v22, %v4165_v7  ;;  %v4040_v13 = vor.u32 %v4039_v15, %v11861_v51  ;;  %v4508_v16 = vrot.slane %v11833_v6, 5 }
 0x243   : > { %v3599_v23 = vpop.f32.mrf.mxu2  ;;  %v4584_v27 = vpack.c.b16 %v4562_v52, %v4561_v57  ;;  %v10192_v52 = vld [vmem:[#allocation2 + $0x84] sm:$0xff]  ;;  %v4505_v37 = vsel %vm10906_vm9, %v4503_v61, %v4504_v9 }
 0x244   : > { %v11855_v50 = vpop.f32.mrf.mxu0  ;;  %v3679_v43 = vadd.f32 %v3599_v23, %v11211_v41  ;;  %v4030_v41 = vor.u32 %v4029_v25, %v4026_v40  ;;  %v11888_v40 = vld [vmem:[#allocation2 + $0xac] sm:$0xf]  ;;  %v4041_v8 = vrot.slane %v4040_v13, 4  ;;  %v4563_v13 = vunpack.c.l.b16 %v11885_v14 }
 0x245   : > { %v4061_v18 = vshrl.u32 %v11888_v40, 16  ;;  %v4510_v9 = vrot.slane %v4508_v16, 4 }
 0x246   : > { %v4333_v29 = vadd.f32 %v11800_v31, %v3679_v43  ;;  %v11870_v49 = vpop.f32.mrf.mxu3  ;;  %v4043_v31 = vshll.u32 %v11859_v59, 16  ;;  %v4031_v46 = vrot.slane %v4030_v41, 4  ;;  %v4057_v43 = vshll.u32 %v11888_v40, 16 }
 0x248   : > { %v4731_v19 = vadd.f32 %v4651_v33, %v4333_v29  ;;  %v3747_v33 = vld [vmem:[#allocation2 + $0xa8] sm:$0xf]  ;;  %v4045_v7 = vrot.slane %v4043_v31, 5  ;;  %v4376_v29 = vld [vmem:[#allocation2 + $0x9c] sm:$0xe]  ;;  %v11897_v56 = vrot.slane %v4057_v43, 5  ;;  %v4036_v6 = vsel %vm10463_vm1, %v4031_v46, %v11861_v51 }
 0x249   : > { %v4048_v22 = vshrl.u32 %v3747_v33, 16  ;;  %v4051_v55 = vshll.u32 %v3747_v33, 16  ;;  %v9734_v61 = vrot.slane %v4376_v29, 9  ;;  %v4067_v51 = vshll.u32 %v11903_v38, 16 }
 0x24a   : > { %v4767_v0 = vadd.f32 %v11868_v2, %v4731_v19  ;;  %v4511_v43 = vrot.slane %v11859_v59, 5 }
 0x24b   : > { %v3601_v23 = vpop.f32.mrf.mxu2  ;;  %9717 = vmatmul.msk.bf16.gmra.mxu3 %vm1339_vm12, %v4187_v39  ;;  %v4050_v41 = vrot.slane %v4048_v22, 4  ;;  %v4053_v36 = vrot.slane %v4051_v55, 5  ;;  %v11937_v59 = vsel %vm10906_vm9, %v9734_v61, %v4508_v16  ;;  %v9967_v16 = vld [vmem:[%s14387_s3 + $0x10] sm:$0xf] }
 0x24c   : > { %v11890_v25 = vpop.f32.mrf.mxu0  ;;  %v4799_v15 = vmax.f32 %v4767_v0, 0.0  ;;  %v3680_v57 = vadd.f32 %v3601_v23, %v11235_v32  ;;  %v4063_v32 = vrot.slane %v4061_v18, 4  ;;  %v4046_v23 = vsel %vm10463_vm1, %v4041_v8, %v4045_v7 }
 0x24d   : > { %v4054_v0 = vor.u32 %v4053_v36, %v4050_v41  ;;  %v4167_v8 = vunpack.c.l.b16 %v4036_v6  ;;  %v4168_v18 = vunpack.c.l.b16 %v4046_v23 }
 0x24e   : > { %v4831_v39 = vpack.c.bf16 %v4799_v15, %v4799_v15  ;;  %v4334_v31 = vadd.f32 %v11821_v63, %v3680_v57  ;;  %v11901_v19 = vpop.f32.mrf.mxu3  ;;  %v9886_v63 = vld [vmem:[%s14387_s3 + $0xc] sm:$0xf]  ;;  %v4064_v22 = vor.u32 %v4063_v32, %v11897_v56  ;;  %v4069_v32 = vrot.slane %v4067_v51, 5 }
 0x24f   : > { %9749 = vmatmul.msk.bf16.gmra.mxu0 %vm1339_vm12, %v4584_v27  ;;  %v6686_v14 = vsel %vm5828_vm0, %v9886_v63, 0  ;;  %v4055_v29 = vrot.slane %v4054_v0, 4  ;;  %v11946_v0 = vsel %vm10906_vm9, %v4510_v9, %v4511_v43  ;;  %v4188_v61 = vpack.c.b16 %v4168_v18, %v4167_v8  ;;  %v11965_v18 = vld [vmem:[#allocation2 + $0xb8] sm:$0xf] }
 0x250   : > { %v4864_v33 = vshrl.u32 %v4831_v39, 16  ;;  %v4732_v27 = vadd.f32 %v11855_v50, %v4334_v31  ;;  %9699 = vmatmul.msk.bf16.gmra.mxu2 %vm1339_vm12, %v10192_v52  ;;  %v4867_v50 = vshll.u32 %v4831_v39, 16  ;;  %6695 = vmatpush.bf16.msrb.mxu0 %v6686_v14  ;;  %v4564_v52 = vunpack.c.l.b16 %v4505_v37 }
 0x251   : > { %v4065_v31 = vrot.slane %v4064_v22, 4  ;;  %v4060_v14 = vsel %vm10463_vm1, %v4055_v29, %v11897_v56  ;;  %v7340_v9 = vsel %vm5828_vm0, %v9967_v16, 0  ;;  %v5188_v29 = vld [vmem:[#allocation2 + $0x14] sm:$0x1] }
 0x252   : > { %v11921_v46 = vrot.slane %v4864_v33, 7  ;;  %v4768_v55 = vadd.f32 %v11868_v2, %v4732_v27  ;;  %v10288_v33 = vld [vmem:[#allocation2 + $0xc] sm:$0xf]  ;;  %v4585_v23 = vpack.c.b16 %v4564_v52, %v4563_v13  ;;  %7349 = vmatpush.bf16.msrb.mxu1 %v7340_v9  ;;  %v11963_v8 = vunpack.c.l.b16 %v4060_v14 }
 0x253   : > { %v3604_v57 = vpop.f32.mrf.mxu2  ;;  %v4070_v43 = vsel %vm10463_vm1, %v4065_v31, %v4069_v32 }
 0x254   : > { %v11931_v15 = vpop.f32.mrf.mxu0  ;;  %v4869_v41 = vor.u32 %v4867_v50, %v11921_v46  ;;  %v4800_v36 = vmax.f32 %v4768_v55, 0.0  ;;  %v3681_v39 = vadd.f32 %v3604_v57, %v11252_v58  ;;  %v4377_v58 = vld [vmem:[#allocation2 + $0xa8] sm:$0xe]  ;;  %v4565_v50 = vunpack.c.l.b16 %v11937_v59 }
 0x255   : > { %v4870_v13 = vrot.slane %v11921_v46, 4  ;;  %v4566_v55 = vunpack.c.l.b16 %v11946_v0  ;;  %v9735_v57 = vrot.slane %v4377_v58, 9  ;;  %v10193_v58 = vld [vmem:[#allocation2 + $0x90] sm:$0xff]  ;;  %v11972_v16 = vunpack.c.l.b16 %v4070_v43  ;;  %v11983_v43 = vld [vmem:[#allocation2 + $0xbc] sm:$0x1] }
 0x256   : > { %v5185_v27 = vsel %vm11927_vm11, %v4869_v41, %v10288_v33  ;;  %v4832_v63 = vpack.c.bf16 %v4800_v36, %v4800_v36  ;;  %v4335_v37 = vadd.f32 %v11837_v1, %v3681_v39  ;;  %v11942_v6 = vpop.f32.mrf.mxu3  ;;  %v4515_v1 = vrot.slane %v11888_v40, 5 }
 0x257   : > { %5186 = vst [vmem:[#allocation2 + $0xc] sm:$0xf] %v5185_v27  ;;  %v4518_v39 = vrot.slane %v11903_v38, 5 }
 0x258   : > { %v4872_v22 = vshrl.u32 %v4832_v63, 16  ;;  %v4733_v51 = vadd.f32 %v11890_v25, %v4335_v37  ;;  %v4875_v56 = vshll.u32 %v4832_v63, 16  ;;  %v3750_v25 = vld [vmem:[#allocation2 + $0xb4] sm:$0xf]  ;;  %v4517_v36 = vrot.slane %v4515_v1, 4 }
 0x259   : > { %v4072_v31 = vshrl.u32 %v3750_v25, 16  ;;  %v4075_v32 = vshll.u32 %v3750_v25, 16 }
 0x25a   : > { %v4874_v52 = vrot.slane %v4872_v22, 7  ;;  %v4769_v40 = vadd.f32 %v11868_v2, %v4733_v51  ;;  %v4081_v51 = vshll.u32 %v11965_v18, 16 }
 0x25b   : > { %v3606_v46 = vpop.f32.mrf.mxu2  ;;  %9718 = vmatmul.msk.bf16.gmra.mxu3 %vm1339_vm12, %v4188_v61  ;;  %v4074_v14 = vrot.slane %v4072_v31, 4  ;;  %v4077_v22 = vrot.slane %v4075_v32, 5 }
 0x25c   : > { %v11967_v41 = vpop.f32.mrf.mxu0  ;;  %v4877_v33 = vor.u32 %v4875_v56, %v4874_v52  ;;  %v4879_v27 = vrot.slane %v4874_v52, 4  ;;  %v4801_v63 = vmax.f32 %v4769_v40, 0.0  ;;  %v3682_v37 = vadd.f32 %v3606_v46, %v11273_v20 }
 0x25d   : > { %v4078_v46 = vor.u32 %v4077_v22, %v4074_v14 }
 0x25e   : > { %v4878_v61 = vsel %vm10396_vm10, %v4870_v13, %v4877_v33  ;;  %v5189_v38 = vsel %vm10350_vm3, %v4879_v27, %v5188_v29  ;;  %v4833_v9 = vpack.c.bf16 %v4801_v63, %v4801_v63  ;;  %v4336_v52 = vadd.f32 %v11870_v49, %v3682_v37  ;;  %v11981_v56 = vpop.f32.mrf.mxu3  ;;  %v5298_v20 = vld [vmem:[#allocation2 + $0xc] sm:$0xf] }
 0x25f   : > { %9750 = vmatmul.msk.bf16.gmra.mxu0 %vm1339_vm12, %v4585_v23  ;;  %5187 = vst.msk [vmem:[#allocation2 + $0x10] sm:$0xf] %vm227_vm5, %v4878_v61  ;;  %v5370_v40 = vshrl.u32 %v5298_v20, 16  ;;  %v5373_v25 = vshll.u32 %v5298_v20, 16  ;;  %v4516_v13 = vsel %vm10906_vm9, %v9735_v57, %v4515_v1  ;;  %v4519_v49 = vsel %vm10906_vm9, %v4517_v36, %v4518_v39 }
 0x260   : > { %5190 = vst [vmem:[#allocation2 + $0x14] sm:$0x1] %v5189_v38  ;;  %v4881_v29 = vshrl.u32 %v4833_v9, 16  ;;  %v4734_v31 = vadd.f32 %v11931_v15, %v4336_v52  ;;  %9700 = vmatmul.msk.bf16.gmra.mxu2 %vm1339_vm12, %v10193_v58  ;;  %v4085_v23 = vshrl.u32 %v11965_v18, 16  ;;  %v4083_v27 = vrot.slane %v4081_v51, 5 }
 0x261   : > { %v5372_v32 = vrot.slane %v5370_v40, 4  ;;  %v5375_v33 = vrot.slane %v5373_v25, 5  ;;  %v4091_v63 = vshll.u32 %v11983_v43, 16  ;;  %v4884_v1 = vshll.u32 %v4833_v9, 16  ;;  %v5191_v58 = vld [vmem:[#allocation2 + $0x18] sm:$0xf] }
 0x262   : > { %v11994_v37 = vrot.slane %v4881_v29, 7  ;;  %v4770_v57 = vadd.f32 %v11868_v2, %v4734_v31  ;;  %v4087_v14 = vrot.slane %v4085_v23, 4  ;;  %v11999_v15 = vadd.f32 %v11381_v10, %v11442_v54 }
 0x263   : > { %v3609_v36 = vpop.f32.mrf.mxu2  ;;  %v4567_v39 = vunpack.c.l.b16 %v4516_v13  ;;  %v4568_v61 = vunpack.c.l.b16 %v4519_v49  ;;  %v4079_v38 = vrot.slane %v4078_v46, 4  ;;  %v5376_v9 = vor.u32 %v5375_v33, %v5372_v32  ;;  %v4378_v33 = vld [vmem:[#allocation2 + $0xb4] sm:$0xe] }
 0x264   : > { %v12001_v22 = vpop.f32.mrf.mxu0  ;;  %v4886_v51 = vor.u32 %v4884_v1, %v11994_v37  ;;  %v4802_v52 = vmax.f32 %v4770_v57, 0.0  ;;  %v3683_v20 = vadd.f32 %v3609_v36, %v11297_v26  ;;  %v4586_v40 = vpack.c.b16 %v4566_v55, %v4565_v50 }
 0x265   : > { %v4189_v10 = vpack.c.b16 %v11972_v16, %v11963_v8  ;;  %v4088_v54 = vor.u32 %v4087_v14, %v4083_v27  ;;  %v4093_v25 = vrot.slane %v4091_v63, 5  ;;  %v4887_v13 = vrot.slane %v11994_v37, 4 }
 0x266   : > { %v5192_v46 = vsel %vm11927_vm11, %v4886_v51, %v5191_v58  ;;  %v4834_v29 = vpack.c.bf16 %v4802_v52, %v4802_v52  ;;  %v4337_v31 = vadd.f32 %v11901_v19, %v3683_v20  ;;  %v12015_v26 = vpop.f32.mrf.mxu3  ;;  %v12017_v49 = vld [vmem:[#allocation2 + $0x10] sm:$0xf]  ;;  %v12023_v55 = vpack.c.b16 %v4568_v61, %v4567_v39  ;;  %v5195_v61 = vld [vmem:[#allocation2 + $0x20] sm:$0x1] }
 0x267   : > { %5193 = vst [vmem:[#allocation2 + $0x18] sm:$0xf] %v5192_v46  ;;  %v12019_v59 = vld [vmem:[#allocation2 + $0x14] sm:$0x1]  ;;  %v5379_v0 = vshll.u32 %v12017_v49, 16  ;;  %v5383_v50 = vshrl.u32 %v12017_v49, 16  ;;  %v4084_v8 = vsel %vm10463_vm1, %v4079_v38, %v4083_v27 }
 0x268   : > { %v4889_v16 = vshrl.u32 %v4834_v29, 16  ;;  %v4735_v23 = vadd.f32 %v11967_v41, %v4337_v31  ;;  %v5377_v19 = vrot.slane %v5376_v9, 4  ;;  %v5389_v32 = vshll.u32 %v12019_v59, 16 }
 0x269   : > { %v5381_v63 = vrot.slane %v5379_v0, 5  ;;  %v5385_v37 = vrot.slane %v5383_v50, 4  ;;  %v4089_v1 = vrot.slane %v4088_v54, 4  ;;  %v4522_v57 = vrot.slane %v11965_v18, 5 }
 0x26a   : > { %v4891_v14 = vrot.slane %v4889_v16, 7  ;;  %v4892_v58 = vshll.u32 %v4834_v29, 16  ;;  %v4771_v36 = vadd.f32 %v11868_v2, %v4735_v23  ;;  %v12031_v39 = vunpack.c.l.b16 %v4084_v8  ;;  %v10194_v29 = vld [vmem:[#allocation2 + $0x9c] sm:$0xff] }
 0x26b   : > { %v3611_v38 = vpop.f32.mrf.mxu2  ;;  %v5386_v41 = vor.u32 %v5385_v37, %v5381_v63  ;;  %v5391_v51 = vrot.slane %v5389_v32, 5  ;;  %9719 = vmatmul.msk.bf16.gmra.mxu3 %vm1339_vm12, %v4189_v10  ;;  %v4094_v52 = vsel %vm10463_vm1, %v4089_v1, %v4093_v25  ;;  %v9736_v20 = vrot.slane %v4378_v33, 9 }
 0x26c   : > { %v12033_v27 = vpop.f32.mrf.mxu0  ;;  %v4894_v9 = vor.u32 %v4892_v58, %v4891_v14  ;;  %v4896_v18 = vrot.slane %v4891_v14, 4  ;;  %v4803_v54 = vmax.f32 %v4771_v36, 0.0  ;;  %v3684_v46 = vadd.f32 %v3611_v38, %v11332_v12  ;;  %v3753_v14 = vld [vmem:[#allocation2 + $0xc0] sm:$0xf] }
 0x26d   : > { %v5382_v31 = vsel %vm10463_vm1, %v5377_v19, %v5381_v63  ;;  %v5387_v0 = vrot.slane %v5386_v41, 4  ;;  %v12041_v50 = vunpack.c.l.b16 %v4094_v52  ;;  %v4524_v8 = vrot.slane %v4522_v57, 4  ;;  %v12063_v41 = vld [vmem:[#allocation2 + $0xc4] sm:$0xf] }
 0x26e   : > { %v4895_v10 = vsel %vm10396_vm10, %v4887_v13, %v4894_v9  ;;  %v5196_v25 = vsel %vm10350_vm3, %v4896_v18, %v5195_v61  ;;  %v4835_v16 = vpack.c.bf16 %v4803_v54, %v4803_v54  ;;  %v4338_v23 = vadd.f32 %v11942_v6, %v3684_v46  ;;  %v12049_v12 = vpop.f32.mrf.mxu3  ;;  %v5300_v32 = vld [vmem:[#allocation2 + $0x18] sm:$0xf]  ;;  %v5198_v9 = vld [vmem:[#allocation2 + $0x24] sm:$0xf] }
 0x26f   : > { %9751 = vmatmul.msk.bf16.gmra.mxu0 %vm1339_vm12, %v4586_v40  ;;  %5194 = vst.msk [vmem:[#allocation2 + $0x1c] sm:$0xf] %vm227_vm5, %v4895_v10  ;;  %v5392_v19 = vsel %vm10463_vm1, %v5387_v0, %v5391_v51  ;;  %v5394_v33 = vshrl.u32 %v5300_v32, 16  ;;  %v5397_v63 = vshll.u32 %v5300_v32, 16  ;;  %v4525_v13 = vrot.slane %v11983_v43, 5 }
 0x270   : > { %5197 = vst [vmem:[#allocation2 + $0x20] sm:$0x1] %v5196_v25  ;;  %v4898_v37 = vshrl.u32 %v4835_v16, 16  ;;  %v4736_v1 = vadd.f32 %v12001_v22, %v4338_v23  ;;  %9701 = vmatmul.msk.bf16.gmra.mxu2 %vm1339_vm12, %v10194_v29  ;;  %v5733_v40 = vunpack.c.l.b16 %v5382_v31  ;;  %v5734_v6 = vunpack.c.l.b16 %v5392_v19 }
 0x271   : > { %v5396_v58 = vrot.slane %v5394_v33, 4  ;;  %v5399_v36 = vrot.slane %v5397_v63, 5  ;;  %v4190_v61 = vpack.c.b16 %v12041_v50, %v12031_v39  ;;  %v12061_v38 = vsel %vm10906_vm9, %v9736_v20, %v4522_v57 }
 0x272   : > { %v12065_v43 = vrot.slane %v4898_v37, 7  ;;  %v4901_v51 = vshll.u32 %v4835_v16, 16  ;;  %v4772_v22 = vadd.f32 %v11868_v2, %v4736_v1  ;;  %v5764_v52 = vpack.c.b16 %v5734_v6, %v5733_v40 }
 0x273   : > { %v3614_v54 = vpop.f32.mrf.mxu2  ;;  %v5400_v46 = vor.u32 %v5399_v36, %v5396_v58  ;;  %v12072_v39 = vsel %vm10906_vm9, %v4524_v8, %v4525_v13  ;;  %v4096_v29 = vshrl.u32 %v3753_v14, 16  ;;  %v4099_v57 = vshll.u32 %v3753_v14, 16  ;;  %v12094_v36 = vld [vmem:[#allocation2 + $0xc8] sm:$0x1] }
 0x274   : > { %v12068_v18 = vpop.f32.mrf.mxu0  ;;  %v4903_v20 = vor.u32 %v4901_v51, %v12065_v43  ;;  %v4804_v31 = vmax.f32 %v4772_v22, 0.0  ;;  %v3685_v0 = vadd.f32 %v3614_v54, %v11368_v34  ;;  %9758 = vmatmul.msk.bf16.gmra.mxu1 %vm5779_vm7, %v5764_v52  ;;  %v4105_v50 = vshll.u32 %v12063_v41, 16 }
 0x275   : > { %v4904_v10 = vrot.slane %v12065_v43, 4  ;;  %v4569_v25 = vunpack.c.l.b16 %v12061_v38  ;;  %v4098_v16 = vrot.slane %v4096_v29, 4  ;;  %v4101_v23 = vrot.slane %v4099_v57, 5  ;;  %v346_v38 = vld [vmem:[#allocation2 + $0xd4] sm:$0x1] }
 0x276   : > { %v5199_v8 = vsel %vm11927_vm11, %v4903_v20, %v5198_v9  ;;  %v4836_v32 = vpack.c.bf16 %v4804_v31, %v4804_v31  ;;  %v4339_v19 = vadd.f32 %v11981_v56, %v3685_v0  ;;  %v12083_v33 = vpop.f32.mrf.mxu3  ;;  %v12085_v63 = vld [vmem:[#allocation2 + $0x1c] sm:$0xf]  ;;  %v5401_v34 = vrot.slane %v5400_v46, 4  ;;  %v5202_v20 = vld [vmem:[#allocation2 + $0x2c] sm:$0x1] }
 0x277   : > { %5200 = vst [vmem:[#allocation2 + $0x24] sm:$0xf] %v5199_v8  ;;  %v12087_v13 = vld [vmem:[#allocation2 + $0x20] sm:$0x1]  ;;  %v5403_v37 = vshll.u32 %v12085_v63, 16  ;;  %v5407_v1 = vshrl.u32 %v12085_v63, 16  ;;  %v4570_v40 = vunpack.c.l.b16 %v12072_v39  ;;  %v4102_v6 = vor.u32 %v4101_v23, %v4098_v16 }
 0x278   : > { %v4906_v14 = vshrl.u32 %v4836_v32, 16  ;;  %v4737_v58 = vadd.f32 %v12033_v27, %v4339_v19  ;;  %v5413_v56 = vshll.u32 %v12087_v13, 16  ;;  %v4107_v43 = vrot.slane %v4105_v50, 5 }
 0x279   : > { %v5405_v51 = vrot.slane %v5403_v37, 5  ;;  %v5409_v22 = vrot.slane %v5407_v1, 4  ;;  %v4103_v52 = vrot.slane %v4102_v6, 4  ;;  %v4109_v9 = vshrl.u32 %v12063_v41, 16  ;;  %v10195_v1 = vld [vmem:[#allocation2 + $0xa8] sm:$0xff] }
 0x27a   : > { %v4908_v54 = vrot.slane %v4906_v14, 7  ;;  %v4909_v46 = vshll.u32 %v4836_v32, 16  ;;  %v4773_v29 = vadd.f32 %v11868_v2, %v4737_v58  ;;  %v5415_v57 = vrot.slane %v5413_v56, 5 }
 0x27b   : > { %v3616_v0 = vpop.f32.mrf.mxu2  ;;  %v5406_v27 = vsel %vm10463_vm1, %v5401_v34, %v5405_v51  ;;  %v5410_v16 = vor.u32 %v5409_v22, %v5405_v51  ;;  %9720 = vmatmul.msk.bf16.gmra.mxu3 %vm1339_vm12, %v4190_v61  ;;  %v4111_v50 = vrot.slane %v4109_v9, 4  ;;  %v4115_v23 = vshll.u32 %v12094_v36, 16 }
 0x27c   : > { %v12098_v31 = vpop.f32.mrf.mxu0  ;;  %v4911_v8 = vor.u32 %v4909_v46, %v4908_v54  ;;  %v4913_v19 = vrot.slane %v4908_v54, 4  ;;  %v4805_v37 = vmax.f32 %v4773_v29, 0.0  ;;  %v3686_v32 = vadd.f32 %v3616_v0, %v11399_v42  ;;  %v4379_v54 = vld [vmem:[#allocation2 + $0xc0] sm:$0xe] }
 0x27d   : > { %v5411_v6 = vrot.slane %v5410_v16, 4  ;;  %v5735_v14 = vunpack.c.l.b16 %v5406_v27  ;;  %v4108_v58 = vsel %vm10463_vm1, %v4103_v52, %v4107_v43  ;;  %v4112_v56 = vor.u32 %v4111_v50, %v4107_v43 }
 0x27e   : > { %v4912_v34 = vsel %vm10396_vm10, %v4904_v10, %v4911_v8  ;;  %v5203_v61 = vsel %vm10350_vm3, %v4913_v19, %v5202_v20  ;;  %v4837_v51 = vpack.c.bf16 %v4805_v37, %v4805_v37  ;;  %v4340_v22 = vadd.f32 %v12015_v26, %v3686_v32  ;;  %v12114_v42 = vpop.f32.mrf.mxu3  ;;  %v5302_v9 = vld [vmem:[#allocation2 + $0x24] sm:$0xf]  ;;  %v5205_v32 = vld [vmem:[#allocation2 + $0x30] sm:$0xf] }
 0x27f   : > { %9752 = vmatmul.msk.bf16.gmra.mxu0 %vm1339_vm12, %v12023_v55  ;;  %5201 = vst.msk [vmem:[#allocation2 + $0x28] sm:$0xf] %vm227_vm5, %v4912_v34  ;;  %v5416_v43 = vsel %vm10463_vm1, %v5411_v6, %v5415_v57  ;;  %v5418_v52 = vshrl.u32 %v5302_v9, 16  ;;  %v5421_v10 = vshll.u32 %v5302_v9, 16  ;;  %v4117_v46 = vrot.slane %v4115_v23, 5 }
 0x280   : > { %5204 = vst [vmem:[#allocation2 + $0x2c] sm:$0x1] %v5203_v61  ;;  %v4915_v29 = vshrl.u32 %v4837_v51, 16  ;;  %v4918_v20 = vshll.u32 %v4837_v51, 16  ;;  %v4738_v0 = vadd.f32 %v12068_v18, %v4340_v22  ;;  %9702 = vmatmul.msk.bf16.gmra.mxu2 %vm1339_vm12, %v10195_v1  ;;  %v5736_v26 = vunpack.c.l.b16 %v5416_v43  ;;  %v290_v55 = vld [vmem:[#allocation2 + $0xcc] sm:$0x1] }
 0x281   : > { %v5420_v27 = vrot.slane %v5418_v52, 4  ;;  %v5423_v16 = vrot.slane %v5421_v10, 5  ;;  %v4113_v50 = vrot.slane %v4112_v56, 4  ;;  %v9737_v8 = vrot.slane %v4379_v54, 9 }
 0x282   : > { %v12121_v19 = vrot.slane %v4915_v29, 7  ;;  %v4774_v57 = vadd.f32 %v11868_v2, %v4738_v0  ;;  %v5765_v37 = vpack.c.b16 %v5736_v26, %v5735_v14  ;;  %v4529_v23 = vrot.slane %v12063_v41, 5 }
 0x283   : > { %v3619_v34 = vpop.f32.mrf.mxu2  ;;  %v4118_v18 = vsel %vm10463_vm1, %v4113_v50, %v4117_v46  ;;  %v4173_v1 = vunpack.c.l.b16 %v4108_v58  ;;  %v4532_v61 = vrot.slane %v12094_v36, 5  ;;  %v291_v56 = vsel %vm10350_vm3, 0, %v290_v55 }
 0x284   : > { %v12125_v6 = vpop.f32.mrf.mxu0  ;;  %v4920_v51 = vor.u32 %v4918_v20, %v12121_v19  ;;  %v4806_v22 = vmax.f32 %v4774_v57, 0.0  ;;  %v3687_v14 = vadd.f32 %v3619_v34, %v11417_v35  ;;  %9759 = vmatmul.msk.bf16.gmra.mxu1 %vm5779_vm7, %v5765_v37  ;;  %v5424_v41 = vor.u32 %v5423_v16, %v5420_v27  ;;  %292 = vst [vmem:[#allocation2 + $0xcc] sm:$0x1] %v291_v56  ;;  %v12161_v16 = vld [vmem:[#allocation2 + $0xd0] sm:$0xf] }
 0x285   : > { %v4921_v9 = vrot.slane %v12121_v19, 4  ;;  %v4588_v58 = vpack.c.b16 %v4570_v40, %v4569_v25  ;;  %v4174_v36 = vunpack.c.l.b16 %v4118_v18  ;;  %v4531_v54 = vrot.slane %v4529_v23, 4 }
 0x286   : > { %v5206_v43 = vsel %vm11927_vm11, %v4920_v51, %v5205_v32  ;;  %v4838_v52 = vpack.c.bf16 %v4806_v22, %v4806_v22  ;;  %v4341_v10 = vadd.f32 %v12049_v12, %v3687_v14  ;;  %v12143_v35 = vpop.f32.mrf.mxu3  ;;  %v12145_v46 = vld [vmem:[#allocation2 + $0x28] sm:$0xf]  ;;  %v12149_v29 = vsel %vm10906_vm9, %v9737_v8, %v4529_v23 }
 0x287   : > { %5207 = vst [vmem:[#allocation2 + $0x30] sm:$0xf] %v5206_v43  ;;  %v12151_v39 = vld [vmem:[#allocation2 + $0x2c] sm:$0x1]  ;;  %v5427_v25 = vshll.u32 %v12145_v46, 16  ;;  %v5431_v40 = vshrl.u32 %v12145_v46, 16  ;;  %v4191_v20 = vpack.c.b16 %v4174_v36, %v4173_v1  ;;  %v12157_v12 = vsel %vm10906_vm9, %v4531_v54, %v4532_v61 }
 0x288   : > { %v4923_v0 = vshrl.u32 %v4838_v52, 16  ;;  %v4739_v26 = vadd.f32 %v12098_v31, %v4341_v10  ;;  %v5425_v55 = vrot.slane %v5424_v41, 4  ;;  %v5437_v27 = vshll.u32 %v12151_v39, 16  ;;  %v5209_v31 = vld [vmem:[#allocation2 + $0x38] sm:$0x1] }
 0x289   : > { %v5429_v50 = vrot.slane %v5427_v25, 5  ;;  %v5433_v8 = vrot.slane %v5431_v40, 4  ;;  %v4571_v19 = vunpack.c.l.b16 %v12149_v29  ;;  %v347_v57 = vsel %vm10358_vm6, 0, %v346_v38  ;;  %v10196_v43 = vld [vmem:[#allocation2 + $0xb4] sm:$0xff] }
 0x28a   : > { %v4925_v37 = vrot.slane %v4923_v0, 7  ;;  %v4926_v23 = vshll.u32 %v4838_v52, 16  ;;  %v4775_v32 = vadd.f32 %v11868_v2, %v4739_v26  ;;  %v4572_v34 = vunpack.c.l.b16 %v12157_v12  ;;  %348 = vst [vmem:[#allocation2 + $0xd4] sm:$0x1] %v347_v57 }
 0x28b   : > { %v3621_v1 = vpop.f32.mrf.mxu2  ;;  %v5430_v61 = vsel %vm10463_vm1, %v5425_v55, %v5429_v50  ;;  %v5434_v56 = vor.u32 %v5433_v8, %v5429_v50  ;;  %v5439_v51 = vrot.slane %v5437_v27, 5  ;;  %9721 = vmatmul.msk.bf16.gmra.mxu3 %vm1339_vm12, %v4191_v20  ;;  %v3756_v5 = vld [vmem:[#allocation2 + $0xcc] sm:$0xf]  ;;  %v4129_v22 = vshll.u32 %v12161_v16, 16 }
 0x28c   : > { %v12168_v18 = vpop.f32.mrf.mxu0  ;;  %v4928_v14 = vor.u32 %v4926_v23, %v4925_v37  ;;  %v4930_v41 = vrot.slane %v4925_v37, 4  ;;  %v4807_v36 = vmax.f32 %v4775_v32, 0.0  ;;  %v3688_v54 = vadd.f32 %v3621_v1, %v11999_v15 }
 0x28d   : > { %v5435_v52 = vrot.slane %v5434_v56, 4  ;;  %v4120_v10 = vshrl.u32 %v3756_v5, 16  ;;  %v4123_v38 = vshll.u32 %v3756_v5, 16  ;;  %v4133_v25 = vshrl.u32 %v12161_v16, 16 }
 0x28e   : > { %v4929_v40 = vsel %vm10396_vm10, %v4921_v9, %v4928_v14  ;;  %v5210_v20 = vsel %vm10350_vm3, %v4930_v41, %v5209_v31  ;;  %v4839_v0 = vpack.c.bf16 %v4807_v36, %v4807_v36  ;;  %v4342_v26 = vadd.f32 %v12083_v33, %v3688_v54  ;;  %v12182_v55 = vpop.f32.mrf.mxu3  ;;  %v5304_v15 = vld [vmem:[#allocation2 + $0x30] sm:$0xf]  ;;  %v5212_v41 = vld [vmem:[#allocation2 + $0x3c] sm:$0xf] }
 0x28f   : > { %9753 = vmatmul.msk.bf16.gmra.mxu0 %vm1339_vm12, %v4588_v58  ;;  %5208 = vst.msk [vmem:[#allocation2 + $0x34] sm:$0xf] %vm227_vm5, %v4929_v40  ;;  %v5440_v27 = vsel %vm10463_vm1, %v5435_v52, %v5439_v51  ;;  %v5737_v50 = vunpack.c.l.b16 %v5430_v61  ;;  %v5442_v8 = vshrl.u32 %v5304_v15, 16  ;;  %v5445_v57 = vshll.u32 %v5304_v15, 16 }
 0x290   : > { %5211 = vst [vmem:[#allocation2 + $0x38] sm:$0x1] %v5210_v20  ;;  %v4932_v9 = vshrl.u32 %v4839_v0, 16  ;;  %v4935_v37 = vshll.u32 %v4839_v0, 16  ;;  %v4740_v23 = vadd.f32 %v12125_v6, %v4342_v26  ;;  %9703 = vmatmul.msk.bf16.gmra.mxu2 %vm1339_vm12, %v10196_v43  ;;  %v5738_v58 = vunpack.c.l.b16 %v5440_v27  ;;  %v14462_v20 = vld [vmem:[#allocation19_spill] sm:$0xff]  ;;  %v14463_v26 = vld [vmem:[#allocation20_spill] sm:$0xff] }
 0x291   : > { %v5444_v33 = vrot.slane %v5442_v8, 4  ;;  %v5447_v32 = vrot.slane %v5445_v57, 5  ;;  %v12189_v31 = vld [vmem:[#allocation2 + $0xd4] sm:$0x1]  ;;  %v4122_v1 = vrot.slane %v4120_v10, 4  ;;  %v4125_v56 = vrot.slane %v4123_v38, 5 }
 0x292   : > { %v12191_v5 = vrot.slane %v4932_v9, 7  ;;  %v4776_v61 = vadd.f32 %v11868_v2, %v4740_v23  ;;  %v5766_v51 = vpack.c.b16 %v5738_v58, %v5737_v50  ;;  %v4131_v14 = vrot.slane %v4129_v22, 5  ;;  %v4380_v57 = vld [vmem:[#allocation2 + $0xcc] sm:$0xe] }
 0x293   : > { %v3624_v54 = vpop.f32.mrf.mxu2  ;;  %v5448_v6 = vor.u32 %v5447_v32, %v5444_v33  ;;  %v4126_v52 = vor.u32 %v4125_v56, %v4122_v1  ;;  %v4135_v43 = vrot.slane %v4133_v25, 4  ;;  %v4139_v40 = vshll.u32 %v12189_v31, 16 }
 0x294   : > { %v12194_v36 = vpop.f32.mrf.mxu0  ;;  %v3403_v0 = vadd.f32 %v14462_v20, %v11494_v21  ;;  %v4937_v10 = vor.u32 %v4935_v37, %v12191_v5  ;;  %v4808_v38 = vmax.f32 %v4776_v61, 0.0  ;;  %v3689_v15 = vadd.f32 %v3624_v54, %v14463_v26  ;;  %9760 = vmatmul.msk.bf16.gmra.mxu1 %vm5779_vm7, %v5766_v51 }
 0x295   : > { %v4938_v22 = vrot.slane %v12191_v5, 4  ;;  %v5449_v27 = vrot.slane %v5448_v6, 4  ;;  %v4127_v50 = vrot.slane %v4126_v52, 4  ;;  %v4136_v8 = vor.u32 %v4135_v43, %v4131_v14 }
 0x296   : > { %v5213_v25 = vsel %vm11927_vm11, %v4937_v10, %v5212_v41  ;;  %v4840_v9 = vpack.c.bf16 %v4808_v38, %v4808_v38  ;;  %v4343_v23 = vadd.f32 %v12114_v42, %v3689_v15  ;;  %v12206_v21 = vpop.f32.mrf.mxu3  ;;  %v12208_v37 = vld [vmem:[#allocation2 + $0x34] sm:$0xf]  ;;  %v4141_v58 = vrot.slane %v4139_v40, 5  ;;  %v5216_v40 = vld [vmem:[#allocation2 + $0x44] sm:$0x1] }
 0x297   : > { %5214 = vst [vmem:[#allocation2 + $0x3c] sm:$0xf] %v5213_v25  ;;  %v4589_v33 = vpack.c.b16 %v4572_v34, %v4571_v19  ;;  %v12214_v32 = vld [vmem:[#allocation2 + $0x38] sm:$0x1]  ;;  %v5451_v1 = vshll.u32 %v12208_v37, 16  ;;  %v5455_v56 = vshrl.u32 %v12208_v37, 16  ;;  %v4132_v42 = vsel %vm10463_vm1, %v4127_v50, %v4131_v14 }
 0x298   : > { %v4940_v5 = vshrl.u32 %v4840_v9, 16  ;;  %v4741_v61 = vadd.f32 %v12168_v18, %v4343_v23  ;;  %v5461_v51 = vshll.u32 %v12214_v32, 16  ;;  %v9738_v41 = vrot.slane %v4380_v57, 9  ;;  %v10197_v25 = vld [vmem:[#allocation2 + $0xc0] sm:$0xff] }
 0x299   : > { %v4943_v54 = vshll.u32 %v4840_v9, 16  ;;  %v5453_v29 = vrot.slane %v5451_v1, 5  ;;  %v5457_v6 = vrot.slane %v5455_v56, 4  ;;  %v4137_v12 = vrot.slane %v4136_v8, 4 }
 0x29a   : > { %v4942_v19 = vrot.slane %v4940_v5, 7  ;;  %v4777_v34 = vadd.f32 %v11868_v2, %v4741_v61  ;;  %v5463_v52 = vrot.slane %v5461_v51, 5  ;;  %v4175_v43 = vunpack.c.l.b16 %v4132_v42 }
 0x29b   : > { %v3626_v10 = vpop.f32.mrf.mxu2  ;;  %v5454_v14 = vsel %vm10463_vm1, %v5449_v27, %v5453_v29  ;;  %v5458_v18 = vor.u32 %v5457_v6, %v5453_v29  ;;  %v4142_v38 = vsel %vm10463_vm1, %v4137_v12, %v4141_v58  ;;  %v4536_v26 = vrot.slane %v12161_v16, 5 }
 0x29c   : > { %v12223_v20 = vpop.f32.mrf.mxu0  ;;  %v4945_v15 = vor.u32 %v4943_v54, %v4942_v19  ;;  %v4947_v50 = vrot.slane %v4942_v19, 4  ;;  %v4809_v8 = vmax.f32 %v4777_v34, 0.0  ;;  %v3690_v57 = vadd.f32 %v3626_v10, %v3403_v0 }
 0x29d   : > { %v5459_v9 = vrot.slane %v5458_v18, 4  ;;  %v4176_v23 = vunpack.c.l.b16 %v4142_v38  ;;  %v4537_v1 = vsel %vm10906_vm9, %v9738_v41, %v4536_v26  ;;  %v4539_v56 = vrot.slane %v12189_v31, 5 }
 0x29e   : > { %v4946_v27 = vsel %vm10396_vm10, %v4938_v22, %v4945_v15  ;;  %v5217_v58 = vsel %vm10350_vm3, %v4947_v50, %v5216_v40  ;;  %v4841_v42 = vpack.c.bf16 %v4809_v8, %v4809_v8  ;;  %v4344_v16 = vadd.f32 %v12143_v35, %v3690_v57  ;;  %v12239_v0 = vpop.f32.mrf.mxu3  ;;  %v5306_v5 = vld [vmem:[#allocation2 + $0x3c] sm:$0xf]  ;;  %v6141_v22 = vld [vmem:[#allocation2] sm:$0xe]  ;;  %v10289_v15 = vld [vmem:[#allocation2 + $0x4] sm:$0xf] }
 0x29f   : > { %9754 = vmatmul.msk.bf16.gmra.mxu0 %vm1339_vm12, %v4589_v33  ;;  %5215 = vst.msk [vmem:[#allocation2 + $0x40] sm:$0xf] %vm227_vm5, %v4946_v27  ;;  %v5464_v61 = vsel %vm10463_vm1, %v5459_v9, %v5463_v52  ;;  %v5739_v31 = vunpack.c.l.b16 %v5454_v14  ;;  %v4192_v51 = vpack.c.b16 %v4176_v23, %v4175_v43  ;;  %v4538_v41 = vrot.slane %v4536_v26, 4  ;;  %v5219_v14 = vld [vmem:[#allocation2 + $0x48] sm:$0xf] }
 0x2a0   : > { %5218 = vst [vmem:[#allocation2 + $0x44] sm:$0x1] %v5217_v58  ;;  %v4949_v54 = vshrl.u32 %v4841_v42, 16  ;;  %v4742_v29 = vadd.f32 %v12194_v36, %v4344_v16  ;;  %9704 = vmatmul.msk.bf16.gmra.mxu2 %vm1339_vm12, %v10197_v25  ;;  %v5740_v33 = vunpack.c.l.b16 %v5464_v61  ;;  %v4573_v35 = vunpack.c.l.b16 %v4537_v1  ;;  %v10290_v8 = vld [vmem:[#allocation2 + $0x8] sm:$0x1] }
 0x2a1   : > { %v4952_v6 = vshll.u32 %v4841_v42, 16  ;;  %9722 = vmatmul.msk.bf16.gmra.mxu3 %vm1339_vm12, %v4192_v51  ;;  %v4540_v12 = vsel %vm10906_vm9, %v4538_v41, %v4539_v56  ;;  %v5466_v19 = vshrl.u32 %v5306_v5, 16  ;;  %v5469_v34 = vshll.u32 %v5306_v5, 16 }
 0x2a2   : > { %v12249_v52 = vrot.slane %v4949_v54, 7  ;;  %v4778_v43 = vadd.f32 %v11868_v2, %v4742_v29  ;;  %v5767_v40 = vpack.c.b16 %v5740_v33, %v5739_v31  ;;  %v9853_v10 = vrot.slane %v6141_v22, 9 }
 0x2a3   : > { %v3629_v18 = vpop.f32.mrf.mxu2  ;;  %v5468_v38 = vrot.slane %v5466_v19, 4  ;;  %v5471_v26 = vrot.slane %v5469_v34, 5  ;;  %v6191_v50 = vrot.slane %v10289_v15, 5  ;;  %v6194_v57 = vrot.slane %v10290_v8, 5  ;;  %v12279_v34 = vld [vmem:[%s14386_s2] ss:$0 sm:$0xff] }
 0x2a4   : > { %v12252_v36 = vpop.f32.mrf.mxu0  ;;  %v4954_v25 = vor.u32 %v4952_v6, %v12249_v52  ;;  %v4810_v9 = vmax.f32 %v4778_v43, 0.0  ;;  %v3691_v23 = vadd.f32 %v3629_v18, %v11517_v53  ;;  %9761 = vmatmul.msk.bf16.gmra.mxu1 %vm5779_vm7, %v5767_v40  ;;  %v4574_v2 = vunpack.c.l.b16 %v4540_v12  ;;  %v5223_v40 = vld [vmem:[#allocation2 + $0x50] sm:$0x1] }
 0x2a5   : > { %v6193_v1 = vrot.slane %v6191_v50, 4  ;;  %v6192_v5 = vsel %vm10906_vm9, %v9853_v10, %v6191_v50  ;;  %v3405_v53 = vadd.f32 %v11481_v24, %v11533_v45  ;;  %v5472_v61 = vor.u32 %v5471_v26, %v5468_v38 }
 0x2a6   : > { %v5220_v56 = vsel %vm11927_vm11, %v4954_v25, %v5219_v14  ;;  %v4842_v27 = vpack.c.bf16 %v4810_v9, %v4810_v9  ;;  %v4345_v58 = vadd.f32 %v12182_v55, %v3691_v23  ;;  %v12260_v42 = vpop.f32.mrf.mxu3  ;;  %v12262_v16 = vld [vmem:[#allocation2 + $0x40] sm:$0xf]  ;;  %v4590_v22 = vpack.c.b16 %v4574_v2, %v4573_v35  ;;  %v6142_v25 = vld [vmem:[#allocation2 + $0xc] sm:$0xe] }
 0x2a7   : > { %5221 = vst [vmem:[#allocation2 + $0x48] sm:$0xf] %v5220_v56  ;;  %v5475_v31 = vshll.u32 %v12262_v16, 16  ;;  %v6195_v51 = vsel %vm10906_vm9, %v6193_v1, %v6194_v57  ;;  %v12272_v54 = vld [vmem:[#allocation2 + $0x44] sm:$0x1]  ;;  %v5479_v29 = vshrl.u32 %v12262_v16, 16  ;;  %v6303_v6 = vunpack.c.l.b16 %v6192_v5 }
 0x2a8   : > { %v4957_v41 = vshrl.u32 %v4842_v27, 16  ;;  %v4743_v55 = vadd.f32 %v12223_v20, %v4345_v58  ;;  %v6304_v12 = vunpack.c.l.b16 %v6195_v51  ;;  %v6198_v24 = vrot.slane %v12017_v49, 5  ;;  %v10198_v57 = vld [vmem:[#allocation2 + $0xcc] sm:$0xff] }
 0x2a9   : > { %v5477_v33 = vrot.slane %v5475_v31, 5  ;;  %v4960_v19 = vshll.u32 %v4842_v27, 16  ;;  %v5481_v20 = vrot.slane %v5479_v29, 4  ;;  %v4955_v35 = vrot.slane %v12249_v52, 4 }
 0x2aa   : > { %v4959_v45 = vrot.slane %v4957_v41, 7  ;;  %v4779_v43 = vadd.f32 %v12279_v34, %v4743_v55  ;;  %v5473_v18 = vrot.slane %v5472_v61, 4  ;;  %v5485_v38 = vshll.u32 %v12272_v54, 16 }
 0x2ab   : > { %v3631_v14 = vpop.f32.mrf.mxu2  ;;  %v6201_v49 = vrot.slane %v12019_v59, 5  ;;  %v5482_v23 = vor.u32 %v5481_v20, %v5477_v33  ;;  %v6335_v52 = vpack.c.b16 %v6304_v12, %v6303_v6  ;;  %v6200_v2 = vrot.slane %v6198_v24, 4 }
 0x2ac   : > { %v12283_v10 = vpop.f32.mrf.mxu0  ;;  %v4962_v26 = vor.u32 %v4960_v19, %v4959_v45  ;;  %v4964_v15 = vrot.slane %v4959_v45, 4  ;;  %v4811_v50 = vmax.f32 %v4779_v43, 0.0  ;;  %v3692_v8 = vadd.f32 %v3631_v14, %v3405_v53  ;;  %v6143_v45 = vld [vmem:[#allocation2 + $0x18] sm:$0xe] }
 0x2ad   : > { %v5478_v9 = vsel %vm10463_vm1, %v5473_v18, %v5477_v33  ;;  %v5483_v53 = vrot.slane %v5482_v23, 4  ;;  %v5487_v61 = vrot.slane %v5485_v38, 5  ;;  %v9854_v51 = vrot.slane %v6142_v25, 9 }
 0x2ae   : > { %v4963_v1 = vsel %vm10396_vm10, %v4955_v35, %v4962_v26  ;;  %v5224_v56 = vsel %vm10350_vm3, %v4964_v15, %v5223_v40  ;;  %v4843_v27 = vpack.c.bf16 %v4811_v50, %v4811_v50  ;;  %v4346_v59 = vadd.f32 %v12206_v21, %v3692_v8  ;;  %v12295_v58 = vpop.f32.mrf.mxu3  ;;  %v5308_v5 = vld [vmem:[#allocation2 + $0x48] sm:$0xf]  ;;  %v5226_v35 = vld [vmem:[#allocation2 + $0x54] sm:$0xf] }
 0x2af   : > { %9755 = vmatmul.msk.bf16.gmra.mxu0 %vm1339_vm12, %v4590_v22  ;;  %5222 = vst.msk [vmem:[#allocation2 + $0x4c] sm:$0xf] %vm227_vm5, %v4963_v1  ;;  %v5490_v31 = vshrl.u32 %v5308_v5, 16  ;;  %v5493_v29 = vshll.u32 %v5308_v5, 16  ;;  %v6202_v22 = vsel %vm10906_vm9, %v6200_v2, %v6201_v49  ;;  %v3407_v21 = vadd.f32 %v11528_v30, %v11571_v11 }
 0x2b0   : > { %5225 = vst [vmem:[#allocation2 + $0x50] sm:$0x1] %v5224_v56  ;;  %v4966_v41 = vshrl.u32 %v4843_v27, 16  ;;  %v4744_v55 = vadd.f32 %v12252_v36, %v4346_v59  ;;  %9705 = vmatmul.msk.bf16.gmra.mxu2 %vm1339_vm12, %v10198_v57  ;;  %v5488_v33 = vsel %vm10463_vm1, %v5483_v53, %v5487_v61  ;;  %v5741_v6 = vunpack.c.l.b16 %v5478_v9  ;;  %v6144_v9 = vld [vmem:[#allocation2 + $0x24] sm:$0xe] }
 0x2b1   : > { %9870 = vmatmul.msk.bf16.vlgmr.msrb.gmra.mxu3 %vm5779_vm7, %v6335_v52  ;;  %v6199_v12 = vsel %vm10906_vm9, %v9854_v51, %v6198_v24  ;;  %v4969_v19 = vshll.u32 %v4843_v27, 16  ;;  %v5742_v20 = vunpack.c.l.b16 %v5488_v33  ;;  %v5492_v11 = vrot.slane %v5490_v31, 4 }
 0x2b2   : > { %v12309_v36 = vrot.slane %v4966_v41, 7  ;;  %v4780_v43 = vadd.f32 %v12279_v34, %v4744_v55  ;;  %v5495_v14 = vrot.slane %v5493_v29, 5  ;;  %v6306_v18 = vunpack.c.l.b16 %v6202_v22 }
 0x2b3   : > { %v3634_v30 = vpop.f32.mrf.mxu2  ;;  %v6205_v38 = vrot.slane %v12085_v63, 5  ;;  %v9855_v15 = vrot.slane %v6143_v45, 9  ;;  %v5768_v50 = vpack.c.b16 %v5742_v20, %v5741_v6  ;;  %v6305_v8 = vunpack.c.l.b16 %v6199_v12 }
 0x2b4   : > { %v12312_v40 = vpop.f32.mrf.mxu0  ;;  %v4971_v49 = vor.u32 %v4969_v19, %v12309_v36  ;;  %v4812_v26 = vmax.f32 %v4780_v43, 0.0  ;;  %v3693_v24 = vadd.f32 %v3634_v30, %v11551_v4  ;;  %v6208_v25 = vrot.slane %v12087_v13, 5  ;;  %v5230_v19 = vld [vmem:[#allocation2 + $0x5c] sm:$0x1] }
 0x2b5   : > { %v6207_v57 = vrot.slane %v6205_v38, 4  ;;  %v6206_v4 = vsel %vm10906_vm9, %v9855_v15, %v6205_v38  ;;  %9762 = vmatmul.msk.bf16.gmra.mxu1 %vm5779_vm7, %v5768_v50  ;;  %v5496_v56 = vor.u32 %v5495_v14, %v5492_v11  ;;  %v6336_v27 = vpack.c.b16 %v6306_v18, %v6305_v8 }
 0x2b6   : > { %v5227_v23 = vsel %vm11927_vm11, %v4971_v49, %v5226_v35  ;;  %v4844_v52 = vpack.c.bf16 %v4812_v26, %v4812_v26  ;;  %v4347_v2 = vadd.f32 %v12239_v0, %v3693_v24  ;;  %v12321_v1 = vpop.f32.mrf.mxu3  ;;  %v12323_v63 = vld [vmem:[#allocation2 + $0x4c] sm:$0xf]  ;;  %v9856_v31 = vrot.slane %v6144_v9, 9  ;;  %v10199_v49 = vld [vmem:[#allocation2] sm:$0xff] }
 0x2b7   : > { %5228 = vst [vmem:[#allocation2 + $0x54] sm:$0xf] %v5227_v23  ;;  %v5499_v13 = vshll.u32 %v12323_v63, 16  ;;  %v6209_v59 = vsel %vm10906_vm9, %v6207_v57, %v6208_v25  ;;  %v12332_v53 = vld [vmem:[#allocation2 + $0x50] sm:$0x1]  ;;  %v5503_v61 = vshrl.u32 %v12323_v63, 16  ;;  %v6307_v41 = vunpack.c.l.b16 %v6206_v4 }
 0x2b8   : > { %v4974_v5 = vshrl.u32 %v4844_v52, 16  ;;  %v4745_v0 = vadd.f32 %v12283_v10, %v4347_v2  ;;  %v6308_v55 = vunpack.c.l.b16 %v6209_v59  ;;  %v6212_v29 = vrot.slane %v12145_v46, 5  ;;  %v10215_v46 = vld [vmem:[#allocation2 + $0xc] sm:$0xff] }
 0x2b9   : > { %v5501_v51 = vrot.slane %v5499_v13, 5  ;;  %v4977_v33 = vshll.u32 %v4844_v52, 16  ;;  %v5505_v12 = vrot.slane %v5503_v61, 4  ;;  %v4972_v45 = vrot.slane %v12309_v36, 4  ;;  %v6145_v13 = vld [vmem:[#allocation2 + $0x30] sm:$0xe] }
 0x2ba   : > { %v4976_v22 = vrot.slane %v4974_v5, 7  ;;  %v4781_v6 = vadd.f32 %v12279_v34, %v4745_v0  ;;  %v5497_v20 = vrot.slane %v5496_v56, 4  ;;  %v5509_v35 = vshll.u32 %v12332_v53, 16 }
 0x2bb   : > { %v3636_v10 = vpop.f32.mrf.mxu2  ;;  %v12341_v30 = vpack.c.b16 %v6308_v55, %v6307_v41  ;;  %v5506_v26 = vor.u32 %v5505_v12, %v5501_v51  ;;  %v6213_v24 = vsel %vm10906_vm9, %v9856_v31, %v6212_v29  ;;  %v6214_v36 = vrot.slane %v6212_v29, 4 }
 0x2bc   : > { %v12338_v43 = vpop.f32.mrf.mxu0  ;;  %v4979_v11 = vor.u32 %v4977_v33, %v4976_v22  ;;  %v4981_v14 = vrot.slane %v4976_v22, 4  ;;  %v4813_v18 = vmax.f32 %v4781_v6, 0.0  ;;  %v3694_v38 = vadd.f32 %v3636_v10, %v3407_v21 }
 0x2bd   : > { %v6215_v15 = vrot.slane %v12151_v39, 5  ;;  %v5502_v9 = vsel %vm10463_vm1, %v5497_v20, %v5501_v51  ;;  %v5507_v23 = vrot.slane %v5506_v26, 4  ;;  %v5511_v39 = vrot.slane %v5509_v35, 5 }
 0x2be   : > { %v4980_v50 = vsel %vm10396_vm10, %v4972_v45, %v4979_v11  ;;  %v5231_v8 = vsel %vm10350_vm3, %v4981_v14, %v5230_v19  ;;  %v4845_v57 = vpack.c.bf16 %v4813_v18, %v4813_v18  ;;  %v4348_v25 = vadd.f32 %v12260_v42, %v3694_v38  ;;  %v12352_v21 = vpop.f32.mrf.mxu3  ;;  %v14464_v38 = vld [vmem:[#allocation21_spill] sm:$0xff] }
 0x2bf   : > { %9951 = vmatmul.msk.bf16.vlgmr.msrb.gmra.mxu0 %vm5779_vm7, %v10215_v46  ;;  %5229 = vst.msk [vmem:[#allocation2 + $0x58] sm:$0xf] %vm227_vm5, %v4980_v50  ;;  %v6216_v52 = vsel %vm10906_vm9, %v6214_v36, %v6215_v15  ;;  %v6309_v56 = vunpack.c.l.b16 %v6213_v24  ;;  %v5512_v5 = vsel %vm10463_vm1, %v5507_v23, %v5511_v39  ;;  %v6219_v0 = vrot.slane %v12208_v37, 5 }
 0x2c0   : > { %5232 = vst [vmem:[#allocation2 + $0x5c] sm:$0x1] %v5231_v8  ;;  %v4983_v2 = vshrl.u32 %v4845_v57, 16  ;;  %v4746_v4 = vadd.f32 %v12312_v40, %v4348_v25  ;;  %9837 = vmatmul.msk.bf16.vlgmr.msrb.gmra.mxu2 %vm5779_vm7, %v10199_v49  ;;  %v6310_v42 = vunpack.c.l.b16 %v6216_v52  ;;  %v4986_v59 = vshll.u32 %v4845_v57, 16  ;;  %v5233_v40 = vld [vmem:[#allocation2 + $0x60] sm:$0xf] }
 0x2c1   : > { %9871 = vmatmul.msk.bf16.gmra.mxu3 %vm5779_vm7, %v6336_v27  ;;  %v5744_v51 = vunpack.c.l.b16 %v5512_v5  ;;  %v5743_v22 = vunpack.c.l.b16 %v5502_v9  ;;  %v9857_v33 = vrot.slane %v6145_v13, 9  ;;  %v6221_v6 = vrot.slane %v6219_v0, 4  ;;  %v5310_v49 = vld [vmem:[#allocation2 + $0x54] sm:$0xf] }
 0x2c2   : > { %v4985_v61 = vrot.slane %v4983_v2, 7  ;;  %v4782_v31 = vadd.f32 %v12279_v34, %v4746_v4  ;;  %v12366_v41 = vpack.c.b16 %v6310_v42, %v6309_v56  ;;  %v6222_v12 = vrot.slane %v12214_v32, 5  ;;  %v5237_v2 = vld [vmem:[#allocation2 + $0x68] sm:$0x1] }
 0x2c3   : > { %v3639_v29 = vpop.f32.mrf.mxu2  ;;  %v5769_v10 = vpack.c.b16 %v5744_v51, %v5743_v22  ;;  %v6220_v20 = vsel %vm10906_vm9, %v9857_v33, %v6219_v0  ;;  %v5514_v50 = vshrl.u32 %v5310_v49, 16  ;;  %v5517_v57 = vshll.u32 %v5310_v49, 16 }
 0x2c4   : > { %v12368_v55 = vpop.f32.mrf.mxu0  ;;  %v4988_v45 = vor.u32 %v4986_v59, %v4985_v61  ;;  %v4814_v19 = vmax.f32 %v4782_v31, 0.0  ;;  %v3695_v27 = vadd.f32 %v3639_v29, %v11586_v44  ;;  %v4989_v37 = vrot.slane %v4985_v61, 4  ;;  %v10216_v31 = vld [vmem:[#allocation2 + $0x18] sm:$0xff] }
 0x2c5   : > { %v6223_v35 = vsel %vm10906_vm9, %v6221_v6, %v6222_v12  ;;  %v3409_v44 = vadd.f32 %v14464_v38, %v11604_v60  ;;  %9763 = vmatmul.msk.bf16.gmra.mxu1 %vm5779_vm7, %v5769_v10  ;;  %v6311_v8 = vunpack.c.l.b16 %v6220_v20  ;;  %v5516_v39 = vrot.slane %v5514_v50, 4  ;;  %v5240_v50 = vld [vmem:[#allocation2 + $0x6c] sm:$0xf] }
 0x2c6   : > { %v5234_v11 = vsel %vm11927_vm11, %v4988_v45, %v5233_v40  ;;  %v4846_v14 = vpack.c.bf16 %v4814_v19, %v4814_v19  ;;  %v4349_v18 = vadd.f32 %v12295_v58, %v3695_v27  ;;  %v12379_v46 = vpop.f32.mrf.mxu3  ;;  %v6312_v32 = vunpack.c.l.b16 %v6223_v35  ;;  %v12384_v26 = vld [vmem:[#allocation2 + $0x58] sm:$0xf]  ;;  %v6146_v40 = vld [vmem:[#allocation2 + $0x3c] sm:$0xe]  ;;  %v10200_v27 = vld [vmem:[#allocation2 + $0xc] sm:$0xff] }
 0x2c7   : > { %5235 = vst [vmem:[#allocation2 + $0x60] sm:$0xf] %v5234_v11  ;;  %v12387_v15 = vld [vmem:[#allocation2 + $0x5c] sm:$0x1]  ;;  %v5523_v25 = vshll.u32 %v12384_v26, 16  ;;  %v5527_v9 = vshrl.u32 %v12384_v26, 16 }
 0x2c8   : > { %v4991_v24 = vshrl.u32 %v4846_v14, 16  ;;  %v4747_v36 = vadd.f32 %v12338_v43, %v4349_v18  ;;  %v4994_v58 = vshll.u32 %v4846_v14, 16  ;;  %v12392_v52 = vpack.c.b16 %v6312_v32, %v6311_v8 }
 0x2c9   : > { %v5519_v56 = vrot.slane %v5517_v57, 5  ;;  %v5525_v42 = vrot.slane %v5523_v25, 5  ;;  %v5529_v13 = vrot.slane %v5527_v9, 4  ;;  %v5533_v59 = vshll.u32 %v12387_v15, 16 }
 0x2ca   : > { %v4993_v60 = vrot.slane %v4991_v24, 7  ;;  %v4783_v23 = vadd.f32 %v12279_v34, %v4747_v36  ;;  %v6226_v33 = vrot.slane %v12262_v16, 5  ;;  %v9858_v16 = vrot.slane %v6146_v40, 9 }
 0x2cb   : > { %v3641_v43 = vpop.f32.mrf.mxu2  ;;  %v5520_v29 = vor.u32 %v5519_v56, %v5516_v39  ;;  %v5530_v22 = vor.u32 %v5529_v13, %v5525_v42  ;;  %v5535_v11 = vrot.slane %v5533_v59, 5  ;;  %v12429_v59 = vpop.f32.mrf.mxu1 }
 0x2cc   : > { %v12394_v4 = vpop.f32.mrf.mxu0  ;;  %v4996_v5 = vor.u32 %v4994_v58, %v4993_v60  ;;  %v4998_v0 = vrot.slane %v4993_v60, 4  ;;  %v4815_v61 = vmax.f32 %v4783_v23, 0.0  ;;  %v3696_v51 = vadd.f32 %v3641_v43, %v3409_v44  ;;  %v14465_v60 = vld [vmem:[#allocation5_spill] sm:$0xff] }
 0x2cd   : > { %v5521_v20 = vrot.slane %v5520_v29, 4  ;;  %v5531_v35 = vrot.slane %v5530_v22, 4  ;;  %v6228_v18 = vrot.slane %v6226_v33, 4  ;;  %v6227_v38 = vsel %vm10906_vm9, %v9858_v16, %v6226_v33  ;;  %v5244_v16 = vld [vmem:[#allocation2 + $0x74] sm:$0x1] }
 0x2ce   : > { %v4997_v6 = vsel %vm10396_vm10, %v4989_v37, %v4996_v5  ;;  %v5238_v12 = vsel %vm10350_vm3, %v4998_v0, %v5237_v2  ;;  %v4847_v45 = vpack.c.bf16 %v4815_v61, %v4815_v61  ;;  %v4350_v19 = vadd.f32 %v12321_v1, %v3696_v51  ;;  %v12404_v10 = vpop.f32.mrf.mxu3  ;;  %v5312_v5 = vld [vmem:[#allocation2 + $0x60] sm:$0xf]  ;;  %v14467_v51 = vld [vmem:[#allocation3_spill] sm:$0xff] }
 0x2cf   : > { %9952 = vmatmul.msk.bf16.gmra.mxu0 %vm5779_vm7, %v10216_v31  ;;  %5236 = vst.msk [vmem:[#allocation2 + $0x64] sm:$0xf] %vm227_vm5, %v4997_v6  ;;  %v5526_v32 = vsel %vm10463_vm1, %v5521_v20, %v5525_v42  ;;  %v5536_v1 = vsel %vm10463_vm1, %v5531_v35, %v5535_v11  ;;  %v6229_v44 = vrot.slane %v12272_v54, 5  ;;  %v6313_v2 = vunpack.c.l.b16 %v6227_v38  ;;  %v14466_v31 = vld [vmem:[#allocation4_spill] sm:$0xff] }
 0x2d0   : > { %5239 = vst [vmem:[#allocation2 + $0x68] sm:$0x1] %v5238_v12  ;;  %v5000_v14 = vshrl.u32 %v4847_v45, 16  ;;  %v4748_v37 = vadd.f32 %v12368_v55, %v4350_v19  ;;  %9838 = vmatmul.msk.bf16.gmra.mxu2 %vm5779_vm7, %v10200_v27  ;;  %v5003_v24 = vshll.u32 %v4847_v45, 16  ;;  %v5746_v36 = vunpack.c.l.b16 %v5536_v1 }
 0x2d1   : > { %9872 = vmatmul.msk.bf16.gmra.mxu3 %vm5779_vm7, %v12341_v30  ;;  %v5745_v57 = vunpack.c.l.b16 %v5526_v32  ;;  %v6230_v25 = vsel %vm10906_vm9, %v6228_v18, %v6229_v44  ;;  %v3411_v40 = vadd.f32 %v14467_v51, %v14466_v31  ;;  %v5541_v12 = vshll.u32 %v5312_v5, 16 }
 0x2d2   : > { %v5002_v49 = vrot.slane %v5000_v14, 7  ;;  %v4784_v55 = vadd.f32 %v12279_v34, %v4748_v37  ;;  %v6314_v54 = vunpack.c.l.b16 %v6230_v25 }
 0x2d3   : > { %v3644_v58 = vpop.f32.mrf.mxu2  ;;  %v5770_v39 = vpack.c.b16 %v5746_v36, %v5745_v57  ;;  %v5543_v18 = vrot.slane %v5541_v12, 5  ;;  %v6147_v36 = vld [vmem:[#allocation2 + $0x48] sm:$0xe]  ;;  %v6233_v57 = vrot.slane %v12323_v63, 5  ;;  %v5247_v12 = vld [vmem:[#allocation2 + $0x78] sm:$0xf] }
 0x2d4   : > { %v12419_v8 = vpop.f32.mrf.mxu0  ;;  %v5005_v9 = vor.u32 %v5003_v24, %v5002_v49  ;;  %v4816_v30 = vmax.f32 %v4784_v55, 0.0  ;;  %v3697_v23 = vadd.f32 %v3644_v58, %v14465_v60  ;;  %v12434_v61 = vpack.c.b16 %v6314_v54, %v6313_v2  ;;  %v10217_v24 = vld [vmem:[#allocation2 + $0x24] sm:$0xff]  ;;  %v12457_v2 = vpop.f32.mrf.mxu1 }
 0x2d5   : > { %9764 = vmatmul.msk.bf16.gmra.mxu1 %vm5779_vm7, %v5770_v39  ;;  %v5006_v6 = vrot.slane %v5002_v49, 4  ;;  %v6235_v31 = vrot.slane %v6233_v57, 4 }
 0x2d6   : > { %v5241_v43 = vsel %vm11927_vm11, %v5005_v9, %v5240_v50  ;;  %v4848_v56 = vpack.c.bf16 %v4816_v30, %v4816_v30  ;;  %v4351_v42 = vadd.f32 %v12352_v21, %v3697_v23  ;;  %v12427_v13 = vpop.f32.mrf.mxu3  ;;  %v12432_v0 = vld [vmem:[#allocation2 + $0x64] sm:$0xf]  ;;  %v5538_v21 = vshrl.u32 %v5312_v5, 16  ;;  %v10201_v23 = vld [vmem:[#allocation2 + $0x18] sm:$0xff] }
 0x2d7   : > { %5242 = vst [vmem:[#allocation2 + $0x6c] sm:$0xf] %v5241_v43  ;;  %v12439_v33 = vld [vmem:[#allocation2 + $0x68] sm:$0x1]  ;;  %v5547_v45 = vshll.u32 %v12432_v0, 16  ;;  %v5551_v19 = vshrl.u32 %v12432_v0, 16 }
 0x2d8   : > { %v5008_v29 = vshrl.u32 %v4848_v56, 16  ;;  %v4749_v22 = vadd.f32 %v12394_v4, %v4351_v42  ;;  %v5011_v20 = vshll.u32 %v4848_v56, 16  ;;  %v5540_v11 = vrot.slane %v5538_v21, 4 }
 0x2d9   : > { %v5549_v4 = vrot.slane %v5547_v45, 5  ;;  %v5553_v32 = vrot.slane %v5551_v19, 4  ;;  %v5557_v1 = vshll.u32 %v12439_v33, 16  ;;  %v9859_v56 = vrot.slane %v6147_v36, 9  ;;  %v14470_v36 = vld [vmem:[#allocation6_spill] sm:$0xff] }
 0x2da   : > { %v5010_v27 = vrot.slane %v5008_v29, 7  ;;  %v4785_v35 = vadd.f32 %v12279_v34, %v4749_v22  ;;  %v5544_v50 = vor.u32 %v5543_v18, %v5540_v11  ;;  %v6236_v29 = vrot.slane %v12332_v53, 5  ;;  %v14468_v11 = vld [vmem:[#allocation7_spill] sm:$0xff] }
 0x2db   : > { %v3646_v37 = vpop.f32.mrf.mxu2  ;;  %v5554_v58 = vor.u32 %v5553_v32, %v5549_v4  ;;  %v5559_v43 = vrot.slane %v5557_v1, 5 }
 0x2dc   : > { %v12444_v14 = vpop.f32.mrf.mxu0  ;;  %v5013_v38 = vor.u32 %v5011_v20, %v5010_v27  ;;  %v5015_v44 = vrot.slane %v5010_v27, 4  ;;  %v4817_v49 = vmax.f32 %v4785_v35, 0.0  ;;  %v3698_v55 = vadd.f32 %v3646_v37, %v3411_v40 }
 0x2dd   : > { %v5545_v54 = vrot.slane %v5544_v50, 4  ;;  %v5555_v63 = vrot.slane %v5554_v58, 4  ;;  %v6234_v40 = vsel %vm10906_vm9, %v9859_v56, %v6233_v57  ;;  %v6237_v20 = vsel %vm10906_vm9, %v6235_v31, %v6236_v29 }
 0x2de   : > { %v5014_v25 = vsel %vm10396_vm10, %v5006_v6, %v5013_v38  ;;  %v5245_v9 = vsel %vm10350_vm3, %v5015_v44, %v5244_v16  ;;  %v4849_v30 = vpack.c.bf16 %v4817_v49, %v4817_v49  ;;  %v4352_v60 = vadd.f32 %v12379_v46, %v3698_v55  ;;  %v12454_v39 = vpop.f32.mrf.mxu3  ;;  %v5314_v44 = vld [vmem:[#allocation2 + $0x6c] sm:$0xf]  ;;  %v14469_v55 = vld [vmem:[#allocation8_spill] sm:$0xff] }
 0x2df   : > { %9953 = vmatmul.msk.bf16.gmra.mxu0 %vm5779_vm7, %v10217_v24  ;;  %5243 = vst.msk [vmem:[#allocation2 + $0x70] sm:$0xf] %vm227_vm5, %v5014_v25  ;;  %v5550_v46 = vsel %vm10463_vm1, %v5545_v54, %v5549_v4  ;;  %v5560_v51 = vsel %vm10463_vm1, %v5555_v63, %v5559_v43  ;;  %v6315_v18 = vunpack.c.l.b16 %v6234_v40  ;;  %v6316_v53 = vunpack.c.l.b16 %v6237_v20 }
 0x2e0   : > { %5246 = vst [vmem:[#allocation2 + $0x74] sm:$0x1] %v5245_v9  ;;  %v5017_v42 = vshrl.u32 %v4849_v30, 16  ;;  %v4750_v5 = vadd.f32 %v12419_v8, %v4352_v60  ;;  %9839 = vmatmul.msk.bf16.gmra.mxu2 %vm5779_vm7, %v10201_v23  ;;  %v5020_v21 = vshll.u32 %v4849_v30, 16  ;;  %v5748_v6 = vunpack.c.l.b16 %v5560_v51  ;;  %v12491_v30 = vpop.f32.mrf.mxu1 }
 0x2e1   : > { %9873 = vmatmul.msk.bf16.gmra.mxu3 %vm5779_vm7, %v12366_v41  ;;  %v5747_v27 = vunpack.c.l.b16 %v5550_v46  ;;  %v12484_v24 = vpack.c.b16 %v6316_v53, %v6315_v18  ;;  %v3413_v50 = vadd.f32 %v14470_v36, %v14469_v55  ;;  %v5562_v9 = vshrl.u32 %v5314_v44, 16  ;;  %v10202_v18 = vld [vmem:[#allocation2 + $0x24] sm:$0xff] }
 0x2e2   : > { %v5019_v22 = vrot.slane %v5017_v42, 7  ;;  %v4786_v8 = vadd.f32 %v12279_v34, %v4750_v5  ;;  %v5565_v60 = vshll.u32 %v5314_v44, 16  ;;  %v5251_v5 = vld [vmem:[#allocation2 + $0x80] sm:$0x1] }
 0x2e3   : > { %v3649_v19 = vpop.f32.mrf.mxu2  ;;  %v5771_v37 = vpack.c.b16 %v5748_v6, %v5747_v27  ;;  %v5564_v42 = vrot.slane %v5562_v9, 4  ;;  %v10218_v6 = vld [vmem:[#allocation2 + $0x30] sm:$0xff]  ;;  %v6243_v9 = vrot.slane %v12387_v15, 5 }
 0x2e4   : > { %v12471_v45 = vpop.f32.mrf.mxu0  ;;  %v5022_v35 = vor.u32 %v5020_v21, %v5019_v22  ;;  %v4818_v41 = vmax.f32 %v4786_v8, 0.0  ;;  %v3699_v16 = vadd.f32 %v3649_v19, %v14468_v11  ;;  %v5567_v46 = vrot.slane %v5565_v60, 5  ;;  %v6148_v19 = vld [vmem:[#allocation2 + $0x54] sm:$0xe] }
 0x2e5   : > { %9765 = vmatmul.msk.bf16.gmra.mxu1 %vm5779_vm7, %v5771_v37 }
 0x2e6   : > { %v5248_v4 = vsel %vm11927_vm11, %v5022_v35, %v5247_v12  ;;  %v4850_v32 = vpack.c.bf16 %v4818_v41, %v4818_v41  ;;  %v4353_v1 = vadd.f32 %v12404_v10, %v3699_v16  ;;  %v12479_v38 = vpop.f32.mrf.mxu3  ;;  %v12482_v49 = vld [vmem:[#allocation2 + $0x70] sm:$0xf]  ;;  %v5023_v10 = vrot.slane %v5019_v22, 4 }
 0x2e7   : > { %5249 = vst [vmem:[#allocation2 + $0x78] sm:$0xf] %v5248_v4  ;;  %v12489_v25 = vld [vmem:[#allocation2 + $0x74] sm:$0x1]  ;;  %v5571_v23 = vshll.u32 %v12482_v49, 16  ;;  %v5575_v54 = vshrl.u32 %v12482_v49, 16  ;;  %v5568_v27 = vor.u32 %v5567_v46, %v5564_v42 }
 0x2e8   : > { %v5025_v58 = vshrl.u32 %v4850_v32, 16  ;;  %v4751_v57 = vadd.f32 %v12444_v14, %v4353_v1  ;;  %v5028_v43 = vshll.u32 %v4850_v32, 16  ;;  %v5581_v29 = vshll.u32 %v12489_v25, 16 }
 0x2e9   : > { %v5573_v51 = vrot.slane %v5571_v23, 5  ;;  %v5577_v40 = vrot.slane %v5575_v54, 4  ;;  %v6240_v35 = vrot.slane %v12384_v26, 5  ;;  %v5569_v4 = vrot.slane %v5568_v27, 4  ;;  %v5254_v54 = vld [vmem:[#allocation2 + $0x84] sm:$0xf] }
 0x2ea   : > { %v5027_v63 = vrot.slane %v5025_v58, 7  ;;  %v4787_v56 = vadd.f32 %v12279_v34, %v4751_v57  ;;  %v5583_v1 = vrot.slane %v5581_v29, 5  ;;  %v9860_v26 = vrot.slane %v6148_v19, 9  ;;  %v14472_v27 = vld [vmem:[#allocation10_spill] sm:$0xff] }
 0x2eb   : > { %v3651_v14 = vpop.f32.mrf.mxu2  ;;  %v5578_v20 = vor.u32 %v5577_v40, %v5573_v51  ;;  %v6242_v36 = vrot.slane %v6240_v35, 4 }
 0x2ec   : > { %v12496_v31 = vpop.f32.mrf.mxu0  ;;  %v5030_v22 = vor.u32 %v5028_v43, %v5027_v63  ;;  %v5032_v21 = vrot.slane %v5027_v63, 4  ;;  %v4819_v8 = vmax.f32 %v4787_v56, 0.0  ;;  %v3700_v12 = vadd.f32 %v3651_v14, %v3413_v50  ;;  %v14471_v14 = vld [vmem:[#allocation9_spill] sm:$0xff] }
 0x2ed   : > { %v5579_v32 = vrot.slane %v5578_v20, 4  ;;  %v6241_v57 = vsel %vm10906_vm9, %v9860_v26, %v6240_v35  ;;  %v6244_v42 = vsel %vm10906_vm9, %v6242_v36, %v6243_v9  ;;  %v14473_v20 = vld [vmem:[#allocation22_spill] sm:$0xff] }
 0x2ee   : > { %v5031_v41 = vsel %vm10396_vm10, %v5023_v10, %v5030_v22  ;;  %v5252_v11 = vsel %vm10350_vm3, %v5032_v21, %v5251_v5  ;;  %v4851_v16 = vpack.c.bf16 %v4819_v8, %v4819_v8  ;;  %v4354_v37 = vadd.f32 %v12427_v13, %v3700_v12  ;;  %v12506_v53 = vpop.f32.mrf.mxu3 }
 0x2ef   : > { %9954 = vmatmul.msk.bf16.gmra.mxu0 %vm5779_vm7, %v10218_v6  ;;  %5250 = vst.msk [vmem:[#allocation2 + $0x7c] sm:$0xf] %vm227_vm5, %v5031_v41  ;;  %v5574_v13 = vsel %vm10463_vm1, %v5569_v4, %v5573_v51  ;;  %v5584_v58 = vsel %vm10463_vm1, %v5579_v32, %v5583_v1  ;;  %v6317_v40 = vunpack.c.l.b16 %v6241_v57  ;;  %v6318_v15 = vunpack.c.l.b16 %v6244_v42  ;;  %v5316_v6 = vld [vmem:[#allocation2 + $0x78] sm:$0xf]  ;;  %v6149_v42 = vld [vmem:[#allocation2 + $0x60] sm:$0xe] }
 0x2f0   : > { %5253 = vst [vmem:[#allocation2 + $0x80] sm:$0x1] %v5252_v11  ;;  %v5034_v44 = vshrl.u32 %v4851_v16, 16  ;;  %v4752_v55 = vadd.f32 %v12471_v45, %v4354_v37  ;;  %9840 = vmatmul.msk.bf16.gmra.mxu2 %vm5779_vm7, %v10202_v18  ;;  %v5037_v10 = vshll.u32 %v4851_v16, 16  ;;  %v5750_v23 = vunpack.c.l.b16 %v5584_v58 }
 0x2f1   : > { %v12511_v50 = vpop.f32.mrf.mxu1  ;;  %9874 = vmatmul.msk.bf16.gmra.mxu3 %vm5779_vm7, %v12392_v52  ;;  %v5749_v56 = vunpack.c.l.b16 %v5574_v13  ;;  %v12536_v19 = vpack.c.b16 %v6318_v15, %v6317_v40  ;;  %v3415_v35 = vadd.f32 %v14473_v20, %v14472_v27  ;;  %v5586_v37 = vshrl.u32 %v5316_v6, 16  ;;  %v5258_v13 = vld [vmem:[#allocation2 + $0x8c] sm:$0x1] }
 0x2f2   : > { %v5036_v45 = vrot.slane %v5034_v44, 7  ;;  %v4788_v60 = vadd.f32 %v12279_v34, %v4752_v55  ;;  %v5589_v4 = vshll.u32 %v5316_v6, 16 }
 0x2f3   : > { %v3654_v43 = vpop.f32.mrf.mxu2  ;;  %v5772_v51 = vpack.c.b16 %v5750_v23, %v5749_v56  ;;  %v5588_v36 = vrot.slane %v5586_v37, 4 }
 0x2f4   : > { %v12523_v63 = vpop.f32.mrf.mxu0  ;;  %v5039_v5 = vor.u32 %v5037_v10, %v5036_v45  ;;  %v4820_v52 = vmax.f32 %v4788_v60, 0.0  ;;  %v3701_v46 = vadd.f32 %v3654_v43, %v14471_v14  ;;  %v5591_v57 = vrot.slane %v5589_v4, 5  ;;  %v10219_v43 = vld [vmem:[#allocation2 + $0x3c] sm:$0xff] }
 0x2f5   : > { %9766 = vmatmul.msk.bf16.gmra.mxu1 %vm5779_vm7, %v5772_v51  ;;  %v6247_v14 = vrot.slane %v12432_v0, 5  ;;  %v9861_v0 = vrot.slane %v6149_v42, 9  ;;  %v6250_v4 = vrot.slane %v12439_v33, 5 }
 0x2f6   : > { %v5255_v29 = vsel %vm11927_vm11, %v5039_v5, %v5254_v54  ;;  %v4852_v22 = vpack.c.bf16 %v4820_v52, %v4820_v52  ;;  %v4355_v21 = vadd.f32 %v12454_v39, %v3701_v46  ;;  %v12531_v8 = vpop.f32.mrf.mxu3  ;;  %v12534_v12 = vld [vmem:[#allocation2 + $0x7c] sm:$0xf]  ;;  %v5040_v39 = vrot.slane %v5036_v45, 4 }
 0x2f7   : > { %5256 = vst [vmem:[#allocation2 + $0x84] sm:$0xf] %v5255_v29  ;;  %v12541_v16 = vld [vmem:[#allocation2 + $0x80] sm:$0x1]  ;;  %v5595_v32 = vshll.u32 %v12534_v12, 16  ;;  %v5599_v1 = vshrl.u32 %v12534_v12, 16  ;;  %v5592_v5 = vor.u32 %v5591_v57, %v5588_v36 }
 0x2f8   : > { %v5042_v41 = vshrl.u32 %v4852_v22, 16  ;;  %v4753_v11 = vadd.f32 %v12496_v31, %v4355_v21  ;;  %v5045_v44 = vshll.u32 %v4852_v22, 16  ;;  %v5605_v45 = vshll.u32 %v12541_v16, 16  ;;  %v10203_v29 = vld [vmem:[#allocation2 + $0x30] sm:$0xff] }
 0x2f9   : > { %v12543_v18 = vpop.f32.mrf.mxu1  ;;  %v5597_v9 = vrot.slane %v5595_v32, 5  ;;  %v5601_v10 = vrot.slane %v5599_v1, 4  ;;  %v5593_v21 = vrot.slane %v5592_v5, 4 }
 0x2fa   : > { %v5044_v26 = vrot.slane %v5042_v41, 7  ;;  %v4789_v55 = vadd.f32 %v12279_v34, %v4753_v11  ;;  %v5607_v27 = vrot.slane %v5605_v45, 5  ;;  %v6249_v41 = vrot.slane %v6247_v14, 4 }
 0x2fb   : > { %v3656_v31 = vpop.f32.mrf.mxu2  ;;  %v5602_v52 = vor.u32 %v5601_v10, %v5597_v9 }
 0x2fc   : > { %v12548_v58 = vpop.f32.mrf.mxu0  ;;  %v5047_v60 = vor.u32 %v5045_v44, %v5044_v26  ;;  %v5049_v23 = vrot.slane %v5044_v26, 4  ;;  %v4821_v54 = vmax.f32 %v4789_v55, 0.0  ;;  %v3702_v56 = vadd.f32 %v3656_v31, %v3415_v35  ;;  %v5261_v44 = vld [vmem:[#allocation2 + $0x90] sm:$0xf] }
 0x2fd   : > { %v5603_v6 = vrot.slane %v5602_v52, 4  ;;  %v6251_v31 = vsel %vm10906_vm9, %v6249_v41, %v6250_v4 }
 0x2fe   : > { %v5048_v46 = vsel %vm10396_vm10, %v5040_v39, %v5047_v60  ;;  %v5259_v51 = vsel %vm10350_vm3, %v5049_v23, %v5258_v13  ;;  %v4853_v40 = vpack.c.bf16 %v4821_v54, %v4821_v54  ;;  %v4356_v15 = vadd.f32 %v12479_v38, %v3702_v56  ;;  %v12558_v22 = vpop.f32.mrf.mxu3  ;;  %v5318_v42 = vld [vmem:[#allocation2 + $0x84] sm:$0xf] }
 0x2ff   : > { %9955 = vmatmul.msk.bf16.gmra.mxu0 %vm5779_vm7, %v10219_v43  ;;  %5257 = vst.msk [vmem:[#allocation2 + $0x88] sm:$0xf] %vm227_vm5, %v5048_v46  ;;  %v5598_v38 = vsel %vm10463_vm1, %v5593_v21, %v5597_v9  ;;  %v5608_v37 = vsel %vm10463_vm1, %v5603_v6, %v5607_v27  ;;  %v6248_v39 = vsel %vm10906_vm9, %v9861_v0, %v6247_v14  ;;  %v6320_v23 = vunpack.c.l.b16 %v6251_v31  ;;  %v14475_v14 = vld [vmem:[#allocation12_spill] sm:$0xff]  ;;  %v14476_v46 = vld [vmem:[#allocation11_spill] sm:$0xff]  ;;  %v10220_v31 = vld [vmem:[#allocation2 + $0x48] sm:$0xff] }
 0x300   : > { %5260 = vst [vmem:[#allocation2 + $0x8c] sm:$0x1] %v5259_v51  ;;  %v5051_v20 = vshrl.u32 %v4853_v40, 16  ;;  %v4754_v35 = vadd.f32 %v12523_v63, %v4356_v15  ;;  %9841 = vmatmul.msk.bf16.gmra.mxu2 %vm5779_vm7, %v10203_v29  ;;  %v5054_v32 = vshll.u32 %v4853_v40, 16  ;;  %v5752_v26 = vunpack.c.l.b16 %v5608_v37 }
 0x301   : > { %v12563_v11 = vpop.f32.mrf.mxu1  ;;  %9875 = vmatmul.msk.bf16.gmra.mxu3 %vm5779_vm7, %v12434_v61  ;;  %v5751_v13 = vunpack.c.l.b16 %v5598_v38  ;;  %v14474_v61 = vld [vmem:[#allocation23_spill] sm:$0xff]  ;;  %v6319_v60 = vunpack.c.l.b16 %v6248_v39  ;;  %v3417_v51 = vadd.f32 %v14476_v46, %v14475_v14  ;;  %v5610_v21 = vshrl.u32 %v5318_v42, 16 }
 0x302   : > { %v5053_v63 = vrot.slane %v5051_v20, 7  ;;  %v4790_v1 = vadd.f32 %v12279_v34, %v4754_v35  ;;  %v5613_v27 = vshll.u32 %v5318_v42, 16  ;;  %v5265_v39 = vld [vmem:[#allocation2 + $0x98] sm:$0x1] }
 0x303   : > { %v3659_v36 = vpop.f32.mrf.mxu2  ;;  %v5773_v45 = vpack.c.b16 %v5752_v26, %v5751_v13  ;;  %v12586_v52 = vpack.c.b16 %v6320_v23, %v6319_v60  ;;  %v5612_v37 = vrot.slane %v5610_v21, 4 }
 0x304   : > { %v4713_v55 = vpop.f32.mrf.mxu0  ;;  %v5056_v57 = vor.u32 %v5054_v32, %v5053_v63  ;;  %v4822_v9 = vmax.f32 %v4790_v1, 0.0  ;;  %v3703_v10 = vadd.f32 %v3659_v36, %v14474_v61  ;;  %v5615_v32 = vrot.slane %v5613_v27, 5 }
 0x305   : > { %9767 = vmatmul.msk.bf16.gmra.mxu1 %vm5779_vm7, %v5773_v45 }
 0x306   : > { %v5262_v33 = vsel %vm11927_vm11, %v5056_v57, %v5261_v44  ;;  %v4854_v54 = vpack.c.bf16 %v4822_v9, %v4822_v9  ;;  %v4357_v43 = vadd.f32 %v12506_v53, %v3703_v10  ;;  %v12581_v56 = vpop.f32.mrf.mxu3  ;;  %v12584_v5 = vld [vmem:[#allocation2 + $0x88] sm:$0xf]  ;;  %v5057_v53 = vrot.slane %v5053_v63, 4  ;;  %v6150_v9 = vld [vmem:[#allocation2 + $0x6c] sm:$0xe] }
 0x307   : > { %5263 = vst [vmem:[#allocation2 + $0x90] sm:$0xf] %v5262_v33  ;;  %v12591_v29 = vld [vmem:[#allocation2 + $0x8c] sm:$0x1]  ;;  %v5619_v0 = vshll.u32 %v12584_v5, 16  ;;  %v5623_v20 = vshrl.u32 %v12584_v5, 16  ;;  %v5616_v61 = vor.u32 %v5615_v32, %v5612_v37 }
 0x308   : > { %v5059_v40 = vshrl.u32 %v4854_v54, 16  ;;  %v4755_v15 = vadd.f32 %v12548_v58, %v4357_v43  ;;  %v5062_v41 = vshll.u32 %v4854_v54, 16  ;;  %v5629_v63 = vshll.u32 %v12591_v29, 16  ;;  %v10204_v54 = vld [vmem:[#allocation2 + $0x3c] sm:$0xff] }
 0x309   : > { %v12593_v6 = vpop.f32.mrf.mxu1  ;;  %v5621_v1 = vrot.slane %v5619_v0, 5  ;;  %v5625_v26 = vrot.slane %v5623_v20, 4  ;;  %v5617_v43 = vrot.slane %v5616_v61, 4  ;;  %v9862_v46 = vrot.slane %v6150_v9, 9  ;;  %v5268_v37 = vld [vmem:[#allocation2 + $0x9c] sm:$0xf] }
 0x30a   : > { %v5061_v35 = vrot.slane %v5059_v40, 7  ;;  %v4791_v38 = vadd.f32 %v12279_v34, %v4755_v15  ;;  %v6254_v34 = vrot.slane %v12482_v49, 5  ;;  %v5631_v14 = vrot.slane %v5629_v63, 5 }
 0x30b   : > { %v3661_v58 = vpop.f32.mrf.mxu2  ;;  %v5626_v10 = vor.u32 %v5625_v26, %v5621_v1 }
 0x30c   : > { %v12598_v4 = vpop.f32.mrf.mxu0  ;;  %v5064_v44 = vor.u32 %v5062_v41, %v5061_v35  ;;  %v5066_v36 = vrot.slane %v5061_v35, 4  ;;  %v4823_v13 = vmax.f32 %v4791_v38, 0.0  ;;  %v3704_v57 = vadd.f32 %v3661_v58, %v3417_v51  ;;  %v12626_v35 = vld [vmem:[%s14386_s2] ss:$0 sm:$0xff] }
 0x30d   : > { %v5627_v42 = vrot.slane %v5626_v10, 4  ;;  %v6256_v15 = vrot.slane %v6254_v34, 4  ;;  %v6255_v27 = vsel %vm10906_vm9, %v9862_v46, %v6254_v34 }
 0x30e   : > { %v5065_v45 = vsel %vm10396_vm10, %v5057_v53, %v5064_v44  ;;  %v5266_v60 = vsel %vm10350_vm3, %v5066_v36, %v5265_v39  ;;  %v4855_v23 = vpack.c.bf16 %v4823_v13, %v4823_v13  ;;  %v4358_v33 = vadd.f32 %v12531_v8, %v3704_v57  ;;  %v12610_v40 = vpop.f32.mrf.mxu3  ;;  %v5320_v61 = vld [vmem:[#allocation2 + $0x90] sm:$0xf] }
 0x30f   : > { %9956 = vmatmul.msk.bf16.gmra.mxu0 %vm5779_vm7, %v10220_v31  ;;  %5264 = vst.msk [vmem:[#allocation2 + $0x94] sm:$0xf] %vm227_vm5, %v5065_v45  ;;  %v5622_v8 = vsel %vm10463_vm1, %v5617_v43, %v5621_v1  ;;  %v5632_v53 = vsel %vm10463_vm1, %v5627_v42, %v5631_v14  ;;  %v6321_v36 = vunpack.c.l.b16 %v6255_v27  ;;  %v14478_v45 = vld [vmem:[#allocation14_spill] sm:$0xff]  ;;  %v5634_v42 = vshrl.u32 %v5320_v61, 16 }
 0x310   : > { %5267 = vst [vmem:[#allocation2 + $0x98] sm:$0x1] %v5266_v60  ;;  %v5068_v49 = vshrl.u32 %v4855_v23, 16  ;;  %v4756_v51 = vadd.f32 %v4713_v55, %v4358_v33  ;;  %9842 = vmatmul.msk.bf16.gmra.mxu2 %vm5779_vm7, %v10204_v54  ;;  %v6257_v55 = vrot.slane %v12489_v25, 5  ;;  %v5071_v20 = vshll.u32 %v4855_v23, 16  ;;  %v14477_v25 = vld [vmem:[#allocation24_spill] sm:$0xff] }
 0x311   : > { %v12612_v21 = vpop.f32.mrf.mxu1  ;;  %9876 = vmatmul.msk.bf16.gmra.mxu3 %vm5779_vm7, %v12484_v24  ;;  %v5754_v38 = vunpack.c.l.b16 %v5632_v53  ;;  %v5753_v32 = vunpack.c.l.b16 %v5622_v8  ;;  %v14479_v60 = vld [vmem:[#allocation13_spill] sm:$0xff] }
 0x312   : > { %v5070_v0 = vrot.slane %v5068_v49, 7  ;;  %v4792_v41 = vadd.f32 %v12626_v35, %v4756_v51  ;;  %v6258_v24 = vsel %vm10906_vm9, %v6256_v15, %v6257_v55  ;;  %v3419_v23 = vadd.f32 %v14479_v60, %v14478_v45  ;;  %v10205_v45 = vld [vmem:[#allocation2 + $0x48] sm:$0xff] }
 0x313   : > { %v3664_v58 = vpop.f32.mrf.mxu2  ;;  %v5774_v44 = vpack.c.b16 %v5754_v38, %v5753_v32  ;;  %v6322_v13 = vunpack.c.l.b16 %v6258_v24  ;;  %v5636_v55 = vrot.slane %v5634_v42, 4 }
 0x314   : > { %v4718_v39 = vpop.f32.mrf.mxu0  ;;  %v5073_v1 = vor.u32 %v5071_v20, %v5070_v0  ;;  %v4824_v26 = vmax.f32 %v4792_v41, 0.0  ;;  %v3705_v63 = vadd.f32 %v3664_v58, %v14477_v25  ;;  %v5074_v14 = vrot.slane %v5070_v0, 4  ;;  %v5272_v20 = vld [vmem:[#allocation2 + $0xa4] sm:$0x1] }
 0x315   : > { %9768 = vmatmul.msk.bf16.gmra.mxu1 %vm5779_vm7, %v5774_v44  ;;  %v12638_v34 = vpack.c.b16 %v6322_v13, %v6321_v36  ;;  %v6261_v13 = vrot.slane %v12534_v12, 5 }
 0x316   : > { %v5269_v31 = vsel %vm11927_vm11, %v5073_v1, %v5268_v37  ;;  %v4856_v57 = vpack.c.bf16 %v4824_v26, %v4824_v26  ;;  %v4359_v9 = vadd.f32 %v12558_v22, %v3705_v63  ;;  %v12636_v10 = vld [vmem:[#allocation2 + $0x94] sm:$0xf]  ;;  %v5637_v22 = vshll.u32 %v5320_v61, 16  ;;  %v12650_v27 = vpop.f32.mrf.mxu3  ;;  %v6151_v63 = vld [vmem:[#allocation2 + $0x78] sm:$0xe] }
 0x317   : > { %5270 = vst [vmem:[#allocation2 + $0x9c] sm:$0xf] %v5269_v31  ;;  %v12643_v43 = vld [vmem:[#allocation2 + $0x98] sm:$0x1]  ;;  %v5643_v49 = vshll.u32 %v12636_v10, 16  ;;  %v5647_v51 = vshrl.u32 %v12636_v10, 16 }
 0x318   : > { %v5076_v33 = vshrl.u32 %v4856_v57, 16  ;;  %v4757_v54 = vadd.f32 %v12598_v4, %v4359_v9  ;;  %v5079_v8 = vshll.u32 %v4856_v57, 16  ;;  %v5639_v38 = vrot.slane %v5637_v22, 5  ;;  %v10221_v26 = vld [vmem:[#allocation2 + $0x54] sm:$0xff] }
 0x319   : > { %v12645_v46 = vpop.f32.mrf.mxu1  ;;  %v5645_v0 = vrot.slane %v5643_v49, 5  ;;  %v5649_v37 = vrot.slane %v5647_v51, 4  ;;  %v5653_v58 = vshll.u32 %v12643_v43, 16 }
 0x31a   : > { %v5078_v15 = vrot.slane %v5076_v33, 7  ;;  %v4793_v53 = vadd.f32 %v12626_v35, %v4757_v54  ;;  %v5640_v44 = vor.u32 %v5639_v38, %v5636_v55  ;;  %v9863_v54 = vrot.slane %v6151_v63, 9 }
 0x31b   : > { %v3666_v41 = vpop.f32.mrf.mxu2  ;;  %v5650_v36 = vor.u32 %v5649_v37, %v5645_v0  ;;  %v5655_v33 = vrot.slane %v5653_v58, 5 }
 0x31c   : > { %v12652_v4 = vpop.f32.mrf.mxu0  ;;  %v5081_v32 = vor.u32 %v5079_v8, %v5078_v15  ;;  %v5083_v24 = vrot.slane %v5078_v15, 4  ;;  %v4825_v1 = vmax.f32 %v4793_v53, 0.0  ;;  %v3706_v25 = vadd.f32 %v3666_v41, %v3419_v23 }
 0x31d   : > { %v5641_v60 = vrot.slane %v5640_v44, 4  ;;  %v5651_v23 = vrot.slane %v5650_v36, 4  ;;  %v6262_v51 = vsel %vm10906_vm9, %v9863_v54, %v6261_v13  ;;  %v6264_v15 = vrot.slane %v12541_v16, 5 }
 0x31e   : > { %v5082_v31 = vsel %vm10396_vm10, %v5074_v14, %v5081_v32  ;;  %v5273_v57 = vsel %vm10350_vm3, %v5083_v24, %v5272_v20  ;;  %v4857_v9 = vpack.c.bf16 %v4825_v1, %v4825_v1  ;;  %v4360_v61 = vadd.f32 %v12581_v56, %v3706_v25  ;;  %v5275_v20 = vld [vmem:[#allocation2 + $0xa8] sm:$0xf] }
 0x31f   : > { %9957 = vmatmul.msk.bf16.gmra.mxu0 %vm5779_vm7, %v10221_v26  ;;  %5271 = vst.msk [vmem:[#allocation2 + $0xa0] sm:$0xf] %vm227_vm5, %v5082_v31  ;;  %v6263_v14 = vrot.slane %v6261_v13, 4  ;;  %v5646_v49 = vsel %vm10463_vm1, %v5641_v60, %v5645_v0  ;;  %v5656_v56 = vsel %vm10463_vm1, %v5651_v23, %v5655_v33  ;;  %v6323_v16 = vunpack.c.l.b16 %v6262_v51  ;;  %v5322_v13 = vld [vmem:[#allocation2 + $0x9c] sm:$0xf] }
 0x320   : > { %5274 = vst [vmem:[#allocation2 + $0xa4] sm:$0x1] %v5273_v57  ;;  %v5085_v12 = vshrl.u32 %v4857_v9, 16  ;;  %v4758_v42 = vadd.f32 %v4718_v39, %v4360_v61  ;;  %9843 = vmatmul.msk.bf16.gmra.mxu2 %vm5779_vm7, %v10205_v45  ;;  %v5088_v8 = vshll.u32 %v4857_v9, 16  ;;  %v5756_v55 = vunpack.c.l.b16 %v5656_v56  ;;  %v14481_v9 = vld [vmem:[#allocation25_spill] sm:$0xff]  ;;  %v14482_v61 = vld [vmem:[#allocation16_spill] sm:$0xff] }
 0x321   : > { %v12664_v22 = vpop.f32.mrf.mxu1  ;;  %9877 = vmatmul.msk.bf16.gmra.mxu3 %vm5779_vm7, %v12536_v19  ;;  %v5755_v0 = vunpack.c.l.b16 %v5646_v49  ;;  %v6265_v37 = vsel %vm10906_vm9, %v6263_v14, %v6264_v15  ;;  %v14480_v19 = vld [vmem:[#allocation15_spill] sm:$0xff]  ;;  %v3421_v45 = vadd.f32 %v14482_v61, %v14481_v9  ;;  %v5658_v54 = vshrl.u32 %v5322_v13, 16 }
 0x322   : > { %v5087_v39 = vrot.slane %v5085_v12, 7  ;;  %v4794_v53 = vadd.f32 %v12626_v35, %v4758_v42  ;;  %v6324_v25 = vunpack.c.l.b16 %v6265_v37  ;;  %v5661_v42 = vshll.u32 %v5322_v13, 16  ;;  %v10206_v9 = vld [vmem:[#allocation2 + $0x54] sm:$0xff] }
 0x323   : > { %v3669_v38 = vpop.f32.mrf.mxu2  ;;  %v5775_v26 = vpack.c.b16 %v5756_v55, %v5755_v0 }
 0x324   : > { %v4723_v41 = vpop.f32.mrf.mxu0  ;;  %v5090_v58 = vor.u32 %v5088_v8, %v5087_v39  ;;  %v4826_v32 = vmax.f32 %v4794_v53, 0.0  ;;  %v3707_v24 = vadd.f32 %v3669_v38, %v14480_v19  ;;  %v12679_v1 = vpop.f32.mrf.mxu3  ;;  %v12687_v57 = vpack.c.b16 %v6324_v25, %v6323_v16  ;;  %v5279_v53 = vld [vmem:[#allocation2 + $0xb0] sm:$0x1]  ;;  %v10222_v19 = vld [vmem:[#allocation2 + $0x60] sm:$0xff] }
 0x325   : > { %9769 = vmatmul.msk.bf16.gmra.mxu1 %vm5779_vm7, %v5775_v26  ;;  %v5091_v12 = vrot.slane %v5087_v39, 4  ;;  %v5660_v8 = vrot.slane %v5658_v54, 4 }
 0x326   : > { %v5276_v63 = vsel %vm11927_vm11, %v5090_v58, %v5275_v20  ;;  %v4858_v44 = vpack.c.bf16 %v4826_v32, %v4826_v32  ;;  %v4361_v36 = vadd.f32 %v12610_v40, %v3707_v24  ;;  %v12685_v31 = vld [vmem:[#allocation2 + $0xa0] sm:$0xf] }
 0x327   : > { %5277 = vst [vmem:[#allocation2 + $0xa8] sm:$0xf] %v5276_v63  ;;  %v12692_v33 = vld [vmem:[#allocation2 + $0xa4] sm:$0x1]  ;;  %v5667_v40 = vshll.u32 %v12685_v31, 16  ;;  %v5671_v14 = vshrl.u32 %v12685_v31, 16 }
 0x328   : > { %v5093_v60 = vshrl.u32 %v4858_v44, 16  ;;  %v4759_v23 = vadd.f32 %v12652_v4, %v4361_v36  ;;  %v5096_v56 = vshll.u32 %v4858_v44, 16  ;;  %v5663_v4 = vrot.slane %v5661_v42, 5 }
 0x329   : > { %v12697_v15 = vpop.f32.mrf.mxu1  ;;  %v5669_v38 = vrot.slane %v5667_v40, 5  ;;  %v5673_v0 = vrot.slane %v5671_v14, 4  ;;  %v5677_v39 = vshll.u32 %v12692_v33, 16 }
 0x32a   : > { %v5095_v49 = vrot.slane %v5093_v60, 7  ;;  %v4795_v51 = vadd.f32 %v12626_v35, %v4759_v23  ;;  %v5664_v16 = vor.u32 %v5663_v4, %v5660_v8 }
 0x32b   : > { %v3671_v20 = vpop.f32.mrf.mxu2  ;;  %v5674_v25 = vor.u32 %v5673_v0, %v5669_v38  ;;  %v5679_v60 = vrot.slane %v5677_v39, 5 }
 0x32c   : > { %v4726_v55 = vpop.f32.mrf.mxu0  ;;  %v5098_v37 = vor.u32 %v5096_v56, %v5095_v49  ;;  %v5100_v58 = vrot.slane %v5095_v49, 4  ;;  %v4827_v32 = vmax.f32 %v4795_v51, 0.0  ;;  %v3708_v24 = vadd.f32 %v3671_v20, %v3421_v45  ;;  %v12700_v26 = vpop.f32.mrf.mxu3 }
 0x32d   : > { %v5665_v61 = vrot.slane %v5664_v16, 4  ;;  %v5675_v45 = vrot.slane %v5674_v25, 4 }
 0x32e   : > { %v5099_v63 = vsel %vm10396_vm10, %v5091_v12, %v5098_v37  ;;  %v5280_v44 = vsel %vm10350_vm3, %v5100_v58, %v5279_v53  ;;  %v4859_v36 = vpack.c.bf16 %v4827_v32, %v4827_v32  ;;  %v4362_v13 = vadd.f32 %v12650_v27, %v3708_v24  ;;  %v5324_v12 = vld [vmem:[#allocation2 + $0xa8] sm:$0xf] }
 0x32f   : > { %9958 = vmatmul.msk.bf16.gmra.mxu0 %vm5779_vm7, %v10222_v19  ;;  %5278 = vst.msk [vmem:[#allocation2 + $0xac] sm:$0xf] %vm227_vm5, %v5099_v63  ;;  %v5670_v42 = vsel %vm10463_vm1, %v5665_v61, %v5669_v38  ;;  %v5680_v40 = vsel %vm10463_vm1, %v5675_v45, %v5679_v60  ;;  %v5682_v27 = vshrl.u32 %v5324_v12, 16  ;;  %v5685_v14 = vshll.u32 %v5324_v12, 16 }
 0x330   : > { %5281 = vst [vmem:[#allocation2 + $0xb0] sm:$0x1] %v5280_v44  ;;  %v5102_v23 = vshrl.u32 %v4859_v36, 16  ;;  %v4760_v54 = vadd.f32 %v4723_v41, %v4362_v13  ;;  %9844 = vmatmul.msk.bf16.gmra.mxu2 %vm5779_vm7, %v10206_v9  ;;  %v5105_v56 = vshll.u32 %v4859_v36, 16  ;;  %v5758_v8 = vunpack.c.l.b16 %v5680_v40  ;;  %v5282_v41 = vld [vmem:[#allocation2 + $0xb4] sm:$0xf] }
 0x331   : > { %9878 = vmatmul.msk.bf16.gmra.mxu3 %vm5779_vm7, %v12586_v52  ;;  %v5757_v4 = vunpack.c.l.b16 %v5670_v42  ;;  %v5684_v32 = vrot.slane %v5682_v27, 4  ;;  %v5687_v19 = vrot.slane %v5685_v14, 5  ;;  %v3423_v61 = vadd.f32 %v12429_v59, %v11847_v62  ;;  %v5286_v40 = vld [vmem:[#allocation2 + $0xbc] sm:$0x1] }
 0x332   : > { %v5104_v49 = vrot.slane %v5102_v23, 7  ;;  %v4796_v51 = vadd.f32 %v12626_v35, %v4760_v54  ;;  %v12717_v38 = vpop.f32.mrf.mxu1 }
 0x333   : > { %v3674_v20 = vpop.f32.mrf.mxu2  ;;  %v5776_v52 = vpack.c.b16 %v5758_v8, %v5757_v4  ;;  %v5688_v45 = vor.u32 %v5687_v19, %v5684_v32 }
 0x334   : > { %v4728_v53 = vpop.f32.mrf.mxu0  ;;  %v5107_v0 = vor.u32 %v5105_v56, %v5104_v49  ;;  %v4828_v39 = vmax.f32 %v4796_v51, 0.0  ;;  %v3709_v37 = vadd.f32 %v3674_v20, %v11826_v17  ;;  %v12720_v58 = vpop.f32.mrf.mxu3  ;;  %v5108_v42 = vrot.slane %v5104_v49, 4  ;;  %v10000_v56 = vld [vmem:[%s14387_s3 + $0x14] sm:$0xf] }
 0x335   : > { %9770 = vmatmul.msk.bf16.gmra.mxu1 %vm5779_vm7, %v5776_v52  ;;  %v5689_v49 = vrot.slane %v5688_v45, 4 }
 0x336   : > { %v5283_v24 = vsel %vm11927_vm11, %v5107_v0, %v5282_v41  ;;  %v4860_v16 = vpack.c.bf16 %v4828_v39, %v4828_v39  ;;  %v4363_v25 = vadd.f32 %v12679_v1, %v3709_v37  ;;  %v12725_v63 = vld [vmem:[#allocation2 + $0xac] sm:$0xf]  ;;  %v7738_v39 = vsel %vm5828_vm0, %v10000_v56, 0 }
 0x337   : > { %5284 = vst [vmem:[#allocation2 + $0xb4] sm:$0xf] %v5283_v24  ;;  %v5691_v44 = vshll.u32 %v12725_v63, 16  ;;  %v12729_v13 = vld [vmem:[#allocation2 + $0xb0] sm:$0x1]  ;;  %v5695_v9 = vshrl.u32 %v12725_v63, 16  ;;  %7747 = vmatpush.bf16.msra.mxu2 %v7738_v39 }
 0x338   : > { %v5110_v36 = vshrl.u32 %v4860_v16, 16  ;;  %v4761_v17 = vadd.f32 %v4726_v55, %v4363_v25  ;;  %v5113_v1 = vshll.u32 %v4860_v16, 16  ;;  %v5701_v55 = vshll.u32 %v12729_v13, 16  ;;  %v10223_v41 = vld [vmem:[#allocation2 + $0x6c] sm:$0xff]  ;;  %v10207_v24 = vld [vmem:[#allocation2 + $0x60] sm:$0xff] }
 0x339   : > { %v5693_v60 = vrot.slane %v5691_v44, 5  ;;  %v5697_v12 = vrot.slane %v5695_v9, 4  ;;  %v10017_v25 = vld [vmem:[%s14387_s3 + $0x18] sm:$0xf]  ;;  %v12779_v39 = vld [vmem:[#allocation2 + $0x10] sm:$0xf] }
 0x33a   : > { %v5112_v23 = vrot.slane %v5110_v36, 7  ;;  %v4797_v54 = vadd.f32 %v12626_v35, %v4761_v17  ;;  %v12741_v8 = vpop.f32.mrf.mxu1  ;;  %v5703_v36 = vrot.slane %v5701_v55, 5  ;;  %v8024_v9 = vsel %vm5828_vm0, %v10017_v25, 0 }
 0x33b   : > { %v3676_v14 = vpop.f32.mrf.mxu2  ;;  %v5698_v0 = vor.u32 %v5697_v12, %v5693_v60  ;;  %8033 = vmatpush.bf16.msra.mxu3 %v8024_v9  ;;  %v6867_v7 = vshll.u32 %v12779_v39, 16 }
 0x33c   : > { %v12735_v27 = vpop.f32.mrf.mxu0  ;;  %v5115_v51 = vor.u32 %v5113_v1, %v5112_v23  ;;  %v5117_v62 = vrot.slane %v5112_v23, 4  ;;  %v4829_v59 = vmax.f32 %v4797_v54, 0.0  ;;  %v3710_v20 = vadd.f32 %v3676_v14, %v3423_v61  ;;  %v12743_v4 = vpop.f32.mrf.mxu3 }
 0x33d   : > { %v5699_v44 = vrot.slane %v5698_v0, 4 }
 0x33e   : > { %v5116_v37 = vsel %vm10396_vm10, %v5108_v42, %v5115_v51  ;;  %v5287_v52 = vsel %vm10350_vm3, %v5117_v62, %v5286_v40  ;;  %v4861_v32 = vpack.c.bf16 %v4829_v59, %v4829_v59  ;;  %v4364_v19 = vadd.f32 %v12700_v26, %v3710_v20  ;;  %v5326_v16 = vld [vmem:[#allocation2 + $0xb4] sm:$0xf] }
 0x33f   : > { %9959 = vmatmul.msk.bf16.gmra.mxu0 %vm5779_vm7, %v10223_v41  ;;  %5285 = vst.msk [vmem:[#allocation2 + $0xb8] sm:$0xf] %vm227_vm5, %v5116_v37  ;;  %v5706_v17 = vshrl.u32 %v5326_v16, 16  ;;  %v5694_v26 = vsel %vm10463_vm1, %v5689_v49, %v5693_v60  ;;  %v5709_v23 = vshll.u32 %v5326_v16, 16  ;;  %v5704_v1 = vsel %vm10463_vm1, %v5699_v44, %v5703_v36 }
 0x340   : > { %5288 = vst [vmem:[#allocation2 + $0xbc] sm:$0x1] %v5287_v52  ;;  %v5119_v61 = vshrl.u32 %v4861_v32, 16  ;;  %v4762_v45 = vadd.f32 %v4728_v53, %v4364_v19  ;;  %9845 = vmatmul.msk.bf16.gmra.mxu2 %vm5779_vm7, %v10207_v24  ;;  %v5122_v12 = vshll.u32 %v4861_v32, 16  ;;  %v5760_v40 = vunpack.c.l.b16 %v5704_v1  ;;  %v5289_v53 = vld [vmem:[#allocation2 + $0xc0] sm:$0xf] }
 0x341   : > { %9879 = vmatmul.msk.bf16.gmra.mxu3 %vm5779_vm7, %v12638_v34  ;;  %v5759_v56 = vunpack.c.l.b16 %v5694_v26  ;;  %v5708_v60 = vrot.slane %v5706_v17, 4  ;;  %v5711_v20 = vrot.slane %v5709_v23, 5  ;;  %v6268_v36 = vrot.slane %v12584_v5, 5  ;;  %v6152_v26 = vld [vmem:[#allocation2 + $0x84] sm:$0xe] }
 0x342   : > { %v12764_v54 = vrot.slane %v5119_v61, 7  ;;  %v4798_v42 = vadd.f32 %v12626_v35, %v4762_v45  ;;  %v12770_v59 = vpop.f32.mrf.mxu1  ;;  %v10098_v35 = vld [vmem:[%s14387_s3 + $0x1c] sm:$0xf] }
 0x343   : > { %v6061_v55 = vpop.f32.mrf.mxu2  ;;  %v5777_v49 = vpack.c.b16 %v5760_v40, %v5759_v56  ;;  %v8678_v0 = vsel %vm5828_vm0, %v10098_v35, 0  ;;  %v5712_v44 = vor.u32 %v5711_v20, %v5708_v60  ;;  %v9864_v60 = vrot.slane %v6152_v26, 9  ;;  %v10224_v35 = vld [vmem:[#allocation2 + $0x78] sm:$0xff] }
 0x344   : > { %v12767_v14 = vpop.f32.mrf.mxu0  ;;  %v5124_v51 = vor.u32 %v5122_v12, %v12764_v54  ;;  %v4830_v62 = vmax.f32 %v4798_v42, 0.0  ;;  %v6062_v41 = vadd.f32 %v6061_v55, %v12457_v2  ;;  %v12773_v34 = vpop.f32.mrf.mxu3  ;;  %8687 = vmatpush.bf16.msra.mxu0 %v8678_v0  ;;  %v6871_v12 = vshrl.u32 %v12779_v39, 16 }
 0x345   : > { %14483 = vst [vmem:[#allocation17_spill] sm:$0xff] %v12767_v14  ;;  %9771 = vmatmul.msk.bf16.gmra.mxu1 %vm5779_vm7, %v5777_v49  ;;  %v6270_v42 = vrot.slane %v6268_v36, 4  ;;  %v5125_v40 = vrot.slane %v12764_v54, 4 }
 0x346   : > { %v5290_v37 = vsel %vm11927_vm11, %v5124_v51, %v5289_v53  ;;  %v4862_v52 = vpack.c.bf16 %v4830_v62, %v4830_v62  ;;  %v12784_v32 = vadd.f32 %v12720_v58, %v6062_v41  ;;  %v12786_v2 = vld [vmem:[#allocation2 + $0xb8] sm:$0xf]  ;;  %v10131_v58 = vld [vmem:[%s14387_s3 + $0x20] sm:$0xf]  ;;  %v5293_v53 = vld [vmem:[#allocation2 + $0xc8] sm:$0x1] }
 0x347   : > { %5291 = vst [vmem:[#allocation2 + $0xc0] sm:$0xf] %v5290_v37  ;;  %v12789_v19 = vld [vmem:[#allocation2 + $0xbc] sm:$0x1]  ;;  %v5715_v24 = vshll.u32 %v12786_v2, 16  ;;  %v5719_v16 = vshrl.u32 %v12786_v2, 16 }
 0x348   : > { %v5127_v25 = vshrl.u32 %v4862_v52, 16  ;;  %v5725_v61 = vshll.u32 %v12789_v19, 16  ;;  %v9076_v45 = vsel %vm5828_vm0, %v10131_v58, 0  ;;  %v5130_v1 = vshll.u32 %v4862_v52, 16 }
 0x349   : > { %v5717_v17 = vrot.slane %v5715_v24, 5  ;;  %v5721_v9 = vrot.slane %v5719_v16, 4  ;;  %9085 = vmatpush.bf16.msra.mxu1 %v9076_v45  ;;  %v6271_v51 = vrot.slane %v12591_v29, 5  ;;  %v5713_v37 = vrot.slane %v5712_v44, 4  ;;  %v10208_v44 = vld [vmem:[#allocation2 + $0x6c] sm:$0xff] }
 0x34a   : > { %v5129_v23 = vrot.slane %v5127_v25, 7  ;;  %v12805_v20 = vpop.f32.mrf.mxu1  ;;  %v5727_v54 = vrot.slane %v5725_v61, 5  ;;  %v6269_v24 = vsel %vm10906_vm9, %v9864_v60, %v6268_v36 }
 0x34b   : > { %v6063_v56 = vpop.f32.mrf.mxu2  ;;  %v5722_v5 = vor.u32 %v5721_v9, %v5717_v17  ;;  %v6272_v16 = vsel %vm10906_vm9, %v6270_v42, %v6271_v51  ;;  %v5718_v58 = vsel %vm10463_vm1, %v5713_v37, %v5717_v17  ;;  %v6809_v9 = vld [vmem:[#allocation2 + $0xc] sm:$0xf]  ;;  %v6325_v28 = vunpack.c.l.b16 %v6269_v24  ;;  %v12835_v51 = vld [vmem:[#allocation2 + $0x14] sm:$0x1] }
 0x34c   : > { %v12802_v55 = vpop.f32.mrf.mxu0  ;;  %v5132_v62 = vor.u32 %v5130_v1, %v5129_v23  ;;  %v5134_v41 = vrot.slane %v5129_v23, 4  ;;  %v6064_v49 = vadd.f32 %v6063_v56, %v12491_v30  ;;  %v12808_v0 = vpop.f32.mrf.mxu3  ;;  %v6326_v61 = vunpack.c.l.b16 %v6272_v16 }
 0x34d   : > { %14484 = vst [vmem:[#allocation18_spill] sm:$0xff] %v12802_v55  ;;  %v5723_v52 = vrot.slane %v5722_v5, 4  ;;  %v5761_v45 = vunpack.c.l.b16 %v5718_v58  ;;  %v6858_v26 = vshrl.u32 %v6809_v9, 16  ;;  %v6861_v23 = vshll.u32 %v6809_v9, 16 }
 0x34e   : > { %v5133_v29 = vsel %vm10396_vm10, %v5125_v40, %v5132_v62  ;;  %v5294_v25 = vsel %vm10350_vm3, %v5134_v41, %v5293_v53  ;;  %v12820_v30 = vadd.f32 %v12743_v4, %v6064_v49  ;;  %v6346_v4 = vpack.c.b16 %v6326_v61, %v6325_v28  ;;  %v6153_v49 = vld [vmem:[#allocation2 + $0x90] sm:$0xe] }
 0x34f   : > { %9960 = vmatmul.msk.bf16.gmra.mxu0 %vm5779_vm7, %v10224_v35  ;;  %5292 = vst.msk [vmem:[#allocation2 + $0xc4] sm:$0xf] %vm227_vm5, %v5133_v29  ;;  %v5728_v36 = vsel %vm10463_vm1, %v5723_v52, %v5727_v54  ;;  %v6869_v17 = vrot.slane %v6867_v7, 5  ;;  %v6873_v1 = vrot.slane %v6871_v12, 4  ;;  %v6863_v41 = vrot.slane %v6861_v23, 5 }
 0x350   : > { %5295 = vst [vmem:[#allocation2 + $0xc8] sm:$0x1] %v5294_v25  ;;  %9846 = vmatmul.msk.bf16.gmra.mxu2 %vm5779_vm7, %v10208_v44  ;;  %v5762_v3 = vunpack.c.l.b16 %v5728_v36  ;;  %v6877_v7 = vshll.u32 %v12835_v51, 16  ;;  %v6812_v12 = vld [vmem:[#allocation2 + $0x18] sm:$0xf]  ;;  %v6275_v37 = vrot.slane %v12636_v10, 5 }
 0x351   : > { %9880 = vmatmul.msk.bf16.gmra.mxu3 %vm5779_vm7, %v12687_v57  ;;  %v6860_v57 = vrot.slane %v6858_v26, 4  ;;  %v6874_v35 = vor.u32 %v6873_v1, %v6869_v17  ;;  %v12843_v52 = vld [vmem:[#allocation2 + $0x1c] sm:$0xf]  ;;  %v6278_v24 = vrot.slane %v12643_v43, 5  ;;  %v6882_v29 = vshrl.u32 %v6812_v12, 16 }
 0x352   : > { %v5778_v53 = vpack.c.b16 %v5762_v3, %v5761_v45  ;;  %v12832_v56 = vpop.f32.mrf.mxu1  ;;  %v6277_v54 = vrot.slane %v6275_v37, 4  ;;  %v6879_v36 = vrot.slane %v6877_v7, 5  ;;  %v6885_v9 = vshll.u32 %v6812_v12, 16  ;;  %v10225_v3 = vld [vmem:[#allocation2 + $0x84] sm:$0xff] }
 0x353   : > { %v6066_v40 = vpop.f32.mrf.mxu2  ;;  %v6864_v16 = vor.u32 %v6863_v41, %v6860_v57  ;;  %v6891_v28 = vshll.u32 %v12843_v52, 16  ;;  %v6895_v26 = vshrl.u32 %v12843_v52, 16 }
 0x354   : > { %v12830_v42 = vpop.f32.mrf.mxu0  ;;  %v6067_v5 = vadd.f32 %v6066_v40, %v12511_v50  ;;  %v6421_v60 = vpop.f32.mrf.mxu3  ;;  %v9865_v50 = vrot.slane %v6153_v49, 9  ;;  %v6279_v10 = vsel %vm10906_vm9, %v6277_v54, %v6278_v24  ;;  %v12873_v24 = vld [vmem:[#allocation2 + $0x20] sm:$0x1] }
 0x355   : > { %14485 = vst [vmem:[#allocation19_spill] sm:$0xff] %v12830_v42  ;;  %9772 = vmatmul.msk.bf16.gmra.mxu1 %vm5779_vm7, %v5778_v53  ;;  %v6328_v1 = vunpack.c.l.b16 %v6279_v10  ;;  %v10209_v53 = vld [vmem:[#allocation2 + $0x78] sm:$0xff]  ;;  %v6893_v12 = vrot.slane %v6891_v28, 5  ;;  %v6897_v49 = vrot.slane %v6895_v26, 4  ;;  %v12883_v28 = vld [vmem:[#allocation2 + $0x28] sm:$0xf] }
 0x356   : > { %v12838_v62 = vadd.f32 %v12773_v34, %v6067_v5  ;;  %v6875_v34 = vrot.slane %v6874_v35, 4  ;;  %v6276_v25 = vsel %vm10906_vm9, %v9865_v50, %v6275_v37  ;;  %v6865_v5 = vrot.slane %v6864_v16, 4  ;;  %v12947_v42 = vld [vmem:[#allocation2 + $0x38] sm:$0x1] }
 0x357   : > { %v6327_v23 = vunpack.c.l.b16 %v6276_v25  ;;  %v6884_v35 = vrot.slane %v6882_v29, 4 }
 0x358   : > { %14486 = vst [vmem:[#allocation20_spill] sm:$0xff] %v12838_v62  ;;  %v6880_v57 = vsel %vm10463_vm1, %v6875_v34, %v6879_v36  ;;  %v6870_v7 = vsel %vm10463_vm1, %v6865_v5, %v6869_v17  ;;  %v6815_v36 = vld [vmem:[#allocation2 + $0x24] sm:$0xf]  ;;  %v6919_v5 = vshrl.u32 %v12883_v28, 16 }
 0x359   : > { %v12865_v41 = vpack.c.b16 %v6328_v1, %v6327_v23  ;;  %v7244_v37 = vunpack.c.l.b16 %v6880_v57  ;;  %v7243_v54 = vunpack.c.l.b16 %v6870_v7  ;;  %v6906_v23 = vshrl.u32 %v6815_v36, 16 }
 0x35a   : > { %v12853_v61 = vpop.f32.mrf.mxu1  ;;  %v6285_v57 = vrot.slane %v12692_v33, 5 }
 0x35b   : > { %v6068_v58 = vpop.f32.mrf.mxu2  ;;  %v7275_v17 = vpack.c.b16 %v7244_v37, %v7243_v54  ;;  %v10226_v54 = vld [vmem:[#allocation2 + $0x90] sm:$0xff] }
 0x35c   : > { %v12848_v44 = vpop.f32.mrf.mxu0  ;;  %v6069_v43 = vadd.f32 %v6068_v58, %v12543_v18  ;;  %v12856_v45 = vpop.f32.mrf.mxu3  ;;  %v6887_v18 = vrot.slane %v6885_v9, 5  ;;  %v6898_v58 = vor.u32 %v6897_v49, %v6893_v12 }
 0x35d   : > { %14487 = vst [vmem:[#allocation21_spill] sm:$0xff] %v12848_v44 }
 0x35e   : > { %v12861_v40 = vadd.f32 %v12808_v0, %v6069_v43  ;;  %v6888_v16 = vor.u32 %v6887_v18, %v6884_v35  ;;  %v6282_v43 = vrot.slane %v12685_v31, 5  ;;  %v6899_v26 = vrot.slane %v6898_v58, 4 }
 0x35f   : > { %9961 = vmatmul.msk.bf16.gmra.mxu0 %vm5779_vm7, %v10225_v3  ;;  %v6154_v3 = vld [vmem:[#allocation2 + $0x9c] sm:$0xe] }
 0x360   : > { %14488 = vst [vmem:[#allocation5_spill] sm:$0xff] %v12861_v40  ;;  %9847 = vmatmul.msk.bf16.gmra.mxu2 %vm5779_vm7, %v10209_v53  ;;  %v6889_v10 = vrot.slane %v6888_v16, 4  ;;  %v9866_v1 = vrot.slane %v6154_v3, 9  ;;  %v6915_v53 = vshll.u32 %v12883_v28, 16  ;;  %v6155_v40 = vld [vmem:[#allocation2 + $0xa8] sm:$0xe] }
 0x361   : > { %9881 = vmatmul.msk.bf16.gmra.mxu3 %vm5779_vm7, %v6346_v4  ;;  %v6901_v4 = vshll.u32 %v12873_v24, 16  ;;  %v9867_v55 = vrot.slane %v6155_v40, 9 }
 0x362   : > { %v12875_v34 = vpop.f32.mrf.mxu1  ;;  %v6283_v18 = vsel %vm10906_vm9, %v9866_v1, %v6282_v43  ;;  %v6894_v31 = vsel %vm10463_vm1, %v6889_v10, %v6893_v12  ;;  %v12905_v3 = vrot.slane %v6915_v53, 5  ;;  %v6921_v12 = vrot.slane %v6919_v5, 4  ;;  %v12907_v10 = vld [vmem:[#allocation2 + $0x1c] sm:$0xf]  ;;  %v12913_v1 = vld [vmem:[#allocation2 + $0x2c] sm:$0x1] }
 0x363   : > { %v6071_v50 = vpop.f32.mrf.mxu2  ;;  %v6903_v35 = vrot.slane %v6901_v4, 5  ;;  %v6329_v58 = vunpack.c.l.b16 %v6283_v18  ;;  %v8867_v53 = vrot.slane %v12907_v10, 5  ;;  %v6925_v18 = vshll.u32 %v12913_v1, 16 }
 0x364   : > { %v12871_v0 = vpop.f32.mrf.mxu0  ;;  %v6072_v29 = vadd.f32 %v6071_v50, %v12563_v11  ;;  %v12878_v25 = vpop.f32.mrf.mxu3  ;;  %v6909_v11 = vshll.u32 %v6815_v36, 16  ;;  %v6908_v36 = vrot.slane %v6906_v23, 4  ;;  %v12919_v23 = vld [vmem:[#allocation2 + $0x28] sm:$0xf]  ;;  %v6922_v5 = vor.u32 %v6921_v12, %v12905_v3 }
 0x365   : > { %14489 = vst [vmem:[#allocation4_spill] sm:$0xff] %v12871_v0  ;;  %9968 = vmatmul.msk.bf16.vlgmr.msrb.gmra.mxu1 %vm5779_vm7, %v7275_v17  ;;  %v6904_v33 = vsel %vm10463_vm1, %v6899_v26, %v6903_v35  ;;  %v8801_v26 = vld [vmem:[#allocation2 + $0x18] sm:$0xe]  ;;  %v12917_v35 = vld [vmem:[#allocation2 + $0x20] sm:$0x1] }
 0x366   : > { %v12880_v9 = vadd.f32 %v6421_v60, %v6072_v29  ;;  %v6284_v60 = vrot.slane %v6282_v43, 4  ;;  %v6911_v4 = vrot.slane %v6909_v11, 5  ;;  %v7245_v11 = vunpack.c.l.b16 %v6894_v31 }
 0x367   : > { %v8874_v31 = vrot.slane %v12919_v23, 5 }
 0x368   : > { %14490 = vst [vmem:[#allocation3_spill] sm:$0xff] %v12880_v9  ;;  %v6286_v37 = vsel %vm10906_vm9, %v6284_v60, %v6285_v57  ;;  %v7246_v57 = vunpack.c.l.b16 %v6904_v33  ;;  %v8870_v33 = vrot.slane %v12917_v35, 5 }
 0x369   : > { %v6330_v17 = vunpack.c.l.b16 %v6286_v37  ;;  %v10115_v37 = vrot.slane %v8801_v26, 9  ;;  %v8876_v44 = vrot.slane %v8874_v31, 4 }
 0x36a   : > { %v12898_v50 = vpop.f32.mrf.mxu1 }
 0x36b   : > { %v6073_v49 = vpop.f32.mrf.mxu2  ;;  %v12915_v60 = vpack.c.b16 %v6330_v17, %v6329_v58 }
 0x36c   : > { %v12892_v7 = vpop.f32.mrf.mxu0  ;;  %v6074_v16 = vadd.f32 %v6073_v49, %v12593_v6  ;;  %v12901_v29 = vpop.f32.mrf.mxu3  ;;  %v10210_v6 = vld [vmem:[#allocation2 + $0x84] sm:$0xff]  ;;  %v12927_v49 = vld [vmem:[#allocation2 + $0x2c] sm:$0x1] }
 0x36d   : > { %14491 = vst [vmem:[#allocation7_spill] sm:$0xff] %v12892_v7  ;;  %v6818_v7 = vld [vmem:[#allocation2 + $0x30] sm:$0xf] }
 0x36e   : > { %v12911_v43 = vadd.f32 %v12856_v45, %v6074_v16  ;;  %v6912_v45 = vor.u32 %v6911_v4, %v6908_v36  ;;  %v8869_v16 = vrot.slane %v8867_v53, 4  ;;  %v8868_v36 = vsel %vm10906_vm9, %v10115_v37, %v8867_v53 }
 0x36f   : > { %9962 = vmatmul.msk.bf16.gmra.mxu0 %vm5779_vm7, %v10226_v54  ;;  %v12929_v54 = vld [vmem:[#allocation2 + $0x34] sm:$0xf] }
 0x370   : > { %14492 = vst [vmem:[#allocation8_spill] sm:$0xff] %v12911_v43  ;;  %9848 = vmatmul.msk.bf16.gmra.mxu2 %vm5779_vm7, %v10210_v6  ;;  %v7276_v6 = vpack.c.b16 %v7246_v57, %v7245_v11  ;;  %v8871_v0 = vsel %vm10906_vm9, %v8869_v16, %v8870_v33  ;;  %v8802_v43 = vld [vmem:[#allocation2 + $0x24] sm:$0xe]  ;;  %v12945_v9 = vrot.slane %v6912_v45, 4  ;;  %v6923_v57 = vrot.slane %v6922_v5, 4 }
 0x371   : > { %9882 = vmatmul.msk.bf16.gmra.mxu3 %vm5779_vm7, %v12865_v41  ;;  %v7466_v41 = vld [vmem:[#allocation2 + $0x30] sm:$0xe]  ;;  %v6927_v11 = vrot.slane %v6925_v18, 5  ;;  %v7550_v53 = vrot.slane %v12929_v54, 5  ;;  %v6930_v33 = vshrl.u32 %v6818_v7, 16  ;;  %v6289_v45 = vrot.slane %v12725_v63, 5 }
 0x372   : > { %v12937_v4 = vpop.f32.mrf.mxu1  ;;  %v9987_v37 = vrot.slane %v7466_v41, 9  ;;  %v8979_v5 = vunpack.c.l.b16 %v8868_v36  ;;  %v10116_v18 = vrot.slane %v8802_v43, 9  ;;  %v6933_v41 = vshll.u32 %v6818_v7, 16 }
 0x373   : > { %v6076_v17 = vpop.f32.mrf.mxu2  ;;  %v7552_v14 = vrot.slane %v7550_v53, 4  ;;  %v6943_v7 = vshrl.u32 %v12929_v54, 16 }
 0x374   : > { %v12933_v58 = vpop.f32.mrf.mxu0  ;;  %v6077_v12 = vadd.f32 %v6076_v17, %v12612_v21  ;;  %v12940_v26 = vpop.f32.mrf.mxu3  ;;  %v8980_v17 = vunpack.c.l.b16 %v8871_v0  ;;  %v7551_v62 = vsel %vm10906_vm9, %v9987_v37, %v7550_v53  ;;  %v6939_v0 = vshll.u32 %v12929_v54, 16 }
 0x375   : > { %14493 = vst [vmem:[#allocation6_spill] sm:$0xff] %v12933_v58  ;;  %v8877_v58 = vrot.slane %v12927_v49, 5  ;;  %9969 = vmatmul.msk.bf16.gmra.mxu1 %vm5779_vm7, %v7276_v6  ;;  %v8875_v40 = vsel %vm10906_vm9, %v10116_v18, %v8874_v31  ;;  %v12980_v31 = vld [vmem:[#allocation2 + $0x34] sm:$0xf]  ;;  %v6928_v54 = vsel %vm10463_vm1, %v6923_v57, %v6927_v11 }
 0x376   : > { %v12951_v21 = vadd.f32 %v12878_v25, %v6077_v12  ;;  %v7553_v25 = vrot.slane %v12947_v42, 5  ;;  %v6291_v12 = vrot.slane %v6289_v45, 4  ;;  %v12966_v43 = vpack.c.b16 %v8980_v17, %v8979_v5 }
 0x377   : > { %v8878_v16 = vsel %vm10906_vm9, %v8876_v44, %v8877_v58  ;;  %v6292_v44 = vrot.slane %v12729_v13, 5  ;;  %v6290_v58 = vsel %vm10906_vm9, %v9867_v55, %v6289_v45  ;;  %v7647_v13 = vunpack.c.l.b16 %v7551_v62  ;;  %v10227_v55 = vld [vmem:[#allocation2 + $0x9c] sm:$0xff] }
 0x378   : > { %14494 = vst [vmem:[#allocation9_spill] sm:$0xff] %v12951_v21  ;;  %v7554_v63 = vsel %vm10906_vm9, %v7552_v14, %v7553_v25  ;;  %v6331_v45 = vunpack.c.l.b16 %v6290_v58  ;;  %v8982_v18 = vunpack.c.l.b16 %v8878_v16  ;;  %v8803_v25 = vld [vmem:[#allocation2 + $0x30] sm:$0xe]  ;;  %v8981_v62 = vunpack.c.l.b16 %v8875_v40  ;;  %v12994_v16 = vld [vmem:[#allocation2 + $0x38] sm:$0x1] }
 0x379   : > { %14495 = vst [vmem:[#allocation10_spill] sm:$0xff] %v12966_v43  ;;  %v6293_v53 = vsel %vm10906_vm9, %v6291_v12, %v6292_v44  ;;  %v7648_v37 = vunpack.c.l.b16 %v7554_v63  ;;  %v6932_v43 = vrot.slane %v6930_v33, 4  ;;  %v6935_v63 = vrot.slane %v6933_v41, 5 }
 0x37a   : > { %v12975_v21 = vpop.f32.mrf.mxu1  ;;  %v6332_v5 = vunpack.c.l.b16 %v6293_v53  ;;  %v12990_v58 = vrot.slane %v6939_v0, 5  ;;  %v6945_v53 = vrot.slane %v6943_v7, 4  ;;  %v10117_v57 = vrot.slane %v8803_v25, 9 }
 0x37b   : > { %v6078_v36 = vpop.f32.mrf.mxu2  ;;  %v12984_v12 = vpack.c.b16 %v7648_v37, %v7647_v13  ;;  %v8881_v11 = vrot.slane %v12980_v31, 5  ;;  %v7248_v33 = vunpack.c.l.b16 %v6928_v54  ;;  %v8884_v40 = vrot.slane %v12994_v16, 5  ;;  %v6822_v13 = vld [vmem:[#allocation2 + $0x40] sm:$0xf] }
 0x37c   : > { %v12970_v6 = vpop.f32.mrf.mxu0  ;;  %v6079_v14 = vadd.f32 %v6078_v36, %v12645_v46  ;;  %v12978_v17 = vpop.f32.mrf.mxu3  ;;  %v10211_v46 = vld [vmem:[#allocation2 + $0x90] sm:$0xff]  ;;  %v12992_v36 = vpack.c.b16 %v6332_v5, %v6331_v45  ;;  %v6936_v7 = vor.u32 %v6935_v63, %v6932_v43  ;;  %v6946_v45 = vor.u32 %v6945_v53, %v12990_v58  ;;  %v7467_v5 = vld [vmem:[#allocation2 + $0x3c] sm:$0xe] }
 0x37d   : > { %14496 = vst [vmem:[#allocation22_spill] sm:$0xff] %v12970_v6  ;;  %v12996_v6 = vpack.c.b16 %v8982_v18, %v8981_v62  ;;  %v8882_v41 = vsel %vm10906_vm9, %v10117_v57, %v8881_v11  ;;  %v8883_v0 = vrot.slane %v8881_v11, 4  ;;  %v6949_v62 = vshll.u32 %v12947_v42, 16  ;;  %v6821_v42 = vld [vmem:[#allocation2 + $0x3c] sm:$0xf] }
 0x37e   : > { %14497 = vst [vmem:[#allocation23_spill] sm:$0xff] %v12984_v12  ;;  %v12988_v44 = vadd.f32 %v12901_v29, %v6079_v14  ;;  %v6918_v29 = vsel %vm10463_vm1, %v12945_v9, %v12905_v3  ;;  %v8983_v25 = vunpack.c.l.b16 %v8882_v41  ;;  %v7557_v63 = vrot.slane %v6822_v13, 5 }
 0x37f   : > { %9963 = vmatmul.msk.bf16.gmra.mxu0 %vm5779_vm7, %v10227_v55  ;;  %14499 = vst [vmem:[#allocation11_spill] sm:$0xff] %v12996_v6  ;;  %v7247_v14 = vunpack.c.l.b16 %v6918_v29  ;;  %v8885_v9 = vsel %vm10906_vm9, %v8883_v0, %v8884_v40  ;;  %v13025_v57 = vrot.slane %v6936_v7, 4  ;;  %v9988_v11 = vrot.slane %v7467_v5, 9  ;;  %v6156_v0 = vld [vmem:[#allocation2 + $0xb4] sm:$0xe] }
 0x380   : > { %14498 = vst [vmem:[#allocation12_spill] sm:$0xff] %v12988_v44  ;;  %9849 = vmatmul.msk.bf16.gmra.mxu2 %vm5779_vm7, %v10211_v46  ;;  %v8984_v54 = vunpack.c.l.b16 %v8885_v9  ;;  %v13020_v46 = vld [vmem:[#allocation2 + $0x44] sm:$0x1]  ;;  %v6296_v41 = vrot.slane %v12786_v2, 5  ;;  %v9868_v40 = vrot.slane %v6156_v0, 9  ;;  %v6963_v5 = vshll.u32 %v6822_v13, 16 }
 0x381   : > { %9883 = vmatmul.msk.bf16.gmra.mxu3 %vm5779_vm7, %v12915_v60  ;;  %v7277_v43 = vpack.c.b16 %v7248_v33, %v7247_v14  ;;  %v13031_v33 = vld [vmem:[#allocation2 + $0x40] sm:$0xf]  ;;  %v7560_v7 = vrot.slane %v13020_v46, 5  ;;  %v6951_v14 = vrot.slane %v6949_v62, 5  ;;  %v6957_v44 = vshll.u32 %v6821_v42, 16 }
 0x382   : > { %v13014_v3 = vpop.f32.mrf.mxu1  ;;  %v13027_v29 = vpack.c.b16 %v8984_v54, %v8983_v25  ;;  %v6298_v9 = vrot.slane %v6296_v41, 4  ;;  %v6967_v25 = vshrl.u32 %v6822_v13, 16  ;;  %v8804_v54 = vld [vmem:[#allocation2 + $0x3c] sm:$0xe]  ;;  %v10228_v13 = vld [vmem:[#allocation2 + $0xa8] sm:$0xff] }
 0x383   : > { %v6081_v55 = vpop.f32.mrf.mxu2 }
 0x384   : > { %v13009_v37 = vpop.f32.mrf.mxu0  ;;  %v6082_v60 = vadd.f32 %v6081_v55, %v12664_v22  ;;  %v13017_v18 = vpop.f32.mrf.mxu3  ;;  %14502 = vst [vmem:[#allocation13_spill] sm:$0xff] %v13027_v29  ;;  %v6947_v22 = vrot.slane %v6946_v45, 4  ;;  %v7558_v55 = vsel %vm10906_vm9, %v9988_v11, %v7557_v63  ;;  %v6297_v45 = vsel %vm10906_vm9, %v9868_v40, %v6296_v41 }
 0x385   : > { %14500 = vst [vmem:[#allocation24_spill] sm:$0xff] %v13009_v37  ;;  %9970 = vmatmul.msk.bf16.gmra.mxu1 %vm5779_vm7, %v7277_v43  ;;  %v8888_v43 = vrot.slane %v13031_v33, 5  ;;  %v6954_v11 = vshrl.u32 %v6821_v42, 16  ;;  %v7649_v29 = vunpack.c.l.b16 %v7558_v55  ;;  %v10118_v55 = vrot.slane %v8804_v54, 9 }
 0x386   : > { %v13023_v53 = vadd.f32 %v12940_v26, %v6082_v60  ;;  %v7559_v26 = vrot.slane %v7557_v63, 4  ;;  %v6299_v60 = vrot.slane %v12789_v19, 5 }
 0x388   : > { %14501 = vst [vmem:[#allocation14_spill] sm:$0xff] %v13023_v53  ;;  %v7561_v2 = vsel %vm10906_vm9, %v7559_v26, %v7560_v7  ;;  %v6300_v62 = vsel %vm10906_vm9, %v6298_v9, %v6299_v60  ;;  %v6952_v26 = vsel %vm10463_vm1, %v6947_v22, %v6951_v14  ;;  %v6333_v7 = vunpack.c.l.b16 %v6297_v45  ;;  %v13055_v53 = vld [vmem:[#allocation2 + $0x44] sm:$0x1]  ;;  %v6824_v45 = vld [vmem:[#allocation2 + $0x48] sm:$0xf] }
 0x389   : > { %v7650_v6 = vunpack.c.l.b16 %v7561_v2  ;;  %v6334_v37 = vunpack.c.l.b16 %v6300_v62  ;;  %v8890_v60 = vrot.slane %v8888_v43, 4  ;;  %v10212_v2 = vld [vmem:[#allocation2 + $0x9c] sm:$0xff]  ;;  %v6969_v22 = vrot.slane %v6967_v25, 4 }
 0x38a   : > { %v13046_v19 = vpop.f32.mrf.mxu1  ;;  %v6959_v25 = vrot.slane %v6957_v44, 5  ;;  %v6978_v54 = vshrl.u32 %v6824_v45, 16  ;;  %v6973_v44 = vshll.u32 %v13020_v46, 16 }
 0x38b   : > { %v6083_v63 = vpop.f32.mrf.mxu2  ;;  %v13057_v9 = vpack.c.b16 %v7650_v6, %v7649_v29  ;;  %v13065_v14 = vpack.c.b16 %v6334_v37, %v6333_v7  ;;  %v8889_v6 = vsel %vm10906_vm9, %v10118_v55, %v8888_v43  ;;  %v8891_v29 = vrot.slane %v13055_v53, 5 }
 0x38c   : > { %v13042_v0 = vpop.f32.mrf.mxu0  ;;  %v6084_v41 = vadd.f32 %v6083_v63, %v12697_v15  ;;  %v13049_v40 = vpop.f32.mrf.mxu3  ;;  %v13063_v63 = vrot.slane %v6963_v5, 5  ;;  %v6956_v5 = vrot.slane %v6954_v11, 4  ;;  %v7250_v37 = vunpack.c.l.b16 %v6952_v26 }
 0x38d   : > { %14503 = vst [vmem:[#allocation15_spill] sm:$0xff] %v13042_v0  ;;  %v13053_v0 = vld [vmem:[#allocation2 + $0x4c] sm:$0xf]  ;;  %v8985_v7 = vunpack.c.l.b16 %v8889_v6  ;;  %v8147_v6 = vld [vmem:[#allocation2 + $0x18] sm:$0xf] }
 0x38e   : > { %14504 = vst [vmem:[#allocation25_spill] sm:$0xff] %v13057_v9  ;;  %v13061_v15 = vadd.f32 %v12978_v17, %v6084_v41  ;;  %v6987_v62 = vshll.u32 %v13053_v0, 16  ;;  %v6991_v42 = vshrl.u32 %v13053_v0, 16  ;;  %v6942_v17 = vsel %vm10463_vm1, %v13025_v57, %v12990_v58 }
 0x38f   : > { %9964 = vmatmul.msk.bf16.gmra.mxu0 %vm5779_vm7, %v10228_v13  ;;  %v8892_v13 = vsel %vm10906_vm9, %v8890_v60, %v8891_v29  ;;  %v6970_v43 = vor.u32 %v6969_v22, %v13063_v63  ;;  %v6981_v41 = vshll.u32 %v6824_v45, 16  ;;  %v6960_v45 = vor.u32 %v6959_v25, %v6956_v5  ;;  %v13094_v29 = vld [vmem:[#allocation2 + $0x4c] sm:$0xf] }
 0x390   : > { %14505 = vst [vmem:[#allocation16_spill] sm:$0xff] %v13061_v15  ;;  %9850 = vmatmul.msk.bf16.gmra.mxu2 %vm5779_vm7, %v10212_v2  ;;  %v8986_v55 = vunpack.c.l.b16 %v8892_v13  ;;  %v7249_v15 = vunpack.c.l.b16 %v6942_v17  ;;  %v13082_v9 = vrot.slane %v6987_v62, 5  ;;  %v6993_v58 = vrot.slane %v6991_v42, 4  ;;  %v13099_v17 = vld [vmem:[#allocation2 + $0x50] sm:$0x1] }
 0x391   : > { %9884 = vmatmul.msk.bf16.gmra.mxu3 %vm5779_vm7, %v12992_v36  ;;  %v6971_v42 = vrot.slane %v6970_v43, 4  ;;  %v6983_v13 = vrot.slane %v6981_v41, 5  ;;  %v8199_v5 = vshll.u32 %v8147_v6, 16  ;;  %v8895_v25 = vrot.slane %v13094_v29, 5 }
 0x392   : > { %v13084_v57 = vpop.f32.mrf.mxu1  ;;  %v13090_v26 = vpack.c.b16 %v8986_v55, %v8985_v7  ;;  %v7278_v22 = vpack.c.b16 %v7250_v37, %v7249_v15  ;;  %v6994_v46 = vor.u32 %v6993_v58, %v13082_v9  ;;  %v13103_v7 = vld [vmem:[#allocation2 + $0x50] sm:$0x1]  ;;  %v6975_v55 = vrot.slane %v6973_v44, 5  ;;  %v8805_v37 = vld [vmem:[#allocation2 + $0x48] sm:$0xe] }
 0x393   : > { %v6086_v2 = vpop.f32.mrf.mxu2  ;;  %14506 = vst [vmem:[#allocation26_spill] sm:$0xff] %v13084_v57  ;;  %v8196_v15 = vshrl.u32 %v8147_v6, 16  ;;  %v8897_v41 = vrot.slane %v8895_v25, 4  ;;  %v8209_v44 = vshrl.u32 %v12907_v10, 16  ;;  %v10119_v6 = vrot.slane %v8805_v37, 9 }
 0x394   : > { %v6087_v11 = vadd.f32 %v6086_v2, %v12717_v38  ;;  %v13087_v36 = vpop.f32.mrf.mxu3  ;;  %14507 = vst [vmem:[#allocation27_spill] sm:$0xff] %v13090_v26  ;;  %v13092_v60 = vpop.f32.mrf.mxu0  ;;  %v6980_v38 = vrot.slane %v6978_v54, 4  ;;  %v6961_v2 = vrot.slane %v6960_v45, 4  ;;  %v6976_v43 = vsel %vm10463_vm1, %v6971_v42, %v6975_v55  ;;  %v10213_v55 = vld [vmem:[#allocation2 + $0xa8] sm:$0xff] }
 0x395   : > { %14508 = vst [vmem:[#allocation28_spill] sm:$0xff] %v13092_v60  ;;  %9971 = vmatmul.msk.bf16.gmra.mxu1 %vm5779_vm7, %v7278_v22  ;;  %v6995_v58 = vrot.slane %v6994_v46, 4  ;;  %v8205_v26 = vshll.u32 %v12907_v10, 16  ;;  %v8198_v12 = vrot.slane %v8196_v15, 4  ;;  %v8201_v42 = vrot.slane %v8199_v5, 5 }
 0x396   : > { %v13097_v62 = vadd.f32 %v13017_v18, %v6087_v11  ;;  %v6997_v18 = vshll.u32 %v13099_v17, 16  ;;  %v6984_v54 = vor.u32 %v6983_v13, %v6980_v38  ;;  %v8898_v11 = vrot.slane %v13103_v7, 5  ;;  %v8150_v15 = vld [vmem:[#allocation2 + $0x24] sm:$0xf] }
 0x397   : > { %v8896_v46 = vsel %vm10906_vm9, %v10119_v6, %v8895_v25  ;;  %v8211_v25 = vrot.slane %v8209_v44, 4 }
 0x398   : > { %14509 = vst [vmem:[#allocation29_spill] sm:$0xff] %v13097_v62  ;;  %v10229_v62 = vld [vmem:[#allocation2 + $0xb4] sm:$0xff]  ;;  %v8899_v38 = vsel %vm10906_vm9, %v8897_v41, %v8898_v11  ;;  %v6999_v13 = vrot.slane %v6997_v18, 5  ;;  %v6985_v37 = vrot.slane %v6984_v54, 4  ;;  %v8207_v41 = vrot.slane %v8205_v26, 5 }
 0x399   : > { %v8987_v11 = vunpack.c.l.b16 %v8896_v46  ;;  %v8988_v6 = vunpack.c.l.b16 %v8899_v38  ;;  %v8220_v54 = vshrl.u32 %v8150_v15, 16 }
 0x39a   : > { %v13112_v60 = vpop.f32.mrf.mxu1  ;;  %v7000_v18 = vsel %vm10463_vm1, %v6995_v58, %v6999_v13  ;;  %v8223_v58 = vshll.u32 %v8150_v15, 16  ;;  %v13153_v15 = vld [vmem:[#allocation2 + $0x5c] sm:$0x1] }
 0x39b   : > { %v6088_v22 = vpop.f32.mrf.mxu2  ;;  %v13139_v26 = vunpack.c.l.b16 %v7000_v18  ;;  %v13141_v44 = vpack.c.b16 %v8988_v6, %v8987_v11  ;;  %v8222_v18 = vrot.slane %v8220_v54, 4  ;;  %v7464_v11 = vld [vmem:[#allocation2 + $0x18] sm:$0xe]  ;;  %v8229_v54 = vshll.u32 %v12919_v23, 16 }
 0x39c   : > { %v6089_v45 = vadd.f32 %v6088_v22, %v12741_v8  ;;  %v13115_v57 = vpop.f32.mrf.mxu3  ;;  %v6966_v8 = vsel %vm10463_vm1, %v6961_v2, %v13063_v63  ;;  %v13128_v5 = vpop.f32.mrf.mxu0  ;;  %v7252_v22 = vunpack.c.l.b16 %v6976_v43  ;;  %v7463_v2 = vld [vmem:[#allocation2 + $0xc] sm:$0xe]  ;;  %v7529_v43 = vrot.slane %v12779_v39, 5 }
 0x39d   : > { %14511 = vst [vmem:[#allocation31_spill] sm:$0xff] %v13128_v5  ;;  %v7251_v63 = vunpack.c.l.b16 %v6966_v8  ;;  %v8215_v39 = vshll.u32 %v12917_v35, 16  ;;  %v9984_v46 = vrot.slane %v7463_v2, 9  ;;  %v13151_v8 = vld [vmem:[#allocation2 + $0x58] sm:$0xf]  ;;  %v8231_v5 = vrot.slane %v8229_v54, 5 }
 0x39e   : > { %v13123_v10 = vadd.f32 %v13049_v40, %v6089_v45  ;;  %v6990_v40 = vsel %vm10463_vm1, %v6985_v37, %v13082_v9  ;;  %14512 = vst [vmem:[#allocation32_spill] sm:$0xff] %v13141_v44  ;;  %v7531_v37 = vrot.slane %v7529_v43, 4  ;;  %v7469_v35 = vld [vmem:[#allocation2 + $0x54] sm:$0xe]  ;;  %v9985_v44 = vrot.slane %v7464_v11, 9 }
 0x39f   : > { %9965 = vmatmul.msk.bf16.gmra.mxu0 %vm5779_vm7, %v10229_v62  ;;  %v8202_v62 = vor.u32 %v8201_v42, %v8198_v12  ;;  %v7279_v13 = vpack.c.b16 %v7252_v22, %v7251_v63  ;;  %v8212_v12 = vor.u32 %v8211_v25, %v8207_v41  ;;  %v8225_v22 = vrot.slane %v8223_v58, 5 }
 0x3a0   : > { %14510 = vst [vmem:[#allocation30_spill] sm:$0xff] %v13123_v10  ;;  %9851 = vmatmul.msk.bf16.gmra.mxu2 %vm5779_vm7, %v10213_v55  ;;  %v13143_v55 = vunpack.c.l.b16 %v6990_v40  ;;  %v7571_v40 = vrot.slane %v13151_v8, 5  ;;  %v7530_v2 = vsel %vm10906_vm9, %v9984_v46, %v7529_v43  ;;  %v8233_v58 = vshrl.u32 %v12919_v23, 16  ;;  %v13177_v46 = vld [vmem:[#allocation2 + $0x58] sm:$0xf] }
 0x3a1   : > { %9885 = vmatmul.msk.bf16.gmra.mxu3 %vm5779_vm7, %v13065_v14  ;;  %v8203_v14 = vrot.slane %v8202_v62, 4  ;;  %v7532_v62 = vrot.slane %v12835_v51, 5  ;;  %v8213_v63 = vrot.slane %v8212_v12, 4  ;;  %v7536_v43 = vrot.slane %v12843_v52, 5  ;;  %v8806_v10 = vld [vmem:[#allocation2 + $0x54] sm:$0xe] }
 0x3a2   : > { %v13145_v9 = vpop.f32.mrf.mxu1 }
 0x3a3   : > { %v6091_v45 = vpop.f32.mrf.mxu2  ;;  %v8208_v6 = vsel %vm10463_vm1, %v8203_v14, %v8207_v41  ;;  %v9990_v41 = vrot.slane %v7469_v35, 9  ;;  %v7641_v14 = vunpack.c.l.b16 %v7530_v2  ;;  %v13191_v2 = vld [vmem:[#allocation2 + $0x24] sm:$0xe] }
 0x3a4   : > { %v6092_v42 = vadd.f32 %v6091_v45, %v12770_v59  ;;  %v13148_v38 = vpop.f32.mrf.mxu3  ;;  %v7573_v45 = vrot.slane %v7571_v40, 4  ;;  %v13170_v51 = vpop.f32.mrf.mxu0  ;;  %v8226_v59 = vor.u32 %v8225_v22, %v8222_v18  ;;  %v13174_v12 = vunpack.c.l.b16 %v8208_v6 }
 0x3a5   : > { %9972 = vmatmul.msk.bf16.gmra.mxu1 %vm5779_vm7, %v7279_v13  ;;  %14514 = vst [vmem:[#allocation34_spill] sm:$0xff] %v13170_v51  ;;  %v7533_v13 = vsel %vm10906_vm9, %v7531_v37, %v7532_v62  ;;  %v7539_v37 = vrot.slane %v12873_v24, 5  ;;  %v7572_v18 = vsel %vm10906_vm9, %v9990_v41, %v7571_v40  ;;  %v10230_v62 = vld [vmem:[#allocation2 + $0xc0] sm:$0xff]  ;;  %v8235_v6 = vrot.slane %v8233_v58, 4 }
 0x3a6   : > { %v13157_v25 = vadd.f32 %v13087_v36, %v6092_v42  ;;  %v8217_v36 = vrot.slane %v8215_v39, 5  ;;  %v7574_v42 = vrot.slane %v13153_v15, 5  ;;  %v7642_v35 = vunpack.c.l.b16 %v7533_v13  ;;  %v13203_v13 = vld [vmem:[#allocation2 + $0x5c] sm:$0x1] }
 0x3a7   : > { %v7015_v24 = vshrl.u32 %v13151_v8, 16  ;;  %v8227_v54 = vrot.slane %v8226_v59, 4  ;;  %v8902_v40 = vrot.slane %v13177_v46, 5  ;;  %v8239_v58 = vshll.u32 %v12927_v49, 16  ;;  %v8153_v49 = vld [vmem:[#allocation2 + $0x30] sm:$0xf] }
 0x3a8   : > { %14513 = vst [vmem:[#allocation33_spill] sm:$0xff] %v13157_v25  ;;  %v7575_v23 = vsel %vm10906_vm9, %v7573_v45, %v7574_v42  ;;  %v8218_v51 = vsel %vm10463_vm1, %v8213_v63, %v8217_v36  ;;  %v6827_v42 = vld [vmem:[#allocation2 + $0x54] sm:$0xf]  ;;  %v7011_v63 = vshll.u32 %v13151_v8, 16  ;;  %v13209_v59 = vsel %vm10906_vm9, %v9985_v44, %v7536_v43 }
 0x3a9   : > { %v7654_v45 = vunpack.c.l.b16 %v7575_v23  ;;  %v13200_v41 = vunpack.c.l.b16 %v8218_v51  ;;  %v7653_v23 = vunpack.c.l.b16 %v7572_v18  ;;  %v8232_v8 = vsel %vm10463_vm1, %v8227_v54, %v8231_v5 }
 0x3aa   : > { %v13186_v22 = vpop.f32.mrf.mxu1  ;;  %v7002_v51 = vshrl.u32 %v6827_v42, 16  ;;  %v13216_v18 = vrot.slane %v7011_v63, 5  ;;  %v7017_v54 = vrot.slane %v7015_v24, 4  ;;  %v8905_v44 = vrot.slane %v13203_v13, 5 }
 0x3ab   : > { %v6093_v39 = vpop.f32.mrf.mxu2  ;;  %14515 = vst [vmem:[#allocation35_spill] sm:$0xff] %v13186_v22  ;;  %v13213_v25 = vpack.c.b16 %v7654_v45, %v7653_v23  ;;  %v8904_v22 = vrot.slane %v8902_v40, 4  ;;  %v7543_v24 = vrot.slane %v12883_v28, 5 }
 0x3ac   : > { %v6094_v52 = vadd.f32 %v6093_v39, %v12805_v20  ;;  %v13189_v11 = vpop.f32.mrf.mxu3  ;;  %v10214_v20 = vld [vmem:[#allocation2 + $0xb4] sm:$0xff] }
 0x3ad   : > { %v10231_v39 = vld [vmem:[#allocation2 + $0x18] sm:$0xff]  ;;  %14517 = vst [vmem:[#allocation37_spill] sm:$0xff] %v13213_v25  ;;  %v8906_v23 = vsel %vm10906_vm9, %v8904_v22, %v8905_v44  ;;  %v8247_v44 = vshll.u32 %v8153_v49, 16 }
 0x3ae   : > { %v13198_v36 = vadd.f32 %v13115_v57, %v6094_v52  ;;  %v9986_v57 = vrot.slane %v13191_v2, 9  ;;  %v7005_v52 = vshll.u32 %v6827_v42, 16  ;;  %v13221_v2 = vpack.c.b16 %v7642_v35, %v7641_v14 }
 0x3af   : > { %9966 = vmatmul.msk.bf16.gmra.mxu0 %vm5779_vm7, %v10230_v62  ;;  %v7538_v62 = vrot.slane %v7536_v43, 4  ;;  %v8613_v43 = vpack.c.b16 %v13200_v41, %v13174_v12  ;;  %v13228_v42 = vunpack.c.l.b16 %v8232_v8  ;;  %v10120_v8 = vrot.slane %v8806_v10, 9 }
 0x3b0   : > { %14516 = vst [vmem:[#allocation36_spill] sm:$0xff] %v13198_v36  ;;  %9852 = vmatmul.msk.bf16.gmra.mxu2 %vm5779_vm7, %v10214_v20  ;;  %v8236_v36 = vor.u32 %v8235_v6, %v8231_v5  ;;  %v13223_v20 = vrot.slane %v8239_v58, 5  ;;  %v7643_v5 = vunpack.c.l.b16 %v13209_v59  ;;  %v13226_v6 = vpop.f32.mrf.mxu0  ;;  %v13240_v58 = vld [vmem:[#allocation2 + $0x64] sm:$0xf]  ;;  %v7004_v59 = vrot.slane %v7002_v51, 4 }
 0x3b1   : > { %10082 = vmatmul.msk.bf16.vlgmr.msra.gmra.mxu3 %vm5779_vm7, %v10231_v39  ;;  %14518 = vst [vmem:[#allocation38_spill] sm:$0xff] %v13226_v6  ;;  %v7540_v63 = vsel %vm10906_vm9, %v7538_v62, %v7539_v37  ;;  %v8244_v39 = vshrl.u32 %v8153_v49, 16  ;;  %v7007_v6 = vrot.slane %v7005_v52, 5  ;;  %v7018_v37 = vor.u32 %v7017_v54, %v13216_v18  ;;  %v13243_v62 = vld [vmem:[#allocation2 + $0x68] sm:$0x1] }
 0x3b2   : > { %v13235_v12 = vpop.f32.mrf.mxu1  ;;  %v8237_v41 = vrot.slane %v8236_v36, 4  ;;  %v7578_v28 = vrot.slane %v13240_v58, 5  ;;  %v8903_v36 = vsel %vm10906_vm9, %v10120_v8, %v8902_v40  ;;  %v14521_v10 = vpack.c.b16 %v13139_v26, %v13143_v55 }
 0x3b3   : > { %v6096_v45 = vpop.f32.mrf.mxu2  ;;  %14519 = vst [vmem:[#allocation39_spill] sm:$0xff] %v13235_v12  ;;  %v7021_v51 = vshll.u32 %v13153_v15, 16  ;;  %v7644_v52 = vunpack.c.l.b16 %v7540_v63  ;;  %v8257_v54 = vshrl.u32 %v12980_v31, 16  ;;  %v8990_v25 = vunpack.c.l.b16 %v8906_v23 }
 0x3b4   : > { %v6097_v14 = vadd.f32 %v6096_v45, %v12832_v56  ;;  %v13238_v35 = vpop.f32.mrf.mxu3  ;;  %v8253_v56 = vshll.u32 %v12980_v31, 16  ;;  %v7470_v45 = vld [vmem:[#allocation2 + $0x60] sm:$0xe]  ;;  %v7545_v49 = vrot.slane %v7543_v24, 4  ;;  %v7008_v40 = vor.u32 %v7007_v6, %v7004_v59  ;;  %v13269_v31 = vld [vmem:[#allocation2 + $0x64] sm:$0xf] }
 0x3b5   : > { %9973 = vmatmul.msk.bf16.gmra.mxu1 %vm5779_vm7, %v14521_v10  ;;  %v7019_v8 = vrot.slane %v7018_v37, 4  ;;  %v9991_v12 = vrot.slane %v7470_v45, 9  ;;  %v8989_v26 = vunpack.c.l.b16 %v8903_v36  ;;  %v13263_v55 = vrot.slane %v8244_v39, 4 }
 0x3b6   : > { %v13247_v22 = vadd.f32 %v13148_v38, %v6097_v14  ;;  %v13260_v38 = vsel %vm10906_vm9, %v9986_v57, %v7543_v24  ;;  %v7580_v14 = vrot.slane %v7578_v28, 4  ;;  %v13265_v10 = vrot.slane %v8247_v44, 5 }
 0x3b7   : > { %v13267_v15 = vrot.slane %v8253_v56, 5  ;;  %v7023_v24 = vrot.slane %v7021_v51, 5  ;;  %v8259_v23 = vrot.slane %v8257_v54, 4  ;;  %v7579_v6 = vsel %vm10906_vm9, %v9991_v12, %v7578_v28  ;;  %v8156_v28 = vld [vmem:[#allocation2 + $0x3c] sm:$0xf] }
 0x3b8   : > { %14520 = vst [vmem:[#allocation40_spill] sm:$0xff] %v13247_v22  ;;  %v7581_v22 = vrot.slane %v13243_v62, 5  ;;  %v13275_v59 = vpack.c.b16 %v8990_v25, %v8989_v26  ;;  %v8242_v56 = vsel %vm10463_vm1, %v8237_v41, %v13223_v20  ;;  %v13285_v45 = vpack.c.b16 %v7644_v52, %v7643_v5  ;;  %v13287_v36 = vpop.f32.mrf.mxu0  ;;  %v6830_v20 = vld [vmem:[#allocation2 + $0x60] sm:$0xf] }
 0x3b9   : > { %14523 = vst [vmem:[#allocation42_spill] sm:$0xff] %v13287_v36  ;;  %v7009_v51 = vrot.slane %v7008_v40, 4  ;;  %v7024_v25 = vsel %vm10463_vm1, %v7019_v8, %v7023_v24  ;;  %v7546_v12 = vrot.slane %v12913_v1, 5  ;;  %v7035_v5 = vshll.u32 %v13240_v58, 16 }
 0x3ba   : > { %v7582_v57 = vsel %vm10906_vm9, %v7580_v14, %v7581_v22  ;;  %14522 = vst [vmem:[#allocation41_spill] sm:$0xff] %v13275_v59  ;;  %v13277_v37 = vpop.f32.mrf.mxu1  ;;  %v7039_v41 = vshrl.u32 %v13240_v58, 16  ;;  %v7655_v52 = vunpack.c.l.b16 %v7579_v6  ;;  %v10232_v14 = vld [vmem:[#allocation2 + $0x24] sm:$0xff]  ;;  %v13299_v40 = vunpack.c.l.b16 %v8242_v56 }
 0x3bb   : > { %v6098_v63 = vpop.f32.mrf.mxu2  ;;  %v7656_v22 = vunpack.c.l.b16 %v7582_v57  ;;  %v8250_v1 = vor.u32 %v13265_v10, %v13263_v55  ;;  %v8260_v8 = vor.u32 %v8259_v23, %v13267_v15  ;;  %v7014_v58 = vsel %vm10463_vm1, %v7009_v51, %v13216_v18 }
 0x3bc   : > { %v6099_v39 = vadd.f32 %v6098_v63, %v12853_v61  ;;  %v13280_v44 = vpop.f32.mrf.mxu3  ;;  %v14390_v61 = vrot.slane %v13269_v31, 5  ;;  %v8268_v26 = vshrl.u32 %v8156_v28, 16  ;;  %v8271_v57 = vshll.u32 %v8156_v28, 16 }
 0x3bd   : > { %v13315_v63 = vpack.c.b16 %v7656_v22, %v7655_v52  ;;  %v7256_v55 = vunpack.c.l.b16 %v7024_v25  ;;  %v7026_v10 = vshrl.u32 %v6830_v20, 16  ;;  %v7029_v24 = vshll.u32 %v6830_v20, 16 }
 0x3be   : > { %v13295_v54 = vadd.f32 %v13189_v11, %v6099_v39  ;;  %v13308_v11 = vld [vmem:[#allocation2 + $0x68] sm:$0x1]  ;;  %v13320_v23 = vrot.slane %v7035_v5, 5  ;;  %v7041_v6 = vrot.slane %v7039_v41, 4  ;;  %v7255_v56 = vunpack.c.l.b16 %v7014_v58  ;;  %v13333_v5 = vld [vmem:[#allocation2 + $0x70] sm:$0xf] }
 0x3bf   : > { %10099 = vmatmul.msk.bf16.vlgmr.msra.gmra.mxu0 %vm5779_vm7, %v8613_v43  ;;  %v13306_v43 = vsel %vm10906_vm9, %v7545_v49, %v7546_v12  ;;  %v8911_v49 = vrot.slane %v14390_v61, 4  ;;  %v8912_v39 = vrot.slane %v13308_v11, 5  ;;  %v13324_v51 = vrot.slane %v8260_v8, 4  ;;  %v13339_v61 = vld [vmem:[#allocation2 + $0x74] sm:$0x1] }
 0x3c0   : > { %14524 = vst [vmem:[#allocation43_spill] sm:$0xff] %v13295_v54  ;;  %10001 = vmatmul.msk.bf16.vlgmr.msra.gmra.mxu2 %vm5779_vm7, %v13221_v2  ;;  %v8263_v2 = vshll.u32 %v12994_v16, 16  ;;  %v8277_v22 = vshll.u32 %v13031_v33, 16  ;;  %v8281_v25 = vshrl.u32 %v13031_v33, 16  ;;  %v8270_v41 = vrot.slane %v8268_v26, 4 }
 0x3c1   : > { %10083 = vmatmul.msk.bf16.gmra.mxu3 %vm5779_vm7, %v10232_v14  ;;  %v8273_v16 = vrot.slane %v8271_v57, 5  ;;  %v13337_v52 = vsel %vm10906_vm9, %v8911_v49, %v8912_v39  ;;  %v7281_v14 = vpack.c.b16 %v7256_v55, %v7255_v56  ;;  %v7028_v8 = vrot.slane %v7026_v10, 4  ;;  %v13349_v49 = vpop.f32.mrf.mxu0  ;;  %v8807_v39 = vld [vmem:[#allocation2 + $0x60] sm:$0xe] }
 0x3c2   : > { %v13328_v12 = vpop.f32.mrf.mxu1  ;;  %v7031_v58 = vrot.slane %v7029_v24, 5  ;;  %v7585_v33 = vrot.slane %v13333_v5, 5  ;;  %v7042_v26 = vor.u32 %v7041_v6, %v13320_v23  ;;  %14526 = vst [vmem:[#allocation45_spill] sm:$0xff] %v13349_v49  ;;  %v13352_v55 = vrot.slane %v8263_v2, 5 }
 0x3c3   : > { %v6101_v18 = vpop.f32.mrf.mxu2  ;;  %v13355_v24 = vrot.slane %v8277_v22, 5  ;;  %v7045_v56 = vshll.u32 %v13243_v62, 16 }
 0x3c4   : > { %v6102_v28 = vadd.f32 %v6101_v18, %v12875_v34  ;;  %v13331_v20 = vpop.f32.mrf.mxu3  ;;  %v8614_v34 = vpack.c.b16 %v13299_v40, %v13228_v42  ;;  %v7471_v18 = vld [vmem:[#allocation2 + $0x6c] sm:$0xe]  ;;  %v13358_v42 = vrot.slane %v8250_v1, 4  ;;  %v8159_v40 = vld [vmem:[#allocation2 + $0x48] sm:$0xf]  ;;  %v7587_v6 = vrot.slane %v7585_v33, 4 }
 0x3c5   : > { %9974 = vmatmul.msk.bf16.gmra.mxu1 %vm5779_vm7, %v7281_v14  ;;  %v7032_v57 = vor.u32 %v7031_v58, %v7028_v8  ;;  %v8266_v2 = vsel %vm10463_vm1, %v13324_v51, %v13352_v55  ;;  %v8274_v14 = vor.u32 %v8273_v16, %v8270_v41  ;;  %v9992_v10 = vrot.slane %v7471_v18, 9  ;;  %v13369_v8 = vld [vmem:[#allocation2 + $0x70] sm:$0xf] }
 0x3c6   : > { %v13343_v59 = vadd.f32 %v13238_v35, %v6102_v28  ;;  %v8283_v35 = vrot.slane %v8281_v25, 4  ;;  %v7588_v28 = vrot.slane %v13339_v61, 5  ;;  %v7043_v22 = vrot.slane %v7042_v26, 4 }
 0x3c7   : > { %v8287_v25 = vshll.u32 %v13055_v53, 16  ;;  %v10121_v1 = vrot.slane %v8807_v39, 9  ;;  %v8292_v36 = vshrl.u32 %v8159_v40, 16  ;;  %v8295_v54 = vshll.u32 %v8159_v40, 16  ;;  %v6833_v39 = vld [vmem:[#allocation2 + $0x6c] sm:$0xf] }
 0x3c8   : > { %14525 = vst [vmem:[#allocation44_spill] sm:$0xff] %v13343_v59  ;;  %v7589_v62 = vsel %vm10906_vm9, %v7587_v6, %v7588_v28  ;;  %v8284_v59 = vor.u32 %v8283_v35, %v13355_v24  ;;  %v7586_v58 = vsel %vm10906_vm9, %v9992_v10, %v7585_v33  ;;  %v7047_v53 = vrot.slane %v7045_v56, 5  ;;  %v10233_v28 = vld [vmem:[#allocation2 + $0x30] sm:$0xff] }
 0x3c9   : > { %v7658_v26 = vunpack.c.l.b16 %v7589_v62  ;;  %v14527_v18 = vrot.slane %v13269_v31, 5  ;;  %v7033_v35 = vrot.slane %v7032_v57, 4  ;;  %v7059_v40 = vshll.u32 %v13333_v5, 16 }
 0x3ca   : > { %v13373_v51 = vpop.f32.mrf.mxu1  ;;  %v7063_v6 = vshrl.u32 %v13333_v5, 16  ;;  %v8992_v33 = vunpack.c.l.b16 %v13337_v52  ;;  %v7657_v10 = vunpack.c.l.b16 %v7586_v58  ;;  %v14391_v56 = vrot.slane %v13369_v8, 5  ;;  %v13401_v58 = vpop.f32.mrf.mxu0 }
 0x3cb   : > { %v6103_v49 = vpop.f32.mrf.mxu2  ;;  %v8910_v55 = vsel %vm10906_vm9, %v10121_v1, %v14527_v18  ;;  %v8275_v57 = vrot.slane %v8274_v14, 4  ;;  %v8285_v62 = vrot.slane %v8284_v59, 4  ;;  %v8289_v1 = vrot.slane %v8287_v25, 5  ;;  %v13392_v18 = vld [vmem:[#allocation2 + $0x74] sm:$0x1]  ;;  %14528 = vst [vmem:[#allocation46_spill] sm:$0xff] %v13401_v58 }
 0x3cc   : > { %v6104_v41 = vadd.f32 %v6103_v49, %v12898_v50  ;;  %v13376_v16 = vpop.f32.mrf.mxu3  ;;  %v7048_v49 = vsel %vm10463_vm1, %v7043_v22, %v7047_v53  ;;  %v8991_v5 = vunpack.c.l.b16 %v8910_v55  ;;  %v7050_v52 = vshrl.u32 %v6833_v39, 16 }
 0x3cd   : > { %v13399_v22 = vpack.c.b16 %v7658_v26, %v7657_v10  ;;  %v13404_v59 = vrot.slane %v7059_v40, 5  ;;  %v7065_v14 = vrot.slane %v7063_v6, 4  ;;  %v8294_v53 = vrot.slane %v8292_v36, 4 }
 0x3ce   : > { %v13387_v50 = vadd.f32 %v13280_v44, %v6104_v41  ;;  %v7038_v44 = vsel %vm10463_vm1, %v7033_v35, %v13320_v23  ;;  %v7258_v41 = vunpack.c.l.b16 %v7048_v49  ;;  %v13406_v25 = vpack.c.b16 %v8992_v33, %v8991_v5 }
 0x3cf   : > { %10100 = vmatmul.msk.bf16.gmra.mxu0 %vm5779_vm7, %v8614_v34  ;;  %v7053_v34 = vshll.u32 %v6833_v39, 16  ;;  %v8918_v55 = vrot.slane %v14391_v56, 4  ;;  %v8919_v23 = vrot.slane %v13392_v18, 5  ;;  %v7257_v26 = vunpack.c.l.b16 %v7038_v44 }
 0x3d0   : > { %10002 = vmatmul.msk.bf16.gmra.mxu2 %vm5779_vm7, %v13285_v45  ;;  %14529 = vst [vmem:[#allocation47_spill] sm:$0xff] %v13406_v25  ;;  %v8297_v45 = vrot.slane %v8295_v54, 5  ;;  %v8256_v39 = vsel %vm10463_vm1, %v13358_v42, %v13267_v15  ;;  %v8586_v49 = vunpack.c.l.b16 %v8266_v2  ;;  %v8290_v40 = vsel %vm10463_vm1, %v8285_v62, %v8289_v1  ;;  %v13432_v1 = vld [vmem:[#allocation2 + $0x80] sm:$0x1] }
 0x3d1   : > { %10084 = vmatmul.msk.bf16.gmra.mxu3 %vm5779_vm7, %v10233_v28  ;;  %v7052_v33 = vrot.slane %v7050_v52, 4  ;;  %v8280_v10 = vsel %vm10463_vm1, %v8275_v57, %v13355_v24  ;;  %v13425_v28 = vld [vmem:[#allocation2 + $0x7c] sm:$0xf]  ;;  %v13429_v15 = vsel %vm10906_vm9, %v8918_v55, %v8919_v23  ;;  %v7282_v42 = vpack.c.b16 %v7258_v41, %v7257_v26  ;;  %v13440_v57 = vld [vmem:[#allocation2 + $0x48] sm:$0xe] }
 0x3d2   : > { %v13417_v6 = vpop.f32.mrf.mxu1  ;;  %v7055_v2 = vrot.slane %v7053_v34, 5  ;;  %v7066_v62 = vor.u32 %v7065_v14, %v13404_v59  ;;  %v8585_v44 = vunpack.c.l.b16 %v8256_v39  ;;  %v13438_v52 = vunpack.c.l.b16 %v8290_v40  ;;  %v8808_v23 = vld [vmem:[#allocation2 + $0x6c] sm:$0xe] }
 0x3d3   : > { %v6106_v35 = vpop.f32.mrf.mxu2  ;;  %v8298_v24 = vor.u32 %v8297_v45, %v8294_v53  ;;  %v14531_v34 = vunpack.c.l.b16 %v13260_v38  ;;  %v14532_v41 = vunpack.c.l.b16 %v13306_v43  ;;  %v7069_v55 = vshll.u32 %v13339_v61, 16 }
 0x3d4   : > { %v6107_v36 = vadd.f32 %v6106_v35, %v12937_v4  ;;  %v13420_v54 = vpop.f32.mrf.mxu3  ;;  %v7592_v4 = vrot.slane %v13425_v28, 5  ;;  %v7472_v35 = vld [vmem:[#allocation2 + $0x78] sm:$0xe]  ;;  %v8615_v26 = vpack.c.b16 %v8586_v49, %v8585_v44  ;;  %v7595_v40 = vrot.slane %v13432_v1, 5  ;;  %v13458_v49 = vpop.f32.mrf.mxu0 }
 0x3d5   : > { %9975 = vmatmul.msk.bf16.gmra.mxu1 %vm5779_vm7, %v7282_v42  ;;  %v7675_v14 = vpack.c.b16 %v14532_v41, %v14531_v34  ;;  %v7056_v53 = vor.u32 %v7055_v2, %v7052_v33  ;;  %v7067_v45 = vrot.slane %v7066_v62, 4  ;;  %v9993_v56 = vrot.slane %v7472_v35, 9  ;;  %14533 = vst [vmem:[#allocation49_spill] sm:$0xff] %v13458_v49  ;;  %v13462_v2 = vld [vmem:[#allocation2 + $0x7c] sm:$0xf] }
 0x3d6   : > { %v13436_v5 = vadd.f32 %v13331_v20, %v6107_v36  ;;  %v13448_v20 = vunpack.c.l.b16 %v8280_v10  ;;  %v7594_v39 = vrot.slane %v7592_v4, 4  ;;  %v13454_v42 = vrot.slane %v8298_v24, 4  ;;  %v7473_v49 = vld [vmem:[#allocation2 + $0x84] sm:$0xe] }
 0x3d7   : > { %v10122_v43 = vrot.slane %v8808_v23, 9  ;;  %v7071_v44 = vrot.slane %v7069_v55, 5  ;;  %v8301_v34 = vshll.u32 %v13094_v29, 16  ;;  %v8305_v33 = vshrl.u32 %v13094_v29, 16 }
 0x3d8   : > { %14530 = vst [vmem:[#allocation48_spill] sm:$0xff] %v13436_v5  ;;  %v7596_v61 = vsel %vm10906_vm9, %v7594_v39, %v7595_v40  ;;  %v7593_v62 = vsel %vm10906_vm9, %v9993_v56, %v7592_v4  ;;  %v8311_v23 = vshll.u32 %v13103_v7, 16  ;;  %v14534_v55 = vrot.slane %v13369_v8, 5  ;;  %v6836_v7 = vld [vmem:[#allocation2 + $0x78] sm:$0xf] }
 0x3d9   : > { %v7660_v39 = vunpack.c.l.b16 %v7596_v61  ;;  %v7057_v29 = vrot.slane %v7056_v53, 4  ;;  %v7072_v38 = vsel %vm10463_vm1, %v7067_v45, %v7071_v44  ;;  %v7083_v56 = vshll.u32 %v13425_v28, 16  ;;  %v8162_v44 = vld [vmem:[#allocation2 + $0x54] sm:$0xf] }
 0x3da   : > { %v13466_v35 = vpop.f32.mrf.mxu1  ;;  %v8917_v40 = vsel %vm10906_vm9, %v10122_v43, %v14534_v55  ;;  %v8994_v4 = vunpack.c.l.b16 %v13429_v15  ;;  %v7087_v61 = vshrl.u32 %v13425_v28, 16  ;;  %v10234_v43 = vld [vmem:[#allocation2 + $0x3c] sm:$0xff]  ;;  %v13486_v53 = vrot.slane %v8301_v34, 5 }
 0x3db   : > { %v6108_v10 = vpop.f32.mrf.mxu2  ;;  %v7564_v45 = vrot.slane %v13053_v0, 5  ;;  %v13490_v55 = vld [vmem:[#allocation2 + $0x80] sm:$0x1]  ;;  %v8993_v15 = vunpack.c.l.b16 %v8917_v40  ;;  %v8307_v28 = vrot.slane %v8305_v33, 4  ;;  %v7260_v34 = vunpack.c.l.b16 %v7072_v38 }
 0x3dc   : > { %v6109_v24 = vadd.f32 %v6108_v10, %v12975_v21  ;;  %v13469_v41 = vpop.f32.mrf.mxu3  ;;  %v7659_v10 = vunpack.c.l.b16 %v7593_v62  ;;  %v7074_v0 = vshrl.u32 %v6836_v7, 16  ;;  %v13503_v40 = vrot.slane %v7083_v56, 5 }
 0x3dd   : > { %v13501_v36 = vpack.c.b16 %v8994_v4, %v8993_v15  ;;  %v14537_v25 = vrot.slane %v13462_v2, 5  ;;  %v6777_v33 = vadd.f32 %v12735_v27, %v12784_v32  ;;  %v13522_v27 = vpop.f32.mrf.mxu0 }
 0x3de   : > { %v13482_v21 = vadd.f32 %v13376_v16, %v6109_v24  ;;  %v7062_v16 = vsel %vm10463_vm1, %v7057_v29, %v13404_v59  ;;  %v13498_v62 = vpack.c.b16 %v7660_v39, %v7659_v10  ;;  %v7077_v24 = vshll.u32 %v6836_v7, 16  ;;  %v13516_v10 = vld [vmem:[#allocation2 + $0x88] sm:$0xf]  ;;  %14538 = vst [vmem:[#allocation52_spill] sm:$0xff] %v13522_v27 }
 0x3df   : > { %10101 = vmatmul.msk.bf16.gmra.mxu0 %vm5779_vm7, %v8615_v26  ;;  %v13496_v26 = vrot.slane %v8311_v23, 5  ;;  %14536 = vst [vmem:[#allocation51_spill] sm:$0xff] %v13501_v36  ;;  %v8926_v59 = vrot.slane %v13490_v55, 5  ;;  %v7259_v38 = vunpack.c.l.b16 %v7062_v16  ;;  %v8325_v39 = vshll.u32 %v13177_v46, 16  ;;  %v13530_v36 = vld [vmem:[#allocation2 + $0x8c] sm:$0x1] }
 0x3e0   : > { %14535 = vst [vmem:[#allocation50_spill] sm:$0xff] %v13482_v21  ;;  %10003 = vmatmul.msk.bf16.gmra.mxu2 %vm5779_vm7, %v7675_v14  ;;  %v7089_v14 = vrot.slane %v7087_v61, 4  ;;  %v8925_v21 = vrot.slane %v14537_v25, 4  ;;  %v8329_v29 = vshrl.u32 %v13177_v46, 16  ;;  %v8308_v61 = vor.u32 %v8307_v28, %v13486_v53 }
 0x3e1   : > { %10085 = vmatmul.msk.bf16.gmra.mxu3 %vm5779_vm7, %v10234_v43  ;;  %v8316_v25 = vshrl.u32 %v8162_v44, 16  ;;  %v7283_v15 = vpack.c.b16 %v7260_v34, %v7259_v38  ;;  %v7076_v46 = vrot.slane %v7074_v0, 4  ;;  %v8319_v16 = vshll.u32 %v8162_v44, 16  ;;  %v8809_v0 = vld [vmem:[#allocation2 + $0x78] sm:$0xe] }
 0x3e2   : > { %v7351_v7 = vpop.f32.mrf.mxu1  ;;  %v13520_v43 = vsel %vm10906_vm9, %v8925_v21, %v8926_v59  ;;  %v7090_v28 = vor.u32 %v7089_v14, %v13503_v40  ;;  %v7599_v5 = vrot.slane %v13516_v10, 5  ;;  %v13534_v21 = vrot.slane %v8325_v39, 5 }
 0x3e3   : > { %v6111_v23 = vpop.f32.mrf.mxu2  ;;  %v13524_v32 = vadd.f32 %v7351_v7, %v6777_v33  ;;  %v8331_v59 = vrot.slane %v8329_v29, 4  ;;  %v14540_v34 = vrot.slane %v13440_v57, 9  ;;  %v8304_v14 = vsel %vm10463_vm1, %v13454_v42, %v13486_v53 }
 0x3e4   : > { %v6112_v4 = vadd.f32 %v6111_v23, %v13014_v3  ;;  %v13513_v56 = vpop.f32.mrf.mxu3  ;;  %v7079_v23 = vrot.slane %v7077_v24, 5  ;;  %v7093_v24 = vshll.u32 %v13432_v1, 16  ;;  %v8309_v33 = vrot.slane %v8308_v61, 4 }
 0x3e5   : > { %9976 = vmatmul.msk.bf16.gmra.mxu1 %vm5779_vm7, %v7283_v15  ;;  %v13540_v44 = vsel %vm10906_vm9, %v14540_v34, %v7564_v45  ;;  %v7601_v38 = vrot.slane %v7599_v5, 4  ;;  %v8318_v39 = vrot.slane %v8316_v25, 4  ;;  %v8321_v7 = vrot.slane %v8319_v16, 5 }
 0x3e6   : > { %v13527_v3 = vadd.f32 %v13420_v54, %v6112_v4  ;;  %v7566_v54 = vrot.slane %v7564_v45, 4  ;;  %v9994_v29 = vrot.slane %v7473_v49, 9  ;;  %v7602_v57 = vrot.slane %v13530_v36, 5 }
 0x3e7   : > { %v7080_v4 = vor.u32 %v7079_v23, %v7076_v46  ;;  %v7091_v15 = vrot.slane %v7090_v28, 4  ;;  %v8335_v34 = vshll.u32 %v13203_v13, 16  ;;  %v10123_v45 = vrot.slane %v8809_v0, 9 }
 0x3e8   : > { %14539 = vst [vmem:[#allocation53_spill] sm:$0xff] %v13527_v3  ;;  %v14541_v3 = vld [vmem:[#allocation17_spill] sm:$0xff]  ;;  %v8332_v58 = vor.u32 %v8331_v59, %v13534_v21  ;;  %v7600_v42 = vsel %vm10906_vm9, %v9994_v29, %v7599_v5  ;;  %v7603_v53 = vsel %vm10906_vm9, %v7601_v38, %v7602_v57  ;;  %v7095_v46 = vrot.slane %v7093_v24, 5  ;;  %v13577_v38 = vpop.f32.mrf.mxu0 }
 0x3e9   : > { %v6778_v1 = vadd.f32 %v14541_v3, %v12820_v30  ;;  %v7662_v13 = vunpack.c.l.b16 %v7603_v53  ;;  %v14542_v16 = vrot.slane %v13462_v2, 5  ;;  %v7107_v23 = vshll.u32 %v13516_v10, 16  ;;  %14545 = vst [vmem:[#allocation54_spill] sm:$0xff] %v13577_v38  ;;  %v10235_v29 = vld [vmem:[#allocation2 + $0x48] sm:$0xff]  ;;  %v6842_v38 = vld [vmem:[#allocation2 + $0x90] sm:$0xf] }
 0x3ea   : > { %v7353_v49 = vpop.f32.mrf.mxu1  ;;  %v7111_v5 = vshrl.u32 %v13516_v10, 16  ;;  %v8996_v28 = vunpack.c.l.b16 %v13520_v43  ;;  %v7081_v59 = vrot.slane %v7080_v4, 4  ;;  %v7096_v0 = vsel %vm10463_vm1, %v7091_v15, %v7095_v46  ;;  %v6839_v10 = vld [vmem:[#allocation2 + $0x84] sm:$0xf]  ;;  %v14547_v4 = vld [vmem:[#allocation23_spill] sm:$0xff] }
 0x3eb   : > { %v6113_v27 = vpop.f32.mrf.mxu2  ;;  %v8924_v30 = vsel %vm10906_vm9, %v10123_v45, %v14542_v16  ;;  %v13563_v3 = vadd.f32 %v7353_v49, %v6778_v1  ;;  %v7661_v24 = vunpack.c.l.b16 %v7600_v42  ;;  %v13579_v57 = vunpack.c.l.b16 %v8304_v14  ;;  %v8165_v42 = vld [vmem:[#allocation2 + $0x60] sm:$0xf] }
 0x3ec   : > { %v6114_v61 = vadd.f32 %v6113_v27, %v13046_v19  ;;  %v13557_v25 = vpop.f32.mrf.mxu3  ;;  %v14543_v19 = vpack.c.b16 %v13438_v52, %v13448_v20  ;;  %v8322_v43 = vor.u32 %v8321_v7, %v8318_v39  ;;  %v14546_v45 = vrot.slane %v13099_v17, 5  ;;  %v13587_v20 = vld [vmem:[#allocation2 + $0x88] sm:$0xf]  ;;  %v14549_v16 = vld [vmem:[#allocation20_spill] sm:$0xff] }
 0x3ed   : > { %v7086_v15 = vsel %vm10463_vm1, %v7081_v59, %v13503_v40  ;;  %v8314_v14 = vsel %vm10463_vm1, %v8309_v33, %v13496_v26  ;;  %v8333_v39 = vrot.slane %v8332_v58, 4  ;;  %v13597_v17 = vpack.c.b16 %v7662_v13, %v7661_v24 }
 0x3ee   : > { %v13573_v27 = vadd.f32 %v13469_v41, %v6114_v61  ;;  %v13585_v52 = vsel %vm10906_vm9, %v7566_v54, %v14546_v45  ;;  %v8995_v41 = vunpack.c.l.b16 %v8924_v30  ;;  %v7262_v7 = vunpack.c.l.b16 %v7096_v0  ;;  %v14550_v30 = vld [vmem:[#allocation18_spill] sm:$0xff] }
 0x3ef   : > { %10102 = vmatmul.msk.bf16.gmra.mxu0 %vm5779_vm7, %v14543_v19  ;;  %v13600_v54 = vrot.slane %v7107_v23, 5  ;;  %v7113_v1 = vrot.slane %v7111_v5, 4  ;;  %v7098_v49 = vshrl.u32 %v6839_v10, 16  ;;  %v7101_v61 = vshll.u32 %v6839_v10, 16  ;;  %v14551_v23 = vld [vmem:[#allocation26_spill] sm:$0xff] }
 0x3f0   : > { %14544 = vst [vmem:[#allocation17_spill] sm:$0xff] %v13573_v27  ;;  %10004 = vmatmul.msk.bf16.gmra.mxu2 %vm5779_vm7, %v14547_v4  ;;  %v13602_v53 = vpack.c.b16 %v8996_v28, %v8995_v41  ;;  %v8337_v46 = vrot.slane %v8335_v34, 5  ;;  %v14392_v40 = vrot.slane %v13587_v20, 5  ;;  %v6779_v26 = vadd.f32 %v14550_v30, %v14549_v16  ;;  %v6843_v4 = vld [vmem:[#allocation2 + $0x94] sm:$0xf] }
 0x3f1   : > { %10086 = vmatmul.msk.bf16.gmra.mxu3 %vm5779_vm7, %v10235_v29  ;;  %v7261_v33 = vunpack.c.l.b16 %v7086_v15  ;;  %v8590_v13 = vunpack.c.l.b16 %v8314_v14  ;;  %v13607_v19 = vrot.slane %v8322_v43, 4  ;;  %v8340_v24 = vshrl.u32 %v8165_v42, 16  ;;  %v13614_v29 = vld [vmem:[#allocation2 + $0x8c] sm:$0x1] }
 0x3f2   : > { %14548 = vst [vmem:[#allocation23_spill] sm:$0xff] %v13602_v53  ;;  %v7356_v59 = vpop.f32.mrf.mxu1  ;;  %v8338_v28 = vsel %vm10463_vm1, %v8333_v39, %v8337_v46  ;;  %v8343_v34 = vshll.u32 %v8165_v42, 16  ;;  %v7114_v41 = vor.u32 %v7113_v1, %v13600_v54  ;;  %v8932_v43 = vrot.slane %v14392_v40, 4  ;;  %v7474_v1 = vld [vmem:[#allocation2 + $0x90] sm:$0xe]  ;;  %v14554_v46 = vld [vmem:[#allocation5_spill] sm:$0xff] }
 0x3f3   : > { %v6116_v58 = vpop.f32.mrf.mxu2  ;;  %v13616_v10 = vadd.f32 %v7356_v59, %v6779_v26  ;;  %v7284_v45 = vpack.c.b16 %v7262_v7, %v7261_v33  ;;  %v7100_v14 = vrot.slane %v7098_v49, 4  ;;  %v7103_v16 = vrot.slane %v7101_v61, 5  ;;  %v13637_v33 = vpop.f32.mrf.mxu0  ;;  %v13639_v59 = vld [vmem:[#allocation2 + $0x98] sm:$0x1] }
 0x3f4   : > { %v6117_v0 = vadd.f32 %v6116_v58, %v14551_v23  ;;  %v13610_v5 = vpop.f32.mrf.mxu3  ;;  %v8349_v39 = vshll.u32 %v13269_v31, 16  ;;  %v7117_v42 = vshll.u32 %v13530_v36, 16  ;;  %v8933_v30 = vrot.slane %v13614_v29, 5  ;;  %v8810_v58 = vld [vmem:[#allocation2 + $0x84] sm:$0xe]  ;;  %14553 = vst [vmem:[#allocation18_spill] sm:$0xff] %v13637_v33 }
 0x3f5   : > { %9977 = vmatmul.msk.bf16.gmra.mxu1 %vm5779_vm7, %v7284_v45  ;;  %v8617_v26 = vpack.c.b16 %v8590_v13, %v13579_v57  ;;  %v13635_v49 = vunpack.c.l.b16 %v8338_v28  ;;  %v7606_v61 = vrot.slane %v6843_v4, 5  ;;  %v7115_v36 = vrot.slane %v7114_v41, 4 }
 0x3f6   : > { %v13622_v15 = vadd.f32 %v13513_v56, %v6117_v0  ;;  %v13641_v23 = vrot.slane %v8340_v24, 4  ;;  %v8353_v0 = vshrl.u32 %v13269_v31, 16  ;;  %v8934_v57 = vsel %vm10906_vm9, %v8932_v43, %v8933_v30  ;;  %v14555_v56 = vld [vmem:[#allocation19_spill] sm:$0xff] }
 0x3f7   : > { %v7104_v13 = vor.u32 %v7103_v16, %v7100_v14  ;;  %v13646_v45 = vrot.slane %v8343_v34, 5  ;;  %v13648_v7 = vrot.slane %v8349_v39, 5  ;;  %v9995_v28 = vrot.slane %v7474_v1, 9 }
 0x3f8   : > { %14552 = vst [vmem:[#allocation20_spill] sm:$0xff] %v13622_v15  ;;  %v6780_v40 = vadd.f32 %v14555_v56, %v14554_v46  ;;  %v7119_v41 = vrot.slane %v7117_v42, 5  ;;  %v7608_v15 = vrot.slane %v7606_v61, 4  ;;  %v10124_v33 = vrot.slane %v8810_v58, 9  ;;  %v10236_v56 = vld [vmem:[#allocation2 + $0x54] sm:$0xff] }
 0x3f9   : > { %v7131_v43 = vshll.u32 %v6843_v4, 16  ;;  %v7607_v34 = vsel %vm10906_vm9, %v9995_v28, %v7606_v61  ;;  %v7609_v14 = vrot.slane %v13639_v59, 5  ;;  %v7135_v42 = vshrl.u32 %v6843_v4, 16  ;;  %v13674_v58 = vld [vmem:[#allocation2 + $0x94] sm:$0xf] }
 0x3fa   : > { %v7358_v24 = vpop.f32.mrf.mxu1  ;;  %v7120_v39 = vsel %vm10463_vm1, %v7115_v36, %v7119_v41  ;;  %v8355_v46 = vrot.slane %v8353_v0, 4  ;;  %v14557_v30 = vrot.slane %v13587_v20, 5  ;;  %v7122_v61 = vshrl.u32 %v6842_v38, 16 }
 0x3fb   : > { %v6118_v53 = vpop.f32.mrf.mxu2  ;;  %v13658_v16 = vadd.f32 %v7358_v24, %v6780_v40  ;;  %v7610_v1 = vsel %vm10906_vm9, %v7608_v15, %v7609_v14  ;;  %v8346_v4 = vor.u32 %v13646_v45, %v13641_v23  ;;  %v7264_v0 = vunpack.c.l.b16 %v7120_v39  ;;  %v13684_v23 = vld [vmem:[#allocation2 + $0x98] sm:$0x1]  ;;  %v13691_v39 = vpop.f32.mrf.mxu0 }
 0x3fc   : > { %v6119_v27 = vadd.f32 %v6118_v53, %v13112_v60  ;;  %v13653_v31 = vpop.f32.mrf.mxu3  ;;  %v7105_v53 = vrot.slane %v7104_v13, 4  ;;  %v8931_v40 = vsel %vm10906_vm9, %v10124_v33, %v14557_v30  ;;  %v7664_v36 = vunpack.c.l.b16 %v7610_v1  ;;  %14559 = vst [vmem:[#allocation5_spill] sm:$0xff] %v13691_v39 }
 0x3fd   : > { %v7125_v13 = vshll.u32 %v6842_v38, 16  ;;  %v13681_v33 = vrot.slane %v7131_v43, 5  ;;  %v7137_v28 = vrot.slane %v7135_v42, 4  ;;  %v8997_v41 = vunpack.c.l.b16 %v8931_v40  ;;  %v14560_v38 = vld [vmem:[#allocation3_spill] sm:$0xff]  ;;  %v14561_v43 = vld [vmem:[#allocation21_spill] sm:$0xff] }
 0x3fe   : > { %v13664_v60 = vadd.f32 %v13557_v25, %v6119_v27  ;;  %v8811_v25 = vld [vmem:[#allocation2 + $0x90] sm:$0xe]  ;;  %v14558_v27 = vld [vmem:[#allocation25_spill] sm:$0xff]  ;;  %v7110_v15 = vsel %vm10463_vm1, %v7105_v53, %v13600_v54  ;;  %v8998_v24 = vunpack.c.l.b16 %v8934_v57  ;;  %v8359_v14 = vshll.u32 %v13308_v11, 16 }
 0x3ff   : > { %10103 = vmatmul.msk.bf16.gmra.mxu0 %vm5779_vm7, %v8617_v26  ;;  %v7663_v26 = vunpack.c.l.b16 %v7607_v34  ;;  %v8356_v34 = vor.u32 %v8355_v46, %v13648_v7  ;;  %v10125_v1 = vrot.slane %v8811_v25, 9  ;;  %v8937_v54 = vrot.slane %v13674_v58, 5 }
 0x400   : > { %14556 = vst [vmem:[#allocation26_spill] sm:$0xff] %v13664_v60  ;;  %10005 = vmatmul.msk.bf16.gmra.mxu2 %vm5779_vm7, %v14558_v27  ;;  %v6781_v53 = vadd.f32 %v14561_v43, %v14560_v38  ;;  %v7263_v42 = vunpack.c.l.b16 %v7110_v15  ;;  %v8168_v27 = vld [vmem:[#allocation2 + $0x6c] sm:$0xf]  ;;  %v8940_v25 = vrot.slane %v13684_v23, 5  ;;  %v7127_v43 = vrot.slane %v7125_v13, 5 }
 0x401   : > { %10087 = vmatmul.msk.bf16.gmra.mxu3 %vm5779_vm7, %v10236_v56  ;;  %v13686_v45 = vpack.c.b16 %v7664_v36, %v7663_v26  ;;  %v7124_v56 = vrot.slane %v7122_v61, 4  ;;  %v13695_v26 = vpack.c.b16 %v8998_v24, %v8997_v41  ;;  %v8938_v11 = vsel %vm10906_vm9, %v10125_v1, %v8937_v54  ;;  %v13706_v15 = vld [vmem:[#allocation2 + $0xa0] sm:$0xf] }
 0x402   : > { %v7361_v40 = vpop.f32.mrf.mxu1  ;;  %v8939_v36 = vrot.slane %v8937_v54, 4  ;;  %v7285_v38 = vpack.c.b16 %v7264_v0, %v7263_v42  ;;  %v7138_v61 = vor.u32 %v7137_v28, %v13681_v33  ;;  %v8364_v24 = vshrl.u32 %v8168_v27, 16 }
 0x403   : > { %v6121_v30 = vpop.f32.mrf.mxu2  ;;  %14562 = vst [vmem:[#allocation19_spill] sm:$0xff] %v13695_v26  ;;  %v13703_v60 = vadd.f32 %v7361_v40, %v6781_v53  ;;  %v7141_v1 = vshll.u32 %v13639_v59, 16  ;;  %v8367_v54 = vshll.u32 %v8168_v27, 16  ;;  %v8999_v53 = vunpack.c.l.b16 %v8938_v11  ;;  %v7475_v27 = vld [vmem:[#allocation2 + $0x9c] sm:$0xe] }
 0x404   : > { %v6122_v57 = vadd.f32 %v6121_v30, %v13145_v9  ;;  %v13698_v46 = vpop.f32.mrf.mxu3  ;;  %v8357_v9 = vrot.slane %v8356_v34, 4  ;;  %v8941_v30 = vsel %vm10906_vm9, %v8939_v36, %v8940_v25  ;;  %v14564_v13 = vsel %vm10463_vm1, %v13607_v19, %v13534_v21 }
 0x405   : > { %9978 = vmatmul.msk.bf16.gmra.mxu1 %vm5779_vm7, %v7285_v38  ;;  %v9000_v0 = vunpack.c.l.b16 %v8941_v30  ;;  %v8591_v28 = vunpack.c.l.b16 %v14564_v13  ;;  %v8361_v42 = vrot.slane %v8359_v14, 5  ;;  %v7613_v34 = vrot.slane %v13706_v15, 5  ;;  %v14569_v14 = vld [vmem:[#allocation4_spill] sm:$0xff] }
 0x406   : > { %v13709_v41 = vadd.f32 %v13610_v5, %v6122_v57  ;;  %v8347_v5 = vrot.slane %v8346_v4, 4  ;;  %v14565_v40 = vunpack.c.l.b16 %v13540_v44  ;;  %v14566_v57 = vunpack.c.l.b16 %v13585_v52  ;;  %v13733_v4 = vld [vmem:[#allocation2 + $0xa4] sm:$0x1] }
 0x407   : > { %v7128_v25 = vor.u32 %v7127_v43, %v7124_v56  ;;  %v7139_v59 = vrot.slane %v7138_v61, 4  ;;  %v13725_v11 = vpack.c.b16 %v9000_v0, %v8999_v53  ;;  %v8618_v38 = vpack.c.b16 %v13635_v49, %v8591_v28  ;;  %v14568_v52 = vld [vmem:[#allocation8_spill] sm:$0xff]  ;;  %v14570_v0 = vld [vmem:[#allocation35_spill] sm:$0xff] }
 0x408   : > { %14563 = vst [vmem:[#allocation25_spill] sm:$0xff] %v13709_v41  ;;  %v7678_v36 = vpack.c.b16 %v14566_v57, %v14565_v40  ;;  %v8352_v21 = vsel %vm10463_vm1, %v8347_v5, %v13648_v7  ;;  %v8362_v19 = vsel %vm10463_vm1, %v8357_v9, %v8361_v42  ;;  %v13735_v44 = vrot.slane %v8364_v24, 4  ;;  %v13751_v57 = vpop.f32.mrf.mxu0 }
 0x409   : > { %14567 = vst [vmem:[#allocation3_spill] sm:$0xff] %v13725_v11  ;;  %v6782_v56 = vadd.f32 %v14569_v14, %v14568_v52  ;;  %v7143_v61 = vrot.slane %v7141_v1, 5  ;;  %v13739_v30 = vrot.slane %v8367_v54, 5  ;;  %v7615_v53 = vrot.slane %v7613_v34, 4  ;;  %v6845_v1 = vld [vmem:[#allocation2 + $0x9c] sm:$0xf] }
 0x40a   : > { %v7363_v49 = vpop.f32.mrf.mxu1  ;;  %v8373_v7 = vshll.u32 %v13369_v8, 16  ;;  %v8377_v9 = vshrl.u32 %v13369_v8, 16  ;;  %v9996_v5 = vrot.slane %v7475_v27, 9  ;;  %v7129_v42 = vrot.slane %v7128_v25, 4  ;;  %14571 = vst [vmem:[#allocation21_spill] sm:$0xff] %v13751_v57  ;;  %v10237_v27 = vld [vmem:[#allocation2 + $0x60] sm:$0xff] }
 0x40b   : > { %v6123_v43 = vpop.f32.mrf.mxu2  ;;  %v13746_v24 = vadd.f32 %v7363_v49, %v6782_v56  ;;  %v7144_v40 = vsel %vm10463_vm1, %v7139_v59, %v7143_v61  ;;  %v7616_v54 = vrot.slane %v13733_v4, 5  ;;  %v7155_v14 = vshll.u32 %v13706_v15, 16  ;;  %v13767_v61 = vld [vmem:[#allocation2 + $0xa0] sm:$0xf]  ;;  %v14573_v11 = vld [vmem:[#allocation9_spill] sm:$0xff] }
 0x40c   : > { %v6124_v13 = vadd.f32 %v6123_v43, %v14570_v0  ;;  %v13742_v28 = vpop.f32.mrf.mxu3  ;;  %v7159_v8 = vshrl.u32 %v13706_v15, 16  ;;  %v7614_v25 = vsel %vm10906_vm9, %v9996_v5, %v7613_v34  ;;  %v13761_v56 = vunpack.c.l.b16 %v8352_v21 }
 0x40d   : > { %v13763_v59 = vunpack.c.l.b16 %v8362_v19  ;;  %v8370_v43 = vor.u32 %v13739_v30, %v13735_v44  ;;  %v7134_v15 = vsel %vm10463_vm1, %v7129_v42, %v13681_v33  ;;  %v7146_v34 = vshrl.u32 %v6845_v1, 16  ;;  %v13778_v30 = vld [vmem:[#allocation2 + $0xa4] sm:$0x1]  ;;  %v14574_v33 = vld [vmem:[#allocation7_spill] sm:$0xff] }
 0x40e   : > { %v13755_v52 = vadd.f32 %v13653_v31, %v6124_v13  ;;  %v7617_v31 = vsel %vm10906_vm9, %v7615_v53, %v7616_v54  ;;  %v13775_v21 = vrot.slane %v8373_v7, 5  ;;  %v8379_v19 = vrot.slane %v8377_v9, 4 }
 0x40f   : > { %10104 = vmatmul.msk.bf16.gmra.mxu0 %vm5779_vm7, %v8618_v38  ;;  %v8812_v38 = vld [vmem:[#allocation2 + $0x9c] sm:$0xe]  ;;  %v7266_v49 = vunpack.c.l.b16 %v7144_v40  ;;  %v7149_v44 = vshll.u32 %v6845_v1, 16  ;;  %v7665_v0 = vunpack.c.l.b16 %v7614_v25  ;;  %v7666_v13 = vunpack.c.l.b16 %v7617_v31 }
 0x410   : > { %14572 = vst [vmem:[#allocation8_spill] sm:$0xff] %v13755_v52  ;;  %10006 = vmatmul.msk.bf16.gmra.mxu2 %vm5779_vm7, %v7678_v36  ;;  %v13780_v53 = vrot.slane %v7155_v14, 5  ;;  %v7161_v5 = vrot.slane %v7159_v8, 4  ;;  %v10126_v36 = vrot.slane %v8812_v38, 9  ;;  %v8944_v54 = vrot.slane %v13767_v61, 5 }
 0x411   : > { %10088 = vmatmul.msk.bf16.gmra.mxu3 %vm5779_vm7, %v10237_v27  ;;  %v6783_v42 = vadd.f32 %v14574_v33, %v14573_v11  ;;  %v7265_v26 = vunpack.c.l.b16 %v7134_v15  ;;  %v8383_v9 = vshll.u32 %v13392_v18, 16  ;;  %v13786_v40 = vpack.c.b16 %v7666_v13, %v7665_v0  ;;  %v14575_v27 = vld [vmem:[#allocation39_spill] sm:$0xff]  ;;  %v6849_v18 = vld [vmem:[#allocation2 + $0xac] sm:$0xf] }
 0x412   : > { %v7366_v1 = vpop.f32.mrf.mxu1  ;;  %v8945_v14 = vsel %vm10906_vm9, %v10126_v36, %v8944_v54  ;;  %v8946_v8 = vrot.slane %v8944_v54, 4  ;;  %v8947_v31 = vrot.slane %v13778_v30, 5  ;;  %v7148_v33 = vrot.slane %v7146_v34, 4  ;;  %v8171_v54 = vld [vmem:[#allocation2 + $0x78] sm:$0xf]  ;;  %v13805_v34 = vpop.f32.mrf.mxu0 }
 0x413   : > { %v6126_v7 = vpop.f32.mrf.mxu2  ;;  %v13794_v38 = vadd.f32 %v7366_v1, %v6783_v42  ;;  %v7286_v11 = vpack.c.b16 %v7266_v49, %v7265_v26  ;;  %v8380_v15 = vor.u32 %v8379_v19, %v13775_v21  ;;  %v7151_v13 = vrot.slane %v7149_v44, 5  ;;  %14577 = vst [vmem:[#allocation35_spill] sm:$0xff] %v13805_v34  ;;  %v7476_v1 = vld [vmem:[#allocation2 + $0xa8] sm:$0xe]  ;;  %v14580_v34 = vld [vmem:[#allocation6_spill] sm:$0xff] }
 0x414   : > { %v6127_v52 = vadd.f32 %v6126_v7, %v14575_v27  ;;  %v13789_v25 = vpop.f32.mrf.mxu3  ;;  %v7162_v7 = vor.u32 %v7161_v5, %v13780_v53  ;;  %v8948_v27 = vsel %vm10906_vm9, %v8946_v8, %v8947_v31  ;;  %v7165_v36 = vshll.u32 %v13733_v4, 16 }
 0x415   : > { %9979 = vmatmul.msk.bf16.gmra.mxu1 %vm5779_vm7, %v7286_v11  ;;  %v9001_v42 = vunpack.c.l.b16 %v8945_v14  ;;  %v9002_v26 = vunpack.c.l.b16 %v8948_v27  ;;  %v8619_v19 = vpack.c.b16 %v13763_v59, %v13761_v56  ;;  %v8385_v49 = vrot.slane %v8383_v9, 5  ;;  %v13815_v11 = vld [vmem:[#allocation2 + $0xb0] sm:$0x1] }
 0x416   : > { %v13798_v0 = vadd.f32 %v13698_v46, %v6127_v52  ;;  %v13809_v46 = vrot.slane %v8370_v43, 4  ;;  %v7620_v52 = vrot.slane %v6849_v18, 5  ;;  %v8397_v44 = vshll.u32 %v13462_v2, 16 }
 0x417   : > { %v8401_v5 = vshrl.u32 %v13462_v2, 16  ;;  %v13813_v8 = vpack.c.b16 %v9002_v26, %v9001_v42  ;;  %v7152_v4 = vor.u32 %v7151_v13, %v7148_v33  ;;  %v7163_v31 = vrot.slane %v7162_v7, 4  ;;  %v6848_v42 = vld [vmem:[#allocation2 + $0xa8] sm:$0xf] }
 0x418   : > { %14576 = vst [vmem:[#allocation4_spill] sm:$0xff] %v13798_v0  ;;  %v8381_v14 = vrot.slane %v8380_v15, 4  ;;  %v8388_v27 = vshrl.u32 %v8171_v54, 16  ;;  %v14579_v0 = vld [vmem:[#allocation12_spill] sm:$0xff]  ;;  %v7167_v43 = vrot.slane %v7165_v36, 5  ;;  %v8391_v41 = vshll.u32 %v8171_v54, 16 }
 0x419   : > { %14578 = vst [vmem:[#allocation9_spill] sm:$0xff] %v13813_v8  ;;  %v6784_v56 = vadd.f32 %v14580_v34, %v14579_v0  ;;  %v7622_v9 = vrot.slane %v7620_v52, 4  ;;  %v7179_v26 = vshll.u32 %v6849_v18, 16  ;;  %v7183_v33 = vshrl.u32 %v6849_v18, 16  ;;  %v10238_v34 = vld [vmem:[#allocation2 + $0x6c] sm:$0xff] }
 0x41a   : > { %v7368_v57 = vpop.f32.mrf.mxu1  ;;  %v9997_v13 = vrot.slane %v7476_v1, 9  ;;  %v13824_v7 = vrot.slane %v8397_v44, 5  ;;  %v8403_v8 = vrot.slane %v8401_v5, 4  ;;  %v7623_v0 = vrot.slane %v13815_v11, 5 }
 0x41b   : > { %v6128_v59 = vpop.f32.mrf.mxu2  ;;  %v13822_v15 = vadd.f32 %v7368_v57, %v6784_v56  ;;  %v7153_v54 = vrot.slane %v7152_v4, 4  ;;  %v7170_v57 = vshrl.u32 %v6848_v42, 16  ;;  %v7173_v1 = vshll.u32 %v6848_v42, 16  ;;  %v13835_v56 = vld [vmem:[#allocation2 + $0xac] sm:$0xf]  ;;  %v14583_v42 = vld [vmem:[#allocation14_spill] sm:$0xff] }
 0x41c   : > { %v6129_v39 = vadd.f32 %v6128_v59, %v13277_v37  ;;  %v13820_v2 = vpop.f32.mrf.mxu3  ;;  %v7168_v37 = vsel %vm10463_vm1, %v7163_v31, %v7167_v43  ;;  %v7621_v18 = vsel %vm10906_vm9, %v9997_v13, %v7620_v52  ;;  %v8390_v44 = vrot.slane %v8388_v27, 4  ;;  %v14584_v13 = vld [vmem:[#allocation22_spill] sm:$0xff] }
 0x41d   : > { %v7624_v5 = vsel %vm10906_vm9, %v7622_v9, %v7623_v0  ;;  %v7185_v4 = vrot.slane %v7183_v33, 4  ;;  %v8393_v52 = vrot.slane %v8391_v41, 5  ;;  %v7268_v31 = vunpack.c.l.b16 %v7168_v37  ;;  %v13849_v9 = vpop.f32.mrf.mxu0 }
 0x41e   : > { %v13829_v36 = vadd.f32 %v13742_v28, %v6129_v39  ;;  %v7158_v39 = vsel %vm10463_vm1, %v7153_v54, %v13780_v53  ;;  %v13844_v28 = vrot.slane %v7179_v26, 5  ;;  %v8386_v27 = vsel %vm10463_vm1, %v8381_v14, %v8385_v49 }
 0x41f   : > { %10105 = vmatmul.msk.bf16.gmra.mxu0 %vm5779_vm7, %v8619_v19  ;;  %v14582_v19 = vld [vmem:[#allocation37_spill] sm:$0xff]  ;;  %v7667_v59 = vunpack.c.l.b16 %v7621_v18  ;;  %v7668_v43 = vunpack.c.l.b16 %v7624_v5  ;;  %v6785_v0 = vadd.f32 %v14584_v13, %v14583_v42  ;;  %v8376_v53 = vsel %vm10463_vm1, %v13809_v46, %v13775_v21  ;;  %v13865_v21 = vld [vmem:[#allocation2 + $0xb0] sm:$0x1] }
 0x420   : > { %14581 = vst [vmem:[#allocation7_spill] sm:$0xff] %v13829_v36  ;;  %10007 = vmatmul.msk.bf16.gmra.mxu2 %vm5779_vm7, %v14582_v19  ;;  %v8404_v41 = vor.u32 %v8403_v8, %v13824_v7  ;;  %v8951_v26 = vrot.slane %v13835_v56, 5  ;;  %v7267_v54 = vunpack.c.l.b16 %v7158_v39  ;;  %v7172_v37 = vrot.slane %v7170_v57, 4  ;;  %v6852_v57 = vld [vmem:[#allocation2 + $0xb8] sm:$0xf] }
 0x421   : > { %10089 = vmatmul.msk.bf16.gmra.mxu3 %vm5779_vm7, %v10238_v34  ;;  %v7175_v49 = vrot.slane %v7173_v1, 5  ;;  %v13859_v14 = vpack.c.b16 %v7668_v43, %v7667_v59  ;;  %v8596_v19 = vunpack.c.l.b16 %v8386_v27  ;;  %v7186_v42 = vor.u32 %v7185_v4, %v13844_v28 }
 0x422   : > { %v7371_v18 = vpop.f32.mrf.mxu1  ;;  %v8394_v13 = vor.u32 %v8393_v52, %v8390_v44  ;;  %v7287_v8 = vpack.c.b16 %v7268_v31, %v7267_v54  ;;  %v8407_v39 = vshll.u32 %v13490_v55, 16  ;;  %v8953_v1 = vrot.slane %v8951_v26, 4  ;;  %v8174_v44 = vld [vmem:[#allocation2 + $0x84] sm:$0xf]  ;;  %v8813_v52 = vld [vmem:[#allocation2 + $0xa8] sm:$0xe] }
 0x423   : > { %v6131_v33 = vpop.f32.mrf.mxu2  ;;  %v13867_v46 = vadd.f32 %v7371_v18, %v6785_v0  ;;  %v8595_v27 = vunpack.c.l.b16 %v8376_v53  ;;  %v7176_v43 = vor.u32 %v7175_v49, %v7172_v37  ;;  %v13875_v4 = vrot.slane %v8404_v41, 4  ;;  %v13888_v41 = vld [vmem:[#allocation2 + $0xbc] sm:$0x1] }
 0x424   : > { %v6132_v34 = vadd.f32 %v6131_v33, %v13328_v12  ;;  %v13862_v5 = vpop.f32.mrf.mxu3  ;;  %v7189_v12 = vshll.u32 %v13815_v11, 16  ;;  %v8954_v0 = vrot.slane %v13865_v21, 5  ;;  %v7187_v31 = vrot.slane %v7186_v42, 4  ;;  %v14587_v42 = vld [vmem:[#allocation16_spill] sm:$0xff] }
 0x425   : > { %14585 = vst [vmem:[#allocation39_spill] sm:$0xff] %v13867_v46  ;;  %9980 = vmatmul.msk.bf16.gmra.mxu1 %vm5779_vm7, %v7287_v8  ;;  %v13878_v33 = vrot.slane %v8394_v13, 4  ;;  %v7627_v55 = vrot.slane %v6852_v57, 5  ;;  %v8620_v54 = vpack.c.b16 %v8596_v19, %v8595_v27  ;;  %v13880_v18 = vrot.slane %v8407_v39, 5  ;;  %v14588_v13 = vld [vmem:[#allocation24_spill] sm:$0xff]  ;;  %v13896_v27 = vpop.f32.mrf.mxu0 }
 0x426   : > { %v13871_v59 = vadd.f32 %v13789_v25, %v6132_v34  ;;  %v7477_v25 = vld [vmem:[#allocation2 + $0xb4] sm:$0xe]  ;;  %v8955_v11 = vsel %vm10906_vm9, %v8953_v1, %v8954_v0  ;;  %v7191_v34 = vrot.slane %v7189_v12, 5  ;;  %v8412_v37 = vshrl.u32 %v8174_v44, 16  ;;  %14589 = vst [vmem:[#allocation6_spill] sm:$0xff] %v13896_v27 }
 0x427   : > { %v10127_v49 = vrot.slane %v8813_v52, 9  ;;  %v6786_v8 = vadd.f32 %v14588_v13, %v14587_v42  ;;  %v7177_v39 = vrot.slane %v7176_v43, 4  ;;  %v8410_v1 = vsel %vm10463_vm1, %v13875_v4, %v13880_v18 }
 0x428   : > { %14586 = vst [vmem:[#allocation12_spill] sm:$0xff] %v13871_v59  ;;  %v7629_v12 = vrot.slane %v7627_v55, 4  ;;  %v7192_v46 = vsel %vm10463_vm1, %v7187_v31, %v7191_v34  ;;  %v9998_v52 = vrot.slane %v7477_v25, 9  ;;  %v6851_v59 = vld [vmem:[#allocation2 + $0xb4] sm:$0xf]  ;;  %v7203_v36 = vshll.u32 %v6852_v57, 16 }
 0x429   : > { %v8952_v42 = vsel %vm10906_vm9, %v10127_v49, %v8951_v26  ;;  %v7207_v4 = vshrl.u32 %v6852_v57, 16  ;;  %v7630_v18 = vrot.slane %v13888_v41, 5  ;;  %v8421_v31 = vshll.u32 %v13587_v20, 16  ;;  %v10239_v34 = vld [vmem:[#allocation2 + $0x78] sm:$0xff] }
 0x42a   : > { %v7373_v0 = vpop.f32.mrf.mxu1  ;;  %v7628_v26 = vsel %vm10906_vm9, %v9998_v52, %v7627_v55  ;;  %v7182_v25 = vsel %vm10463_vm1, %v7177_v39, %v13844_v28  ;;  %v8425_v57 = vshrl.u32 %v13587_v20, 16  ;;  %v13924_v55 = vrot.slane %v7203_v36, 5  ;;  %v13926_v28 = vld [vmem:[#allocation2 + $0xb8] sm:$0xf] }
 0x42b   : > { %v6133_v19 = vpop.f32.mrf.mxu2  ;;  %v13903_v13 = vadd.f32 %v7373_v0, %v6786_v8  ;;  %v7631_v49 = vsel %vm10906_vm9, %v7629_v12, %v7630_v18  ;;  %v9003_v8 = vunpack.c.l.b16 %v8952_v42  ;;  %v7209_v0 = vrot.slane %v7207_v4, 4 }
 0x42c   : > { %v6134_v53 = vadd.f32 %v6133_v19, %v13373_v51  ;;  %v13905_v43 = vpop.f32.mrf.mxu3  ;;  %v8415_v19 = vshll.u32 %v8174_v44, 16  ;;  %v7194_v44 = vshrl.u32 %v6851_v59, 16  ;;  %v7669_v39 = vunpack.c.l.b16 %v7628_v26 }
 0x42d   : > { %14590 = vst [vmem:[#allocation37_spill] sm:$0xff] %v13903_v13  ;;  %v7670_v20 = vunpack.c.l.b16 %v7631_v49  ;;  %v8414_v52 = vrot.slane %v8412_v37, 4  ;;  %v13928_v12 = vrot.slane %v8421_v31, 5  ;;  %v7269_v42 = vunpack.c.l.b16 %v7182_v25  ;;  %v13937_v49 = vld [vmem:[#allocation2 + $0xbc] sm:$0x1]  ;;  %v13945_v25 = vpop.f32.mrf.mxu0 }
 0x42e   : > { %v13910_v51 = vadd.f32 %v13820_v2, %v6134_v53  ;;  %v7270_v2 = vunpack.c.l.b16 %v7192_v46  ;;  %v7197_v53 = vshll.u32 %v6851_v59, 16  ;;  %v8417_v13 = vrot.slane %v8415_v19, 5  ;;  %v14594_v46 = vld [vmem:[#allocation15_spill] sm:$0xff] }
 0x42f   : > { %10106 = vmatmul.msk.bf16.gmra.mxu0 %vm5779_vm7, %v8620_v54  ;;  %v9004_v54 = vunpack.c.l.b16 %v8955_v11  ;;  %v7196_v27 = vrot.slane %v7194_v44, 4  ;;  %v8958_v37 = vrot.slane %v13926_v28, 5  ;;  %v8431_v44 = vshll.u32 %v13614_v29, 16 }
 0x430   : > { %14591 = vst [vmem:[#allocation14_spill] sm:$0xff] %v13910_v51  ;;  %10008 = vmatmul.msk.bf16.gmra.mxu2 %vm5779_vm7, %v13315_v63  ;;  %v14593_v63 = vld [vmem:[#allocation29_spill] sm:$0xff]  ;;  %v8427_v51 = vrot.slane %v8425_v57, 4  ;;  %v7199_v26 = vrot.slane %v7197_v53, 5  ;;  %v7288_v31 = vpack.c.b16 %v7270_v2, %v7269_v42  ;;  %v7478_v53 = vld [vmem:[#allocation2 + $0xc0] sm:$0xe] }
 0x431   : > { %10090 = vmatmul.msk.bf16.gmra.mxu3 %vm5779_vm7, %v10239_v34  ;;  %v13930_v11 = vpack.c.b16 %v9004_v54, %v9003_v8  ;;  %v6787_v18 = vadd.f32 %v14594_v46, %v14593_v63  ;;  %v13934_v34 = vpack.c.b16 %v7670_v20, %v7669_v39  ;;  %v8598_v54 = vunpack.c.l.b16 %v8410_v1  ;;  %v13943_v63 = vld [vmem:[#allocation2 + $0xc4] sm:$0xf]  ;;  %v8814_v46 = vld [vmem:[#allocation2 + $0xb4] sm:$0xe] }
 0x432   : > { %v7376_v36 = vpop.f32.mrf.mxu1  ;;  %v7210_v8 = vor.u32 %v7209_v0, %v13924_v55  ;;  %v8960_v39 = vrot.slane %v8958_v37, 4  ;;  %v14596_v1 = vsel %vm10463_vm1, %v13878_v33, %v13824_v7  ;;  %v7213_v0 = vshll.u32 %v13888_v41, 16  ;;  %v14597_v7 = vld [vmem:[#allocation30_spill] sm:$0xff]  ;;  %v14598_v33 = vld [vmem:[#allocation28_spill] sm:$0xff] }
 0x433   : > { %14592 = vst [vmem:[#allocation22_spill] sm:$0xff] %v13930_v11  ;;  %v6136_v59 = vpop.f32.mrf.mxu2  ;;  %v13940_v19 = vadd.f32 %v7376_v36, %v6787_v18  ;;  %v8597_v2 = vunpack.c.l.b16 %v14596_v1  ;;  %v8428_v29 = vor.u32 %v8427_v51, %v13928_v12  ;;  %v7634_v18 = vrot.slane %v13943_v63, 5 }
 0x434   : > { %v6137_v4 = vadd.f32 %v6136_v59, %v13417_v6  ;;  %v8418_v6 = vor.u32 %v8417_v13, %v8414_v52  ;;  %v13952_v20 = vpop.f32.mrf.mxu3  ;;  %v7200_v13 = vor.u32 %v7199_v26, %v7196_v27  ;;  %v13962_v52 = vld [vmem:[#allocation2 + $0xc8] sm:$0x1]  ;;  %v7211_v42 = vrot.slane %v7210_v8, 4 }
 0x435   : > { %14595 = vst [vmem:[#allocation16_spill] sm:$0xff] %v13940_v19  ;;  %9981 = vmatmul.msk.bf16.gmra.mxu1 %vm5779_vm7, %v7288_v31  ;;  %v8621_v59 = vpack.c.b16 %v8598_v54, %v8597_v2  ;;  %v9999_v36 = vrot.slane %v7478_v53, 9  ;;  %v6788_v31 = vadd.f32 %v14598_v33, %v14597_v7  ;;  %v13971_v1 = vrot.slane %v8431_v44, 5  ;;  %v8815_v44 = vld [vmem:[#allocation2 + $0xc0] sm:$0xe] }
 0x436   : > { %v13948_v57 = vadd.f32 %v13862_v5, %v6137_v4  ;;  %v8961_v5 = vrot.slane %v13937_v49, 5  ;;  %v13969_v41 = vrot.slane %v8418_v6, 4  ;;  %v10128_v27 = vrot.slane %v8814_v46, 9 }
 0x437   : > { %v7215_v51 = vrot.slane %v7213_v0, 5  ;;  %v7635_v19 = vsel %vm10906_vm9, %v9999_v36, %v7634_v18  ;;  %v7636_v11 = vrot.slane %v7634_v18, 4  ;;  %v7637_v54 = vrot.slane %v13962_v52, 5  ;;  %v6854_v36 = vld [vmem:[#allocation2 + $0xc0] sm:$0xf] }
 0x438   : > { %v8962_v4 = vsel %vm10906_vm9, %v8960_v39, %v8961_v5  ;;  %v7201_v39 = vrot.slane %v7200_v13, 4  ;;  %v8429_v2 = vrot.slane %v8428_v29, 4  ;;  %v13977_v5 = vld [vmem:[#allocation2 + $0xc4] sm:$0xf]  ;;  %v8959_v6 = vsel %vm10906_vm9, %v10128_v27, %v8958_v37  ;;  %v13993_v37 = vld [vmem:[#allocation2 + $0xc8] sm:$0x1] }
 0x439   : > { %v7216_v0 = vsel %vm10463_vm1, %v7211_v42, %v7215_v51  ;;  %v7227_v18 = vshll.u32 %v13943_v63, 16  ;;  %v7638_v7 = vsel %vm10906_vm9, %v7636_v11, %v7637_v54  ;;  %v7231_v13 = vshrl.u32 %v13943_v63, 16 }
 0x43a   : > { %v7378_v8 = vpop.f32.mrf.mxu1  ;;  %v7671_v29 = vunpack.c.l.b16 %v7635_v19  ;;  %v7672_v33 = vunpack.c.l.b16 %v7638_v7  ;;  %v9005_v27 = vunpack.c.l.b16 %v8959_v6  ;;  %v9006_v42 = vunpack.c.l.b16 %v8962_v4  ;;  %v14602_v7 = vld [vmem:[#allocation31_spill] sm:$0xff] }
 0x43b   : > { %v6138_v26 = vpop.f32.mrf.mxu2  ;;  %v13981_v46 = vadd.f32 %v7378_v8, %v6788_v31  ;;  %v10240_v31 = vld [vmem:[#allocation2 + $0x84] sm:$0xff]  ;;  %v8965_v51 = vrot.slane %v13977_v5, 5  ;;  %v13996_v8 = vpop.f32.mrf.mxu0  ;;  %v7272_v11 = vunpack.c.l.b16 %v7216_v0  ;;  %v7218_v63 = vshrl.u32 %v6854_v36, 16 }
 0x43c   : > { %v6139_v53 = vadd.f32 %v6138_v26, %v13466_v35  ;;  %v10129_v26 = vrot.slane %v8815_v44, 9  ;;  %v8037_v19 = vpop.f32.mrf.mxu3  ;;  %v14006_v4 = vpack.c.b16 %v9006_v42, %v9005_v27  ;;  %v8968_v6 = vrot.slane %v13993_v37, 5  ;;  %v14601_v0 = vld [vmem:[#allocation33_spill] sm:$0xff] }
 0x43d   : > { %14599 = vst [vmem:[#allocation24_spill] sm:$0xff] %v13981_v46  ;;  %v7233_v44 = vrot.slane %v7231_v13, 4  ;;  %v8445_v27 = vshll.u32 %v13674_v58, 16  ;;  %v8449_v46 = vshrl.u32 %v13674_v58, 16  ;;  %v8424_v13 = vsel %vm10463_vm1, %v13969_v41, %v13928_v12 }
 0x43e   : > { %v13990_v35 = vadd.f32 %v13905_v43, %v6139_v53  ;;  %v7206_v43 = vsel %vm10463_vm1, %v7201_v39, %v13924_v55  ;;  %14600 = vst [vmem:[#allocation29_spill] sm:$0xff] %v14006_v4  ;;  %v8966_v54 = vsel %vm10906_vm9, %v10129_v26, %v8965_v51  ;;  %v8967_v53 = vrot.slane %v8965_v51, 4  ;;  %v8177_v4 = vld [vmem:[#allocation2 + $0x90] sm:$0xf] }
 0x43f   : > { %10107 = vmatmul.msk.bf16.gmra.mxu0 %vm5779_vm7, %v8621_v59  ;;  %v14003_v59 = vpack.c.b16 %v7672_v33, %v7671_v29  ;;  %v7221_v55 = vshll.u32 %v6854_v36, 16  ;;  %v7229_v39 = vrot.slane %v7227_v18, 5  ;;  %v6789_v29 = vadd.f32 %v14602_v7, %v14601_v0 }
 0x440   : > { %10009 = vmatmul.msk.bf16.gmra.mxu2 %vm5779_vm7, %v13399_v22  ;;  %v8434_v22 = vsel %vm10463_vm1, %v8429_v2, %v13971_v1  ;;  %v8969_v42 = vsel %vm10906_vm9, %v8967_v53, %v8968_v6  ;;  %v9007_v1 = vunpack.c.l.b16 %v8966_v54  ;;  %v8436_v54 = vshrl.u32 %v8177_v4, 16 }
 0x441   : > { %10091 = vmatmul.msk.bf16.gmra.mxu3 %vm5779_vm7, %v10240_v31  ;;  %v7271_v31 = vunpack.c.l.b16 %v7206_v43  ;;  %v9008_v2 = vunpack.c.l.b16 %v8969_v42  ;;  %v7220_v43 = vrot.slane %v7218_v63, 4  ;;  %v7223_v53 = vrot.slane %v7221_v55, 5  ;;  %v14603_v63 = vld [vmem:[#allocation36_spill] sm:$0xff]  ;;  %v14604_v55 = vld [vmem:[#allocation34_spill] sm:$0xff] }
 0x442   : > { %v7381_v26 = vpop.f32.mrf.mxu1  ;;  %v7234_v6 = vor.u32 %v7233_v44, %v7229_v39  ;;  %v8600_v58 = vunpack.c.l.b16 %v8434_v22  ;;  %v7237_v7 = vshll.u32 %v13962_v52, 16  ;;  %v6790_v44 = vadd.f32 %v14604_v55, %v14603_v63 }
 0x443   : > { %v7749_v33 = vpop.f32.mrf.mxu2  ;;  %v14021_v36 = vadd.f32 %v7381_v26, %v6789_v29  ;;  %v7289_v18 = vpack.c.b16 %v7272_v11, %v7271_v31  ;;  %v8439_v11 = vshll.u32 %v8177_v4, 16  ;;  %v8447_v29 = vrot.slane %v8445_v27, 5  ;;  %v14034_v42 = vpop.f32.mrf.mxu0 }
 0x444   : > { %v7829_v51 = vadd.f32 %v7749_v33, %v13524_v32  ;;  %v14030_v32 = vpack.c.b16 %v9008_v2, %v9007_v1  ;;  %v8451_v33 = vrot.slane %v8449_v46, 4  ;;  %v8599_v31 = vunpack.c.l.b16 %v8424_v13 }
 0x445   : > { %9982 = vmatmul.msk.bf16.gmra.mxu1 %vm5779_vm7, %v7289_v18  ;;  %v7224_v12 = vor.u32 %v7223_v53, %v7220_v43  ;;  %v7235_v41 = vrot.slane %v7234_v6, 4  ;;  %v8438_v1 = vrot.slane %v8436_v54, 4  ;;  %v7239_v18 = vrot.slane %v7237_v7, 5  ;;  %v10241_v6 = vld [vmem:[#allocation2 + $0x90] sm:$0xff] }
 0x446   : > { %v14028_v0 = vadd.f32 %v13952_v20, %v7829_v51  ;;  %v8040_v20 = vpop.f32.mrf.mxu3  ;;  %v8622_v26 = vpack.c.b16 %v8600_v58, %v8599_v31  ;;  %v8441_v52 = vrot.slane %v8439_v11, 5  ;;  %v8452_v4 = vor.u32 %v8451_v33, %v8447_v29  ;;  %v14605_v11 = vld [vmem:[#allocation40_spill] sm:$0xff]  ;;  %v14606_v33 = vld [vmem:[#allocation38_spill] sm:$0xff] }
 0x447   : > { %v7225_v13 = vrot.slane %v7224_v12, 4  ;;  %v7240_v43 = vsel %vm10463_vm1, %v7235_v41, %v7239_v18  ;;  %v8455_v53 = vshll.u32 %v13684_v23, 16  ;;  %v6791_v31 = vadd.f32 %v14606_v33, %v14605_v11 }
 0x448   : > { %v8442_v58 = vor.u32 %v8441_v52, %v8438_v1  ;;  %v8453_v54 = vrot.slane %v8452_v4, 4  ;;  %v7274_v7 = vunpack.c.l.b16 %v7240_v43  ;;  %v8180_v1 = vld [vmem:[#allocation2 + $0x9c] sm:$0xf] }
 0x449   : > { %v8460_v4 = vshrl.u32 %v8180_v1, 16 }
 0x44a   : > { %v7383_v2 = vpop.f32.mrf.mxu1 }
 0x44b   : > { %v7751_v51 = vpop.f32.mrf.mxu2  ;;  %v14039_v27 = vadd.f32 %v7383_v2, %v6790_v44  ;;  %v14054_v63 = vpop.f32.mrf.mxu0  ;;  %v8469_v2 = vshll.u32 %v13767_v61, 16 }
 0x44c   : > { %v7830_v22 = vadd.f32 %v7751_v51, %v13563_v3  ;;  %v7230_v3 = vsel %vm10463_vm1, %v7225_v13, %v7229_v39  ;;  %v8463_v13 = vshll.u32 %v8180_v1, 16  ;;  %v14610_v1 = vld [vmem:[#allocation45_spill] sm:$0xff] }
 0x44d   : > { %v7273_v41 = vunpack.c.l.b16 %v7230_v3  ;;  %v8471_v43 = vrot.slane %v8469_v2, 5  ;;  %v14607_v3 = vld [vmem:[#allocation43_spill] sm:$0xff] }
 0x44e   : > { %v14042_v46 = vadd.f32 %v8037_v19, %v7830_v22  ;;  %v8457_v19 = vrot.slane %v8455_v53, 5  ;;  %v8042_v44 = vpop.f32.mrf.mxu3  ;;  %v8473_v22 = vshrl.u32 %v13767_v61, 16  ;;  %v8465_v33 = vrot.slane %v8463_v13, 5 }
 0x44f   : > { %10108 = vmatmul.msk.bf16.gmra.mxu0 %vm5779_vm7, %v8622_v26  ;;  %v7290_v51 = vpack.c.b16 %v7274_v7, %v7273_v41 }
 0x450   : > { %10010 = vmatmul.msk.bf16.gmra.mxu2 %vm5779_vm7, %v13498_v62  ;;  %v8443_v62 = vrot.slane %v8442_v58, 4  ;;  %v8458_v39 = vsel %vm10463_vm1, %v8453_v54, %v8457_v19  ;;  %v8475_v53 = vrot.slane %v8473_v22, 4  ;;  %v14608_v58 = vld [vmem:[#allocation42_spill] sm:$0xff] }
 0x451   : > { %10092 = vmatmul.msk.bf16.gmra.mxu3 %vm5779_vm7, %v10241_v6  ;;  %v8602_v52 = vunpack.c.l.b16 %v8458_v39  ;;  %v6792_v54 = vadd.f32 %v14608_v58, %v14607_v3  ;;  %v14611_v58 = vld [vmem:[#allocation10_spill] sm:$0xff] }
 0x452   : > { %v7386_v23 = vpop.f32.mrf.mxu1 }
 0x453   : > { %v7754_v12 = vpop.f32.mrf.mxu2  ;;  %v14059_v26 = vadd.f32 %v7386_v23, %v6791_v31 }
 0x454   : > { %v7831_v55 = vadd.f32 %v7754_v12, %v13616_v10  ;;  %v8448_v10 = vsel %vm10463_vm1, %v8443_v62, %v8447_v29  ;;  %v8476_v12 = vor.u32 %v8475_v53, %v8471_v43  ;;  %v14073_v29 = vpop.f32.mrf.mxu0  ;;  %v8479_v62 = vshll.u32 %v13778_v30, 16  ;;  %v8183_v53 = vld [vmem:[#allocation2 + $0xa8] sm:$0xf] }
 0x455   : > { %9983 = vmatmul.msk.bf16.gmra.mxu1 %vm5779_vm7, %v7290_v51  ;;  %v8601_v6 = vunpack.c.l.b16 %v8448_v10  ;;  %v14609_v51 = vld [vmem:[#allocation44_spill] sm:$0xff] }
 0x456   : > { %v14063_v18 = vadd.f32 %v8040_v20, %v7831_v55  ;;  %v8462_v20 = vrot.slane %v8460_v4, 4  ;;  %v8045_v23 = vpop.f32.mrf.mxu3  ;;  %v10242_v55 = vld [vmem:[#allocation2 + $0x9c] sm:$0xff]  ;;  %v6793_v2 = vadd.f32 %v14610_v1, %v14609_v51  ;;  %v8481_v10 = vrot.slane %v8479_v62, 5 }
 0x457   : > { %v8623_v11 = vpack.c.b16 %v8602_v52, %v8601_v6  ;;  %v8497_v6 = vshrl.u32 %v13835_v56, 16 }
 0x458   : > { %v8466_v39 = vor.u32 %v8465_v33, %v8462_v20 }
 0x459   : > { %v8499_v33 = vrot.slane %v8497_v6, 4 }
 0x45a   : > { %v7388_v19 = vpop.f32.mrf.mxu1  ;;  %v8467_v4 = vrot.slane %v8466_v39, 4 }
 0x45b   : > { %v7756_v7 = vpop.f32.mrf.mxu2  ;;  %v14071_v31 = vadd.f32 %v7388_v19, %v6792_v54  ;;  %v8484_v19 = vshrl.u32 %v8183_v53, 16 }
 0x45c   : > { %v7832_v61 = vadd.f32 %v7756_v7, %v13658_v16  ;;  %v8477_v16 = vrot.slane %v8476_v12, 4  ;;  %v8472_v54 = vsel %vm10463_vm1, %v8467_v4, %v8471_v43 }
 0x45d   : > { %v8603_v12 = vunpack.c.l.b16 %v8472_v54  ;;  %v8486_v51 = vrot.slane %v8484_v19, 4 }
 0x45e   : > { %v14076_v41 = vadd.f32 %v8042_v44, %v7832_v61  ;;  %v8482_v30 = vsel %vm10463_vm1, %v8477_v16, %v8481_v10  ;;  %v8047_v61 = vpop.f32.mrf.mxu3  ;;  %v10243_v10 = vld [vmem:[#allocation2 + $0xa8] sm:$0xff] }
 0x45f   : > { %10109 = vmatmul.msk.bf16.gmra.mxu0 %vm5779_vm7, %v8623_v11  ;;  %v8604_v7 = vunpack.c.l.b16 %v8482_v30  ;;  %v8487_v11 = vshll.u32 %v8183_v53, 16  ;;  %v14613_v30 = vld [vmem:[#allocation48_spill] sm:$0xff]  ;;  %v14614_v53 = vld [vmem:[#allocation49_spill] sm:$0xff] }
 0x460   : > { %10011 = vmatmul.msk.bf16.gmra.mxu2 %vm5779_vm7, %v13597_v17  ;;  %v8493_v17 = vshll.u32 %v13835_v56, 16 }
 0x461   : > { %10093 = vmatmul.msk.bf16.gmra.mxu3 %vm5779_vm7, %v10242_v55  ;;  %v14612_v55 = vld [vmem:[#allocation46_spill] sm:$0xff]  ;;  %v8624_v39 = vpack.c.b16 %v8604_v7, %v8603_v12  ;;  %v8489_v1 = vrot.slane %v8487_v11, 5 }
 0x462   : > { %v7391_v52 = vpop.f32.mrf.mxu1  ;;  %v8495_v20 = vrot.slane %v8493_v17, 5  ;;  %v6794_v56 = vadd.f32 %v14612_v55, %v13387_v50  ;;  %v6795_v17 = vadd.f32 %v14614_v53, %v14613_v30  ;;  %v8186_v11 = vld [vmem:[#allocation2 + $0xb4] sm:$0xf]  ;;  %v14615_v55 = vld [vmem:[#allocation11_spill] sm:$0xff] }
 0x463   : > { %v7759_v22 = vpop.f32.mrf.mxu2  ;;  %v14085_v13 = vadd.f32 %v7391_v52, %v6793_v2  ;;  %v8503_v52 = vshll.u32 %v13865_v21, 16  ;;  %v8490_v50 = vor.u32 %v8489_v1, %v8486_v51  ;;  %v14616_v1 = vld [vmem:[#allocation50_spill] sm:$0xff] }
 0x464   : > { %v7833_v44 = vadd.f32 %v7759_v22, %v13703_v60  ;;  %v14097_v60 = vpop.f32.mrf.mxu0  ;;  %v8500_v2 = vor.u32 %v8499_v33, %v8495_v20  ;;  %v8521_v33 = vshrl.u32 %v13926_v28, 16 }
 0x465   : > { %10132 = vmatmul.msk.bf16.vlgmr.msra.gmra.mxu1 %vm5779_vm7, %v14611_v58  ;;  %v8505_v58 = vrot.slane %v8503_v52, 5  ;;  %v8491_v19 = vrot.slane %v8490_v50, 4 }
 0x466   : > { %v14091_v3 = vadd.f32 %v8045_v23, %v7833_v44  ;;  %v8501_v44 = vrot.slane %v8500_v2, 4  ;;  %v8050_v4 = vpop.f32.mrf.mxu3  ;;  %v14617_v2 = vld [vmem:[#allocation52_spill] sm:$0xff] }
 0x46a   : > { %v7393_v62 = vpop.f32.mrf.mxu1 }
 0x46b   : > { %v7761_v23 = vpop.f32.mrf.mxu2  ;;  %v14102_v43 = vadd.f32 %v7393_v62, %v6794_v56  ;;  %v8496_v56 = vsel %vm10463_vm1, %v8491_v19, %v8495_v20  ;;  %v8511_v62 = vshll.u32 %v8186_v11, 16 }
 0x46c   : > { %v7834_v16 = vadd.f32 %v7761_v23, %v13746_v24  ;;  %v14111_v24 = vpop.f32.mrf.mxu0  ;;  %v8508_v23 = vshrl.u32 %v8186_v11, 16  ;;  %v8605_v51 = vunpack.c.l.b16 %v8496_v56  ;;  %v14619_v11 = vld [vmem:[#allocation54_spill] sm:$0xff] }
 0x46d   : > { %v8513_v53 = vrot.slane %v8511_v62, 5  ;;  %v8545_v62 = vshrl.u32 %v13977_v5, 16 }
 0x46e   : > { %v14105_v22 = vadd.f32 %v8047_v61, %v7834_v16  ;;  %v8517_v61 = vshll.u32 %v13926_v28, 16  ;;  %v8523_v16 = vrot.slane %v8521_v33, 4  ;;  %v8510_v30 = vrot.slane %v8508_v23, 4 }
 0x46f   : > { %10110 = vmatmul.msk.bf16.gmra.mxu0 %vm5779_vm7, %v8624_v39 }
 0x470   : > { %10012 = vmatmul.msk.bf16.gmra.mxu2 %vm5779_vm7, %v13686_v45  ;;  %v8506_v45 = vsel %vm10463_vm1, %v8501_v44, %v8505_v58  ;;  %v8519_v39 = vrot.slane %v8517_v61, 5  ;;  %v8514_v19 = vor.u32 %v8513_v53, %v8510_v30  ;;  %v14621_v30 = vld [vmem:[#allocation17_spill] sm:$0xff]  ;;  %v14622_v53 = vld [vmem:[#allocation18_spill] sm:$0xff] }
 0x471   : > { %10094 = vmatmul.msk.bf16.gmra.mxu3 %vm5779_vm7, %v10243_v10  ;;  %v6796_v10 = vadd.f32 %v14617_v2, %v14616_v1 }
 0x472   : > { %v7396_v54 = vpop.f32.mrf.mxu1  ;;  %v8515_v56 = vrot.slane %v8514_v19, 4 }
 0x473   : > { %v7764_v6 = vpop.f32.mrf.mxu2  ;;  %v14116_v21 = vadd.f32 %v7396_v54, %v6795_v17  ;;  %v8052_v17 = vpop.f32.mrf.mxu3  ;;  %v10244_v54 = vld [vmem:[#allocation2 + $0xb4] sm:$0xff] }
 0x474   : > { %v7835_v7 = vadd.f32 %v7764_v6, %v13794_v38  ;;  %v8606_v38 = vunpack.c.l.b16 %v8506_v45  ;;  %v14130_v50 = vpop.f32.mrf.mxu0  ;;  %v8524_v6 = vor.u32 %v8523_v16, %v8519_v39  ;;  %v14618_v45 = vld [vmem:[#allocation53_spill] sm:$0xff]  ;;  %v8189_v16 = vld [vmem:[#allocation2 + $0xc0] sm:$0xf]  ;;  %v8520_v1 = vsel %vm10463_vm1, %v8515_v56, %v8519_v39 }
 0x475   : > { %10133 = vmatmul.msk.bf16.gmra.mxu1 %vm5779_vm7, %v14615_v55  ;;  %v6797_v61 = vadd.f32 %v14619_v11, %v14618_v45  ;;  %v10245_v45 = vld [vmem:[#allocation2 + $0xc0] sm:$0xff]  ;;  %v8551_v39 = vshll.u32 %v13993_v37, 16  ;;  %v14624_v56 = vld [vmem:[#allocation5_spill] sm:$0xff] }
 0x476   : > { %v14122_v12 = vadd.f32 %v8050_v4, %v7835_v7  ;;  %v8625_v44 = vpack.c.b16 %v8606_v38, %v8605_v51  ;;  %v8527_v7 = vshll.u32 %v13937_v49, 16  ;;  %v8541_v49 = vshll.u32 %v13977_v5, 16  ;;  %v14620_v51 = vld [vmem:[#allocation13_spill] sm:$0xff] }
 0x478   : > { %v8529_v33 = vrot.slane %v8527_v7, 5 }
 0x47a   : > { %v7398_v28 = vpop.f32.mrf.mxu1 }
 0x47b   : > { %v7766_v52 = vpop.f32.mrf.mxu2  ;;  %v14133_v20 = vadd.f32 %v7398_v28, %v6796_v10  ;;  %v8532_v10 = vshrl.u32 %v8189_v16, 16  ;;  %v8543_v28 = vrot.slane %v8541_v49, 5  ;;  %v8553_v49 = vrot.slane %v8551_v39, 5 }
 0x47c   : > { %v7836_v4 = vadd.f32 %v7766_v52, %v13822_v15  ;;  %v8525_v15 = vrot.slane %v8524_v6, 4  ;;  %v8535_v52 = vshll.u32 %v8189_v16, 16 }
 0x47d   : > { %v8534_v7 = vrot.slane %v8532_v10, 4 }
 0x47e   : > { %v14136_v58 = vadd.f32 %v8052_v17, %v7836_v4  ;;  %v8530_v23 = vsel %vm10463_vm1, %v8525_v15, %v8529_v33  ;;  %v8607_v4 = vunpack.c.l.b16 %v8520_v1  ;;  %v6798_v17 = vadd.f32 %v14622_v53, %v14621_v30  ;;  %v14625_v1 = vld [vmem:[#allocation27_spill] sm:$0xff] }
 0x47f   : > { %10111 = vmatmul.msk.bf16.gmra.mxu0 %vm5779_vm7, %v8625_v44  ;;  %v8608_v2 = vunpack.c.l.b16 %v8530_v23  ;;  %v8547_v44 = vrot.slane %v8545_v62, 4  ;;  %v8537_v19 = vrot.slane %v8535_v52, 5 }
 0x480   : > { %10013 = vmatmul.msk.bf16.gmra.mxu2 %vm5779_vm7, %v13786_v40  ;;  %v14150_v40 = vpop.f32.mrf.mxu0 }
 0x481   : > { %10095 = vmatmul.msk.bf16.gmra.mxu3 %vm5779_vm7, %v10244_v54  ;;  %v8626_v5 = vpack.c.b16 %v8608_v2, %v8607_v4  ;;  %v8548_v15 = vor.u32 %v8547_v44, %v8543_v28  ;;  %v14626_v44 = vld [vmem:[#allocation26_spill] sm:$0xff]  ;;  %v14627_v4 = vld [vmem:[#allocation21_spill] sm:$0xff] }
 0x482   : > { %v7401_v55 = vpop.f32.mrf.mxu1  ;;  %v6800_v30 = vadd.f32 %v14627_v4, %v14626_v44 }
 0x483   : > { %v14144_v38 = vadd.f32 %v7401_v55, %v6797_v61  ;;  %v8538_v61 = vor.u32 %v8537_v19, %v8534_v7  ;;  %v8549_v33 = vrot.slane %v8548_v15, 4  ;;  %v14623_v55 = vld [vmem:[#allocation20_spill] sm:$0xff]  ;;  %v8192_v7 = vld [vmem:[#allocation2 + $0xcc] sm:$0xf]  ;;  %v14183_v19 = vld [vmem:[#allocation2 + $0xd0] sm:$0xf] }
 0x484   : > { %v6799_v23 = vadd.f32 %v14624_v56, %v14623_v55  ;;  %v14185_v15 = vld [vmem:[#allocation2 + $0xd4] sm:$0x1]  ;;  %v8565_v39 = vshll.u32 %v14183_v19, 16 }
 0x485   : > { %10134 = vmatmul.msk.bf16.gmra.mxu1 %vm5779_vm7, %v14620_v51  ;;  %v8539_v51 = vrot.slane %v8538_v61, 4  ;;  %v8554_v37 = vsel %vm10463_vm1, %v8549_v33, %v8553_v49  ;;  %v8569_v61 = vshrl.u32 %v14183_v19, 16  ;;  %v8575_v33 = vshll.u32 %v14185_v15, 16 }
 0x486   : > { %v8610_v2 = vunpack.c.l.b16 %v8554_v37  ;;  %v14629_v37 = vld [vmem:[#allocation35_spill] sm:$0xff] }
 0x487   : > { %v8571_v49 = vrot.slane %v8569_v61, 4 }
 0x488   : > { %v14162_v11 = vpop.f32.mrf.mxu0 }
 0x48a   : > { %v7403_v6 = vpop.f32.mrf.mxu1 }
 0x48b   : > { %v14158_v54 = vadd.f32 %v7403_v6, %v6798_v17  ;;  %v10246_v6 = vld [vmem:[#allocation2 + $0xcc] sm:$0xff] }
 0x48f   : > { %10112 = vmatmul.msk.bf16.gmra.mxu0 %vm5779_vm7, %v8626_v5 }
 0x490   : > { %10014 = vmatmul.msk.bf16.gmra.mxu2 %vm5779_vm7, %v13859_v14  ;;  %v8544_v14 = vsel %vm10463_vm1, %v8539_v51, %v8543_v28  ;;  %v14177_v10 = vpop.f32.mrf.mxu0  ;;  %v8556_v28 = vshrl.u32 %v8192_v7, 16  ;;  %v14628_v51 = vld [vmem:[#allocation25_spill] sm:$0xff] }
 0x491   : > { %10096 = vmatmul.msk.bf16.gmra.mxu3 %vm5779_vm7, %v10245_v45  ;;  %v8609_v52 = vunpack.c.l.b16 %v8544_v14  ;;  %v8559_v45 = vshll.u32 %v8192_v7, 16 }
 0x492   : > { %v7406_v62 = vpop.f32.mrf.mxu1  ;;  %v8558_v55 = vrot.slane %v8556_v28, 4 }
 0x493   : > { %v14169_v16 = vadd.f32 %v7406_v62, %v6799_v23  ;;  %v8627_v17 = vpack.c.b16 %v8610_v2, %v8609_v52  ;;  %v8561_v56 = vrot.slane %v8559_v45, 5  ;;  %v8567_v23 = vrot.slane %v8565_v39, 5  ;;  %v14631_v39 = vld [vmem:[#allocation8_spill] sm:$0xff] }
 0x494   : > { %v8577_v2 = vrot.slane %v8575_v33, 5  ;;  %v6802_v61 = vadd.f32 %v13849_v9, %v14631_v39  ;;  %v14635_v9 = vld [vmem:[#allocation7_spill] sm:$0xff] }
 0x495   : > { %10135 = vmatmul.msk.bf16.gmra.mxu1 %vm5779_vm7, %v14625_v1  ;;  %v8562_v62 = vor.u32 %v8561_v56, %v8558_v55  ;;  %v6801_v1 = vadd.f32 %v14629_v37, %v14628_v51  ;;  %v8572_v14 = vor.u32 %v8571_v49, %v8567_v23  ;;  %v14633_v49 = vld [vmem:[#allocation6_spill] sm:$0xff]  ;;  %v14634_v37 = vld [vmem:[#allocation41_spill] sm:$0xff] }
 0x497   : > { %v8563_v4 = vrot.slane %v8562_v62, 4 }
 0x498   : > { %v14196_v52 = vpop.f32.mrf.mxu0 }
 0x49a   : > { %v7408_v53 = vpop.f32.mrf.mxu1 }
 0x49b   : > { %v14181_v5 = vadd.f32 %v7408_v53, %v6800_v30  ;;  %v8573_v53 = vrot.slane %v8572_v14, 4 }
 0x49f   : > { %10113 = vmatmul.msk.bf16.gmra.mxu0 %vm5779_vm7, %v8627_v17  ;;  %v14630_v17 = vld [vmem:[#allocation32_spill] sm:$0xff] }
 0x4a0   : > { %10015 = vmatmul.msk.bf16.gmra.mxu2 %vm5779_vm7, %v13934_v34  ;;  %v8568_v34 = vsel %vm10463_vm1, %v8563_v4, %v8567_v23  ;;  %v14210_v56 = vpop.f32.mrf.mxu0  ;;  %v14632_v23 = vld [vmem:[#allocation4_spill] sm:$0xff] }
 0x4a1   : > { %10097 = vmatmul.msk.bf16.gmra.mxu3 %vm5779_vm7, %v10246_v6  ;;  %v8578_v6 = vsel %vm10463_vm1, %v8573_v53, %v8577_v2  ;;  %v8611_v7 = vunpack.c.l.b16 %v8568_v34  ;;  %v6803_v47 = vadd.f32 %v14633_v49, %v14632_v23  ;;  %v14637_v34 = vld [vmem:[#allocation47_spill] sm:$0xff] }
 0x4a2   : > { %v7411_v44 = vpop.f32.mrf.mxu1  ;;  %v8612_v28 = vunpack.c.l.b16 %v8578_v6 }
 0x4a3   : > { %v14198_v30 = vadd.f32 %v7411_v44, %v6801_v1  ;;  %v6804_v1 = vadd.f32 %v13945_v25, %v14635_v9  ;;  %v14636_v44 = vld [vmem:[#allocation12_spill] sm:$0xff]  ;;  %v6807_v25 = vadd.f32 %v14054_v63, %v13948_v57 }
 0x4a4   : > { %v8628_v45 = vpack.c.b16 %v8612_v28, %v8611_v7  ;;  %v6805_v4 = vadd.f32 %v13996_v8, %v14636_v44  ;;  %v6808_v8 = vadd.f32 %v14073_v29, %v13990_v35  ;;  %v14251_v57 = vld [vmem:[%s14388_s4] ss:$0 sm:$0xff]  ;;  %v8770_v29 = vadd.f32 %v14111_v24, %v14042_v46 }
 0x4a5   : > { %10136 = vmatmul.msk.bf16.gmra.mxu1 %vm5779_vm7, %v14630_v17  ;;  %v14638_v17 = vld [vmem:[#allocation14_spill] sm:$0xff] }
 0x4a6   : > { %v6806_v6 = vadd.f32 %v14034_v42, %v14638_v17  ;;  %v8769_v42 = vadd.f32 %v14097_v60, %v14028_v0  ;;  %v7769_v0 = vpop.f32.mrf.mxu2 }
 0x4a8   : > { %v8709_v44 = vpop.f32.mrf.mxu0 }
 0x4aa   : > { %v7413_v33 = vpop.f32.mrf.mxu1 }
 0x4ab   : > { %v14208_v55 = vadd.f32 %v7413_v33, %v6802_v61  ;;  %v14639_v61 = vld [vmem:[#allocation51_spill] sm:$0xff] }
 0x4af   : > { %10114 = vmatmul.msk.bf16.gmra.mxu0 %vm5779_vm7, %v8628_v45 }
 0x4b0   : > { %10016 = vmatmul.msk.bf16.gmra.mxu2 %vm5779_vm7, %v14003_v59 }
 0x4b2   : > { %v7416_v62 = vpop.f32.mrf.mxu1 }
 0x4b3   : > { %v14217_v51 = vadd.f32 %v7416_v62, %v6803_v47  ;;  %v14640_v62 = vld [vmem:[#allocation23_spill] sm:$0xff] }
 0x4b5   : > { %10137 = vmatmul.msk.bf16.gmra.mxu1 %vm5779_vm7, %v14634_v37 }
 0x4ba   : > { %v7418_v14 = vpop.f32.mrf.mxu1 }
 0x4bb   : > { %v14223_v2 = vadd.f32 %v7418_v14, %v6804_v1  ;;  %v8055_v1 = vpop.f32.mrf.mxu3 }
 0x4c2   : > { %v7421_v59 = vpop.f32.mrf.mxu1 }
 0x4c3   : > { %v14227_v53 = vadd.f32 %v7421_v59, %v6805_v4  ;;  %v8771_v4 = vadd.f32 %v14130_v50, %v14063_v18  ;;  %v7771_v59 = vpop.f32.mrf.mxu2  ;;  %v8057_v24 = vpop.f32.mrf.mxu3 }
 0x4c5   : > { %10138 = vmatmul.msk.bf16.gmra.mxu1 %vm5779_vm7, %v14637_v34 }
 0x4ca   : > { %v7423_v7 = vpop.f32.mrf.mxu1 }
 0x4cb   : > { %v14233_v28 = vadd.f32 %v7423_v7, %v6806_v6  ;;  %v14641_v7 = vld [vmem:[#allocation19_spill] sm:$0xff]  ;;  %v7774_v18 = vpop.f32.mrf.mxu2 }
 0x4d2   : > { %v7426_v45 = vpop.f32.mrf.mxu1 }
 0x4d3   : > { %v14237_v39 = vadd.f32 %v7426_v45, %v6807_v25  ;;  %v8772_v25 = vadd.f32 %v14150_v40, %v14076_v41  ;;  %v14642_v41 = vld [vmem:[#allocation3_spill] sm:$0xff]  ;;  %v7776_v40 = vpop.f32.mrf.mxu2 }
 0x4d5   : > { %10139 = vmatmul.msk.bf16.gmra.mxu1 %vm5779_vm7, %v14639_v61  ;;  %v8711_v61 = vpop.f32.mrf.mxu0 }
 0x4da   : > { %v7428_v33 = vpop.f32.mrf.mxu1 }
 0x4db   : > { %v14244_v23 = vadd.f32 %v7428_v33, %v6808_v8 }
 0x4e2   : > { %v9087_v63 = vpop.f32.mrf.mxu1 }
 0x4e3   : > { %v9167_v49 = vadd.f32 %v9087_v63, %v8769_v42  ;;  %v8773_v42 = vadd.f32 %v14162_v11, %v14091_v3  ;;  %v8060_v63 = vpop.f32.mrf.mxu3 }
 0x4e5   : > { %v9203_v47 = vadd.f32 %v14251_v57, %v9167_v49  ;;  %10140 = vmatmul.msk.bf16.gmra.mxu1 %vm5779_vm7, %v14640_v62  ;;  %v8714_v62 = vpop.f32.mrf.mxu0 }
 0x4e7   : > { %v9235_v35 = vmax.f32 %v9203_v47, 0.0 }
 0x4e9   : > { %9267 = vst [vmem:[%s14259_s26] sm:$0xff] %v9235_v35 }
 0x4ea   : > { %v9089_v60 = vpop.f32.mrf.mxu1 }
 0x4eb   : > { %v9168_v37 = vadd.f32 %v9089_v60, %v8770_v29  ;;  %v8774_v60 = vadd.f32 %v14177_v10, %v14105_v22  ;;  %v8062_v3 = vpop.f32.mrf.mxu3 }
 0x4ed   : > { %v9204_v9 = vadd.f32 %v14251_v57, %v9168_v37 }
 0x4ef   : > { %v9236_v14 = vmax.f32 %v9204_v9, 0.0 }
 0x4f1   : > { %9268 = vst [vmem:[%s14259_s26 + $0x8] sm:$0xff] %v9236_v14  ;;  %v8716_v14 = vpop.f32.mrf.mxu0 }
 0x4f2   : > { %v9092_v34 = vpop.f32.mrf.mxu1 }
 0x4f3   : > { %v9169_v17 = vadd.f32 %v9092_v34, %v8771_v4  ;;  %v7779_v34 = vpop.f32.mrf.mxu2  ;;  %v8065_v22 = vpop.f32.mrf.mxu3 }
 0x4f5   : > { %v9205_v6 = vadd.f32 %v14251_v57, %v9169_v17  ;;  %10141 = vmatmul.msk.bf16.gmra.mxu1 %vm5779_vm7, %v14641_v7  ;;  %v8775_v17 = vadd.f32 %v14196_v52, %v14122_v12 }
 0x4f7   : > { %v9237_v46 = vmax.f32 %v9205_v6, 0.0 }
 0x4f9   : > { %9269 = vst [vmem:[%s14259_s26 + $0x10] sm:$0xff] %v9237_v46 }
 0x4fa   : > { %v9094_v45 = vpop.f32.mrf.mxu1 }
 0x4fb   : > { %v9170_v8 = vadd.f32 %v9094_v45, %v8772_v25  ;;  %v14643_v25 = vld [vmem:[#allocation9_spill] sm:$0xff]  ;;  %v14644_v45 = vld [vmem:[#allocation39_spill] sm:$0xff] }
 0x4fd   : > { %v9206_v50 = vadd.f32 %v14251_v57, %v9170_v8  ;;  %v7837_v8 = vadd.f32 %v7769_v0, %v14644_v45 }
 0x4ff   : > { %v9238_v33 = vmax.f32 %v9206_v50, 0.0  ;;  %v8719_v50 = vpop.f32.mrf.mxu0  ;;  %v8123_v52 = vadd.f32 %v8055_v1, %v7837_v8 }
 0x501   : > { %9270 = vst [vmem:[%s14259_s26 + $0x18] sm:$0xff] %v9238_v33  ;;  %v8776_v33 = vadd.f32 %v14210_v56, %v14136_v58  ;;  %v14646_v56 = vld [vmem:[#allocation22_spill] sm:$0xff] }
 0x502   : > { %v9097_v49 = vpop.f32.mrf.mxu1 }
 0x503   : > { %v9171_v47 = vadd.f32 %v9097_v49, %v8773_v42  ;;  %v7781_v42 = vpop.f32.mrf.mxu2 }
 0x505   : > { %v9207_v35 = vadd.f32 %v14251_v57, %v9171_v47  ;;  %10142 = vmatmul.msk.bf16.gmra.mxu1 %vm5779_vm7, %v14642_v41  ;;  %v8067_v41 = vpop.f32.mrf.mxu3 }
 0x507   : > { %v9239_v29 = vmax.f32 %v9207_v35, 0.0  ;;  %v8721_v0 = vpop.f32.mrf.mxu0 }
 0x509   : > { %9271 = vst [vmem:[%s14259_s26 + $0x20] sm:$0xff] %v9239_v29  ;;  %v14645_v29 = vld [vmem:[#allocation37_spill] sm:$0xff] }
 0x50a   : > { %v9099_v37 = vpop.f32.mrf.mxu1 }
 0x50b   : > { %v9172_v9 = vadd.f32 %v9099_v37, %v8774_v60  ;;  %v7838_v60 = vadd.f32 %v7771_v59, %v14645_v29  ;;  %v8777_v37 = vadd.f32 %v8709_v44, %v8123_v52 }
 0x50d   : > { %v9208_v11 = vadd.f32 %v14251_v57, %v9172_v9 }
 0x50f   : > { %v9240_v4 = vmax.f32 %v9208_v11, 0.0  ;;  %v8724_v45 = vpop.f32.mrf.mxu0 }
 0x511   : > { %9272 = vst [vmem:[%s14259_s26 + $0x28] sm:$0xff] %v9240_v4  ;;  %v7784_v4 = vpop.f32.mrf.mxu2 }
 0x512   : > { %v9102_v6 = vpop.f32.mrf.mxu1 }
 0x513   : > { %v9173_v7 = vadd.f32 %v9102_v6, %v8775_v17  ;;  %v8124_v17 = vadd.f32 %v8057_v24, %v7838_v60  ;;  %v14647_v6 = vld [vmem:[#allocation16_spill] sm:$0xff]  ;;  %v14649_v60 = vld [vmem:[#allocation29_spill] sm:$0xff] }
 0x515   : > { %v9209_v46 = vadd.f32 %v14251_v57, %v9173_v7  ;;  %10143 = vmatmul.msk.bf16.gmra.mxu1 %vm5779_vm7, %v14643_v25  ;;  %v7839_v7 = vadd.f32 %v7774_v18, %v14647_v6  ;;  %v8070_v25 = vpop.f32.mrf.mxu3  ;;  %v7842_v6 = vadd.f32 %v7781_v42, %v14039_v27  ;;  %v8975_v27 = vrot.slane %v14185_v15, 5 }
 0x517   : > { %v9241_v10 = vmax.f32 %v9209_v46, 0.0  ;;  %v8778_v46 = vadd.f32 %v8711_v61, %v8124_v17  ;;  %v8125_v44 = vadd.f32 %v8060_v63, %v7839_v7  ;;  %v8726_v63 = vpop.f32.mrf.mxu0 }
 0x519   : > { %9273 = vst [vmem:[%s14259_s26 + $0x30] sm:$0xff] %v9241_v10  ;;  %v7786_v24 = vpop.f32.mrf.mxu2  ;;  %v8779_v52 = vadd.f32 %v8714_v62, %v8125_v44  ;;  %v8972_v44 = vrot.slane %v14183_v19, 5 }
 0x51a   : > { %v9104_v49 = vpop.f32.mrf.mxu1 }
 0x51b   : > { %v9174_v12 = vadd.f32 %v9104_v49, %v8776_v33  ;;  %v14648_v49 = vld [vmem:[#allocation24_spill] sm:$0xff] }
 0x51d   : > { %v9210_v47 = vadd.f32 %v14251_v57, %v9174_v12  ;;  %v7840_v12 = vadd.f32 %v7776_v40, %v14648_v49  ;;  %v8072_v29 = vpop.f32.mrf.mxu3 }
 0x51f   : > { %v9242_v35 = vmax.f32 %v9210_v47, 0.0  ;;  %v8126_v18 = vadd.f32 %v8062_v3, %v7840_v12  ;;  %v8729_v7 = vpop.f32.mrf.mxu0 }
 0x521   : > { %9274 = vst [vmem:[%s14259_s26 + $0x38] sm:$0xff] %v9242_v35  ;;  %v8780_v17 = vadd.f32 %v8716_v14, %v8126_v18  ;;  %v8128_v14 = vadd.f32 %v8067_v41, %v7842_v6 }
 0x522   : > { %v9107_v9 = vpop.f32.mrf.mxu1 }
 0x523   : > { %v9175_v11 = vadd.f32 %v9107_v9, %v8777_v37  ;;  %v7789_v9 = vpop.f32.mrf.mxu2  ;;  %v8782_v12 = vadd.f32 %v8721_v0, %v8128_v14 }
 0x525   : > { %v9211_v58 = vadd.f32 %v14251_v57, %v9175_v11  ;;  %10144 = vmatmul.msk.bf16.gmra.mxu1 %vm5779_vm7, %v14646_v56  ;;  %v7841_v11 = vadd.f32 %v7779_v34, %v14021_v36  ;;  %v8816_v34 = vld [vmem:[#allocation2 + $0xcc] sm:$0xe] }
 0x527   : > { %v9243_v1 = vmax.f32 %v9211_v58, 0.0  ;;  %v8127_v62 = vadd.f32 %v8065_v22, %v7841_v11  ;;  %v10130_v22 = vrot.slane %v8816_v34, 9 }
 0x529   : > { %9275 = vst [vmem:[%s14259_s26 + $0x40] sm:$0xff] %v9243_v1  ;;  %v8075_v1 = vpop.f32.mrf.mxu3  ;;  %v8973_v41 = vsel %vm10906_vm9, %v10130_v22, %v8972_v44 }
 0x52a   : > { %v9109_v59 = vpop.f32.mrf.mxu1 }
 0x52b   : > { %v9176_v10 = vadd.f32 %v9109_v59, %v8778_v46  ;;  %v8781_v46 = vadd.f32 %v8719_v50, %v8127_v62  ;;  %v7791_v59 = vpop.f32.mrf.mxu2  ;;  %v7843_v50 = vadd.f32 %v7784_v4, %v14059_v26  ;;  %v7844_v26 = vadd.f32 %v7786_v24, %v14071_v31 }
 0x52c   : > { %v7846_v34 = vadd.f32 %v7791_v59, %v14102_v43 }
 0x52d   : > { %v9212_v8 = vadd.f32 %v14251_v57, %v9176_v10  ;;  %v8129_v18 = vadd.f32 %v8070_v25, %v7843_v50  ;;  %v8130_v48 = vadd.f32 %v8072_v29, %v7844_v26 }
 0x52f   : > { %v9244_v33 = vmax.f32 %v9212_v8, 0.0  ;;  %v8783_v0 = vadd.f32 %v8724_v45, %v8129_v18  ;;  %v8784_v6 = vadd.f32 %v8726_v63, %v8130_v48 }
 0x531   : > { %9276 = vst [vmem:[%s14259_s26 + $0x48] sm:$0xff] %v9244_v33  ;;  %v8974_v33 = vrot.slane %v8972_v44, 4  ;;  %v8077_v49 = vpop.f32.mrf.mxu3 }
 0x532   : > { %v9112_v47 = vpop.f32.mrf.mxu1 }
 0x533   : > { %v9177_v35 = vadd.f32 %v9112_v47, %v8779_v52  ;;  %v8976_v52 = vsel %vm10906_vm9, %v8974_v33, %v8975_v27  ;;  %v8731_v47 = vpop.f32.mrf.mxu0  ;;  %v8132_v33 = vadd.f32 %v8077_v49, %v7846_v34 }
 0x535   : > { %v9213_v61 = vadd.f32 %v14251_v57, %v9177_v35  ;;  %10145 = vmatmul.msk.bf16.gmra.mxu1 %vm5779_vm7, %v14649_v60  ;;  %v7794_v35 = vpop.f32.mrf.mxu2  ;;  %v9010_v60 = vunpack.c.l.b16 %v8976_v52 }
 0x537   : > { %v9245_v37 = vmax.f32 %v9213_v61, 0.0  ;;  %v9009_v61 = vunpack.c.l.b16 %v8973_v41 }
 0x539   : > { %9277 = vst [vmem:[%s14259_s26 + $0x50] sm:$0xff] %v9245_v37  ;;  %v9026_v4 = vpack.c.b16 %v9010_v60, %v9009_v61  ;;  %v8080_v11 = vpop.f32.mrf.mxu3 }
 0x53a   : > { %v9114_v40 = vpop.f32.mrf.mxu1 }
 0x53b   : > { %v9178_v58 = vadd.f32 %v9114_v40, %v8780_v17 }
 0x53d   : > { %v9214_v56 = vadd.f32 %v14251_v57, %v9178_v58  ;;  %v8734_v58 = vpop.f32.mrf.mxu0  ;;  %v7796_v25 = vpop.f32.mrf.mxu2 }
 0x53e   : > { %v7848_v49 = vadd.f32 %v7796_v25, %v14133_v20 }
 0x53f   : > { %v9246_v3 = vmax.f32 %v9214_v56, 0.0 }
 0x541   : > { %9278 = vst [vmem:[%s14259_s26 + $0x58] sm:$0xff] %v9246_v3  ;;  %v7845_v3 = vadd.f32 %v7789_v9, %v14085_v13  ;;  %v8082_v45 = vpop.f32.mrf.mxu3 }
 0x542   : > { %v9117_v10 = vpop.f32.mrf.mxu1 }
 0x543   : > { %v9179_v36 = vadd.f32 %v9117_v10, %v8781_v46  ;;  %v8131_v46 = vadd.f32 %v8075_v1, %v7845_v3  ;;  %v7847_v1 = vadd.f32 %v7794_v35, %v14116_v21  ;;  %v8134_v35 = vadd.f32 %v8082_v45, %v7848_v49 }
 0x545   : > { %v9215_v8 = vadd.f32 %v14251_v57, %v9179_v36  ;;  %10146 = vmatmul.msk.bf16.gmra.mxu1 %vm5779_vm7, %v14030_v32  ;;  %v8736_v29 = vpop.f32.mrf.mxu0  ;;  %v7799_v36 = vpop.f32.mrf.mxu2  ;;  %v8785_v14 = vadd.f32 %v8729_v7, %v8131_v46  ;;  %v8133_v43 = vadd.f32 %v8080_v11, %v7847_v1 }
 0x546   : > { %v7849_v60 = vadd.f32 %v7799_v36, %v14144_v38 }
 0x547   : > { %v9247_v42 = vmax.f32 %v9215_v8, 0.0  ;;  %v8787_v52 = vadd.f32 %v8734_v58, %v8133_v43 }
 0x549   : > { %9279 = vst [vmem:[%s14259_s26 + $0x60] sm:$0xff] %v9247_v42  ;;  %v8085_v63 = vpop.f32.mrf.mxu3  ;;  %v8786_v42 = vadd.f32 %v8731_v47, %v8132_v33 }
 0x54a   : > { %v9119_v19 = vpop.f32.mrf.mxu1  ;;  %v8135_v11 = vadd.f32 %v8085_v63, %v7849_v60 }
 0x54b   : > { %v9180_v32 = vadd.f32 %v9119_v19, %v8782_v12 }
 0x54d   : > { %v9216_v15 = vadd.f32 %v14251_v57, %v9180_v32  ;;  %v8739_v27 = vpop.f32.mrf.mxu0  ;;  %v7801_v50 = vpop.f32.mrf.mxu2 }
 0x54e   : > { %v7850_v58 = vadd.f32 %v7801_v50, %v14158_v54 }
 0x54f   : > { %v9248_v37 = vmax.f32 %v9216_v15, 0.0 }
 0x551   : > { %9280 = vst [vmem:[%s14259_s26 + $0x68] sm:$0xff] %v9248_v37  ;;  %v8087_v41 = vpop.f32.mrf.mxu3  ;;  %v8788_v37 = vadd.f32 %v8736_v29, %v8134_v35 }
 0x552   : > { %v9122_v17 = vpop.f32.mrf.mxu1  ;;  %v8136_v38 = vadd.f32 %v8087_v41, %v7850_v58 }
 0x553   : > { %v9181_v40 = vadd.f32 %v9122_v17, %v8783_v0 }
 0x555   : > { %v9217_v62 = vadd.f32 %v14251_v57, %v9181_v40  ;;  %10147 = vmatmul.msk.bf16.gmra.mxu1 %vm5779_vm7, %v9026_v4  ;;  %v8741_v18 = vpop.f32.mrf.mxu0  ;;  %v7804_v21 = vpop.f32.mrf.mxu2 }
 0x556   : > { %v7851_v46 = vadd.f32 %v7804_v21, %v14169_v16 }
 0x557   : > { %v9249_v56 = vmax.f32 %v9217_v62, 0.0  ;;  %v8789_v62 = vadd.f32 %v8739_v27, %v8135_v11 }
 0x559   : > { %9281 = vst [vmem:[%s14259_s26 + $0x70] sm:$0xff] %v9249_v56  ;;  %v8090_v26 = vpop.f32.mrf.mxu3 }
 0x55a   : > { %v9124_v31 = vpop.f32.mrf.mxu1  ;;  %v8137_v36 = vadd.f32 %v8090_v26, %v7851_v46 }
 0x55b   : > { %v9182_v24 = vadd.f32 %v9124_v31, %v8784_v6 }
 0x55d   : > { %v9218_v10 = vadd.f32 %v14251_v57, %v9182_v24  ;;  %v8744_v20 = vpop.f32.mrf.mxu0  ;;  %v7806_v40 = vpop.f32.mrf.mxu2 }
 0x55e   : > { %v8791_v33 = vadd.f32 %v8744_v20, %v8137_v36 }
 0x55f   : > { %v9250_v44 = vmax.f32 %v9218_v10, 0.0  ;;  %v8790_v10 = vadd.f32 %v8741_v18, %v8136_v38 }
 0x561   : > { %9282 = vst [vmem:[%s14259_s26 + $0x78] sm:$0xff] %v9250_v44  ;;  %v8092_v3 = vpop.f32.mrf.mxu3 }
 0x562   : > { %v9127_v8 = vpop.f32.mrf.mxu1 }
 0x563   : > { %v9183_v22 = vadd.f32 %v9127_v8, %v8785_v14 }
 0x565   : > { %v9219_v13 = vadd.f32 %v14251_v57, %v9183_v22  ;;  %v8746_v31 = vpop.f32.mrf.mxu0  ;;  %v7809_v45 = vpop.f32.mrf.mxu2  ;;  %v7852_v22 = vadd.f32 %v7806_v40, %v14181_v5 }
 0x566   : > { %v7853_v50 = vadd.f32 %v7809_v45, %v14198_v30 }
 0x567   : > { %v9251_v9 = vmax.f32 %v9219_v13, 0.0  ;;  %v8138_v16 = vadd.f32 %v8092_v3, %v7852_v22 }
 0x569   : > { %9283 = vst [vmem:[%s14259_s26 + $0x80] sm:$0xff] %v9251_v9  ;;  %v8095_v34 = vpop.f32.mrf.mxu3 }
 0x56a   : > { %v9129_v12 = vpop.f32.mrf.mxu1  ;;  %v8139_v5 = vadd.f32 %v8095_v34, %v7853_v50 }
 0x56b   : > { %v9184_v19 = vadd.f32 %v9129_v12, %v8786_v42  ;;  %v8792_v12 = vadd.f32 %v8746_v31, %v8138_v16 }
 0x56d   : > { %v9220_v7 = vadd.f32 %v14251_v57, %v9184_v19  ;;  %v8749_v8 = vpop.f32.mrf.mxu0  ;;  %v7811_v13 = vpop.f32.mrf.mxu2 }
 0x56f   : > { %v9252_v59 = vmax.f32 %v9220_v7, 0.0 }
 0x571   : > { %9284 = vst [vmem:[%s14259_s26 + $0x88] sm:$0xff] %v9252_v59  ;;  %v8097_v42 = vpop.f32.mrf.mxu3 }
 0x572   : > { %v9132_v32 = vpop.f32.mrf.mxu1 }
 0x573   : > { %v9185_v15 = vadd.f32 %v9132_v32, %v8787_v52  ;;  %v7854_v52 = vadd.f32 %v7811_v13, %v14208_v55  ;;  %v8793_v32 = vadd.f32 %v8749_v8, %v8139_v5 }
 0x575   : > { %v9221_v47 = vadd.f32 %v14251_v57, %v9185_v15  ;;  %v8751_v43 = vpop.f32.mrf.mxu0  ;;  %v7814_v59 = vpop.f32.mrf.mxu2  ;;  %v8140_v30 = vadd.f32 %v8097_v42, %v7854_v52 }
 0x577   : > { %v9253_v61 = vmax.f32 %v9221_v47, 0.0  ;;  %v8794_v26 = vadd.f32 %v8751_v43, %v8140_v30 }
 0x579   : > { %9285 = vst [vmem:[%s14259_s26 + $0x90] sm:$0xff] %v9253_v61  ;;  %v8100_v18 = vpop.f32.mrf.mxu3 }
 0x57a   : > { %v9134_v0 = vpop.f32.mrf.mxu1 }
 0x57b   : > { %v9186_v4 = vadd.f32 %v9134_v0, %v8788_v37  ;;  %v7855_v37 = vadd.f32 %v7814_v59, %v14217_v51 }
 0x57d   : > { %v9222_v17 = vadd.f32 %v14251_v57, %v9186_v4  ;;  %v8754_v35 = vpop.f32.mrf.mxu0  ;;  %v7816_v61 = vpop.f32.mrf.mxu2  ;;  %v8141_v55 = vadd.f32 %v8100_v18, %v7855_v37 }
 0x57e   : > { %v7856_v58 = vadd.f32 %v7816_v61, %v14223_v2 }
 0x57f   : > { %v9254_v48 = vmax.f32 %v9222_v17, 0.0 }
 0x581   : > { %9286 = vst [vmem:[%s14259_s26 + $0x98] sm:$0xff] %v9254_v48  ;;  %v8102_v11 = vpop.f32.mrf.mxu3 }
 0x582   : > { %v9137_v25 = vpop.f32.mrf.mxu1  ;;  %v8142_v3 = vadd.f32 %v8102_v11, %v7856_v58 }
 0x583   : > { %v9187_v56 = vadd.f32 %v9137_v25, %v8789_v62  ;;  %v8795_v62 = vadd.f32 %v8754_v35, %v8141_v55 }
 0x585   : > { %v9223_v6 = vadd.f32 %v14251_v57, %v9187_v56  ;;  %v8756_v17 = vpop.f32.mrf.mxu0  ;;  %v7819_v48 = vpop.f32.mrf.mxu2 }
 0x586   : > { %v8796_v45 = vadd.f32 %v8756_v17, %v8142_v3 }
 0x587   : > { %v9255_v24 = vmax.f32 %v9223_v6, 0.0 }
 0x589   : > { %9287 = vst [vmem:[%s14259_s26 + $0xa0] sm:$0xff] %v9255_v24  ;;  %v8105_v38 = vpop.f32.mrf.mxu3  ;;  %v7857_v24 = vadd.f32 %v7819_v48, %v14227_v53 }
 0x58a   : > { %v9139_v29 = vpop.f32.mrf.mxu1 }
 0x58b   : > { %v9188_v44 = vadd.f32 %v9139_v29, %v8790_v10 }
 0x58d   : > { %v9224_v54 = vadd.f32 %v14251_v57, %v9188_v44  ;;  %v8759_v31 = vpop.f32.mrf.mxu0  ;;  %v7821_v46 = vpop.f32.mrf.mxu2  ;;  %v8143_v44 = vadd.f32 %v8105_v38, %v7857_v24 }
 0x58e   : > { %v7858_v34 = vadd.f32 %v7821_v46, %v14233_v28 }
 0x58f   : > { %v9256_v14 = vmax.f32 %v9224_v54, 0.0 }
 0x591   : > { %9288 = vst [vmem:[%s14259_s26 + $0xa8] sm:$0xff] %v9256_v14  ;;  %v8107_v54 = vpop.f32.mrf.mxu3  ;;  %v8797_v14 = vadd.f32 %v8759_v31, %v8143_v44 }
 0x592   : > { %v9142_v63 = vpop.f32.mrf.mxu1  ;;  %v8144_v53 = vadd.f32 %v8107_v54, %v7858_v34 }
 0x593   : > { %v9189_v9 = vadd.f32 %v9142_v63, %v8791_v33 }
 0x595   : > { %v9225_v1 = vadd.f32 %v14251_v57, %v9189_v9  ;;  %v8761_v33 = vpop.f32.mrf.mxu0  ;;  %v7824_v13 = vpop.f32.mrf.mxu2 }
 0x597   : > { %v9257_v27 = vmax.f32 %v9225_v1, 0.0  ;;  %v7859_v1 = vadd.f32 %v7824_v13, %v14237_v39 }
 0x599   : > { %9289 = vst [vmem:[%s14259_s26 + $0xb0] sm:$0xff] %v9257_v27  ;;  %v8110_v16 = vpop.f32.mrf.mxu3  ;;  %v8798_v27 = vadd.f32 %v8761_v33, %v8144_v53 }
 0x59a   : > { %v9144_v19 = vpop.f32.mrf.mxu1  ;;  %v8145_v28 = vadd.f32 %v8110_v16, %v7859_v1 }
 0x59b   : > { %v9190_v7 = vadd.f32 %v9144_v19, %v8792_v12 }
 0x59d   : > { %v9226_v41 = vadd.f32 %v14251_v57, %v9190_v7  ;;  %v8764_v12 = vpop.f32.mrf.mxu0  ;;  %v7826_v43 = vpop.f32.mrf.mxu2 }
 0x59e   : > { %v8799_v59 = vadd.f32 %v8764_v12, %v8145_v28  ;;  %v7860_v5 = vadd.f32 %v7826_v43, %v14244_v23 }
 0x59f   : > { %v9258_v49 = vmax.f32 %v9226_v41, 0.0 }
 0x5a1   : > { %9290 = vst [vmem:[%s14259_s26 + $0xb8] sm:$0xff] %v9258_v49  ;;  %v8112_v41 = vpop.f32.mrf.mxu3 }
 0x5a2   : > { %v9147_v15 = vpop.f32.mrf.mxu1  ;;  %v8146_v39 = vadd.f32 %v8112_v41, %v7860_v5 }
 0x5a3   : > { %v9191_v21 = vadd.f32 %v9147_v15, %v8793_v32 }
 0x5a5   : > { %v9227_v47 = vadd.f32 %v14251_v57, %v9191_v21  ;;  %v8766_v18 = vpop.f32.mrf.mxu0 }
 0x5a6   : > { %v8800_v21 = vadd.f32 %v8766_v18, %v8146_v39 }
 0x5a7   : > { %v9259_v60 = vmax.f32 %v9227_v47, 0.0 }
 0x5a9   : > { %9291 = vst [vmem:[%s14259_s26 + $0xc0] sm:$0xff] %v9259_v60 }
 0x5aa   : > { %v9149_v0 = vpop.f32.mrf.mxu1 }
 0x5ab   : > { %v9192_v4 = vadd.f32 %v9149_v0, %v8794_v26 }
 0x5ad   : > { %v9228_v20 = vadd.f32 %v14251_v57, %v9192_v4 }
 0x5af   : > { %v9260_v40 = vmax.f32 %v9228_v20, 0.0 }
 0x5b1   : > { %9292 = vst [vmem:[%s14259_s26 + $0xc8] sm:$0xff] %v9260_v40 }
 0x5b2   : > { %v9152_v25 = vpop.f32.mrf.mxu1 }
 0x5b3   : > { %v9193_v56 = vadd.f32 %v9152_v25, %v8795_v62 }
 0x5b5   : > { %v9229_v51 = vadd.f32 %v14251_v57, %v9193_v56 }
 0x5b7   : > { %v9261_v6 = vmax.f32 %v9229_v51, 0.0 }
 0x5b9   : > { %9293 = vst [vmem:[%s14259_s26 + $0xd0] sm:$0xff] %v9261_v6 }
 0x5ba   : > { %v9154_v10 = vpop.f32.mrf.mxu1 }
 0x5bb   : > { %v9194_v29 = vadd.f32 %v9154_v10, %v8796_v45 }
 0x5bd   : > { %v9230_v2 = vadd.f32 %v14251_v57, %v9194_v29 }
 0x5bf   : > { %v9262_v36 = vmax.f32 %v9230_v2, 0.0 }
 0x5c1   : > { %9294 = vst [vmem:[%s14259_s26 + $0xd8] sm:$0xff] %v9262_v36 }
 0x5c2   : > { %v9157_v8 = vpop.f32.mrf.mxu1 }
 0x5c3   : > { %v9195_v22 = vadd.f32 %v9157_v8, %v8797_v14 }
 0x5c5   : > { %v9231_v63 = vadd.f32 %v14251_v57, %v9195_v22 }
 0x5c7   : > { %v9263_v9 = vmax.f32 %v9231_v63, 0.0 }
 0x5c9   : > { %9295 = vst [vmem:[%s14259_s26 + $0xe0] sm:$0xff] %v9263_v9 }
 0x5ca   : > { %v9159_v42 = vpop.f32.mrf.mxu1 }
 0x5cb   : > { %v9196_v50 = vadd.f32 %v9159_v42, %v8798_v27 }
 0x5cd   : > { %v9232_v19 = vadd.f32 %v14251_v57, %v9196_v50 }
 0x5cf   : > { %v9264_v7 = vmax.f32 %v9232_v19, 0.0 }
 0x5d1   : > { %9296 = vst [vmem:[%s14259_s26 + $0xe8] sm:$0xff] %v9264_v7 }
 0x5d2   : > { %v9162_v49 = vpop.f32.mrf.mxu1 }
 0x5d3   : > { %v9197_v52 = vadd.f32 %v9162_v49, %v8799_v59 }
 0x5d5   : > { %v9233_v32 = vadd.f32 %v14251_v57, %v9197_v52 }
 0x5d7   : > { %v9265_v15 = vmax.f32 %v9233_v32, 0.0 }
 0x5d9   : > { %9297 = vst [vmem:[%s14259_s26 + $0xf0] sm:$0xff] %v9265_v15 }
 0x5da   : > { %v9164_v35 = vpop.f32.mrf.mxu1 }
 0x5db   : > { %v9198_v30 = vadd.f32 %v9164_v35, %v8800_v21 }
 0x5dd   : > { %v9234_v47 = vadd.f32 %v14251_v57, %v9198_v30 }
 0x5df   : > { %v9266_v61 = vmax.f32 %v9234_v47, 0.0 }
 0x5e1   : > { %9298 = vst [vmem:[%s14259_s26 + $0xf8] sm:$0xff] %v9266_v61 }
 0x5e2 PF: > { %s15_s18 = sadd.s32 1, %s10299_s18  }
 0x5e3   : > { %p12_p5 = scmp.ge.s32.totalorder %s15_s18, 4  }
 0x5e5   :  { %14 = sbr.rel (!%p12_p5) target bundleno = 1 (0x1), region = 89 }

</bundles_post_ra>
